<compile_context>
chip_gen: v7x
topology: tpu7x:2x2x1
jax: 0.10.0
libtpu: 0.0.40
codegen_flags: <defaults>
</compile_context>

<pallas_src>
import functools

import jax
import jax.numpy as jnp
from jax.experimental import pallas as pl
from jax.experimental.pallas import tpu as pltpu

LATENT_DIM = 20


def _round_up(x, m):
    return (x + m - 1) // m * m


def _pick_tm(M):
    """Single M tile for small layers; 256-row tiles (even tile counts at
    M >= 512) so the 'parallel' M axis shards across both v7x TensorCores."""
    Mp = _round_up(M, 16)          # 16 sublanes: bf16 packs 2 rows / sublane
    if Mp <= 256:
        return Mp, Mp              # one grid step — per-step overhead wins
    return 256, _round_up(Mp, 256)


# ----------------------------------------------------------------------------
# Pallas kernels
# ----------------------------------------------------------------------------
def _fused_matmul_kernel(a_ref, w_ref, b_ref, o_ref, *, act):
    """o = act(a @ w + b); bf16 operands, f32 MXU accumulate + f32 epilogue.
    W and bias are whole-array VMEM-resident blocks (no K tiling/scratch)."""
    out = jnp.dot(a_ref[...], w_ref[...], preferred_element_type=jnp.float32)
    out = out + b_ref[...]
    if act == "relu":
        out = jnp.maximum(out, 0.0)
    elif act == "sigmoid":
        out = jax.nn.sigmoid(out)
    o_ref[...] = out.astype(o_ref.dtype)


def fused_matmul(a, w, b, act="none", out_dtype=jnp.bfloat16):
    """act(a @ w + b); a:(M,K) bf16, w:(K,N) bf16 pre-laid-out, b:(1,N) f32."""
    M, K = a.shape
    K2, N = w.shape
    assert K == K2 and b.shape == (1, N)
    a = a.astype(jnp.bfloat16)              # no-op: activations are bf16
    tm, Mp = _pick_tm(M)
    if Mp != M:
        a = jnp.pad(a, ((0, Mp - M), (0, 0)))
    out = pl.pallas_call(
        functools.partial(_fused_matmul_kernel, act=act),
        out_shape=jax.ShapeDtypeStruct((Mp, N), out_dtype),
        grid=(Mp // tm,),
        in_specs=[
            pl.BlockSpec((tm, K), lambda i: (i, 0)),   # A: M-tiled
            pl.BlockSpec((K, N), lambda i: (0, 0)),    # W: VMEM-resident
            pl.BlockSpec((1, N), lambda i: (0, 0)),    # bias row
        ],
        out_specs=pl.BlockSpec((tm, N), lambda i: (i, 0)),
        compiler_params=pltpu.CompilerParams(
            dimension_semantics=("parallel",),
            vmem_limit_bytes=32 * 1024 * 1024),        # v5e default is 16 MiB
    )(a, w, b)
    if Mp != M:
        out = out[:M]
    return out


def _vae_head_kernel(h_ref, w1_ref, b1_ref, eps_ref, w2_ref, b2_ref,
                     mu_ref, logvar_ref, hdec_ref):
    """Fused: [mu | logvar] = h @ W1 + b1 ; z = mu + eps*exp(0.5*logvar) ;
    h_dec = z @ W2 + b2.  mu / logvar occupy separate 128-lane blocks; all
    lane/row padding of W1/b1/W2/eps is zero, so padded z lanes stay zero."""
    acc = jnp.dot(h_ref[...], w1_ref[...], preferred_element_type=jnp.float32)
    acc = acc + b1_ref[...]
    mu = acc[:, :128]
    logvar = acc[:, 128:]
    z = mu + eps_ref[...] * jnp.exp(0.5 * logvar)
    mu_ref[...] = mu
    logvar_ref[...] = logvar
    h2 = jnp.dot(z.astype(w2_ref.dtype), w2_ref[...],
                 preferred_element_type=jnp.float32)
    hdec_ref[...] = (h2 + b2_ref[...]).astype(hdec_ref.dtype)


def vae_head(h, w1, b1, eps, w2, b2):
    """h:(B,1024) -> mu:(B,20), logvar:(B,20), h_dec:(B,1024)."""
    B = h.shape[0]
    Bp = _round_up(B, 16)
    h_p = jnp.pad(h.astype(jnp.bfloat16), ((0, Bp - B), (0, 0)))
    eps_p = jnp.pad(eps.astype(jnp.float32),
                    ((0, Bp - B), (0, 128 - LATENT_DIM)))
    mu, logvar, hdec = pl.pallas_call(
        _vae_head_kernel,
        out_shape=(jax.ShapeDtypeStruct((Bp, 128), jnp.float32),
                   jax.ShapeDtypeStruct((Bp, 128), jnp.float32),
                   jax.ShapeDtypeStruct((Bp, 256 * 2 * 2), jnp.bfloat16)),
    )(h_p, w1, b1, eps_p, w2, b2)
    return mu[:B, :LATENT_DIM], logvar[:B, :LATENT_DIM], hdec[:B]


# ----------------------------------------------------------------------------
# Conv / ConvTranspose wrappers (NHWC; patch build in XLA, GEMM in Pallas)
# ----------------------------------------------------------------------------
def _im2col_nhwc(x, k, stride, pad):
    """x:(B,H,W,C) -> (B*Ho*Wo, k*k*C) patch matrix, column order (kh, kw, c).
    # TODO(synk): move the tap extraction into the GEMM kernel (implicit GEMM
    # tap loop) to avoid the k*k patch expansion through HBM."""
    B, H, W, C = x.shape
    xp = jnp.pad(x, ((0, 0), (pad, pad), (pad, pad), (0, 0)))
    Ho = (H + 2 * pad - k) // stride + 1
    Wo = (W + 2 * pad - k) // stride + 1
    cols = []
    for ki in range(k):
        for kj in range(k):
            cols.append(xp[:, ki:ki + stride * Ho:stride,
                               kj:kj + stride * Wo:stride, :])
    p = jnp.concatenate(cols, axis=-1)              # (B, Ho, Wo, k*k*C)
    return p.reshape(B * Ho * Wo, k * k * C), Ho, Wo


def conv2d_nhwc(x, wm, bias, act="relu", out_dtype=jnp.bfloat16):
    """nn.Conv2d(k=4, s=2, p=1); x NHWC bf16, wm:(16*Cin, Cout), bias:(1,Cout)."""
    B = x.shape[0]
    patches, Ho, Wo = _im2col_nhwc(x, 4, 2, 1)
    out = fused_matmul(patches, wm, bias, act=act, out_dtype=out_dtype)
    return out.reshape(B, Ho, Wo, wm.shape[1])


def conv_transpose2d_nhwc(x, wm, bias, act="relu", out_dtype=jnp.bfloat16):
    """nn.ConvTranspose2d(k=4, s=2, p=1) via 4-output-phase decomposition:
    one GEMM of 3x3 patches (K=9*Cin) against a (9*Cin, 4*Cout) phase-packed
    weight; no zero-inserted pixels ever reach the MXU.
    # TODO(synk): fold the sub-pixel interleave into the GEMM epilogue or the
    # next layer's tap indexing to drop this full-tensor XLA transpose."""
    B, H, W, _ = x.shape
    Cout = wm.shape[1] // 4
    patches, _, _ = _im2col_nhwc(x, 3, 1, 1)            # (B*H*W, 9*Cin)
    out = fused_matmul(patches, wm, bias, act=act, out_dtype=out_dtype)
    out = out.reshape(B, H, W, 2, 2, Cout).transpose(0, 1, 3, 2, 4, 5)
    return out.reshape(B, 2 * H, 2 * W, Cout)


# ----------------------------------------------------------------------------
# Parameters: PyTorch-layout init + ONE-TIME GEMM-layout preparation
# ----------------------------------------------------------------------------
def _uniform(key, shape, fan_in):
    bound = 1.0 / jnp.sqrt(float(fan_in))
    return jax.random.uniform(key, shape, jnp.float32, -bound, bound)


def init_params(key):
    ks = jax.random.split(key, 22)
    p = {}
    enc = [(32, 3), (64, 32), (128, 64), (256, 128)]
    for i, (co, ci) in enumerate(enc, start=1):
        p[f"enc{i}_w"] = _uniform(ks[2 * i - 2], (co, ci, 4, 4), ci * 16)
        p[f"enc{i}_b"] = _uniform(ks[2 * i - 1], (co,), ci * 16)
    p["fc_mu_w"] = _uniform(ks[8], (LATENT_DIM, 256 * 2 * 2), 256 * 2 * 2)
    p["fc_mu_b"] = _uniform(ks[9], (LATENT_DIM,), 256 * 2 * 2)
    p["fc_logvar_w"] = _uniform(ks[10], (LATENT_DIM, 256 * 2 * 2), 256 * 2 * 2)
    p["fc_logvar_b"] = _uniform(ks[11], (LATENT_DIM,), 256 * 2 * 2)
    p["dec_fc_w"] = _uniform(ks[12], (256 * 2 * 2, LATENT_DIM), LATENT_DIM)
    p["dec_fc_b"] = _uniform(ks[13], (256 * 2 * 2,), LATENT_DIM)
    dec = [(256, 128), (128, 64), (64, 32), (32, 3)]
    for i, (ci, co) in enumerate(dec, start=1):
        p[f"dec{i}_w"] = _uniform(ks[12 + 2 * i], (ci, co, 4, 4), co * 16)
        p[f"dec{i}_b"] = _uniform(ks[13 + 2 * i], (co,), co * 16)
    return p


def _build_deconv_weight(w):
    """(Cin, Cout, 4, 4) ConvTranspose2d weight -> (9*Cin, 4*Cout) phase GEMM.

    For stride 2 / pad 1, output pixel 2*j+p only sees input offsets
    dy-1 in {-1,0,+1}; surviving taps:
      phase p=0: (dy=0 -> kh=3), (dy=1 -> kh=1)
      phase p=1: (dy=1 -> kh=2), (dy=2 -> kh=0)
    Column blocks ordered phase = 2*py + px; rows ordered (dy, dx, cin)."""
    cin, cout = w.shape[0], w.shape[1]
    tap = {(0, 0): 3, (0, 1): 1, (1, 1): 2, (1, 2): 0}
    wt = jnp.zeros((3, 3, cin, 4 * cout), jnp.float32)
    for py in range(2):
        for px in range(2):
            ph = py * 2 + px
            for dy in range(3):
                kh = tap.get((py, dy))
                if kh is None:
                    continue
                for dx in range(3):
                    kw = tap.get((px, dx))
                    if kw is None:
                        continue
                    wt = wt.at[dy, dx, :, ph * cout:(ph + 1) * cout].set(
                        w[:, :, kh, kw])
    return wt.reshape(9 * cin, 4 * cout)


def prepare_params(p):
    """One-time layout prep: NHWC GEMM weights, phase-packed deconv weights,
    fused FC head, (1,N) f32 bias rows, bf16 casts.  Nothing here runs per
    forward; exact PyTorch semantics are preserved."""
    q = {}
    # encoder convs: (Cout,Cin,4,4) -> rows (kh,kw,cin), cols cout
    for i in range(1, 5):
        w = p[f"enc{i}_w"]
        q[f"enc{i}_wm"] = (w.transpose(2, 3, 1, 0)
                            .reshape(-1, w.shape[0]).astype(jnp.bfloat16))
        q[f"enc{i}_b"] = p[f"enc{i}_b"].reshape(1, -1).astype(jnp.float32)

    # FC head: permute the 1024-feature axis from NCHW flatten (c,h,w) to our
    # NHWC flatten (h,w,c) so results match torch's .view exactly.
    def cols_nchw_to_nhwc(w):                        # w: (out, 1024)
        return (w.reshape(-1, 256, 2, 2).transpose(0, 2, 3, 1)
                 .reshape(-1, 256 * 2 * 2))

    wmu = cols_nchw_to_nhwc(p["fc_mu_w"]).T          # (1024, 20)
    wlv = cols_nchw_to_nhwc(p["fc_logvar_w"]).T
    pad_n = lambda a, n: jnp.pad(a, ((0, 0), (0, n - a.shape[1])))
    pad_v = lambda v, n: jnp.pad(v, (0, n - v.shape[0]))
    q["head_w1"] = jnp.concatenate(
        [pad_n(wmu, 128), pad_n(wlv, 128)], axis=1).astype(jnp.bfloat16)
    q["head_b1"] = jnp.concatenate(
        [pad_v(p["fc_mu_b"], 128), pad_v(p["fc_logvar_b"], 128)]
    ).reshape(1, 256).astype(jnp.float32)

    wdec = cols_nchw_to_nhwc(p["dec_fc_w"].T)        # (20, 1024) cols (h,w,c)
    q["head_w2"] = jnp.pad(
        wdec, ((0, 128 - LATENT_DIM), (0, 0))).astype(jnp.bfloat16)
    q["head_b2"] = (p["dec_fc_b"].reshape(256, 2, 2).transpose(1, 2, 0)
                    .reshape(1, 256 * 2 * 2).astype(jnp.float32))

    # decoder transpose-convs: phase-packed (9*Cin, 4*Cout) + 4x-tiled bias
    for i in range(1, 5):
        q[f"dec{i}_wm"] = _build_deconv_weight(
            p[f"dec{i}_w"]).astype(jnp.bfloat16)
        q[f"dec{i}_b"] = jnp.tile(p[f"dec{i}_b"], 4).reshape(1, -1).astype(
            jnp.float32)
    return q


# ----------------------------------------------------------------------------
# Full forward pass (matches ConvVAE.forward)
# TODO(synk): end state is ONE persistent Pallas kernel for the whole forward
# (all weights + activations fit VMEM on every generation at small batch).
# ----------------------------------------------------------------------------
def conv_vae_forward(params, x, eps):
    B = x.shape[0]
    h = jnp.transpose(x, (0, 2, 3, 1)).astype(jnp.bfloat16)   # NCHW -> NHWC
    # encode
    h = conv2d_nhwc(h, params["enc1_wm"], params["enc1_b"])
    h = conv2d_nhwc(h, params["enc2_wm"], params["enc2_b"])
    h = conv2d_nhwc(h, params["enc3_wm"], params["enc3_b"])
    h = conv2d_nhwc(h, params["enc4_wm"], params["enc4_b"])
    h = h.reshape(B, 2 * 2 * 256)
    # fc_mu + fc_logvar + reparameterize + decoder_fc, all in one kernel
    mu, logvar, hdec = vae_head(h, params["head_w1"], params["head_b1"],
                                eps, params["head_w2"], params["head_b2"])
    # decode
    h = hdec.reshape(B, 2, 2, 256)
    h = conv_transpose2d_nhwc(h, params["dec1_wm"], params["dec1_b"])
    h = conv_transpose2d_nhwc(h, params["dec2_wm"], params["dec2_b"])
    h = conv_transpose2d_nhwc(h, params["dec3_wm"], params["dec3_b"])
    x_rec = conv_transpose2d_nhwc(h, params["dec4_wm"], params["dec4_b"],
                                  act="sigmoid", out_dtype=jnp.float32)
    return jnp.transpose(x_rec, (0, 3, 1, 2)), mu, logvar     # NHWC -> NCHW


if __name__ == "__main__":
    key = jax.random.PRNGKey(0)
    k_x, k_p, k_eps = jax.random.split(key, 3)

    # encoder reduces 32 -> 16 -> 8 -> 4 -> 2 (fc expects 256*2*2)
    B = 2
    x = jax.random.normal(k_x, (B, 3, 32, 32), jnp.float32)
    eps = jax.random.normal(k_eps, (B, LATENT_DIM), jnp.float32)

    params = prepare_params(init_params(k_p))     # weight layouts prepped once

    fwd = jax.jit(conv_vae_forward)
    x_rec, mu, logvar = fwd(params, x, eps)
    jax.block_until_ready((x_rec, mu, logvar))

    assert x_rec.shape == (B, 3, 32, 32), x_rec.shape
    assert mu.shape == (B, LATENT_DIM), mu.shape
    assert logvar.shape == (B, LATENT_DIM), logvar.shape
    assert bool(jnp.all(jnp.isfinite(x_rec)))
    assert bool(jnp.all(jnp.isfinite(mu))) and bool(jnp.all(jnp.isfinite(logvar)))
    assert bool(jnp.all((x_rec >= 0.0) & (x_rec <= 1.0)))   # sigmoid range
    print("KERNEL_OK")
</pallas_src>

<mosaic_0001>
module attributes {stable_mosaic.version = 11 : i64} {
  func.func @_fused_matmul_kernel(%arg0: i32, %arg1: memref<256x48xbf16, #tpu.memory_space<vmem>>, %arg2: memref<48x32xbf16, #tpu.memory_space<vmem>>, %arg3: memref<1x32xf32, #tpu.memory_space<vmem>>, %arg4: memref<256x32xbf16, #tpu.memory_space<vmem>>) attributes {dimension_semantics = [#tpu.dimension_semantics<parallel>], iteration_bounds = array<i64: 2>, scalar_prefetch = 0 : i64, scratch_operands = 0 : i64, tpu.core_type = #tpu.core_type<tc>, window_params = [{transform_indices = @transform_0, window_bounds = array<i64: 256, 48>}, {pipeline_mode = #tpu.pipeline_mode<synchronous>, transform_indices = @transform_1, window_bounds = array<i64: 48, 32>}, {pipeline_mode = #tpu.pipeline_mode<synchronous>, transform_indices = @transform_2, window_bounds = array<i64: 1, 32>}, {transform_indices = @transform_3, window_bounds = array<i64: 256, 32>}]} {
    %c0 = arith.constant 0 : index
    %c0_0 = arith.constant 0 : index
    %0 = vector.load %arg1[%c0, %c0_0] : memref<256x48xbf16, #tpu.memory_space<vmem>>, vector<256x48xbf16>
    %c0_1 = arith.constant 0 : index
    %c0_2 = arith.constant 0 : index
    %1 = vector.load %arg2[%c0_1, %c0_2] : memref<48x32xbf16, #tpu.memory_space<vmem>>, vector<48x32xbf16>
    %cst = arith.constant dense<0.000000e+00> : vector<256x32xf32>
    %2 = tpu.matmul %0, %1, %cst {dimension_numbers = #tpu.dot_dimension_numbers<[1], [0], [0], [1], [0, 0, 1, 1], [], []>} : vector<256x48xbf16>, vector<48x32xbf16>, vector<256x32xf32> -> vector<256x32xf32>
    %c0_3 = arith.constant 0 : index
    %c0_4 = arith.constant 0 : index
    %3 = vector.load %arg3[%c0_3, %c0_4] : memref<1x32xf32, #tpu.memory_space<vmem>>, vector<1x32xf32>
    %4 = vector.broadcast %3 : vector<1x32xf32> to vector<256x32xf32>
    %5 = arith.addf %2, %4 : vector<256x32xf32>
    %cst_5 = arith.constant 0.000000e+00 : f32
    %6 = vector.broadcast %cst_5 : f32 to vector<256x32xf32>
    %7 = arith.maximumf %5, %6 : vector<256x32xf32>
    %8 = arith.truncf %7 : vector<256x32xf32> to vector<256x32xbf16>
    %c0_6 = arith.constant 0 : index
    %c0_7 = arith.constant 0 : index
    %9 = vector.load %arg4[%c0_6, %c0_7] : memref<256x32xbf16, #tpu.memory_space<vmem>>, vector<256x32xbf16>
    tpu.vector_store %arg4[%c0_6, %c0_7], %8 {strides = array<i32>} : memref<256x32xbf16, #tpu.memory_space<vmem>>, vector<256x32xbf16>,
    return
  }
  func.func @transform_0(%arg0: i32) -> (i32, i32) {
    %c0_i32 = arith.constant 0 : i32
    %c0_i32_0 = arith.constant 0 : i32
    return %arg0, %c0_i32 : i32, i32
  }
  func.func @transform_1(%arg0: i32) -> (i32, i32) {
    %c0_i32 = arith.constant 0 : i32
    %c0_i32_0 = arith.constant 0 : i32
    %c0_i32_1 = arith.constant 0 : i32
    return %c0_i32, %c0_i32_0 : i32, i32
  }
  func.func @transform_2(%arg0: i32) -> (i32, i32) {
    %c0_i32 = arith.constant 0 : i32
    %c0_i32_0 = arith.constant 0 : i32
    %c0_i32_1 = arith.constant 0 : i32
    return %c0_i32, %c0_i32_0 : i32, i32
  }
  func.func @transform_3(%arg0: i32) -> (i32, i32) {
    %c0_i32 = arith.constant 0 : i32
    %c0_i32_0 = arith.constant 0 : i32
    return %arg0, %c0_i32 : i32, i32
  }
}

module attributes {stable_mosaic.version = 11 : i64} {
  func.func @_fused_matmul_kernel(%arg0: i32, %arg1: memref<128x512xbf16, #tpu.memory_space<vmem>>, %arg2: memref<512x64xbf16, #tpu.memory_space<vmem>>, %arg3: memref<1x64xf32, #tpu.memory_space<vmem>>, %arg4: memref<128x64xbf16, #tpu.memory_space<vmem>>) attributes {dimension_semantics = [#tpu.dimension_semantics<parallel>], iteration_bounds = array<i64: 1>, scalar_prefetch = 0 : i64, scratch_operands = 0 : i64, tpu.core_type = #tpu.core_type<tc>, window_params = [{transform_indices = @transform_0, window_bounds = array<i64: 128, 512>}, {pipeline_mode = #tpu.pipeline_mode<synchronous>, transform_indices = @transform_1, window_bounds = array<i64: 512, 64>}, {pipeline_mode = #tpu.pipeline_mode<synchronous>, transform_indices = @transform_2, window_bounds = array<i64: 1, 64>}, {transform_indices = @transform_3, window_bounds = array<i64: 128, 64>}]} {
    %c0 = arith.constant 0 : index
    %c0_0 = arith.constant 0 : index
    %0 = vector.load %arg1[%c0, %c0_0] : memref<128x512xbf16, #tpu.memory_space<vmem>>, vector<128x512xbf16>
    %c0_1 = arith.constant 0 : index
    %c0_2 = arith.constant 0 : index
    %1 = vector.load %arg2[%c0_1, %c0_2] : memref<512x64xbf16, #tpu.memory_space<vmem>>, vector<512x64xbf16>
    %cst = arith.constant dense<0.000000e+00> : vector<128x64xf32>
    %2 = tpu.matmul %0, %1, %cst {dimension_numbers = #tpu.dot_dimension_numbers<[1], [0], [0], [1], [0, 0, 1, 1], [], []>} : vector<128x512xbf16>, vector<512x64xbf16>, vector<128x64xf32> -> vector<128x64xf32>
    %c0_3 = arith.constant 0 : index
    %c0_4 = arith.constant 0 : index
    %3 = vector.load %arg3[%c0_3, %c0_4] : memref<1x64xf32, #tpu.memory_space<vmem>>, vector<1x64xf32>
    %4 = vector.broadcast %3 : vector<1x64xf32> to vector<128x64xf32>
    %5 = arith.addf %2, %4 : vector<128x64xf32>
    %cst_5 = arith.constant 0.000000e+00 : f32
    %6 = vector.broadcast %cst_5 : f32 to vector<128x64xf32>
    %7 = arith.maximumf %5, %6 : vector<128x64xf32>
    %8 = arith.truncf %7 : vector<128x64xf32> to vector<128x64xbf16>
    %c0_6 = arith.constant 0 : index
    %c0_7 = arith.constant 0 : index
    %9 = vector.load %arg4[%c0_6, %c0_7] : memref<128x64xbf16, #tpu.memory_space<vmem>>, vector<128x64xbf16>
    tpu.vector_store %arg4[%c0_6, %c0_7], %8 {strides = array<i32>} : memref<128x64xbf16, #tpu.memory_space<vmem>>, vector<128x64xbf16>,
    return
  }
  func.func @transform_0(%arg0: i32) -> (i32, i32) {
    %c0_i32 = arith.constant 0 : i32
    %c0_i32_0 = arith.constant 0 : i32
    return %arg0, %c0_i32 : i32, i32
  }
  func.func @transform_1(%arg0: i32) -> (i32, i32) {
    %c0_i32 = arith.constant 0 : i32
    %c0_i32_0 = arith.constant 0 : i32
    %c0_i32_1 = arith.constant 0 : i32
    return %c0_i32, %c0_i32_0 : i32, i32
  }
  func.func @transform_2(%arg0: i32) -> (i32, i32) {
    %c0_i32 = arith.constant 0 : i32
    %c0_i32_0 = arith.constant 0 : i32
    %c0_i32_1 = arith.constant 0 : i32
    return %c0_i32, %c0_i32_0 : i32, i32
  }
  func.func @transform_3(%arg0: i32) -> (i32, i32) {
    %c0_i32 = arith.constant 0 : i32
    %c0_i32_0 = arith.constant 0 : i32
    return %arg0, %c0_i32 : i32, i32
  }
}

module attributes {stable_mosaic.version = 11 : i64} {
  func.func @_fused_matmul_kernel(%arg0: i32, %arg1: memref<32x1024xbf16, #tpu.memory_space<vmem>>, %arg2: memref<1024x128xbf16, #tpu.memory_space<vmem>>, %arg3: memref<1x128xf32, #tpu.memory_space<vmem>>, %arg4: memref<32x128xbf16, #tpu.memory_space<vmem>>) attributes {dimension_semantics = [#tpu.dimension_semantics<parallel>], iteration_bounds = array<i64: 1>, scalar_prefetch = 0 : i64, scratch_operands = 0 : i64, tpu.core_type = #tpu.core_type<tc>, window_params = [{transform_indices = @transform_0, window_bounds = array<i64: 32, 1024>}, {pipeline_mode = #tpu.pipeline_mode<synchronous>, transform_indices = @transform_1, window_bounds = array<i64: 1024, 128>}, {pipeline_mode = #tpu.pipeline_mode<synchronous>, transform_indices = @transform_2, window_bounds = array<i64: 1, 128>}, {transform_indices = @transform_3, window_bounds = array<i64: 32, 128>}]} {
    %c0 = arith.constant 0 : index
    %c0_0 = arith.constant 0 : index
    %0 = vector.load %arg1[%c0, %c0_0] : memref<32x1024xbf16, #tpu.memory_space<vmem>>, vector<32x1024xbf16>
    %c0_1 = arith.constant 0 : index
    %c0_2 = arith.constant 0 : index
    %1 = vector.load %arg2[%c0_1, %c0_2] : memref<1024x128xbf16, #tpu.memory_space<vmem>>, vector<1024x128xbf16>
    %cst = arith.constant dense<0.000000e+00> : vector<32x128xf32>
    %2 = tpu.matmul %0, %1, %cst {dimension_numbers = #tpu.dot_dimension_numbers<[1], [0], [0], [1], [0, 0, 1, 1], [], []>} : vector<32x1024xbf16>, vector<1024x128xbf16>, vector<32x128xf32> -> vector<32x128xf32>
    %c0_3 = arith.constant 0 : index
    %c0_4 = arith.constant 0 : index
    %3 = vector.load %arg3[%c0_3, %c0_4] : memref<1x128xf32, #tpu.memory_space<vmem>>, vector<1x128xf32>
    %4 = vector.broadcast %3 : vector<1x128xf32> to vector<32x128xf32>
    %5 = arith.addf %2, %4 : vector<32x128xf32>
    %cst_5 = arith.constant 0.000000e+00 : f32
    %6 = vector.broadcast %cst_5 : f32 to vector<32x128xf32>
    %7 = arith.maximumf %5, %6 : vector<32x128xf32>
    %8 = arith.truncf %7 : vector<32x128xf32> to vector<32x128xbf16>
    %c0_6 = arith.constant 0 : index
    %c0_7 = arith.constant 0 : index
    %9 = vector.load %arg4[%c0_6, %c0_7] : memref<32x128xbf16, #tpu.memory_space<vmem>>, vector<32x128xbf16>
    tpu.vector_store %arg4[%c0_6, %c0_7], %8 {strides = array<i32>} : memref<32x128xbf16, #tpu.memory_space<vmem>>, vector<32x128xbf16>,
    return
  }
  func.func @transform_0(%arg0: i32) -> (i32, i32) {
    %c0_i32 = arith.constant 0 : i32
    %c0_i32_0 = arith.constant 0 : i32
    return %arg0, %c0_i32 : i32, i32
  }
  func.func @transform_1(%arg0: i32) -> (i32, i32) {
    %c0_i32 = arith.constant 0 : i32
    %c0_i32_0 = arith.constant 0 : i32
    %c0_i32_1 = arith.constant 0 : i32
    return %c0_i32, %c0_i32_0 : i32, i32
  }
  func.func @transform_2(%arg0: i32) -> (i32, i32) {
    %c0_i32 = arith.constant 0 : i32
    %c0_i32_0 = arith.constant 0 : i32
    %c0_i32_1 = arith.constant 0 : i32
    return %c0_i32, %c0_i32_0 : i32, i32
  }
  func.func @transform_3(%arg0: i32) -> (i32, i32) {
    %c0_i32 = arith.constant 0 : i32
    %c0_i32_0 = arith.constant 0 : i32
    return %arg0, %c0_i32 : i32, i32
  }
}

module attributes {stable_mosaic.version = 11 : i64} {
  func.func @_fused_matmul_kernel(%arg0: i32, %arg1: memref<16x2048xbf16, #tpu.memory_space<vmem>>, %arg2: memref<2048x256xbf16, #tpu.memory_space<vmem>>, %arg3: memref<1x256xf32, #tpu.memory_space<vmem>>, %arg4: memref<16x256xbf16, #tpu.memory_space<vmem>>) attributes {dimension_semantics = [#tpu.dimension_semantics<parallel>], iteration_bounds = array<i64: 1>, scalar_prefetch = 0 : i64, scratch_operands = 0 : i64, tpu.core_type = #tpu.core_type<tc>, window_params = [{transform_indices = @transform_0, window_bounds = array<i64: 16, 2048>}, {pipeline_mode = #tpu.pipeline_mode<synchronous>, transform_indices = @transform_1, window_bounds = array<i64: 2048, 256>}, {pipeline_mode = #tpu.pipeline_mode<synchronous>, transform_indices = @transform_2, window_bounds = array<i64: 1, 256>}, {transform_indices = @transform_3, window_bounds = array<i64: 16, 256>}]} {
    %c0 = arith.constant 0 : index
    %c0_0 = arith.constant 0 : index
    %0 = vector.load %arg1[%c0, %c0_0] : memref<16x2048xbf16, #tpu.memory_space<vmem>>, vector<16x2048xbf16>
    %c0_1 = arith.constant 0 : index
    %c0_2 = arith.constant 0 : index
    %1 = vector.load %arg2[%c0_1, %c0_2] : memref<2048x256xbf16, #tpu.memory_space<vmem>>, vector<2048x256xbf16>
    %cst = arith.constant dense<0.000000e+00> : vector<16x256xf32>
    %2 = tpu.matmul %0, %1, %cst {dimension_numbers = #tpu.dot_dimension_numbers<[1], [0], [0], [1], [0, 0, 1, 1], [], []>} : vector<16x2048xbf16>, vector<2048x256xbf16>, vector<16x256xf32> -> vector<16x256xf32>
    %c0_3 = arith.constant 0 : index
    %c0_4 = arith.constant 0 : index
    %3 = vector.load %arg3[%c0_3, %c0_4] : memref<1x256xf32, #tpu.memory_space<vmem>>, vector<1x256xf32>
    %4 = vector.broadcast %3 : vector<1x256xf32> to vector<16x256xf32>
    %5 = arith.addf %2, %4 : vector<16x256xf32>
    %cst_5 = arith.constant 0.000000e+00 : f32
    %6 = vector.broadcast %cst_5 : f32 to vector<16x256xf32>
    %7 = arith.maximumf %5, %6 : vector<16x256xf32>
    %8 = arith.truncf %7 : vector<16x256xf32> to vector<16x256xbf16>
    %c0_6 = arith.constant 0 : index
    %c0_7 = arith.constant 0 : index
    %9 = vector.load %arg4[%c0_6, %c0_7] : memref<16x256xbf16, #tpu.memory_space<vmem>>, vector<16x256xbf16>
    tpu.vector_store %arg4[%c0_6, %c0_7], %8 {strides = array<i32>} : memref<16x256xbf16, #tpu.memory_space<vmem>>, vector<16x256xbf16>,
    return
  }
  func.func @transform_0(%arg0: i32) -> (i32, i32) {
    %c0_i32 = arith.constant 0 : i32
    %c0_i32_0 = arith.constant 0 : i32
    return %arg0, %c0_i32 : i32, i32
  }
  func.func @transform_1(%arg0: i32) -> (i32, i32) {
    %c0_i32 = arith.constant 0 : i32
    %c0_i32_0 = arith.constant 0 : i32
    %c0_i32_1 = arith.constant 0 : i32
    return %c0_i32, %c0_i32_0 : i32, i32
  }
  func.func @transform_2(%arg0: i32) -> (i32, i32) {
    %c0_i32 = arith.constant 0 : i32
    %c0_i32_0 = arith.constant 0 : i32
    %c0_i32_1 = arith.constant 0 : i32
    return %c0_i32, %c0_i32_0 : i32, i32
  }
  func.func @transform_3(%arg0: i32) -> (i32, i32) {
    %c0_i32 = arith.constant 0 : i32
    %c0_i32_0 = arith.constant 0 : i32
    return %arg0, %c0_i32 : i32, i32
  }
}

module attributes {stable_mosaic.version = 11 : i64} {
  func.func @_vae_head_kernel(%arg0: memref<16x1024xbf16, #tpu.memory_space<vmem>>, %arg1: memref<1024x256xbf16, #tpu.memory_space<vmem>>, %arg2: memref<1x256xf32, #tpu.memory_space<vmem>>, %arg3: memref<16x128xf32, #tpu.memory_space<vmem>>, %arg4: memref<128x1024xbf16, #tpu.memory_space<vmem>>, %arg5: memref<1x1024xf32, #tpu.memory_space<vmem>>, %arg6: memref<16x128xf32, #tpu.memory_space<vmem>>, %arg7: memref<16x128xf32, #tpu.memory_space<vmem>>, %arg8: memref<16x1024xbf16, #tpu.memory_space<vmem>>) attributes {dimension_semantics = [], scalar_prefetch = 0 : i64, scratch_operands = 0 : i64, tpu.core_type = #tpu.core_type<tc>} {
    %c0 = arith.constant 0 : index
    %c0_0 = arith.constant 0 : index
    %0 = vector.load %arg0[%c0, %c0_0] : memref<16x1024xbf16, #tpu.memory_space<vmem>>, vector<16x1024xbf16>
    %c0_1 = arith.constant 0 : index
    %c0_2 = arith.constant 0 : index
    %1 = vector.load %arg1[%c0_1, %c0_2] : memref<1024x256xbf16, #tpu.memory_space<vmem>>, vector<1024x256xbf16>
    %cst = arith.constant dense<0.000000e+00> : vector<16x256xf32>
    %2 = tpu.matmul %0, %1, %cst {dimension_numbers = #tpu.dot_dimension_numbers<[1], [0], [0], [1], [0, 0, 1, 1], [], []>} : vector<16x1024xbf16>, vector<1024x256xbf16>, vector<16x256xf32> -> vector<16x256xf32>
    %c0_3 = arith.constant 0 : index
    %c0_4 = arith.constant 0 : index
    %3 = vector.load %arg2[%c0_3, %c0_4] : memref<1x256xf32, #tpu.memory_space<vmem>>, vector<1x256xf32>
    %4 = vector.broadcast %3 : vector<1x256xf32> to vector<16x256xf32>
    %5 = arith.addf %2, %4 : vector<16x256xf32>
    %6 = vector.extract_strided_slice %5 {offsets = [0, 0], sizes = [16, 128], strides = [1, 1]} : vector<16x256xf32> to vector<16x128xf32>
    %7 = vector.extract_strided_slice %5 {offsets = [0, 128], sizes = [16, 128], strides = [1, 1]} : vector<16x256xf32> to vector<16x128xf32>
    %c0_5 = arith.constant 0 : index
    %c0_6 = arith.constant 0 : index
    %8 = vector.load %arg3[%c0_5, %c0_6] : memref<16x128xf32, #tpu.memory_space<vmem>>, vector<16x128xf32>
    %cst_7 = arith.constant 5.000000e-01 : f32
    %9 = vector.broadcast %cst_7 : f32 to vector<16x128xf32>
    %10 = arith.mulf %9, %7 : vector<16x128xf32>
    %11 = math.exp %10 : vector<16x128xf32>
    %12 = arith.mulf %8, %11 : vector<16x128xf32>
    %13 = arith.addf %6, %12 : vector<16x128xf32>
    %c0_8 = arith.constant 0 : index
    %c0_9 = arith.constant 0 : index
    %14 = vector.load %arg6[%c0_8, %c0_9] : memref<16x128xf32, #tpu.memory_space<vmem>>, vector<16x128xf32>
    tpu.vector_store %arg6[%c0_8, %c0_9], %6 {strides = array<i32>} : memref<16x128xf32, #tpu.memory_space<vmem>>, vector<16x128xf32>,
    %c0_10 = arith.constant 0 : index
    %c0_11 = arith.constant 0 : index
    %15 = vector.load %arg7[%c0_10, %c0_11] : memref<16x128xf32, #tpu.memory_space<vmem>>, vector<16x128xf32>
    tpu.vector_store %arg7[%c0_10, %c0_11], %7 {strides = array<i32>} : memref<16x128xf32, #tpu.memory_space<vmem>>, vector<16x128xf32>,
    %16 = arith.truncf %13 : vector<16x128xf32> to vector<16x128xbf16>
    %c0_12 = arith.constant 0 : index
    %c0_13 = arith.constant 0 : index
    %17 = vector.load %arg4[%c0_12, %c0_13] : memref<128x1024xbf16, #tpu.memory_space<vmem>>, vector<128x1024xbf16>
    %cst_14 = arith.constant dense<0.000000e+00> : vector<16x1024xf32>
    %18 = tpu.matmul %16, %17, %cst_14 {dimension_numbers = #tpu.dot_dimension_numbers<[1], [0], [0], [1], [0, 0, 1, 1], [], []>} : vector<16x128xbf16>, vector<128x1024xbf16>, vector<16x1024xf32> -> vector<16x1024xf32>
    %c0_15 = arith.constant 0 : index
    %c0_16 = arith.constant 0 : index
    %19 = vector.load %arg5[%c0_15, %c0_16] : memref<1x1024xf32, #tpu.memory_space<vmem>>, vector<1x1024xf32>
    %20 = vector.broadcast %19 : vector<1x1024xf32> to vector<16x1024xf32>
    %21 = arith.addf %18, %20 : vector<16x1024xf32>
    %22 = arith.truncf %21 : vector<16x1024xf32> to vector<16x1024xbf16>
    %c0_17 = arith.constant 0 : index
    %c0_18 = arith.constant 0 : index
    %23 = vector.load %arg8[%c0_17, %c0_18] : memref<16x1024xbf16, #tpu.memory_space<vmem>>, vector<16x1024xbf16>
    tpu.vector_store %arg8[%c0_17, %c0_18], %22 {strides = array<i32>} : memref<16x1024xbf16, #tpu.memory_space<vmem>>, vector<16x1024xbf16>,
    return
  }
}

module attributes {stable_mosaic.version = 11 : i64} {
  func.func @_fused_matmul_kernel(%arg0: i32, %arg1: memref<16x2304xbf16, #tpu.memory_space<vmem>>, %arg2: memref<2304x512xbf16, #tpu.memory_space<vmem>>, %arg3: memref<1x512xf32, #tpu.memory_space<vmem>>, %arg4: memref<16x512xbf16, #tpu.memory_space<vmem>>) attributes {dimension_semantics = [#tpu.dimension_semantics<parallel>], iteration_bounds = array<i64: 1>, scalar_prefetch = 0 : i64, scratch_operands = 0 : i64, tpu.core_type = #tpu.core_type<tc>, window_params = [{transform_indices = @transform_0, window_bounds = array<i64: 16, 2304>}, {pipeline_mode = #tpu.pipeline_mode<synchronous>, transform_indices = @transform_1, window_bounds = array<i64: 2304, 512>}, {pipeline_mode = #tpu.pipeline_mode<synchronous>, transform_indices = @transform_2, window_bounds = array<i64: 1, 512>}, {transform_indices = @transform_3, window_bounds = array<i64: 16, 512>}]} {
    %c0 = arith.constant 0 : index
    %c0_0 = arith.constant 0 : index
    %0 = vector.load %arg1[%c0, %c0_0] : memref<16x2304xbf16, #tpu.memory_space<vmem>>, vector<16x2304xbf16>
    %c0_1 = arith.constant 0 : index
    %c0_2 = arith.constant 0 : index
    %1 = vector.load %arg2[%c0_1, %c0_2] : memref<2304x512xbf16, #tpu.memory_space<vmem>>, vector<2304x512xbf16>
    %cst = arith.constant dense<0.000000e+00> : vector<16x512xf32>
    %2 = tpu.matmul %0, %1, %cst {dimension_numbers = #tpu.dot_dimension_numbers<[1], [0], [0], [1], [0, 0, 1, 1], [], []>} : vector<16x2304xbf16>, vector<2304x512xbf16>, vector<16x512xf32> -> vector<16x512xf32>
    %c0_3 = arith.constant 0 : index
    %c0_4 = arith.constant 0 : index
    %3 = vector.load %arg3[%c0_3, %c0_4] : memref<1x512xf32, #tpu.memory_space<vmem>>, vector<1x512xf32>
    %4 = vector.broadcast %3 : vector<1x512xf32> to vector<16x512xf32>
    %5 = arith.addf %2, %4 : vector<16x512xf32>
    %cst_5 = arith.constant 0.000000e+00 : f32
    %6 = vector.broadcast %cst_5 : f32 to vector<16x512xf32>
    %7 = arith.maximumf %5, %6 : vector<16x512xf32>
    %8 = arith.truncf %7 : vector<16x512xf32> to vector<16x512xbf16>
    %c0_6 = arith.constant 0 : index
    %c0_7 = arith.constant 0 : index
    %9 = vector.load %arg4[%c0_6, %c0_7] : memref<16x512xbf16, #tpu.memory_space<vmem>>, vector<16x512xbf16>
    tpu.vector_store %arg4[%c0_6, %c0_7], %8 {strides = array<i32>} : memref<16x512xbf16, #tpu.memory_space<vmem>>, vector<16x512xbf16>,
    return
  }
  func.func @transform_0(%arg0: i32) -> (i32, i32) {
    %c0_i32 = arith.constant 0 : i32
    %c0_i32_0 = arith.constant 0 : i32
    return %arg0, %c0_i32 : i32, i32
  }
  func.func @transform_1(%arg0: i32) -> (i32, i32) {
    %c0_i32 = arith.constant 0 : i32
    %c0_i32_0 = arith.constant 0 : i32
    %c0_i32_1 = arith.constant 0 : i32
    return %c0_i32, %c0_i32_0 : i32, i32
  }
  func.func @transform_2(%arg0: i32) -> (i32, i32) {
    %c0_i32 = arith.constant 0 : i32
    %c0_i32_0 = arith.constant 0 : i32
    %c0_i32_1 = arith.constant 0 : i32
    return %c0_i32, %c0_i32_0 : i32, i32
  }
  func.func @transform_3(%arg0: i32) -> (i32, i32) {
    %c0_i32 = arith.constant 0 : i32
    %c0_i32_0 = arith.constant 0 : i32
    return %arg0, %c0_i32 : i32, i32
  }
}

module attributes {stable_mosaic.version = 11 : i64} {
  func.func @_fused_matmul_kernel(%arg0: i32, %arg1: memref<32x1152xbf16, #tpu.memory_space<vmem>>, %arg2: memref<1152x256xbf16, #tpu.memory_space<vmem>>, %arg3: memref<1x256xf32, #tpu.memory_space<vmem>>, %arg4: memref<32x256xbf16, #tpu.memory_space<vmem>>) attributes {dimension_semantics = [#tpu.dimension_semantics<parallel>], iteration_bounds = array<i64: 1>, scalar_prefetch = 0 : i64, scratch_operands = 0 : i64, tpu.core_type = #tpu.core_type<tc>, window_params = [{transform_indices = @transform_0, window_bounds = array<i64: 32, 1152>}, {pipeline_mode = #tpu.pipeline_mode<synchronous>, transform_indices = @transform_1, window_bounds = array<i64: 1152, 256>}, {pipeline_mode = #tpu.pipeline_mode<synchronous>, transform_indices = @transform_2, window_bounds = array<i64: 1, 256>}, {transform_indices = @transform_3, window_bounds = array<i64: 32, 256>}]} {
    %c0 = arith.constant 0 : index
    %c0_0 = arith.constant 0 : index
    %0 = vector.load %arg1[%c0, %c0_0] : memref<32x1152xbf16, #tpu.memory_space<vmem>>, vector<32x1152xbf16>
    %c0_1 = arith.constant 0 : index
    %c0_2 = arith.constant 0 : index
    %1 = vector.load %arg2[%c0_1, %c0_2] : memref<1152x256xbf16, #tpu.memory_space<vmem>>, vector<1152x256xbf16>
    %cst = arith.constant dense<0.000000e+00> : vector<32x256xf32>
    %2 = tpu.matmul %0, %1, %cst {dimension_numbers = #tpu.dot_dimension_numbers<[1], [0], [0], [1], [0, 0, 1, 1], [], []>} : vector<32x1152xbf16>, vector<1152x256xbf16>, vector<32x256xf32> -> vector<32x256xf32>
    %c0_3 = arith.constant 0 : index
    %c0_4 = arith.constant 0 : index
    %3 = vector.load %arg3[%c0_3, %c0_4] : memref<1x256xf32, #tpu.memory_space<vmem>>, vector<1x256xf32>
    %4 = vector.broadcast %3 : vector<1x256xf32> to vector<32x256xf32>
    %5 = arith.addf %2, %4 : vector<32x256xf32>
    %cst_5 = arith.constant 0.000000e+00 : f32
    %6 = vector.broadcast %cst_5 : f32 to vector<32x256xf32>
    %7 = arith.maximumf %5, %6 : vector<32x256xf32>
    %8 = arith.truncf %7 : vector<32x256xf32> to vector<32x256xbf16>
    %c0_6 = arith.constant 0 : index
    %c0_7 = arith.constant 0 : index
    %9 = vector.load %arg4[%c0_6, %c0_7] : memref<32x256xbf16, #tpu.memory_space<vmem>>, vector<32x256xbf16>
    tpu.vector_store %arg4[%c0_6, %c0_7], %8 {strides = array<i32>} : memref<32x256xbf16, #tpu.memory_space<vmem>>, vector<32x256xbf16>,
    return
  }
  func.func @transform_0(%arg0: i32) -> (i32, i32) {
    %c0_i32 = arith.constant 0 : i32
    %c0_i32_0 = arith.constant 0 : i32
    return %arg0, %c0_i32 : i32, i32
  }
  func.func @transform_1(%arg0: i32) -> (i32, i32) {
    %c0_i32 = arith.constant 0 : i32
    %c0_i32_0 = arith.constant 0 : i32
    %c0_i32_1 = arith.constant 0 : i32
    return %c0_i32, %c0_i32_0 : i32, i32
  }
  func.func @transform_2(%arg0: i32) -> (i32, i32) {
    %c0_i32 = arith.constant 0 : i32
    %c0_i32_0 = arith.constant 0 : i32
    %c0_i32_1 = arith.constant 0 : i32
    return %c0_i32, %c0_i32_0 : i32, i32
  }
  func.func @transform_3(%arg0: i32) -> (i32, i32) {
    %c0_i32 = arith.constant 0 : i32
    %c0_i32_0 = arith.constant 0 : i32
    return %arg0, %c0_i32 : i32, i32
  }
}

module attributes {stable_mosaic.version = 11 : i64} {
  func.func @_fused_matmul_kernel(%arg0: i32, %arg1: memref<128x576xbf16, #tpu.memory_space<vmem>>, %arg2: memref<576x128xbf16, #tpu.memory_space<vmem>>, %arg3: memref<1x128xf32, #tpu.memory_space<vmem>>, %arg4: memref<128x128xbf16, #tpu.memory_space<vmem>>) attributes {dimension_semantics = [#tpu.dimension_semantics<parallel>], iteration_bounds = array<i64: 1>, scalar_prefetch = 0 : i64, scratch_operands = 0 : i64, tpu.core_type = #tpu.core_type<tc>, window_params = [{transform_indices = @transform_0, window_bounds = array<i64: 128, 576>}, {pipeline_mode = #tpu.pipeline_mode<synchronous>, transform_indices = @transform_1, window_bounds = array<i64: 576, 128>}, {pipeline_mode = #tpu.pipeline_mode<synchronous>, transform_indices = @transform_2, window_bounds = array<i64: 1, 128>}, {transform_indices = @transform_3, window_bounds = array<i64: 128, 128>}]} {
    %c0 = arith.constant 0 : index
    %c0_0 = arith.constant 0 : index
    %0 = vector.load %arg1[%c0, %c0_0] : memref<128x576xbf16, #tpu.memory_space<vmem>>, vector<128x576xbf16>
    %c0_1 = arith.constant 0 : index
    %c0_2 = arith.constant 0 : index
    %1 = vector.load %arg2[%c0_1, %c0_2] : memref<576x128xbf16, #tpu.memory_space<vmem>>, vector<576x128xbf16>
    %cst = arith.constant dense<0.000000e+00> : vector<128x128xf32>
    %2 = tpu.matmul %0, %1, %cst {dimension_numbers = #tpu.dot_dimension_numbers<[1], [0], [0], [1], [0, 0, 1, 1], [], []>} : vector<128x576xbf16>, vector<576x128xbf16>, vector<128x128xf32> -> vector<128x128xf32>
    %c0_3 = arith.constant 0 : index
    %c0_4 = arith.constant 0 : index
    %3 = vector.load %arg3[%c0_3, %c0_4] : memref<1x128xf32, #tpu.memory_space<vmem>>, vector<1x128xf32>
    %4 = vector.broadcast %3 : vector<1x128xf32> to vector<128x128xf32>
    %5 = arith.addf %2, %4 : vector<128x128xf32>
    %cst_5 = arith.constant 0.000000e+00 : f32
    %6 = vector.broadcast %cst_5 : f32 to vector<128x128xf32>
    %7 = arith.maximumf %5, %6 : vector<128x128xf32>
    %8 = arith.truncf %7 : vector<128x128xf32> to vector<128x128xbf16>
    %c0_6 = arith.constant 0 : index
    %c0_7 = arith.constant 0 : index
    %9 = vector.load %arg4[%c0_6, %c0_7] : memref<128x128xbf16, #tpu.memory_space<vmem>>, vector<128x128xbf16>
    tpu.vector_store %arg4[%c0_6, %c0_7], %8 {strides = array<i32>} : memref<128x128xbf16, #tpu.memory_space<vmem>>, vector<128x128xbf16>,
    return
  }
  func.func @transform_0(%arg0: i32) -> (i32, i32) {
    %c0_i32 = arith.constant 0 : i32
    %c0_i32_0 = arith.constant 0 : i32
    return %arg0, %c0_i32 : i32, i32
  }
  func.func @transform_1(%arg0: i32) -> (i32, i32) {
    %c0_i32 = arith.constant 0 : i32
    %c0_i32_0 = arith.constant 0 : i32
    %c0_i32_1 = arith.constant 0 : i32
    return %c0_i32, %c0_i32_0 : i32, i32
  }
  func.func @transform_2(%arg0: i32) -> (i32, i32) {
    %c0_i32 = arith.constant 0 : i32
    %c0_i32_0 = arith.constant 0 : i32
    %c0_i32_1 = arith.constant 0 : i32
    return %c0_i32, %c0_i32_0 : i32, i32
  }
  func.func @transform_3(%arg0: i32) -> (i32, i32) {
    %c0_i32 = arith.constant 0 : i32
    %c0_i32_0 = arith.constant 0 : i32
    return %arg0, %c0_i32 : i32, i32
  }
}

module attributes {stable_mosaic.version = 11 : i64} {
  func.func @_fused_matmul_kernel(%arg0: i32, %arg1: memref<256x288xbf16, #tpu.memory_space<vmem>>, %arg2: memref<288x12xbf16, #tpu.memory_space<vmem>>, %arg3: memref<1x12xf32, #tpu.memory_space<vmem>>, %arg4: memref<256x12xf32, #tpu.memory_space<vmem>>) attributes {dimension_semantics = [#tpu.dimension_semantics<parallel>], iteration_bounds = array<i64: 2>, scalar_prefetch = 0 : i64, scratch_operands = 0 : i64, tpu.core_type = #tpu.core_type<tc>, window_params = [{transform_indices = @transform_0, window_bounds = array<i64: 256, 288>}, {pipeline_mode = #tpu.pipeline_mode<synchronous>, transform_indices = @transform_1, window_bounds = array<i64: 288, 12>}, {pipeline_mode = #tpu.pipeline_mode<synchronous>, transform_indices = @transform_2, window_bounds = array<i64: 1, 12>}, {transform_indices = @transform_3, window_bounds = array<i64: 256, 12>}]} {
    %c0 = arith.constant 0 : index
    %c0_0 = arith.constant 0 : index
    %0 = vector.load %arg1[%c0, %c0_0] : memref<256x288xbf16, #tpu.memory_space<vmem>>, vector<256x288xbf16>
    %c0_1 = arith.constant 0 : index
    %c0_2 = arith.constant 0 : index
    %1 = vector.load %arg2[%c0_1, %c0_2] : memref<288x12xbf16, #tpu.memory_space<vmem>>, vector<288x12xbf16>
    %cst = arith.constant dense<0.000000e+00> : vector<256x12xf32>
    %2 = tpu.matmul %0, %1, %cst {dimension_numbers = #tpu.dot_dimension_numbers<[1], [0], [0], [1], [0, 0, 1, 1], [], []>} : vector<256x288xbf16>, vector<288x12xbf16>, vector<256x12xf32> -> vector<256x12xf32>
    %c0_3 = arith.constant 0 : index
    %c0_4 = arith.constant 0 : index
    %3 = vector.load %arg3[%c0_3, %c0_4] : memref<1x12xf32, #tpu.memory_space<vmem>>, vector<1x12xf32>
    %4 = vector.broadcast %3 : vector<1x12xf32> to vector<256x12xf32>
    %5 = arith.addf %2, %4 : vector<256x12xf32>
    %6 = arith.negf %5 : vector<256x12xf32>
    %7 = math.exp %6 : vector<256x12xf32>
    %cst_5 = arith.constant 1.000000e+00 : f32
    %8 = vector.broadcast %cst_5 : f32 to vector<256x12xf32>
    %9 = arith.addf %8, %7 : vector<256x12xf32>
    %10 = arith.divf %8, %9 : vector<256x12xf32>
    %c0_6 = arith.constant 0 : index
    %c0_7 = arith.constant 0 : index
    %11 = vector.load %arg4[%c0_6, %c0_7] : memref<256x12xf32, #tpu.memory_space<vmem>>, vector<256x12xf32>
    tpu.vector_store %arg4[%c0_6, %c0_7], %10 {strides = array<i32>} : memref<256x12xf32, #tpu.memory_space<vmem>>, vector<256x12xf32>,
    return
  }
  func.func @transform_0(%arg0: i32) -> (i32, i32) {
    %c0_i32 = arith.constant 0 : i32
    %c0_i32_0 = arith.constant 0 : i32
    return %arg0, %c0_i32 : i32, i32
  }
  func.func @transform_1(%arg0: i32) -> (i32, i32) {
    %c0_i32 = arith.constant 0 : i32
    %c0_i32_0 = arith.constant 0 : i32
    %c0_i32_1 = arith.constant 0 : i32
    return %c0_i32, %c0_i32_0 : i32, i32
  }
  func.func @transform_2(%arg0: i32) -> (i32, i32) {
    %c0_i32 = arith.constant 0 : i32
    %c0_i32_0 = arith.constant 0 : i32
    %c0_i32_1 = arith.constant 0 : i32
    return %c0_i32, %c0_i32_0 : i32, i32
  }
  func.func @transform_3(%arg0: i32) -> (i32, i32) {
    %c0_i32 = arith.constant 0 : i32
    %c0_i32_0 = arith.constant 0 : i32
    return %arg0, %c0_i32 : i32, i32
  }
}

</mosaic_0001>

<bundles_post_ra>
// kernel: conv_vae_forward.9
= control target key start
LH: loop header
LB: loop body
LE: loop exit
PB: predicated region body
PF: predicated region fallthrough
CT: control target
= control target key end

     0   :  { %s1006_s12 = smov 0   ;;  %s1176_s0 = inlined_call_operand.vmem [shape: bf16[512,48], index: 0, kind: input, shape index: {}]   ;;  %s1177_s1 = inlined_call_operand.vmem [shape: bf16[48,32], index: 1, kind: input, shape index: {}]   ;;  %s1178_s2 = inlined_call_operand.vmem [shape: f32[1,32], index: 2, kind: input, shape index: {}]   ;;  %s1179_s3 = inlined_call_operand.vmem [shape: bf16[512,32], index: 3, kind: output, shape index: {}]  }
   0x1 LB: > { %s777_s13 = sadd.s32 4294967295, %s984_s12   ;;  %p781_p0 = scmp.ge.s32.totalorder %s984_s12, 1  ;;  %s984_s12 = sphi %s1006_s12, %s13_s12  }
   0x2   : > { %p138_p1 = scmp.lt.s32.totalorder %s984_s12, 3 }
   0x4   : > { %p139_p2 = pnand %p781_p0, %p138_p1 }
   0x5   : > { %v959_v0 = vld [vmem:[%s1177_s1] sm:$0xff] (!%p139_p2)   ;;  %s782_s16 = sshll.u32 (!%p139_p2), %s777_s13, 5  ;;  %v960_v1 = vld [vmem:[%s1177_s1 + $0x8] sm:$0xff] (!%p139_p2)   ;;  %v961_v2 = vld [vmem:[%s1177_s1 + $0x10] sm:$0xff] (!%p139_p2)   ;;  %vm318_vm0 = vcmask (!%p139_p2), 392192   ;;  %vm688_vm1 = vcmask (!%p139_p2), 257024  }
   0x6   : > { %142 = sbr.rel (%p139_p2) target bundleno = 265 (0x109), region = 32  ;;  %p163_p3 = scmp.lt.s32.totalorder (!%p139_p2), %s782_s16, 63  ;;  %907 = vmatprep.subr.bf16.mxu0 (!%p139_p2), %v959_v0  ;;  %945 = vmatprep.subr.bf16.mxu1 (!%p139_p2), %v959_v0  ;;  %v1068_v19 = vld [vmem:[%s1178_s2] ss:$0 sm:$0xff] (!%p139_p2) }
   0x7   : > { %908 = vmatpush3.bf16.msra.mxu0 (!%p139_p2), %v959_v0  ;;  %948 = vmatpush3.bf16.msra.mxu1 (!%p139_p2), %v959_v0 }
   0x8   : > { %909 = vmatprep.subr.bf16.mxu0 (!%p139_p2), %v960_v1  ;;  %946 = vmatprep.subr.bf16.mxu1 (!%p139_p2), %v960_v1 }
   0xb   : > { %910 = vmatpush3.bf16.msra.mxu0 (!%p139_p2), %v960_v1  ;;  %949 = vmatpush3.bf16.msra.mxu1 (!%p139_p2), %v960_v1 }
   0xc   : > { %911 = vmatprep.subr.bf16.mxu0 (!%p139_p2), %v961_v2  ;;  %947 = vmatprep.subr.bf16.mxu1 (!%p139_p2), %v961_v2 }
   0xd   : > { %s1181_s16 = smov (!%p163_p3, %s782_s16), 63 }
   0xe   : > { %s783_s21 = sshll.u32 %s1181_s16, 2 }
   0xf   : > { %s1031_s24 = scalar_lea.vmem %s1176_s0, %s783_s21  ;;  %912 = vmatpush3.bf16.msra.mxu0 %v961_v2  ;;  %950 = vmatpush3.bf16.msra.mxu1 %v961_v2  ;;  %s1081_s29 = scalar_lea.vmem %s1179_s3, %s783_s21 }
  0x10   : > { %v962_v3 = vld [vmem:[%s1031_s24] sm:$0xff]   ;;  %v964_v5 = vld [vmem:[%s1031_s24 + $0x8] sm:$0xff]   ;;  %v966_v7 = vld [vmem:[%s1031_s24 + $0x10] sm:$0xff]  }
  0x11   : > { %v963_v4 = vld [vmem:[%s1031_s24 + $0x40] sm:$0xff]   ;;  %913 = vmatprep.mubr.msk.bf16.mxu0 %vm318_vm0, %v962_v3  ;;  %v965_v6 = vld [vmem:[%s1031_s24 + $0x48] sm:$0xff]   ;;  %v967_v8 = vld [vmem:[%s1031_s24 + $0x50] sm:$0xff]  }
  0x12   : > { %929 = vmatprep.mubr.msk.bf16.mxu1 %vm318_vm0, %v963_v4  ;;  %914 = vmatmul.mubr.msk.bf16.vlgmr.msra.gmra.mrb[0].mxu0 %vm318_vm0, %v964_v5  ;;  %v968_v9 = vld [vmem:[%s1031_s24 + $0x18] sm:$0xff]   ;;  %v970_v11 = vld [vmem:[%s1031_s24 + $0x20] sm:$0xff]   ;;  %v972_v13 = vld [vmem:[%s1031_s24 + $0x28] sm:$0xff]  }
  0x13   : > { %930 = vmatmul.mubr.msk.bf16.vlgmr.msra.gmra.mrb[0].mxu1 %vm318_vm0, %v965_v6  ;;  %917 = vmatprep.mubr.msk.bf16.mxu0 %vm318_vm0, %v966_v7  ;;  %v969_v10 = vld [vmem:[%s1031_s24 + $0x58] sm:$0xff]   ;;  %v971_v12 = vld [vmem:[%s1031_s24 + $0x60] sm:$0xff]   ;;  %v973_v14 = vld [vmem:[%s1031_s24 + $0x68] sm:$0xff]  }
  0x14   : > { %933 = vmatprep.mubr.msk.bf16.mxu1 %vm318_vm0, %v967_v8  ;;  %v974_v15 = vld [vmem:[%s1031_s24 + $0x30] sm:$0xff]   ;;  %v976_v17 = vld [vmem:[%s1031_s24 + $0x38] sm:$0xff]  }
  0x15   : > { %v975_v16 = vld [vmem:[%s1031_s24 + $0x70] sm:$0xff]   ;;  %v977_v18 = vld [vmem:[%s1031_s24 + $0x78] sm:$0xff]  }
  0x1a   : > { %918 = vmatmul.mubr.msk.bf16.gmra.mrb[4].mxu0 %vm318_vm0, %v968_v9 }
  0x1b   : > { %934 = vmatmul.mubr.msk.bf16.gmra.mrb[4].mxu1 %vm318_vm0, %v969_v10  ;;  %921 = vmatprep.mubr.msk.bf16.mxu0 %vm318_vm0, %v970_v11 }
  0x1c   : > { %937 = vmatprep.mubr.msk.bf16.mxu1 %vm318_vm0, %v971_v12 }
  0x22   : > { %922 = vmatmul.mubr.msk.bf16.gmra.mrb[8].mxu0 %vm318_vm0, %v972_v13 }
  0x23   : > { %938 = vmatmul.mubr.msk.bf16.gmra.mrb[8].mxu1 %vm318_vm0, %v973_v14  ;;  %925 = vmatprep.mubr.msk.bf16.mxu0 %vm318_vm0, %v974_v15 }
  0x24   : > { %941 = vmatprep.mubr.msk.bf16.mxu1 %vm318_vm0, %v975_v16 }
  0x2a   : > { %926 = vmatmul.mubr.msk.bf16.gmra.mrb[12].mxu0 %vm318_vm0, %v976_v17 }
  0x2b   : > { %942 = vmatmul.mubr.msk.bf16.gmra.mrb[12].mxu1 %vm318_vm0, %v977_v18 }
  0xe5   : > { %v915_v20 = vpop.f32.mrb[0].mxu0 }
  0xe6   : > { %v931_v21 = vpop.f32.mrb[0].mxu1  ;;  %v410_v22 = vadd.f32 %v915_v20, %v1068_v19  ;;  %v401_v24 = vpop.f32.mrb[1].mxu0 }
  0xe7   : > { %v474_v23 = vadd.f32 %v931_v21, %v1068_v19  ;;  %v465_v25 = vpop.f32.mrb[1].mxu1  ;;  %v402_v26 = vadd.f32 %v1068_v19, %v401_v24  ;;  %v916_v28 = vpop.f32.mrb[2].mxu0 }
  0xe8   : > { %v466_v27 = vadd.f32 %v1068_v19, %v465_v25  ;;  %v932_v29 = vpop.f32.mrb[2].mxu1  ;;  %v530_v30 = vmax.f32 %v410_v22, 0.0  ;;  %v413_v32 = vadd.f32 %v916_v28, %v1068_v19  ;;  %v404_v34 = vpop.f32.mrb[3].mxu0 }
  0xe9   : > { %v546_v31 = vmax.f32 %v474_v23, 0.0  ;;  %v477_v33 = vadd.f32 %v932_v29, %v1068_v19  ;;  %v468_v35 = vpop.f32.mrb[3].mxu1  ;;  %v528_v36 = vmax.f32 %v402_v26, 0.0  ;;  %v405_v38 = vadd.f32 %v1068_v19, %v404_v34 }
  0xea   : > { %v544_v37 = vmax.f32 %v466_v27, 0.0  ;;  %v469_v39 = vadd.f32 %v1068_v19, %v468_v35  ;;  %v858_v40 = vpack.c.bf16 %v530_v30, %v530_v30  ;;  %v531_v42 = vmax.f32 %v413_v32, 0.0 }
  0xeb   : > { %v874_v41 = vpack.c.bf16 %v546_v31, %v546_v31  ;;  %v547_v43 = vmax.f32 %v477_v33, 0.0  ;;  %v856_v44 = vpack.c.bf16 %v528_v36, %v528_v36  ;;  %v529_v46 = vmax.f32 %v405_v38, 0.0 }
  0xec   : > { %v872_v45 = vpack.c.bf16 %v544_v37, %v544_v37  ;;  %v545_v47 = vmax.f32 %v469_v39, 0.0  ;;  %691 = vst.msk [vmem:[%s1081_s29 + $0x8] sm:$0xf] %vm688_vm1, %v858_v40  ;;  %v859_v48 = vpack.c.bf16 %v531_v42, %v531_v42 }
  0xed   : > { %707 = vst.msk [vmem:[%s1081_s29 + $0x48] sm:$0xf] %vm688_vm1, %v874_v41  ;;  %v875_v49 = vpack.c.bf16 %v547_v43, %v547_v43  ;;  %689 = vst.msk [vmem:[%s1081_s29] sm:$0xf] %vm688_vm1, %v856_v44  ;;  %v857_v50 = vpack.c.bf16 %v529_v46, %v529_v46  ;;  %v919_v52 = vpop.f32.mrb[4].mxu0 }
  0xee   : > { %705 = vst.msk [vmem:[%s1081_s29 + $0x40] sm:$0xf] %vm688_vm1, %v872_v45  ;;  %v873_v51 = vpack.c.bf16 %v545_v47, %v545_v47  ;;  %v935_v53 = vpop.f32.mrb[4].mxu1  ;;  %692 = vst.msk [vmem:[%s1081_s29 + $0xc] sm:$0xf] %vm688_vm1, %v859_v48  ;;  %v426_v54 = vadd.f32 %v919_v52, %v1068_v19  ;;  %v417_v56 = vpop.f32.mrb[5].mxu0 }
  0xef   : > { %708 = vst.msk [vmem:[%s1081_s29 + $0x4c] sm:$0xf] %vm688_vm1, %v875_v49  ;;  %v490_v55 = vadd.f32 %v935_v53, %v1068_v19  ;;  %v481_v57 = vpop.f32.mrb[5].mxu1  ;;  %690 = vst.msk [vmem:[%s1081_s29 + $0x4] sm:$0xf] %vm688_vm1, %v857_v50  ;;  %v418_v58 = vadd.f32 %v1068_v19, %v417_v56  ;;  %v920_v60 = vpop.f32.mrb[6].mxu0 }
  0xf0   : > { %706 = vst.msk [vmem:[%s1081_s29 + $0x44] sm:$0xf] %vm688_vm1, %v873_v51  ;;  %v482_v59 = vadd.f32 %v1068_v19, %v481_v57  ;;  %v936_v61 = vpop.f32.mrb[6].mxu1  ;;  %v534_v62 = vmax.f32 %v426_v54, 0.0  ;;  %v429_v0 = vadd.f32 %v920_v60, %v1068_v19  ;;  %v420_v2 = vpop.f32.mrb[7].mxu0 }
  0xf1   : > { %v550_v63 = vmax.f32 %v490_v55, 0.0  ;;  %v493_v1 = vadd.f32 %v936_v61, %v1068_v19  ;;  %v484_v3 = vpop.f32.mrb[7].mxu1  ;;  %v532_v4 = vmax.f32 %v418_v58, 0.0  ;;  %v421_v6 = vadd.f32 %v1068_v19, %v420_v2 }
  0xf2   : > { %v548_v5 = vmax.f32 %v482_v59, 0.0  ;;  %v485_v7 = vadd.f32 %v1068_v19, %v484_v3  ;;  %v862_v8 = vpack.c.bf16 %v534_v62, %v534_v62  ;;  %v535_v10 = vmax.f32 %v429_v0, 0.0 }
  0xf3   : > { %v878_v9 = vpack.c.bf16 %v550_v63, %v550_v63  ;;  %v551_v11 = vmax.f32 %v493_v1, 0.0  ;;  %v860_v12 = vpack.c.bf16 %v532_v4, %v532_v4  ;;  %v533_v14 = vmax.f32 %v421_v6, 0.0 }
  0xf4   : > { %v876_v13 = vpack.c.bf16 %v548_v5, %v548_v5  ;;  %v549_v15 = vmax.f32 %v485_v7, 0.0  ;;  %695 = vst.msk [vmem:[%s1081_s29 + $0x18] sm:$0xf] %vm688_vm1, %v862_v8  ;;  %v863_v16 = vpack.c.bf16 %v535_v10, %v535_v10 }
  0xf5   : > { %711 = vst.msk [vmem:[%s1081_s29 + $0x58] sm:$0xf] %vm688_vm1, %v878_v9  ;;  %v879_v17 = vpack.c.bf16 %v551_v11, %v551_v11  ;;  %693 = vst.msk [vmem:[%s1081_s29 + $0x10] sm:$0xf] %vm688_vm1, %v860_v12  ;;  %v861_v18 = vpack.c.bf16 %v533_v14, %v533_v14  ;;  %v923_v21 = vpop.f32.mrb[8].mxu0 }
  0xf6   : > { %709 = vst.msk [vmem:[%s1081_s29 + $0x50] sm:$0xf] %vm688_vm1, %v876_v13  ;;  %v877_v20 = vpack.c.bf16 %v549_v15, %v549_v15  ;;  %v939_v22 = vpop.f32.mrb[8].mxu1  ;;  %696 = vst.msk [vmem:[%s1081_s29 + $0x1c] sm:$0xf] %vm688_vm1, %v863_v16  ;;  %v442_v23 = vadd.f32 %v923_v21, %v1068_v19  ;;  %v433_v25 = vpop.f32.mrb[9].mxu0 }
  0xf7   : > { %712 = vst.msk [vmem:[%s1081_s29 + $0x5c] sm:$0xf] %vm688_vm1, %v879_v17  ;;  %v506_v24 = vadd.f32 %v939_v22, %v1068_v19  ;;  %v497_v26 = vpop.f32.mrb[9].mxu1  ;;  %694 = vst.msk [vmem:[%s1081_s29 + $0x14] sm:$0xf] %vm688_vm1, %v861_v18  ;;  %v434_v27 = vadd.f32 %v1068_v19, %v433_v25  ;;  %v924_v29 = vpop.f32.mrb[10].mxu0 }
  0xf8   : > { %710 = vst.msk [vmem:[%s1081_s29 + $0x54] sm:$0xf] %vm688_vm1, %v877_v20  ;;  %v498_v28 = vadd.f32 %v1068_v19, %v497_v26  ;;  %v940_v30 = vpop.f32.mrb[10].mxu1  ;;  %v538_v31 = vmax.f32 %v442_v23, 0.0  ;;  %v445_v33 = vadd.f32 %v924_v29, %v1068_v19  ;;  %v436_v35 = vpop.f32.mrb[11].mxu0 }
  0xf9   : > { %v554_v32 = vmax.f32 %v506_v24, 0.0  ;;  %v509_v34 = vadd.f32 %v940_v30, %v1068_v19  ;;  %v500_v36 = vpop.f32.mrb[11].mxu1  ;;  %v536_v37 = vmax.f32 %v434_v27, 0.0  ;;  %v437_v39 = vadd.f32 %v1068_v19, %v436_v35 }
  0xfa   : > { %v552_v38 = vmax.f32 %v498_v28, 0.0  ;;  %v501_v40 = vadd.f32 %v1068_v19, %v500_v36  ;;  %v866_v41 = vpack.c.bf16 %v538_v31, %v538_v31  ;;  %v539_v43 = vmax.f32 %v445_v33, 0.0 }
  0xfb   : > { %v882_v42 = vpack.c.bf16 %v554_v32, %v554_v32  ;;  %v555_v44 = vmax.f32 %v509_v34, 0.0  ;;  %v864_v45 = vpack.c.bf16 %v536_v37, %v536_v37  ;;  %v537_v47 = vmax.f32 %v437_v39, 0.0 }
  0xfc   : > { %v880_v46 = vpack.c.bf16 %v552_v38, %v552_v38  ;;  %v553_v48 = vmax.f32 %v501_v40, 0.0  ;;  %699 = vst.msk [vmem:[%s1081_s29 + $0x28] sm:$0xf] %vm688_vm1, %v866_v41  ;;  %v867_v49 = vpack.c.bf16 %v539_v43, %v539_v43 }
  0xfd   : > { %715 = vst.msk [vmem:[%s1081_s29 + $0x68] sm:$0xf] %vm688_vm1, %v882_v42  ;;  %v883_v50 = vpack.c.bf16 %v555_v44, %v555_v44  ;;  %697 = vst.msk [vmem:[%s1081_s29 + $0x20] sm:$0xf] %vm688_vm1, %v864_v45  ;;  %v865_v51 = vpack.c.bf16 %v537_v47, %v537_v47  ;;  %v927_v53 = vpop.f32.mrb[12].mxu0 }
  0xfe   : > { %713 = vst.msk [vmem:[%s1081_s29 + $0x60] sm:$0xf] %vm688_vm1, %v880_v46  ;;  %v881_v52 = vpack.c.bf16 %v553_v48, %v553_v48  ;;  %v943_v54 = vpop.f32.mrb[12].mxu1  ;;  %700 = vst.msk [vmem:[%s1081_s29 + $0x2c] sm:$0xf] %vm688_vm1, %v867_v49  ;;  %v458_v55 = vadd.f32 %v927_v53, %v1068_v19  ;;  %v449_v57 = vpop.f32.mrb[13].mxu0 }
  0xff   : > { %716 = vst.msk [vmem:[%s1081_s29 + $0x6c] sm:$0xf] %vm688_vm1, %v883_v50  ;;  %v522_v56 = vadd.f32 %v943_v54, %v1068_v19  ;;  %v513_v58 = vpop.f32.mrb[13].mxu1  ;;  %698 = vst.msk [vmem:[%s1081_s29 + $0x24] sm:$0xf] %vm688_vm1, %v865_v51  ;;  %v450_v59 = vadd.f32 %v1068_v19, %v449_v57  ;;  %v928_v61 = vpop.f32.mrb[14].mxu0 }
 0x100   : > { %714 = vst.msk [vmem:[%s1081_s29 + $0x64] sm:$0xf] %vm688_vm1, %v881_v52  ;;  %v514_v60 = vadd.f32 %v1068_v19, %v513_v58  ;;  %v944_v62 = vpop.f32.mrb[14].mxu1  ;;  %v542_v63 = vmax.f32 %v458_v55, 0.0  ;;  %v461_v1 = vadd.f32 %v928_v61, %v1068_v19  ;;  %v452_v3 = vpop.f32.mrb[15].mxu0 }
 0x101   : > { %v558_v0 = vmax.f32 %v522_v56, 0.0  ;;  %v525_v2 = vadd.f32 %v944_v62, %v1068_v19  ;;  %v516_v4 = vpop.f32.mrb[15].mxu1  ;;  %v540_v5 = vmax.f32 %v450_v59, 0.0  ;;  %v453_v7 = vadd.f32 %v1068_v19, %v452_v3 }
 0x102   : > { %v556_v6 = vmax.f32 %v514_v60, 0.0  ;;  %v517_v8 = vadd.f32 %v1068_v19, %v516_v4  ;;  %v870_v9 = vpack.c.bf16 %v542_v63, %v542_v63  ;;  %v543_v11 = vmax.f32 %v461_v1, 0.0 }
 0x103   : > { %v886_v10 = vpack.c.bf16 %v558_v0, %v558_v0  ;;  %v559_v12 = vmax.f32 %v525_v2, 0.0  ;;  %v868_v13 = vpack.c.bf16 %v540_v5, %v540_v5  ;;  %v541_v15 = vmax.f32 %v453_v7, 0.0 }
 0x104   : > { %v884_v14 = vpack.c.bf16 %v556_v6, %v556_v6  ;;  %v557_v16 = vmax.f32 %v517_v8, 0.0  ;;  %703 = vst.msk [vmem:[%s1081_s29 + $0x38] sm:$0xf] %vm688_vm1, %v870_v9  ;;  %v871_v17 = vpack.c.bf16 %v543_v11, %v543_v11 }
 0x105   : > { %719 = vst.msk [vmem:[%s1081_s29 + $0x78] sm:$0xf] %vm688_vm1, %v886_v10  ;;  %v887_v18 = vpack.c.bf16 %v559_v12, %v559_v12  ;;  %701 = vst.msk [vmem:[%s1081_s29 + $0x30] sm:$0xf] %vm688_vm1, %v868_v13  ;;  %v869_v19 = vpack.c.bf16 %v541_v15, %v541_v15 }
 0x106   : > { %717 = vst.msk [vmem:[%s1081_s29 + $0x70] sm:$0xf] %vm688_vm1, %v884_v14  ;;  %v885_v20 = vpack.c.bf16 %v557_v16, %v557_v16  ;;  %704 = vst.msk [vmem:[%s1081_s29 + $0x3c] sm:$0xf] %vm688_vm1, %v871_v17 }
 0x107   : > { %720 = vst.msk [vmem:[%s1081_s29 + $0x7c] sm:$0xf] %vm688_vm1, %v887_v18  ;;  %702 = vst.msk [vmem:[%s1081_s29 + $0x34] sm:$0xf] %vm688_vm1, %v869_v19 }
 0x108   : > { %718 = vst.msk [vmem:[%s1081_s29 + $0x74] sm:$0xf] %vm688_vm1, %v885_v20 }
 0x109 PF: > { %s13_s12 = sadd.s32 1, %s984_s12  }
 0x10a   : > { %p10_p4 = scmp.ge.s32.totalorder %s13_s12, 4  }
 0x10c   :  { %12 = sbr.rel (!%p10_p4) target bundleno = 1 (0x1), region = 62 }

// kernel: conv_vae_forward.10
= control target key start
LH: loop header
LB: loop body
LE: loop exit
PB: predicated region body
PF: predicated region fallthrough
CT: control target
= control target key end

     0   :  { %vm744_vm0 = vcmask 519168   ;;  %s1367_s1 = inlined_call_operand.vmem [shape: bf16[512,64], index: 1, kind: input, shape index: {}]   ;;  %s1368_s0 = inlined_call_operand.vmem [shape: bf16[128,512], index: 0, kind: input, shape index: {}]   ;;  %s1369_s2 = inlined_call_operand.vmem [shape: f32[1,64], index: 2, kind: input, shape index: {}]   ;;  %s1370_s3 = inlined_call_operand.vmem [shape: bf16[128,64], index: 3, kind: output, shape index: {}]  }
   0x1   :  { %v990_v0 = vld [vmem:[%s1367_s1 + $0x40] sm:$0xff]   ;;  %v994_v4 = vld [vmem:[%s1367_s1 + $0x48] sm:$0xff]   ;;  %v998_v8 = vld [vmem:[%s1367_s1 + $0x50] sm:$0xff]  }
   0x2   :  { %v991_v1 = vld [vmem:[%s1367_s1 + $0xc0] sm:$0xff]   ;;  %862 = vmatprep.subr.bf16.mxu0 %v990_v0  ;;  %v995_v5 = vld [vmem:[%s1367_s1 + $0xc8] sm:$0xff]   ;;  %v999_v9 = vld [vmem:[%s1367_s1 + $0xd0] sm:$0xff]  }
   0x3   :  { %v992_v2 = vld [vmem:[%s1367_s1] sm:$0xff]   ;;  %926 = vmatprep.subr.bf16.mxu1 %v991_v1  ;;  %v996_v6 = vld [vmem:[%s1367_s1 + $0x8] sm:$0xff]   ;;  %v1000_v10 = vld [vmem:[%s1367_s1 + $0x10] sm:$0xff]  }
   0x4   :  { %v993_v3 = vld [vmem:[%s1367_s1 + $0x80] sm:$0xff]   ;;  %863 = vmatpush3.bf16.msra.mxu0 %v992_v2  ;;  %v997_v7 = vld [vmem:[%s1367_s1 + $0x88] sm:$0xff]   ;;  %v1001_v11 = vld [vmem:[%s1367_s1 + $0x90] sm:$0xff]  }
   0x5   :  { %927 = vmatpush3.bf16.msra.mxu1 %v993_v3  ;;  %864 = vmatprep.subr.bf16.mxu0 %v994_v4  ;;  %v1002_v12 = vld [vmem:[%s1367_s1 + $0x58] sm:$0xff]   ;;  %v1006_v16 = vld [vmem:[%s1367_s1 + $0x60] sm:$0xff]   ;;  %v1010_v20 = vld [vmem:[%s1367_s1 + $0x68] sm:$0xff]  }
   0x6   :  { %928 = vmatprep.subr.bf16.mxu1 %v995_v5  ;;  %v1003_v13 = vld [vmem:[%s1367_s1 + $0xd8] sm:$0xff]   ;;  %v1007_v17 = vld [vmem:[%s1367_s1 + $0xe0] sm:$0xff]   ;;  %v1011_v21 = vld [vmem:[%s1367_s1 + $0xe8] sm:$0xff]  }
   0x7   :  { %v1004_v14 = vld [vmem:[%s1367_s1 + $0x18] sm:$0xff]   ;;  %v1008_v18 = vld [vmem:[%s1367_s1 + $0x20] sm:$0xff]   ;;  %v1012_v22 = vld [vmem:[%s1367_s1 + $0x28] sm:$0xff]  }
   0x8   :  { %865 = vmatpush3.bf16.msra.mxu0 %v996_v6  ;;  %v1005_v15 = vld [vmem:[%s1367_s1 + $0x98] sm:$0xff]   ;;  %v1009_v19 = vld [vmem:[%s1367_s1 + $0xa0] sm:$0xff]   ;;  %v1013_v23 = vld [vmem:[%s1367_s1 + $0xa8] sm:$0xff]  }
   0x9   :  { %929 = vmatpush3.bf16.msra.mxu1 %v997_v7  ;;  %866 = vmatprep.subr.bf16.mxu0 %v998_v8  ;;  %v1014_v24 = vld [vmem:[%s1367_s1 + $0x70] sm:$0xff]   ;;  %v1018_v28 = vld [vmem:[%s1367_s1 + $0x78] sm:$0xff]   ;;  %v1285_v2 = vld [vmem:[%s1369_s2] ss:$0 sm:$0xff] }
   0xa   :  { %930 = vmatprep.subr.bf16.mxu1 %v999_v9  ;;  %v1015_v25 = vld [vmem:[%s1367_s1 + $0xf0] sm:$0xff]   ;;  %v1019_v29 = vld [vmem:[%s1367_s1 + $0xf8] sm:$0xff]  }
   0xb   :  { %v1016_v26 = vld [vmem:[%s1367_s1 + $0x30] sm:$0xff]   ;;  %v1020_v30 = vld [vmem:[%s1367_s1 + $0x38] sm:$0xff]  }
   0xc   :  { %867 = vmatpush3.bf16.msra.mxu0 %v1000_v10  ;;  %v1017_v27 = vld [vmem:[%s1367_s1 + $0xb0] sm:$0xff]   ;;  %v1021_v31 = vld [vmem:[%s1367_s1 + $0xb8] sm:$0xff]  }
   0xd   :  { %931 = vmatpush3.bf16.msra.mxu1 %v1001_v11  ;;  %868 = vmatprep.subr.bf16.mxu0 %v1002_v12  ;;  %v1022_v32 = vld [vmem:[%s1368_s0] ss:$16 sps:$4 sm:$0xff]   ;;  %v1024_v33 = vld [vmem:[%s1368_s0 + $0x4] ss:$16 sps:$4 sm:$0xff]   ;;  %v1025_v34 = vld [vmem:[%s1368_s0 + $0x8] ss:$16 sps:$4 sm:$0xff]  }
   0xe   :  { %932 = vmatprep.subr.bf16.mxu1 %v1003_v13  ;;  %v1027_v35 = vld [vmem:[%s1368_s0 + $0xc] ss:$16 sps:$4 sm:$0xff]   ;;  %502 = vmatprep.mubr.bf16.mxu0 %v1024_v33  ;;  %v1028_v36 = vld [vmem:[%s1368_s0 + $0x24] ss:$16 sps:$4 sm:$0xff]   ;;  %v1032_v38 = vld [vmem:[%s1368_s0 + $0x20] ss:$16 sps:$4 sm:$0xff]  }
   0xf   :  { %599 = vmatprep.mubr.bf16.mxu1 %v1027_v35  ;;  %v1030_v37 = vld [vmem:[%s1368_s0 + $0x2c] ss:$16 sps:$4 sm:$0xff]   ;;  %v1033_v39 = vld [vmem:[%s1368_s0 + $0x28] ss:$16 sps:$4 sm:$0xff]   ;;  %v1034_v40 = vld [vmem:[%s1368_s0 + $0x44] ss:$16 sps:$4 sm:$0xff]  }
  0x10   :  { %869 = vmatpush3.bf16.msra.mxu0 %v1004_v14  ;;  %v1036_v41 = vld [vmem:[%s1368_s0 + $0x4c] ss:$16 sps:$4 sm:$0xff]   ;;  %v1038_v42 = vld [vmem:[%s1368_s0 + $0x40] ss:$16 sps:$4 sm:$0xff]   ;;  %v1039_v43 = vld [vmem:[%s1368_s0 + $0x48] ss:$16 sps:$4 sm:$0xff]  }
  0x11   :  { %933 = vmatpush3.bf16.msra.mxu1 %v1005_v15  ;;  %870 = vmatprep.subr.bf16.mxu0 %v1006_v16  ;;  %v1040_v44 = vld [vmem:[%s1368_s0 + $0x64] ss:$16 sps:$4 sm:$0xff]   ;;  %v1042_v45 = vld [vmem:[%s1368_s0 + $0x6c] ss:$16 sps:$4 sm:$0xff]   ;;  %v1044_v46 = vld [vmem:[%s1368_s0 + $0x60] ss:$16 sps:$4 sm:$0xff]  }
  0x12   :  { %934 = vmatprep.subr.bf16.mxu1 %v1007_v17  ;;  %v1045_v47 = vld [vmem:[%s1368_s0 + $0x68] ss:$16 sps:$4 sm:$0xff]   ;;  %v1046_v48 = vld [vmem:[%s1368_s0 + $0x84] ss:$16 sps:$4 sm:$0xff]   ;;  %v1048_v49 = vld [vmem:[%s1368_s0 + $0x8c] ss:$16 sps:$4 sm:$0xff]  }
  0x13   :  { %v1050_v50 = vld [vmem:[%s1368_s0 + $0x80] ss:$16 sps:$4 sm:$0xff]   ;;  %v1051_v51 = vld [vmem:[%s1368_s0 + $0x88] ss:$16 sps:$4 sm:$0xff]   ;;  %v1052_v52 = vld [vmem:[%s1368_s0 + $0xa4] ss:$16 sps:$4 sm:$0xff]  }
  0x14   :  { %871 = vmatpush3.bf16.msra.mxu0 %v1008_v18  ;;  %v1054_v53 = vld [vmem:[%s1368_s0 + $0xac] ss:$16 sps:$4 sm:$0xff]   ;;  %v1056_v54 = vld [vmem:[%s1368_s0 + $0xa0] ss:$16 sps:$4 sm:$0xff]   ;;  %v1057_v55 = vld [vmem:[%s1368_s0 + $0xa8] ss:$16 sps:$4 sm:$0xff]  }
  0x15   :  { %935 = vmatpush3.bf16.msra.mxu1 %v1009_v19  ;;  %872 = vmatprep.subr.bf16.mxu0 %v1010_v20  ;;  %v1058_v56 = vld [vmem:[%s1368_s0 + $0xc4] ss:$16 sps:$4 sm:$0xff]   ;;  %v1060_v57 = vld [vmem:[%s1368_s0 + $0xcc] ss:$16 sps:$4 sm:$0xff]   ;;  %v1062_v58 = vld [vmem:[%s1368_s0 + $0xc0] ss:$16 sps:$4 sm:$0xff]  }
  0x16   :  { %936 = vmatprep.subr.bf16.mxu1 %v1011_v21  ;;  %v1063_v59 = vld [vmem:[%s1368_s0 + $0xc8] ss:$16 sps:$4 sm:$0xff]   ;;  %v1064_v60 = vld [vmem:[%s1368_s0 + $0xe4] ss:$16 sps:$4 sm:$0xff]   ;;  %v1066_v61 = vld [vmem:[%s1368_s0 + $0xec] ss:$16 sps:$4 sm:$0xff]  }
  0x17   :  { %v1068_v62 = vld [vmem:[%s1368_s0 + $0xe0] ss:$16 sps:$4 sm:$0xff]   ;;  %v1069_v63 = vld [vmem:[%s1368_s0 + $0xe8] ss:$16 sps:$4 sm:$0xff]  }
  0x18   :  { %873 = vmatpush3.bf16.msra.mxu0 %v1012_v22 }
  0x19   :  { %937 = vmatpush3.bf16.msra.mxu1 %v1013_v23  ;;  %874 = vmatprep.subr.bf16.mxu0 %v1014_v24 }
  0x1a   :  { %938 = vmatprep.subr.bf16.mxu1 %v1015_v25 }
  0x1c   :  { %875 = vmatpush3.bf16.msra.mxu0 %v1016_v26 }
  0x1d   :  { %939 = vmatpush3.bf16.msra.mxu1 %v1017_v27  ;;  %876 = vmatprep.subr.bf16.mxu0 %v1018_v28 }
  0x1e   :  { %940 = vmatprep.subr.bf16.mxu1 %v1019_v29 }
  0x20   :  { %877 = vmatpush3.bf16.msra.mxu0 %v1020_v30 }
  0x21   :  { %941 = vmatpush3.bf16.msra.mxu1 %v1021_v31 }
  0x23   :  { %503 = vmatmul.mubr.bf16.vlgmr.msra.gmra.mrb[0].mxu0 %v1022_v32 }
  0x24   :  { %600 = vmatmul.mubr.bf16.vlgmr.msra.gmra.mrb[0].mxu1 %v1025_v34  ;;  %510 = vmatprep.mubr.bf16.mxu0 %v1028_v36 }
  0x25   :  { %607 = vmatprep.mubr.bf16.mxu1 %v1030_v37 }
  0x2b   :  { %511 = vmatmul.mubr.bf16.gmra.mrb[4].mxu0 %v1032_v38 }
  0x2c   :  { %608 = vmatmul.mubr.bf16.gmra.mrb[4].mxu1 %v1033_v39  ;;  %518 = vmatprep.mubr.bf16.mxu0 %v1034_v40 }
  0x2d   :  { %615 = vmatprep.mubr.bf16.mxu1 %v1036_v41 }
  0x33   :  { %519 = vmatmul.mubr.bf16.gmra.mrb[8].mxu0 %v1038_v42 }
  0x34   :  { %616 = vmatmul.mubr.bf16.gmra.mrb[8].mxu1 %v1039_v43  ;;  %526 = vmatprep.mubr.bf16.mxu0 %v1040_v44 }
  0x35   :  { %623 = vmatprep.mubr.bf16.mxu1 %v1042_v45 }
  0x3b   :  { %527 = vmatmul.mubr.bf16.gmra.mrb[12].mxu0 %v1044_v46 }
  0x3c   :  { %624 = vmatmul.mubr.bf16.gmra.mrb[12].mxu1 %v1045_v47  ;;  %534 = vmatprep.mubr.bf16.mxu0 %v1046_v48 }
  0x3d   :  { %631 = vmatprep.mubr.bf16.mxu1 %v1048_v49 }
  0x43   :  { %535 = vmatmul.mubr.bf16.gmra.mrb[16].mxu0 %v1050_v50 }
  0x44   :  { %632 = vmatmul.mubr.bf16.gmra.mrb[16].mxu1 %v1051_v51  ;;  %542 = vmatprep.mubr.bf16.mxu0 %v1052_v52 }
  0x45   :  { %639 = vmatprep.mubr.bf16.mxu1 %v1054_v53 }
  0x4b   :  { %543 = vmatmul.mubr.bf16.gmra.mrb[20].mxu0 %v1056_v54 }
  0x4c   :  { %640 = vmatmul.mubr.bf16.gmra.mrb[20].mxu1 %v1057_v55  ;;  %550 = vmatprep.mubr.bf16.mxu0 %v1058_v56 }
  0x4d   :  { %647 = vmatprep.mubr.bf16.mxu1 %v1060_v57 }
  0x53   :  { %551 = vmatmul.mubr.bf16.gmra.mrb[24].mxu0 %v1062_v58 }
  0x54   :  { %648 = vmatmul.mubr.bf16.gmra.mrb[24].mxu1 %v1063_v59  ;;  %558 = vmatprep.mubr.bf16.mxu0 %v1064_v60 }
  0x55   :  { %655 = vmatprep.mubr.bf16.mxu1 %v1066_v61 }
  0x5b   :  { %559 = vmatmul.mubr.bf16.gmra.mrb[28].mxu0 %v1068_v62 }
  0x5c   :  { %656 = vmatmul.mubr.bf16.gmra.mrb[28].mxu1 %v1069_v63 }
  0xf6   :  { %v878_v0 = vpop.f32.mrb[0].mxu0 }
  0xf7   :  { %v942_v1 = vpop.f32.mrb[0].mxu1  ;;  %v879_v3 = vpop.f32.mrb[1].mxu0 }
  0xf8   :  { %v880_v4 = vadd.f32 %v879_v3, %v878_v0  ;;  %v943_v5 = vpop.f32.mrb[1].mxu1  ;;  %v881_v6 = vpop.f32.mrb[2].mxu0 }
  0xf9   :  { %v944_v7 = vadd.f32 %v943_v5, %v942_v1  ;;  %v945_v8 = vpop.f32.mrb[2].mxu1  ;;  %v882_v9 = vpop.f32.mrb[3].mxu0 }
  0xfa   :  { %v505_v10 = vadd.f32 %v880_v4, %v1285_v2  ;;  %v883_v11 = vadd.f32 %v882_v9, %v881_v6  ;;  %v946_v12 = vpop.f32.mrb[3].mxu1 }
  0xfb   :  { %v947_v13 = vadd.f32 %v946_v12, %v945_v8 }
  0xfc   :  { %v602_v14 = vadd.f32 %v944_v7, %v505_v10  ;;  %v508_v15 = vadd.f32 %v883_v11, %v1285_v2 }
  0xfe   :  { %v664_v16 = vmax.f32 %v602_v14, 0.0  ;;  %v605_v17 = vadd.f32 %v947_v13, %v508_v15  ;;  %v884_v18 = vpop.f32.mrb[4].mxu0 }
  0xff   :  { %v948_v19 = vpop.f32.mrb[4].mxu1  ;;  %v885_v20 = vpop.f32.mrb[5].mxu0 }
 0x100   :  { %v846_v21 = vpack.c.bf16 %v664_v16, %v664_v16  ;;  %v665_v22 = vmax.f32 %v605_v17, 0.0  ;;  %v886_v23 = vadd.f32 %v885_v20, %v884_v18  ;;  %v949_v24 = vpop.f32.mrb[5].mxu1  ;;  %v887_v25 = vpop.f32.mrb[6].mxu0 }
 0x101   :  { %v950_v26 = vadd.f32 %v949_v24, %v948_v19  ;;  %v951_v27 = vpop.f32.mrb[6].mxu1  ;;  %v888_v28 = vpop.f32.mrb[7].mxu0 }
 0x102   :  { %745 = vst.msk [vmem:[%s1370_s3] sm:$0xf] %vm744_vm0, %v846_v21  ;;  %v847_v29 = vpack.c.bf16 %v665_v22, %v665_v22  ;;  %v513_v30 = vadd.f32 %v886_v23, %v1285_v2  ;;  %v889_v31 = vadd.f32 %v888_v28, %v887_v25  ;;  %v952_v32 = vpop.f32.mrb[7].mxu1 }
 0x103   :  { %v953_v33 = vadd.f32 %v952_v32, %v951_v27 }
 0x104   :  { %746 = vst.msk [vmem:[%s1370_s3 + $0x4] sm:$0xf] %vm744_vm0, %v847_v29  ;;  %v610_v34 = vadd.f32 %v950_v26, %v513_v30  ;;  %v516_v35 = vadd.f32 %v889_v31, %v1285_v2 }
 0x106   :  { %v666_v36 = vmax.f32 %v610_v34, 0.0  ;;  %v613_v37 = vadd.f32 %v953_v33, %v516_v35  ;;  %v890_v38 = vpop.f32.mrb[8].mxu0 }
 0x107   :  { %v954_v39 = vpop.f32.mrb[8].mxu1  ;;  %v891_v40 = vpop.f32.mrb[9].mxu0 }
 0x108   :  { %v848_v41 = vpack.c.bf16 %v666_v36, %v666_v36  ;;  %v667_v42 = vmax.f32 %v613_v37, 0.0  ;;  %v892_v43 = vadd.f32 %v891_v40, %v890_v38  ;;  %v955_v44 = vpop.f32.mrb[9].mxu1  ;;  %v893_v45 = vpop.f32.mrb[10].mxu0 }
 0x109   :  { %v956_v46 = vadd.f32 %v955_v44, %v954_v39  ;;  %v957_v47 = vpop.f32.mrb[10].mxu1  ;;  %v894_v48 = vpop.f32.mrb[11].mxu0 }
 0x10a   :  { %747 = vst.msk [vmem:[%s1370_s3 + $0x8] sm:$0xf] %vm744_vm0, %v848_v41  ;;  %v849_v49 = vpack.c.bf16 %v667_v42, %v667_v42  ;;  %v521_v50 = vadd.f32 %v892_v43, %v1285_v2  ;;  %v895_v51 = vadd.f32 %v894_v48, %v893_v45  ;;  %v958_v52 = vpop.f32.mrb[11].mxu1 }
 0x10b   :  { %v959_v53 = vadd.f32 %v958_v52, %v957_v47 }
 0x10c   :  { %748 = vst.msk [vmem:[%s1370_s3 + $0xc] sm:$0xf] %vm744_vm0, %v849_v49  ;;  %v618_v54 = vadd.f32 %v956_v46, %v521_v50  ;;  %v524_v55 = vadd.f32 %v895_v51, %v1285_v2 }
 0x10e   :  { %v668_v56 = vmax.f32 %v618_v54, 0.0  ;;  %v621_v57 = vadd.f32 %v959_v53, %v524_v55  ;;  %v896_v58 = vpop.f32.mrb[12].mxu0 }
 0x10f   :  { %v960_v59 = vpop.f32.mrb[12].mxu1  ;;  %v897_v60 = vpop.f32.mrb[13].mxu0 }
 0x110   :  { %v850_v61 = vpack.c.bf16 %v668_v56, %v668_v56  ;;  %v669_v62 = vmax.f32 %v621_v57, 0.0  ;;  %v898_v63 = vadd.f32 %v897_v60, %v896_v58  ;;  %v961_v0 = vpop.f32.mrb[13].mxu1  ;;  %v899_v1 = vpop.f32.mrb[14].mxu0 }
 0x111   :  { %v962_v3 = vadd.f32 %v961_v0, %v960_v59  ;;  %v963_v4 = vpop.f32.mrb[14].mxu1  ;;  %v900_v5 = vpop.f32.mrb[15].mxu0 }
 0x112   :  { %749 = vst.msk [vmem:[%s1370_s3 + $0x10] sm:$0xf] %vm744_vm0, %v850_v61  ;;  %v851_v6 = vpack.c.bf16 %v669_v62, %v669_v62  ;;  %v529_v7 = vadd.f32 %v898_v63, %v1285_v2  ;;  %v901_v8 = vadd.f32 %v900_v5, %v899_v1  ;;  %v964_v9 = vpop.f32.mrb[15].mxu1 }
 0x113   :  { %v965_v10 = vadd.f32 %v964_v9, %v963_v4 }
 0x114   :  { %750 = vst.msk [vmem:[%s1370_s3 + $0x14] sm:$0xf] %vm744_vm0, %v851_v6  ;;  %v626_v11 = vadd.f32 %v962_v3, %v529_v7  ;;  %v532_v12 = vadd.f32 %v901_v8, %v1285_v2 }
 0x116   :  { %v670_v13 = vmax.f32 %v626_v11, 0.0  ;;  %v629_v14 = vadd.f32 %v965_v10, %v532_v12  ;;  %v902_v15 = vpop.f32.mrb[16].mxu0 }
 0x117   :  { %v966_v16 = vpop.f32.mrb[16].mxu1  ;;  %v903_v17 = vpop.f32.mrb[17].mxu0 }
 0x118   :  { %v852_v18 = vpack.c.bf16 %v670_v13, %v670_v13  ;;  %v671_v19 = vmax.f32 %v629_v14, 0.0  ;;  %v904_v20 = vadd.f32 %v903_v17, %v902_v15  ;;  %v967_v21 = vpop.f32.mrb[17].mxu1  ;;  %v905_v22 = vpop.f32.mrb[18].mxu0 }
 0x119   :  { %v968_v23 = vadd.f32 %v967_v21, %v966_v16  ;;  %v969_v24 = vpop.f32.mrb[18].mxu1  ;;  %v906_v25 = vpop.f32.mrb[19].mxu0 }
 0x11a   :  { %751 = vst.msk [vmem:[%s1370_s3 + $0x18] sm:$0xf] %vm744_vm0, %v852_v18  ;;  %v853_v26 = vpack.c.bf16 %v671_v19, %v671_v19  ;;  %v537_v27 = vadd.f32 %v904_v20, %v1285_v2  ;;  %v907_v28 = vadd.f32 %v906_v25, %v905_v22  ;;  %v970_v29 = vpop.f32.mrb[19].mxu1 }
 0x11b   :  { %v971_v30 = vadd.f32 %v970_v29, %v969_v24 }
 0x11c   :  { %752 = vst.msk [vmem:[%s1370_s3 + $0x1c] sm:$0xf] %vm744_vm0, %v853_v26  ;;  %v634_v31 = vadd.f32 %v968_v23, %v537_v27  ;;  %v540_v32 = vadd.f32 %v907_v28, %v1285_v2 }
 0x11e   :  { %v672_v33 = vmax.f32 %v634_v31, 0.0  ;;  %v637_v34 = vadd.f32 %v971_v30, %v540_v32  ;;  %v908_v35 = vpop.f32.mrb[20].mxu0 }
 0x11f   :  { %v972_v36 = vpop.f32.mrb[20].mxu1  ;;  %v909_v37 = vpop.f32.mrb[21].mxu0 }
 0x120   :  { %v854_v38 = vpack.c.bf16 %v672_v33, %v672_v33  ;;  %v673_v39 = vmax.f32 %v637_v34, 0.0  ;;  %v910_v40 = vadd.f32 %v909_v37, %v908_v35  ;;  %v973_v41 = vpop.f32.mrb[21].mxu1  ;;  %v911_v42 = vpop.f32.mrb[22].mxu0 }
 0x121   :  { %v974_v43 = vadd.f32 %v973_v41, %v972_v36  ;;  %v975_v44 = vpop.f32.mrb[22].mxu1  ;;  %v912_v45 = vpop.f32.mrb[23].mxu0 }
 0x122   :  { %753 = vst.msk [vmem:[%s1370_s3 + $0x20] sm:$0xf] %vm744_vm0, %v854_v38  ;;  %v855_v46 = vpack.c.bf16 %v673_v39, %v673_v39  ;;  %v545_v47 = vadd.f32 %v910_v40, %v1285_v2  ;;  %v913_v48 = vadd.f32 %v912_v45, %v911_v42  ;;  %v976_v49 = vpop.f32.mrb[23].mxu1 }
 0x123   :  { %v977_v50 = vadd.f32 %v976_v49, %v975_v44 }
 0x124   :  { %754 = vst.msk [vmem:[%s1370_s3 + $0x24] sm:$0xf] %vm744_vm0, %v855_v46  ;;  %v642_v51 = vadd.f32 %v974_v43, %v545_v47  ;;  %v548_v52 = vadd.f32 %v913_v48, %v1285_v2 }
 0x126   :  { %v674_v53 = vmax.f32 %v642_v51, 0.0  ;;  %v645_v54 = vadd.f32 %v977_v50, %v548_v52  ;;  %v914_v55 = vpop.f32.mrb[24].mxu0 }
 0x127   :  { %v978_v56 = vpop.f32.mrb[24].mxu1  ;;  %v915_v57 = vpop.f32.mrb[25].mxu0 }
 0x128   :  { %v856_v58 = vpack.c.bf16 %v674_v53, %v674_v53  ;;  %v675_v59 = vmax.f32 %v645_v54, 0.0  ;;  %v916_v60 = vadd.f32 %v915_v57, %v914_v55  ;;  %v979_v61 = vpop.f32.mrb[25].mxu1  ;;  %v917_v62 = vpop.f32.mrb[26].mxu0 }
 0x129   :  { %v980_v63 = vadd.f32 %v979_v61, %v978_v56  ;;  %v981_v0 = vpop.f32.mrb[26].mxu1  ;;  %v918_v1 = vpop.f32.mrb[27].mxu0 }
 0x12a   :  { %755 = vst.msk [vmem:[%s1370_s3 + $0x28] sm:$0xf] %vm744_vm0, %v856_v58  ;;  %v857_v3 = vpack.c.bf16 %v675_v59, %v675_v59  ;;  %v553_v4 = vadd.f32 %v916_v60, %v1285_v2  ;;  %v919_v5 = vadd.f32 %v918_v1, %v917_v62  ;;  %v982_v6 = vpop.f32.mrb[27].mxu1 }
 0x12b   :  { %v983_v7 = vadd.f32 %v982_v6, %v981_v0 }
 0x12c   :  { %756 = vst.msk [vmem:[%s1370_s3 + $0x2c] sm:$0xf] %vm744_vm0, %v857_v3  ;;  %v650_v8 = vadd.f32 %v980_v63, %v553_v4  ;;  %v556_v9 = vadd.f32 %v919_v5, %v1285_v2 }
 0x12e   :  { %v676_v10 = vmax.f32 %v650_v8, 0.0  ;;  %v653_v11 = vadd.f32 %v983_v7, %v556_v9  ;;  %v920_v12 = vpop.f32.mrb[28].mxu0 }
 0x12f   :  { %v984_v13 = vpop.f32.mrb[28].mxu1  ;;  %v921_v14 = vpop.f32.mrb[29].mxu0 }
 0x130   :  { %v858_v15 = vpack.c.bf16 %v676_v10, %v676_v10  ;;  %v677_v16 = vmax.f32 %v653_v11, 0.0  ;;  %v922_v17 = vadd.f32 %v921_v14, %v920_v12  ;;  %v985_v18 = vpop.f32.mrb[29].mxu1  ;;  %v923_v19 = vpop.f32.mrb[30].mxu0 }
 0x131   :  { %v986_v20 = vadd.f32 %v985_v18, %v984_v13  ;;  %v987_v21 = vpop.f32.mrb[30].mxu1  ;;  %v924_v22 = vpop.f32.mrb[31].mxu0 }
 0x132   :  { %757 = vst.msk [vmem:[%s1370_s3 + $0x30] sm:$0xf] %vm744_vm0, %v858_v15  ;;  %v859_v23 = vpack.c.bf16 %v677_v16, %v677_v16  ;;  %v561_v24 = vadd.f32 %v922_v17, %v1285_v2  ;;  %v925_v25 = vadd.f32 %v924_v22, %v923_v19  ;;  %v988_v26 = vpop.f32.mrb[31].mxu1 }
 0x133   :  { %v989_v27 = vadd.f32 %v988_v26, %v987_v21 }
 0x134   :  { %758 = vst.msk [vmem:[%s1370_s3 + $0x34] sm:$0xf] %vm744_vm0, %v859_v23  ;;  %v658_v28 = vadd.f32 %v986_v20, %v561_v24  ;;  %v564_v29 = vadd.f32 %v925_v25, %v1285_v2 }
 0x136   :  { %v678_v30 = vmax.f32 %v658_v28, 0.0  ;;  %v661_v31 = vadd.f32 %v989_v27, %v564_v29 }
 0x138   :  { %v860_v32 = vpack.c.bf16 %v678_v30, %v678_v30  ;;  %v679_v33 = vmax.f32 %v661_v31, 0.0 }
 0x13a   :  { %759 = vst.msk [vmem:[%s1370_s3 + $0x38] sm:$0xf] %vm744_vm0, %v860_v32  ;;  %v861_v34 = vpack.c.bf16 %v679_v33, %v679_v33 }
 0x13c   :  { %760 = vst.msk [vmem:[%s1370_s3 + $0x3c] sm:$0xf] %vm744_vm0, %v861_v34 }

// kernel: conv_vae_forward.11
= control target key start
LH: loop header
LB: loop body
LE: loop exit
PB: predicated region body
PF: predicated region fallthrough
CT: control target
= control target key end

     0   :  { %s1399_s1 = inlined_call_operand.vmem [shape: bf16[1024,128], index: 1, kind: input, shape index: {}]   ;;  %s1400_s0 = inlined_call_operand.vmem [shape: bf16[32,1024], index: 0, kind: input, shape index: {}]   ;;  %s1401_s2 = inlined_call_operand.vmem [shape: f32[1,128], index: 2, kind: input, shape index: {}]   ;;  %s1402_s3 = inlined_call_operand.vmem [shape: bf16[32,128], index: 3, kind: output, shape index: {}]  }
   0x1   :  { %v1066_v0 = vld [vmem:[%s1399_s1 + $0x40] sm:$0xff]   ;;  %v1070_v4 = vld [vmem:[%s1399_s1 + $0x48] sm:$0xff]   ;;  %v1074_v8 = vld [vmem:[%s1399_s1 + $0x50] sm:$0xff]  }
   0x2   :  { %v1067_v1 = vld [vmem:[%s1399_s1 + $0xc0] sm:$0xff]   ;;  %954 = vmatprep.subr.bf16.mxu0 %v1066_v0  ;;  %v1071_v5 = vld [vmem:[%s1399_s1 + $0xc8] sm:$0xff]   ;;  %v1075_v9 = vld [vmem:[%s1399_s1 + $0xd0] sm:$0xff]  }
   0x3   :  { %v1068_v2 = vld [vmem:[%s1399_s1] sm:$0xff]   ;;  %982 = vmatprep.subr.bf16.mxu1 %v1067_v1  ;;  %v1072_v6 = vld [vmem:[%s1399_s1 + $0x8] sm:$0xff]   ;;  %v1076_v10 = vld [vmem:[%s1399_s1 + $0x10] sm:$0xff]  }
   0x4   :  { %v1069_v3 = vld [vmem:[%s1399_s1 + $0x80] sm:$0xff]   ;;  %955 = vmatpush3.bf16.msra.mxu0 %v1068_v2  ;;  %v1073_v7 = vld [vmem:[%s1399_s1 + $0x88] sm:$0xff]   ;;  %v1077_v11 = vld [vmem:[%s1399_s1 + $0x90] sm:$0xff]  }
   0x5   :  { %983 = vmatpush3.bf16.msra.mxu1 %v1069_v3  ;;  %956 = vmatprep.subr.bf16.mxu0 %v1070_v4  ;;  %v1078_v12 = vld [vmem:[%s1399_s1 + $0x58] sm:$0xff]   ;;  %v1082_v16 = vld [vmem:[%s1399_s1 + $0x60] sm:$0xff]   ;;  %v1086_v20 = vld [vmem:[%s1399_s1 + $0x68] sm:$0xff]  }
   0x6   :  { %984 = vmatprep.subr.bf16.mxu1 %v1071_v5  ;;  %v1079_v13 = vld [vmem:[%s1399_s1 + $0xd8] sm:$0xff]   ;;  %v1083_v17 = vld [vmem:[%s1399_s1 + $0xe0] sm:$0xff]   ;;  %v1087_v21 = vld [vmem:[%s1399_s1 + $0xe8] sm:$0xff]  }
   0x7   :  { %v1080_v14 = vld [vmem:[%s1399_s1 + $0x18] sm:$0xff]   ;;  %v1084_v18 = vld [vmem:[%s1399_s1 + $0x20] sm:$0xff]   ;;  %v1088_v22 = vld [vmem:[%s1399_s1 + $0x28] sm:$0xff]  }
   0x8   :  { %957 = vmatpush3.bf16.msra.mxu0 %v1072_v6  ;;  %v1081_v15 = vld [vmem:[%s1399_s1 + $0x98] sm:$0xff]   ;;  %v1085_v19 = vld [vmem:[%s1399_s1 + $0xa0] sm:$0xff]   ;;  %v1089_v23 = vld [vmem:[%s1399_s1 + $0xa8] sm:$0xff]  }
   0x9   :  { %985 = vmatpush3.bf16.msra.mxu1 %v1073_v7  ;;  %958 = vmatprep.subr.bf16.mxu0 %v1074_v8  ;;  %v1090_v24 = vld [vmem:[%s1399_s1 + $0x70] sm:$0xff]   ;;  %v1094_v28 = vld [vmem:[%s1399_s1 + $0x78] sm:$0xff]   ;;  %v15_v32 = vld [vmem:[%s1400_s0] sm:$0xff] }
   0xa   :  { %986 = vmatprep.subr.bf16.mxu1 %v1075_v9  ;;  %v1091_v25 = vld [vmem:[%s1399_s1 + $0xf0] sm:$0xff]   ;;  %v1095_v29 = vld [vmem:[%s1399_s1 + $0xf8] sm:$0xff]   ;;  %v19_v33 = vld [vmem:[%s1400_s0 + $0x20] sm:$0xff] }
   0xb   :  { %v1092_v26 = vld [vmem:[%s1399_s1 + $0x30] sm:$0xff]   ;;  %v1096_v30 = vld [vmem:[%s1399_s1 + $0x38] sm:$0xff]   ;;  %v16_v34 = vld [vmem:[%s1400_s0 + $0x8] sm:$0xff]  ;;  %v855_v35 = vcombine.low %v15_v32, %v19_v33  ;;  %v856_v36 = vcombine.high %v15_v32, %v19_v33 }
   0xc   :  { %959 = vmatpush3.bf16.msra.mxu0 %v1076_v10  ;;  %v1093_v27 = vld [vmem:[%s1399_s1 + $0xb0] sm:$0xff]   ;;  %v1097_v31 = vld [vmem:[%s1399_s1 + $0xb8] sm:$0xff]   ;;  %v20_v37 = vld [vmem:[%s1400_s0 + $0x28] sm:$0xff] }
   0xd   :  { %987 = vmatpush3.bf16.msra.mxu1 %v1077_v11  ;;  %960 = vmatprep.subr.bf16.mxu0 %v1078_v12  ;;  %v857_v38 = vcombine.low %v16_v34, %v20_v37  ;;  %v858_v39 = vcombine.high %v16_v34, %v20_v37  ;;  %v1098_v40 = vld [vmem:[%s1399_s1 + $0x140] sm:$0xff]   ;;  %v1102_v44 = vld [vmem:[%s1399_s1 + $0x148] sm:$0xff]   ;;  %v1106_v48 = vld [vmem:[%s1399_s1 + $0x150] sm:$0xff]  }
   0xe   :  { %988 = vmatprep.subr.bf16.mxu1 %v1079_v13  ;;  %662 = vmatprep.mubr.bf16.mxu0 %v856_v36  ;;  %v1099_v41 = vld [vmem:[%s1399_s1 + $0x1c0] sm:$0xff]   ;;  %v1103_v45 = vld [vmem:[%s1399_s1 + $0x1c8] sm:$0xff]   ;;  %v1107_v49 = vld [vmem:[%s1399_s1 + $0x1d0] sm:$0xff]  }
   0xf   :  { %711 = vmatprep.mubr.bf16.mxu1 %v858_v39  ;;  %v1100_v42 = vld [vmem:[%s1399_s1 + $0x100] sm:$0xff]   ;;  %v1104_v46 = vld [vmem:[%s1399_s1 + $0x108] sm:$0xff]   ;;  %v1108_v50 = vld [vmem:[%s1399_s1 + $0x110] sm:$0xff]  }
  0x10   :  { %961 = vmatpush3.bf16.msra.mxu0 %v1080_v14  ;;  %v1101_v43 = vld [vmem:[%s1399_s1 + $0x180] sm:$0xff]   ;;  %v1105_v47 = vld [vmem:[%s1399_s1 + $0x188] sm:$0xff]   ;;  %v1109_v51 = vld [vmem:[%s1399_s1 + $0x190] sm:$0xff]  }
  0x11   :  { %989 = vmatpush3.bf16.msra.mxu1 %v1081_v15  ;;  %962 = vmatprep.subr.bf16.mxu0 %v1082_v16  ;;  %v1110_v52 = vld [vmem:[%s1399_s1 + $0x158] sm:$0xff]   ;;  %v1114_v56 = vld [vmem:[%s1399_s1 + $0x160] sm:$0xff]   ;;  %v1118_v63 = vld [vmem:[%s1399_s1 + $0x168] sm:$0xff]  }
  0x12   :  { %990 = vmatprep.subr.bf16.mxu1 %v1083_v17  ;;  %v1111_v53 = vld [vmem:[%s1399_s1 + $0x1d8] sm:$0xff]   ;;  %v1115_v57 = vld [vmem:[%s1399_s1 + $0x1e0] sm:$0xff]   ;;  %v1119_v1 = vld [vmem:[%s1399_s1 + $0x1e8] sm:$0xff]  }
  0x13   :  { %v1112_v54 = vld [vmem:[%s1399_s1 + $0x118] sm:$0xff]   ;;  %v1116_v58 = vld [vmem:[%s1399_s1 + $0x120] sm:$0xff]   ;;  %v1120_v2 = vld [vmem:[%s1399_s1 + $0x128] sm:$0xff]  }
  0x14   :  { %963 = vmatpush3.bf16.msra.mxu0 %v1084_v18  ;;  %v1113_v55 = vld [vmem:[%s1399_s1 + $0x198] sm:$0xff]   ;;  %v1117_v59 = vld [vmem:[%s1399_s1 + $0x1a0] sm:$0xff]   ;;  %v1121_v3 = vld [vmem:[%s1399_s1 + $0x1a8] sm:$0xff]  }
  0x15   :  { %991 = vmatpush3.bf16.msra.mxu1 %v1085_v19  ;;  %964 = vmatprep.subr.bf16.mxu0 %v1086_v20  ;;  %v23_v60 = vld [vmem:[%s1400_s0 + $0x40] sm:$0xff]  ;;  %v24_v4 = vld [vmem:[%s1400_s0 + $0x48] sm:$0xff]  ;;  %v1122_v8 = vld [vmem:[%s1399_s1 + $0x170] sm:$0xff]  }
  0x16   :  { %992 = vmatprep.subr.bf16.mxu1 %v1087_v21  ;;  %v27_v61 = vld [vmem:[%s1400_s0 + $0x60] sm:$0xff]  ;;  %v28_v5 = vld [vmem:[%s1400_s0 + $0x68] sm:$0xff]  ;;  %v1123_v9 = vld [vmem:[%s1399_s1 + $0x1f0] sm:$0xff]  }
  0x17   :  { %v864_v62 = vcombine.high %v23_v60, %v27_v61  ;;  %v863_v0 = vcombine.low %v23_v60, %v27_v61  ;;  %v866_v6 = vcombine.high %v24_v4, %v28_v5  ;;  %v865_v7 = vcombine.low %v24_v4, %v28_v5  ;;  %v1124_v10 = vld [vmem:[%s1399_s1 + $0x130] sm:$0xff]   ;;  %v1126_v12 = vld [vmem:[%s1399_s1 + $0x178] sm:$0xff]   ;;  %v854_v34 = vld [vmem:[%s1401_s2] ss:$0 sm:$0xff] }
  0x18   :  { %965 = vmatpush3.bf16.msra.mxu0 %v1088_v22  ;;  %v1125_v11 = vld [vmem:[%s1399_s1 + $0x1b0] sm:$0xff]   ;;  %v1127_v13 = vld [vmem:[%s1399_s1 + $0x1f8] sm:$0xff]  }
  0x19   :  { %993 = vmatpush3.bf16.msra.mxu1 %v1089_v23  ;;  %966 = vmatprep.subr.bf16.mxu0 %v1090_v24  ;;  %v1128_v14 = vld [vmem:[%s1399_s1 + $0x138] sm:$0xff]   ;;  %v17_v16 = vld [vmem:[%s1400_s0 + $0x10] sm:$0xff] }
  0x1a   :  { %994 = vmatprep.subr.bf16.mxu1 %v1091_v25  ;;  %v1129_v15 = vld [vmem:[%s1399_s1 + $0x1b8] sm:$0xff]   ;;  %v21_v17 = vld [vmem:[%s1400_s0 + $0x30] sm:$0xff] }
  0x1b   :  { %v18_v18 = vld [vmem:[%s1400_s0 + $0x18] sm:$0xff]  ;;  %v859_v20 = vcombine.low %v17_v16, %v21_v17  ;;  %v860_v21 = vcombine.high %v17_v16, %v21_v17  ;;  %v25_v24 = vld [vmem:[%s1400_s0 + $0x50] sm:$0xff] }
  0x1c   :  { %967 = vmatpush3.bf16.msra.mxu0 %v1092_v26  ;;  %v22_v19 = vld [vmem:[%s1400_s0 + $0x38] sm:$0xff]  ;;  %v29_v25 = vld [vmem:[%s1400_s0 + $0x70] sm:$0xff] }
  0x1d   :  { %995 = vmatpush3.bf16.msra.mxu1 %v1093_v27  ;;  %968 = vmatprep.subr.bf16.mxu0 %v1094_v28  ;;  %v861_v22 = vcombine.low %v18_v18, %v22_v19  ;;  %v862_v23 = vcombine.high %v18_v18, %v22_v19  ;;  %v26_v26 = vld [vmem:[%s1400_s0 + $0x58] sm:$0xff]  ;;  %v868_v27 = vcombine.high %v25_v24, %v29_v25 }
  0x1e   :  { %996 = vmatprep.subr.bf16.mxu1 %v1095_v29  ;;  %v30_v28 = vld [vmem:[%s1400_s0 + $0x78] sm:$0xff] }
  0x1f   :  { %v870_v29 = vcombine.high %v26_v26, %v30_v28 }
  0x20   :  { %969 = vmatpush3.bf16.msra.mxu0 %v1096_v30  ;;  %v867_v30 = vcombine.low %v25_v24, %v29_v25 }
  0x21   :  { %997 = vmatpush3.bf16.msra.mxu1 %v1097_v31  ;;  %1010 = vmatprep.subr.bf16.mxu0 %v1098_v40  ;;  %v869_v31 = vcombine.low %v26_v26, %v30_v28 }
  0x22   :  { %1038 = vmatprep.subr.bf16.mxu1 %v1099_v41 }
  0x23   :  { %663 = vmatmul.mubr.bf16.vlgmr.msra.gmra.mrb[0].mxu0 %v855_v35 }
  0x24   :  { %712 = vmatmul.mubr.bf16.vlgmr.msra.gmra.mrb[0].mxu1 %v857_v38  ;;  %1011 = vmatpush3.bf16.msra.mxu0 %v1100_v42 }
  0x25   :  { %1039 = vmatpush3.bf16.msra.mxu1 %v1101_v43  ;;  %1012 = vmatprep.subr.bf16.mxu0 %v1102_v44 }
  0x26   :  { %1040 = vmatprep.subr.bf16.mxu1 %v1103_v45  ;;  %670 = vmatprep.mubr.bf16.mxu0 %v864_v62 }
  0x27   :  { %719 = vmatprep.mubr.bf16.mxu1 %v866_v6 }
  0x28   :  { %1013 = vmatpush3.bf16.msra.mxu0 %v1104_v46 }
  0x29   :  { %1041 = vmatpush3.bf16.msra.mxu1 %v1105_v47  ;;  %1014 = vmatprep.subr.bf16.mxu0 %v1106_v48 }
  0x2a   :  { %1042 = vmatprep.subr.bf16.mxu1 %v1107_v49 }
  0x2b   :  { %671 = vmatmul.mubr.bf16.gmra.mrb[4].mxu0 %v863_v0 }
  0x2c   :  { %1015 = vmatpush3.bf16.msra.mxu0 %v1108_v50  ;;  %720 = vmatmul.mubr.bf16.gmra.mrb[4].mxu1 %v865_v7 }
  0x2d   :  { %1043 = vmatpush3.bf16.msra.mxu1 %v1109_v51  ;;  %1016 = vmatprep.subr.bf16.mxu0 %v1110_v52 }
  0x2e   :  { %1044 = vmatprep.subr.bf16.mxu1 %v1111_v53  ;;  %760 = vmatprep.mubr.bf16.mxu0 %v860_v21 }
  0x2f   :  { %809 = vmatprep.mubr.bf16.mxu1 %v862_v23 }
  0x30   :  { %1017 = vmatpush3.bf16.msra.mxu0 %v1112_v54 }
  0x31   :  { %1045 = vmatpush3.bf16.msra.mxu1 %v1113_v55  ;;  %1018 = vmatprep.subr.bf16.mxu0 %v1114_v56 }
  0x32   :  { %1046 = vmatprep.subr.bf16.mxu1 %v1115_v57 }
  0x34   :  { %1019 = vmatpush3.bf16.msra.mxu0 %v1116_v58 }
  0x35   :  { %1047 = vmatpush3.bf16.msra.mxu1 %v1117_v59  ;;  %1020 = vmatprep.subr.bf16.mxu0 %v1118_v63 }
  0x36   :  { %1048 = vmatprep.subr.bf16.mxu1 %v1119_v1 }
  0x38   :  { %1021 = vmatpush3.bf16.msra.mxu0 %v1120_v2 }
  0x39   :  { %1049 = vmatpush3.bf16.msra.mxu1 %v1121_v3  ;;  %1022 = vmatprep.subr.bf16.mxu0 %v1122_v8 }
  0x3a   :  { %1050 = vmatprep.subr.bf16.mxu1 %v1123_v9 }
  0x3c   :  { %1023 = vmatpush3.bf16.msra.mxu0 %v1124_v10 }
  0x3d   :  { %1051 = vmatpush3.bf16.msra.mxu1 %v1125_v11  ;;  %1024 = vmatprep.subr.bf16.mxu0 %v1126_v12 }
  0x3e   :  { %1052 = vmatprep.subr.bf16.mxu1 %v1127_v13 }
  0x40   :  { %1025 = vmatpush3.bf16.msra.mxu0 %v1128_v14 }
  0x41   :  { %1053 = vmatpush3.bf16.msra.mxu1 %v1129_v15 }
  0x43   :  { %761 = vmatmul.mubr.bf16.vlgmr.msra.gmra.mrb[8].mxu0 %v859_v20 }
  0x44   :  { %810 = vmatmul.mubr.bf16.vlgmr.msra.gmra.mrb[8].mxu1 %v861_v22  ;;  %768 = vmatprep.mubr.bf16.mxu0 %v868_v27 }
  0x45   :  { %817 = vmatprep.mubr.bf16.mxu1 %v870_v29 }
  0x4b   :  { %769 = vmatmul.mubr.bf16.gmra.mrb[12].mxu0 %v867_v30 }
  0x4c   :  { %818 = vmatmul.mubr.bf16.gmra.mrb[12].mxu1 %v869_v31 }
  0xf6   :  { %v970_v32 = vpop.f32.mrb[0].mxu0 }
  0xf7   :  { %v998_v33 = vpop.f32.mrb[0].mxu1  ;;  %v971_v35 = vpop.f32.mrb[1].mxu0 }
  0xf8   :  { %v972_v36 = vadd.f32 %v971_v35, %v970_v32  ;;  %v999_v37 = vpop.f32.mrb[1].mxu1  ;;  %v973_v38 = vpop.f32.mrb[2].mxu0 }
  0xf9   :  { %v1000_v39 = vadd.f32 %v999_v37, %v998_v33  ;;  %v1001_v40 = vpop.f32.mrb[2].mxu1  ;;  %v974_v41 = vpop.f32.mrb[3].mxu0 }
  0xfa   :  { %v665_v42 = vadd.f32 %v972_v36, %v854_v34  ;;  %v975_v43 = vadd.f32 %v974_v41, %v973_v38  ;;  %v1002_v44 = vpop.f32.mrb[3].mxu1 }
  0xfb   :  { %v1003_v45 = vadd.f32 %v1002_v44, %v1001_v40 }
  0xfc   :  { %v714_v46 = vadd.f32 %v1000_v39, %v665_v42  ;;  %v668_v47 = vadd.f32 %v975_v43, %v854_v34 }
  0xfe   :  { %v717_v48 = vadd.f32 %v1003_v45, %v668_v47  ;;  %v976_v49 = vpop.f32.mrb[4].mxu0 }
  0xff   :  { %v977_v50 = vpop.f32.mrb[5].mxu0  ;;  %v1004_v56 = vpop.f32.mrb[4].mxu1 }
 0x100   :  { %v978_v51 = vadd.f32 %v977_v50, %v976_v49  ;;  %v979_v52 = vpop.f32.mrb[6].mxu0  ;;  %v1005_v57 = vpop.f32.mrb[5].mxu1 }
 0x101   :  { %v980_v53 = vpop.f32.mrb[7].mxu0  ;;  %v1006_v59 = vadd.f32 %v1005_v57, %v1004_v56  ;;  %v1007_v60 = vpop.f32.mrb[6].mxu1 }
 0x102   :  { %v981_v54 = vadd.f32 %v980_v53, %v979_v52  ;;  %v673_v55 = vadd.f32 %v978_v51, %v854_v34  ;;  %v1008_v61 = vpop.f32.mrb[7].mxu1 }
 0x103   :  { %v1009_v63 = vadd.f32 %v1008_v61, %v1007_v60 }
 0x104   :  { %v676_v58 = vadd.f32 %v981_v54, %v854_v34  ;;  %v722_v62 = vadd.f32 %v1006_v59, %v673_v55 }
 0x106   :  { %v725_v0 = vadd.f32 %v1009_v63, %v676_v58 }
 0x116   :  { %v1026_v1 = vpop.f32.mrb[8].mxu0 }
 0x117   :  { %v1054_v2 = vpop.f32.mrb[8].mxu1  ;;  %v1027_v3 = vpop.f32.mrb[9].mxu0 }
 0x118   :  { %v1055_v4 = vpop.f32.mrb[9].mxu1  ;;  %v1028_v5 = vadd.f32 %v1027_v3, %v1026_v1  ;;  %v1029_v7 = vpop.f32.mrb[10].mxu0 }
 0x119   :  { %v1056_v6 = vadd.f32 %v1055_v4, %v1054_v2  ;;  %v1057_v8 = vpop.f32.mrb[10].mxu1  ;;  %v1030_v9 = vpop.f32.mrb[11].mxu0 }
 0x11a   :  { %v1058_v10 = vpop.f32.mrb[11].mxu1  ;;  %v763_v11 = vadd.f32 %v1028_v5, %v714_v46  ;;  %v1031_v12 = vadd.f32 %v1030_v9, %v1029_v7 }
 0x11b   :  { %v1059_v13 = vadd.f32 %v1058_v10, %v1057_v8 }
 0x11c   :  { %v812_v14 = vadd.f32 %v1056_v6, %v763_v11  ;;  %v766_v15 = vadd.f32 %v1031_v12, %v717_v48 }
 0x11e   :  { %v815_v16 = vadd.f32 %v1059_v13, %v766_v15  ;;  %v1032_v17 = vpop.f32.mrb[12].mxu0  ;;  %v826_v21 = vmax.f32 %v812_v14, 0.0 }
 0x11f   :  { %v1060_v18 = vpop.f32.mrb[12].mxu1  ;;  %v1033_v19 = vpop.f32.mrb[13].mxu0 }
 0x120   :  { %v1061_v20 = vpop.f32.mrb[13].mxu1  ;;  %v827_v22 = vmax.f32 %v815_v16, 0.0  ;;  %v1034_v23 = vadd.f32 %v1033_v19, %v1032_v17  ;;  %v1035_v25 = vpop.f32.mrb[14].mxu0 }
 0x121   :  { %v1062_v24 = vadd.f32 %v1061_v20, %v1060_v18  ;;  %v1063_v26 = vpop.f32.mrb[14].mxu1  ;;  %v1036_v27 = vpop.f32.mrb[15].mxu0 }
 0x122   :  { %v1064_v28 = vpop.f32.mrb[15].mxu1  ;;  %v946_v29 = vpack.c.bf16 %v827_v22, %v826_v21  ;;  %v771_v30 = vadd.f32 %v1034_v23, %v722_v62  ;;  %v1037_v31 = vadd.f32 %v1036_v27, %v1035_v25 }
 0x123   :  { %v1065_v32 = vadd.f32 %v1064_v28, %v1063_v26 }
 0x124   :  { %947 = vst [vmem:[%s1402_s3] sm:$0xff] %v946_v29   ;;  %v820_v33 = vadd.f32 %v1062_v24, %v771_v30  ;;  %v774_v34 = vadd.f32 %v1037_v31, %v725_v0 }
 0x126   :  { %v823_v35 = vadd.f32 %v1065_v32, %v774_v34  ;;  %v828_v36 = vmax.f32 %v820_v33, 0.0 }
 0x128   :  { %v829_v37 = vmax.f32 %v823_v35, 0.0 }
 0x12a   :  { %v951_v38 = vpack.c.bf16 %v829_v37, %v828_v36 }
 0x12c   :  { %953 = vst [vmem:[%s1402_s3 + $0x8] sm:$0xff] %v951_v38  }

// kernel: conv_vae_forward.13
= control target key start
LH: loop header
LB: loop body
LE: loop exit
PB: predicated region body
PF: predicated region fallthrough
CT: control target
= control target key end

     0   :  { %s2893_s1 = inlined_call_operand.vmem [shape: bf16[1024,256], index: 1, kind: input, shape index: {}]   ;;  %s2894_s0 = inlined_call_operand.vmem [shape: bf16[16,1024], index: 0, kind: input, shape index: {}]   ;;  %s2895_s4 = inlined_call_operand.vmem [shape: bf16[128,1024], index: 4, kind: input, shape index: {}]   ;;  %s2896_s2 = inlined_call_operand.vmem [shape: f32[1,256], index: 2, kind: input, shape index: {}]   ;;  %s2897_s6 = inlined_call_operand.vmem [shape: f32[16,128], index: 6, kind: output, shape index: {0}]   ;;  %s2898_s7 = inlined_call_operand.vmem [shape: f32[16,128], index: 7, kind: output, shape index: {1}]   ;;  %s2899_s3 = inlined_call_operand.vmem [shape: f32[16,128], index: 3, kind: input, shape index: {}]   ;;  %s2900_s5 = inlined_call_operand.vmem [shape: f32[1,1024], index: 5, kind: input, shape index: {}]   ;;  %s2901_s8 = inlined_call_operand.vmem [shape: bf16[16,1024], index: 8, kind: output, shape index: {2}]  }
   0x1   :  { %v1943_v0 = vld [vmem:[%s2893_s1 + $0x104] ss:$8 sps:$4 sm:$0xff]   ;;  %v1945_v1 = vld [vmem:[%s2893_s1 + $0x100] ss:$8 sps:$4 sm:$0xff]   ;;  %v1946_v2 = vld [vmem:[%s2893_s1 + $0x114] ss:$8 sps:$4 sm:$0xff]  }
   0x2   :  { %898 = vmatprep.subr.bf16.mxu0 %v1943_v0  ;;  %v1948_v3 = vld [vmem:[%s2893_s1 + $0x110] ss:$8 sps:$4 sm:$0xff]   ;;  %v1949_v4 = vld [vmem:[%s2893_s1 + $0x124] ss:$8 sps:$4 sm:$0xff]   ;;  %v1951_v5 = vld [vmem:[%s2893_s1 + $0x120] ss:$8 sps:$4 sm:$0xff]  }
   0x3   :  { %899 = vmatpush1.bf16.msra.mxu0 %v1945_v1  ;;  %v1952_v6 = vld [vmem:[%s2893_s1 + $0x134] ss:$8 sps:$4 sm:$0xff]   ;;  %v1954_v7 = vld [vmem:[%s2893_s1 + $0x130] ss:$8 sps:$4 sm:$0xff]   ;;  %v1955_v8 = vld [vmem:[%s2893_s1 + $0x144] ss:$8 sps:$4 sm:$0xff]  }
   0x4   :  { %900 = vmatprep.subr.bf16.mxu0 %v1946_v2  ;;  %v1957_v9 = vld [vmem:[%s2893_s1 + $0x140] ss:$8 sps:$4 sm:$0xff]   ;;  %v1958_v10 = vld [vmem:[%s2893_s1 + $0x154] ss:$8 sps:$4 sm:$0xff]   ;;  %v1960_v11 = vld [vmem:[%s2893_s1 + $0x150] ss:$8 sps:$4 sm:$0xff]  }
   0x5   :  { %v1961_v12 = vld [vmem:[%s2893_s1 + $0x164] ss:$8 sps:$4 sm:$0xff]   ;;  %v1963_v16 = vld [vmem:[%s2893_s1 + $0x160] ss:$8 sps:$4 sm:$0xff]   ;;  %v1964_v17 = vld [vmem:[%s2893_s1 + $0x174] ss:$8 sps:$4 sm:$0xff]  }
   0x6   :  { %v2227_v13 = vld [vmem:[%s2894_s0 + $0x8] sm:$0xff]  ;;  %v1966_v18 = vld [vmem:[%s2893_s1 + $0x170] ss:$8 sps:$4 sm:$0xff]   ;;  %v1970_v21 = vld [vmem:[%s2893_s1 + $0x194] ss:$8 sps:$4 sm:$0xff]  }
   0x7   :  { %901 = vmatpush1.bf16.msra.mxu0 %v1948_v3  ;;  %v2232_v14 = vld [vmem:[%s2894_s0 + $0x28] sm:$0xff]  ;;  %v1972_v22 = vld [vmem:[%s2893_s1 + $0x190] ss:$8 sps:$4 sm:$0xff]   ;;  %v1976_v25 = vld [vmem:[%s2893_s1 + $0x1b4] ss:$8 sps:$4 sm:$0xff]  }
   0x8   :  { %902 = vmatprep.subr.bf16.mxu0 %v1949_v4  ;;  %v1713_v15 = vcombine.high %v2227_v13, %v2232_v14  ;;  %v1967_v19 = vld [vmem:[%s2893_s1 + $0x184] ss:$8 sps:$4 sm:$0xff]   ;;  %v1969_v20 = vld [vmem:[%s2893_s1 + $0x180] ss:$8 sps:$4 sm:$0xff]   ;;  %v1978_v26 = vld [vmem:[%s2893_s1 + $0x1b0] ss:$8 sps:$4 sm:$0xff]   ;;  %v1712_v50 = vcombine.low %v2227_v13, %v2232_v14 }
   0x9   :  { %v1973_v23 = vld [vmem:[%s2893_s1 + $0x1a4] ss:$8 sps:$4 sm:$0xff]   ;;  %v1975_v24 = vld [vmem:[%s2893_s1 + $0x1a0] ss:$8 sps:$4 sm:$0xff]   ;;  %v2042_v30 = vld [vmem:[%s2893_s1 + $0x14] ss:$8 sps:$4 sm:$0xff]  }
   0xa   :  { %930 = vmatprep.mubr.bf16.mxu0 %v1713_v15  ;;  %v2036_v27 = vld [vmem:[%s2893_s1 + $0x4] ss:$8 sps:$4 sm:$0xff]   ;;  %v2038_v28 = vld [vmem:[%s2893_s1] ss:$8 sps:$4 sm:$0xff]   ;;  %v2044_v31 = vld [vmem:[%s2893_s1 + $0x10] ss:$8 sps:$4 sm:$0xff]  }
   0xb   :  { %903 = vmatpush1.bf16.msra.mxu0 %v1951_v5  ;;  %v1979_v29 = vld [vmem:[%s2893_s1 + $0x1c4] ss:$8 sps:$4 sm:$0xff]   ;;  %855 = vmatprep.subr.bf16.mxu1 %v2036_v27  ;;  %v1981_v32 = vld [vmem:[%s2893_s1 + $0x1c0] ss:$8 sps:$4 sm:$0xff]   ;;  %v1982_v33 = vld [vmem:[%s2893_s1 + $0x1d4] ss:$8 sps:$4 sm:$0xff]  }
   0xc   :  { %904 = vmatprep.subr.bf16.mxu0 %v1952_v6  ;;  %856 = vmatpush1.bf16.msra.mxu1 %v2038_v28  ;;  %v2048_v34 = vld [vmem:[%s2893_s1 + $0x24] ss:$8 sps:$4 sm:$0xff]   ;;  %v2050_v35 = vld [vmem:[%s2893_s1 + $0x20] ss:$8 sps:$4 sm:$0xff]   ;;  %v1984_v36 = vld [vmem:[%s2893_s1 + $0x1d0] ss:$8 sps:$4 sm:$0xff]  }
   0xd   :  { %857 = vmatprep.subr.bf16.mxu1 %v2042_v30  ;;  %v2054_v37 = vld [vmem:[%s2893_s1 + $0x34] ss:$8 sps:$4 sm:$0xff]   ;;  %v1985_v38 = vld [vmem:[%s2893_s1 + $0x1e4] ss:$8 sps:$4 sm:$0xff]   ;;  %v2056_v39 = vld [vmem:[%s2893_s1 + $0x30] ss:$8 sps:$4 sm:$0xff]  }
   0xe   :  { %v2060_v40 = vld [vmem:[%s2893_s1 + $0x44] ss:$8 sps:$4 sm:$0xff]   ;;  %v1987_v41 = vld [vmem:[%s2893_s1 + $0x1e0] ss:$8 sps:$4 sm:$0xff]   ;;  %v1988_v42 = vld [vmem:[%s2893_s1 + $0x1f4] ss:$8 sps:$4 sm:$0xff]  }
   0xf   :  { %905 = vmatpush1.bf16.msra.mxu0 %v1954_v7  ;;  %v2062_v43 = vld [vmem:[%s2893_s1 + $0x40] ss:$8 sps:$4 sm:$0xff]   ;;  %v1990_v44 = vld [vmem:[%s2893_s1 + $0x1f0] ss:$8 sps:$4 sm:$0xff]   ;;  %v2066_v45 = vld [vmem:[%s2893_s1 + $0x54] ss:$8 sps:$4 sm:$0xff]  }
  0x10   :  { %906 = vmatprep.subr.bf16.mxu0 %v1955_v8  ;;  %858 = vmatpush1.bf16.msra.mxu1 %v2044_v31  ;;  %v1993_v46 = vld [vmem:[%s2893_s1 + $0x204] ss:$8 sps:$4 sm:$0xff]   ;;  %v2332_v47 = vld [vmem:[%s2894_s0 + $0x10] sm:$0xff]  ;;  %v1991_v52 = vld [vmem:[%s2893_s1 + $0x200] ss:$8 sps:$4 sm:$0xff]  }
  0x11   :  { %859 = vmatprep.subr.bf16.mxu1 %v2048_v34  ;;  %v2337_v48 = vld [vmem:[%s2894_s0 + $0x30] sm:$0xff]  ;;  %v2072_v51 = vld [vmem:[%s2893_s1 + $0x64] ss:$8 sps:$4 sm:$0xff]   ;;  %v2074_v55 = vld [vmem:[%s2893_s1 + $0x60] ss:$8 sps:$4 sm:$0xff]  }
  0x12   :  { %v2068_v49 = vld [vmem:[%s2893_s1 + $0x50] ss:$8 sps:$4 sm:$0xff]   ;;  %v1715_v53 = vcombine.high %v2332_v47, %v2337_v48  ;;  %v1996_v54 = vld [vmem:[%s2893_s1 + $0x214] ss:$8 sps:$4 sm:$0xff]   ;;  %v1999_v58 = vld [vmem:[%s2893_s1 + $0x224] ss:$8 sps:$4 sm:$0xff]  }
  0x13   :  { %907 = vmatpush1.bf16.msra.mxu0 %v1957_v9  ;;  %v2078_v56 = vld [vmem:[%s2893_s1 + $0x74] ss:$8 sps:$4 sm:$0xff]   ;;  %v1994_v57 = vld [vmem:[%s2893_s1 + $0x210] ss:$8 sps:$4 sm:$0xff]   ;;  %v2084_v60 = vld [vmem:[%s2893_s1 + $0x84] ss:$8 sps:$4 sm:$0xff]  }
  0x14   :  { %908 = vmatprep.subr.bf16.mxu0 %v1958_v10  ;;  %860 = vmatpush1.bf16.msra.mxu1 %v2050_v35  ;;  %v2080_v59 = vld [vmem:[%s2893_s1 + $0x70] ss:$8 sps:$4 sm:$0xff]   ;;  %v1997_v61 = vld [vmem:[%s2893_s1 + $0x220] ss:$8 sps:$4 sm:$0xff]   ;;  %v2002_v62 = vld [vmem:[%s2893_s1 + $0x234] ss:$8 sps:$4 sm:$0xff]  }
  0x15   :  { %861 = vmatprep.subr.bf16.mxu1 %v2054_v37  ;;  %v2086_v63 = vld [vmem:[%s2893_s1 + $0x80] ss:$8 sps:$4 sm:$0xff]   ;;  %v2090_v0 = vld [vmem:[%s2893_s1 + $0x94] ss:$8 sps:$4 sm:$0xff]   ;;  %v2000_v1 = vld [vmem:[%s2893_s1 + $0x230] ss:$8 sps:$4 sm:$0xff]  }
  0x16   :  { %v2005_v2 = vld [vmem:[%s2893_s1 + $0x244] ss:$8 sps:$4 sm:$0xff]   ;;  %v2092_v3 = vld [vmem:[%s2893_s1 + $0x90] ss:$8 sps:$4 sm:$0xff]   ;;  %v2003_v5 = vld [vmem:[%s2893_s1 + $0x240] ss:$8 sps:$4 sm:$0xff]  }
  0x17   :  { %909 = vmatpush1.bf16.msra.mxu0 %v1960_v11  ;;  %v2096_v4 = vld [vmem:[%s2893_s1 + $0xa4] ss:$8 sps:$4 sm:$0xff]   ;;  %v2008_v6 = vld [vmem:[%s2893_s1 + $0x254] ss:$8 sps:$4 sm:$0xff]   ;;  %v2098_v7 = vld [vmem:[%s2893_s1 + $0xa0] ss:$8 sps:$4 sm:$0xff]  }
  0x18   :  { %910 = vmatprep.subr.bf16.mxu0 %v1961_v12  ;;  %862 = vmatpush1.bf16.msra.mxu1 %v2056_v39  ;;  %v2102_v8 = vld [vmem:[%s2893_s1 + $0xb4] ss:$8 sps:$4 sm:$0xff]   ;;  %v2006_v9 = vld [vmem:[%s2893_s1 + $0x250] ss:$8 sps:$4 sm:$0xff]   ;;  %v2011_v10 = vld [vmem:[%s2893_s1 + $0x264] ss:$8 sps:$4 sm:$0xff]  }
  0x19   :  { %863 = vmatprep.subr.bf16.mxu1 %v2060_v40  ;;  %v2104_v11 = vld [vmem:[%s2893_s1 + $0xb0] ss:$8 sps:$4 sm:$0xff]   ;;  %v27_v12 = vld [vmem:[%s2894_s0] sm:$0xff]  ;;  %v2126_v27 = vld [vmem:[%s2893_s1 + $0xf4] ss:$8 sps:$4 sm:$0xff]  }
  0x1a   :  { %v31_v13 = vld [vmem:[%s2894_s0 + $0x20] sm:$0xff]  ;;  %v2018_v28 = vld [vmem:[%s2893_s1 + $0x290] ss:$8 sps:$4 sm:$0xff]   ;;  %v2026_v35 = vld [vmem:[%s2893_s1 + $0x2b4] ss:$8 sps:$4 sm:$0xff]  }
  0x1b   :  { %911 = vmatpush1.bf16.msra.mxu0 %v1963_v16  ;;  %v2108_v14 = vld [vmem:[%s2893_s1 + $0xc4] ss:$8 sps:$4 sm:$0xff]   ;;  %v1711_v15 = vcombine.high %v27_v12, %v31_v13  ;;  %v2009_v16 = vld [vmem:[%s2893_s1 + $0x260] ss:$8 sps:$4 sm:$0xff]  }
  0x1c   :  { %912 = vmatprep.subr.bf16.mxu0 %v1964_v17  ;;  %864 = vmatpush1.bf16.msra.mxu1 %v2062_v43  ;;  %v2014_v17 = vld [vmem:[%s2893_s1 + $0x274] ss:$8 sps:$4 sm:$0xff]   ;;  %v1048_v30 = vld [vmem:[%s2895_s4 + $0x20] sm:$0xff] }
  0x1d   :  { %865 = vmatprep.subr.bf16.mxu1 %v2066_v45  ;;  %887 = vmatprep.mubr.bf16.mxu1 %v1711_v15  ;;  %v2023_v31 = vld [vmem:[%s2893_s1 + $0x2a4] ss:$8 sps:$4 sm:$0xff]   ;;  %v2021_v34 = vld [vmem:[%s2893_s1 + $0x2a0] ss:$8 sps:$4 sm:$0xff]   ;;  %v2041_v45 = vld [vmem:[%s2893_s1 + $0x2f4] ss:$8 sps:$4 sm:$0xff]  }
  0x1e   :  { %v2029_v39 = vld [vmem:[%s2893_s1 + $0x2c4] ss:$8 sps:$4 sm:$0xff]   ;;  %v2027_v40 = vld [vmem:[%s2893_s1 + $0x2c0] ss:$8 sps:$4 sm:$0xff]  }
  0x1f   :  { %913 = vmatpush1.bf16.msra.mxu0 %v1966_v18  ;;  %v2110_v18 = vld [vmem:[%s2893_s1 + $0xc0] ss:$8 sps:$4 sm:$0xff]   ;;  %v2035_v43 = vld [vmem:[%s2893_s1 + $0x2e4] ss:$8 sps:$4 sm:$0xff]  }
  0x20   :  { %914 = vmatprep.subr.bf16.mxu0 %v1967_v19  ;;  %866 = vmatpush1.bf16.msra.mxu1 %v2068_v49  ;;  %v2114_v19 = vld [vmem:[%s2893_s1 + $0xd4] ss:$8 sps:$4 sm:$0xff]   ;;  %v2047_v49 = vld [vmem:[%s2893_s1 + $0x304] ss:$8 sps:$4 sm:$0xff]  }
  0x21   :  { %867 = vmatprep.subr.bf16.mxu1 %v2072_v51  ;;  %v2522_v51 = vld [vmem:[%s2894_s0 + $0x38] sm:$0xff]  ;;  %v2131_v15 = vld [vmem:[%s2893_s1 + $0x3e4] ss:$8 sps:$4 sm:$0xff]  }
  0x23   :  { %915 = vmatpush1.bf16.msra.mxu0 %v1969_v20  ;;  %v2012_v20 = vld [vmem:[%s2893_s1 + $0x270] ss:$8 sps:$4 sm:$0xff]  }
  0x24   :  { %916 = vmatprep.subr.bf16.mxu0 %v1970_v21  ;;  %868 = vmatpush1.bf16.msra.mxu1 %v2074_v55  ;;  %v2017_v21 = vld [vmem:[%s2893_s1 + $0x284] ss:$8 sps:$4 sm:$0xff]   ;;  %v2053_v55 = vld [vmem:[%s2893_s1 + $0x314] ss:$8 sps:$4 sm:$0xff]  }
  0x25   :  { %869 = vmatprep.subr.bf16.mxu1 %v2078_v56  ;;  %v2051_v56 = vld [vmem:[%s2893_s1 + $0x310] ss:$8 sps:$4 sm:$0xff]  }
  0x27   :  { %917 = vmatpush1.bf16.msra.mxu0 %v1972_v22  ;;  %v2116_v22 = vld [vmem:[%s2893_s1 + $0xd0] ss:$8 sps:$4 sm:$0xff]  }
  0x28   :  { %918 = vmatprep.subr.bf16.mxu0 %v1973_v23  ;;  %870 = vmatpush1.bf16.msra.mxu1 %v2080_v59  ;;  %v2120_v23 = vld [vmem:[%s2893_s1 + $0xe4] ss:$8 sps:$4 sm:$0xff]  }
  0x29   :  { %871 = vmatprep.subr.bf16.mxu1 %v2084_v60  ;;  %v2071_v59 = vld [vmem:[%s2893_s1 + $0x344] ss:$8 sps:$4 sm:$0xff]   ;;  %v2069_v60 = vld [vmem:[%s2893_s1 + $0x340] ss:$8 sps:$4 sm:$0xff]  }
  0x2b   :  { %919 = vmatpush1.bf16.msra.mxu0 %v1975_v24  ;;  %v2015_v24 = vld [vmem:[%s2893_s1 + $0x280] ss:$8 sps:$4 sm:$0xff]  }
  0x2c   :  { %920 = vmatprep.subr.bf16.mxu0 %v1976_v25  ;;  %872 = vmatpush1.bf16.msra.mxu1 %v2086_v63  ;;  %v2020_v25 = vld [vmem:[%s2893_s1 + $0x294] ss:$8 sps:$4 sm:$0xff]   ;;  %v2083_v63 = vld [vmem:[%s2893_s1 + $0x364] ss:$8 sps:$4 sm:$0xff]  }
  0x2d   :  { %873 = vmatprep.subr.bf16.mxu1 %v2090_v0  ;;  %v2081_v0 = vld [vmem:[%s2893_s1 + $0x360] ss:$8 sps:$4 sm:$0xff]  }
  0x2f   :  { %921 = vmatpush1.bf16.msra.mxu0 %v1978_v26  ;;  %v2122_v26 = vld [vmem:[%s2893_s1 + $0xe0] ss:$8 sps:$4 sm:$0xff]  }
  0x30   :  { %922 = vmatprep.subr.bf16.mxu0 %v1979_v29  ;;  %874 = vmatpush1.bf16.msra.mxu1 %v2092_v3  ;;  %v1044_v29 = vld [vmem:[%s2895_s4] sm:$0xff] }
  0x31   :  { %875 = vmatprep.subr.bf16.mxu1 %v2096_v4  ;;  %v1846_v37 = vcombine.low %v1044_v29, %v1048_v30  ;;  %v2095_v3 = vld [vmem:[%s2893_s1 + $0x384] ss:$8 sps:$4 sm:$0xff]   ;;  %v2093_v4 = vld [vmem:[%s2893_s1 + $0x380] ss:$8 sps:$4 sm:$0xff]  }
  0x33   :  { %923 = vmatpush1.bf16.msra.mxu0 %v1981_v32  ;;  %v2128_v32 = vld [vmem:[%s2893_s1 + $0xf0] ss:$8 sps:$4 sm:$0xff]  }
  0x34   :  { %924 = vmatprep.subr.bf16.mxu0 %v1982_v33  ;;  %876 = vmatpush1.bf16.msra.mxu1 %v2098_v7  ;;  %v1847_v33 = vcombine.high %v1044_v29, %v1048_v30  ;;  %v2107_v7 = vld [vmem:[%s2893_s1 + $0x3a4] ss:$8 sps:$4 sm:$0xff]  }
  0x35   :  { %877 = vmatprep.subr.bf16.mxu1 %v2102_v8  ;;  %v2105_v8 = vld [vmem:[%s2893_s1 + $0x3a0] ss:$8 sps:$4 sm:$0xff]  }
  0x36   :  { %v1072_v29 = vld [vmem:[%s2895_s4 + $0xe0] sm:$0xff] }
  0x37   :  { %925 = vmatpush1.bf16.msra.mxu0 %v1984_v36  ;;  %v1710_v36 = vcombine.low %v27_v12, %v31_v13  ;;  %v2117_v12 = vld [vmem:[%s2893_s1 + $0x3c0] ss:$8 sps:$4 sm:$0xff]   ;;  %v2125_v13 = vld [vmem:[%s2893_s1 + $0x3d4] ss:$8 sps:$4 sm:$0xff]  }
  0x38   :  { %926 = vmatprep.subr.bf16.mxu0 %v1985_v38  ;;  %878 = vmatpush1.bf16.msra.mxu1 %v2104_v11  ;;  %v2024_v38 = vld [vmem:[%s2893_s1 + $0x2b0] ss:$8 sps:$4 sm:$0xff]   ;;  %v2119_v11 = vld [vmem:[%s2893_s1 + $0x3c4] ss:$8 sps:$4 sm:$0xff]  }
  0x39   :  { %879 = vmatprep.subr.bf16.mxu1 %v2108_v14  ;;  %v2123_v14 = vld [vmem:[%s2893_s1 + $0x3d0] ss:$8 sps:$4 sm:$0xff]  }
  0x3b   :  { %927 = vmatpush1.bf16.msra.mxu0 %v1987_v41  ;;  %v2032_v41 = vld [vmem:[%s2893_s1 + $0x2d4] ss:$8 sps:$4 sm:$0xff]  }
  0x3c   :  { %928 = vmatprep.subr.bf16.mxu0 %v1988_v42  ;;  %880 = vmatpush1.bf16.msra.mxu1 %v2110_v18  ;;  %v2030_v42 = vld [vmem:[%s2893_s1 + $0x2d0] ss:$8 sps:$4 sm:$0xff]  }
  0x3d   :  { %881 = vmatprep.subr.bf16.mxu1 %v2114_v19  ;;  %v2132_v18 = vld [vmem:[%s2893_s1 + $0x3f0] ss:$8 sps:$4 sm:$0xff]  }
  0x3f   :  { %929 = vmatpush1.bf16.msra.mxu0 %v1990_v44  ;;  %v2033_v44 = vld [vmem:[%s2893_s1 + $0x2e0] ss:$8 sps:$4 sm:$0xff]  }
  0x40   :  { %941 = vmatprep.subr.bf16.mxu0 %v1993_v46  ;;  %882 = vmatpush1.bf16.msra.mxu1 %v2116_v22  ;;  %v2039_v46 = vld [vmem:[%s2893_s1 + $0x2f0] ss:$8 sps:$4 sm:$0xff]  }
  0x41   :  { %883 = vmatprep.subr.bf16.mxu1 %v2120_v23 }
  0x42   :  { %931 = vmatmul.mubr.bf16.vlgmr.msra.gmra.mrb[0].mxu0 %v1712_v50  ;;  %v2517_v50 = vld [vmem:[%s2894_s0 + $0x18] sm:$0xff] }
  0x43   :  { %942 = vmatpush1.bf16.msra.mxu0 %v1991_v52  ;;  %973 = vmatprep.mubr.bf16.mxu0 %v1715_v53  ;;  %v1714_v52 = vcombine.low %v2332_v47, %v2337_v48  ;;  %v2045_v53 = vld [vmem:[%s2893_s1 + $0x300] ss:$8 sps:$4 sm:$0xff]   ;;  %v2059_v47 = vld [vmem:[%s2893_s1 + $0x324] ss:$8 sps:$4 sm:$0xff]   ;;  %v1716_v19 = vcombine.low %v2517_v50, %v2522_v51 }
  0x44   :  { %943 = vmatprep.subr.bf16.mxu0 %v1996_v54  ;;  %884 = vmatpush1.bf16.msra.mxu1 %v2122_v26  ;;  %v1717_v54 = vcombine.high %v2517_v50, %v2522_v51  ;;  %v2057_v48 = vld [vmem:[%s2893_s1 + $0x320] ss:$8 sps:$4 sm:$0xff]  }
  0x45   :  { %885 = vmatprep.subr.bf16.mxu1 %v2126_v27 }
  0x47   :  { %944 = vmatpush1.bf16.msra.mxu0 %v1994_v57  ;;  %v2065_v57 = vld [vmem:[%s2893_s1 + $0x334] ss:$8 sps:$4 sm:$0xff]  }
  0x48   :  { %945 = vmatprep.subr.bf16.mxu0 %v1999_v58  ;;  %886 = vmatpush1.bf16.msra.mxu1 %v2128_v32  ;;  %v2063_v58 = vld [vmem:[%s2893_s1 + $0x330] ss:$8 sps:$4 sm:$0xff]   ;;  %v1076_v32 = vld [vmem:[%s2895_s4 + $0x100] sm:$0xff] }
  0x49   :  { %1470 = vmatprep.subr.bf16.mxu1 %v1847_v33  ;;  %v1080_v33 = vld [vmem:[%s2895_s4 + $0x120] sm:$0xff] }
  0x4b   :  { %946 = vmatpush1.bf16.msra.mxu0 %v1997_v61  ;;  %888 = vmatmul.mubr.bf16.vlgmr.msra.gmra.mrb[0].mxu1 %v1710_v36  ;;  %v2077_v61 = vld [vmem:[%s2893_s1 + $0x354] ss:$8 sps:$4 sm:$0xff]   ;;  %v1084_v36 = vld [vmem:[%s2895_s4 + $0x140] sm:$0xff] }
  0x4c   :  { %947 = vmatprep.subr.bf16.mxu0 %v2002_v62  ;;  %1471 = vmatpush1.bf16.msra.mxu1 %v1846_v37  ;;  %v2075_v62 = vld [vmem:[%s2893_s1 + $0x350] ss:$8 sps:$4 sm:$0xff]   ;;  %v1088_v37 = vld [vmem:[%s2895_s4 + $0x160] sm:$0xff] }
  0x4f   :  { %948 = vmatpush1.bf16.msra.mxu0 %v2000_v1  ;;  %v2089_v1 = vld [vmem:[%s2893_s1 + $0x374] ss:$8 sps:$4 sm:$0xff]  }
  0x50   :  { %949 = vmatprep.subr.bf16.mxu0 %v2005_v2  ;;  %v2087_v2 = vld [vmem:[%s2893_s1 + $0x370] ss:$8 sps:$4 sm:$0xff]  }
  0x53   :  { %950 = vmatpush1.bf16.msra.mxu0 %v2003_v5  ;;  %v2101_v5 = vld [vmem:[%s2893_s1 + $0x394] ss:$8 sps:$4 sm:$0xff]  }
  0x54   :  { %951 = vmatprep.subr.bf16.mxu0 %v2008_v6  ;;  %v2099_v6 = vld [vmem:[%s2893_s1 + $0x390] ss:$8 sps:$4 sm:$0xff]  }
  0x57   :  { %952 = vmatpush1.bf16.msra.mxu0 %v2006_v9  ;;  %v2113_v9 = vld [vmem:[%s2893_s1 + $0x3b4] ss:$8 sps:$4 sm:$0xff]  }
  0x58   :  { %953 = vmatprep.subr.bf16.mxu0 %v2011_v10  ;;  %v2111_v10 = vld [vmem:[%s2893_s1 + $0x3b0] ss:$8 sps:$4 sm:$0xff]  }
  0x5b   :  { %954 = vmatpush1.bf16.msra.mxu0 %v2009_v16  ;;  %v2129_v16 = vld [vmem:[%s2893_s1 + $0x3e0] ss:$8 sps:$4 sm:$0xff]  }
  0x5c   :  { %955 = vmatprep.subr.bf16.mxu0 %v2014_v17  ;;  %v2134_v17 = vld [vmem:[%s2893_s1 + $0x3f4] ss:$8 sps:$4 sm:$0xff]  }
  0x5f   :  { %956 = vmatpush1.bf16.msra.mxu0 %v2012_v20  ;;  %v1052_v20 = vld [vmem:[%s2895_s4 + $0x40] sm:$0xff] }
  0x60   :  { %957 = vmatprep.subr.bf16.mxu0 %v2017_v21  ;;  %v1056_v21 = vld [vmem:[%s2895_s4 + $0x60] sm:$0xff] }
  0x61   :  { %v1854_v22 = vcombine.low %v1052_v20, %v1056_v21  ;;  %v1855_v23 = vcombine.high %v1052_v20, %v1056_v21 }
  0x63   :  { %958 = vmatpush1.bf16.msra.mxu0 %v2015_v24  ;;  %1472 = vmatprep.subr.bf16.mxu1 %v1855_v23  ;;  %v1060_v24 = vld [vmem:[%s2895_s4 + $0x80] sm:$0xff]  ;;  %v1053_v23 = vld [vmem:[%s2895_s4 + $0x48] sm:$0xff] }
  0x64   :  { %959 = vmatprep.subr.bf16.mxu0 %v2020_v25  ;;  %1473 = vmatpush1.bf16.msra.mxu1 %v1854_v22  ;;  %v1064_v25 = vld [vmem:[%s2895_s4 + $0xa0] sm:$0xff] }
  0x65   :  { %v1863_v26 = vcombine.high %v1060_v24, %v1064_v25  ;;  %v1862_v27 = vcombine.low %v1060_v24, %v1064_v25  ;;  %v1057_v24 = vld [vmem:[%s2895_s4 + $0x68] sm:$0xff] }
  0x67   :  { %960 = vmatpush1.bf16.msra.mxu0 %v2018_v28  ;;  %1474 = vmatprep.subr.bf16.mxu1 %v1863_v26  ;;  %v1068_v28 = vld [vmem:[%s2895_s4 + $0xc0] sm:$0xff] }
  0x68   :  { %961 = vmatprep.subr.bf16.mxu0 %v2023_v31  ;;  %1475 = vmatpush1.bf16.msra.mxu1 %v1862_v27  ;;  %v1871_v30 = vcombine.high %v1068_v28, %v1072_v29  ;;  %v1870_v31 = vcombine.low %v1068_v28, %v1072_v29  ;;  %v1857_v27 = vcombine.high %v1053_v23, %v1057_v24  ;;  %v1061_v28 = vld [vmem:[%s2895_s4 + $0x88] sm:$0xff] }
  0x69   :  { %v1065_v29 = vld [vmem:[%s2895_s4 + $0xa8] sm:$0xff] }
  0x6a   :  { %1476 = vmatprep.subr.bf16.mxu1 %v1871_v30  ;;  %v1856_v30 = vcombine.low %v1053_v23, %v1057_v24  ;;  %v1047_v24 = vld [vmem:[%s2895_s4 + $0x18] sm:$0xff] }
  0x6b   :  { %962 = vmatpush1.bf16.msra.mxu0 %v2021_v34  ;;  %v1879_v34 = vcombine.high %v1076_v32, %v1080_v33 }
  0x6c   :  { %963 = vmatprep.subr.bf16.mxu0 %v2026_v35  ;;  %1477 = vmatpush1.bf16.msra.mxu1 %v1870_v31  ;;  %v1878_v35 = vcombine.low %v1076_v32, %v1080_v33  ;;  %v1865_v31 = vcombine.high %v1061_v28, %v1065_v29  ;;  %v1069_v32 = vld [vmem:[%s2895_s4 + $0xc8] sm:$0xff] }
  0x6d   :  { %1478 = vmatprep.subr.bf16.mxu1 %v1879_v34  ;;  %v1073_v33 = vld [vmem:[%s2895_s4 + $0xe8] sm:$0xff]  ;;  %v1864_v34 = vcombine.low %v1061_v28, %v1065_v29  ;;  %v1055_v29 = vld [vmem:[%s2895_s4 + $0x58] sm:$0xff] }
  0x6f   :  { %964 = vmatpush1.bf16.msra.mxu0 %v2024_v38  ;;  %v1092_v38 = vld [vmem:[%s2895_s4 + $0x180] sm:$0xff] }
  0x70   :  { %965 = vmatprep.subr.bf16.mxu0 %v2029_v39  ;;  %1479 = vmatpush1.bf16.msra.mxu1 %v1878_v35  ;;  %v1886_v39 = vcombine.low %v1084_v36, %v1088_v37  ;;  %v1873_v35 = vcombine.high %v1069_v32, %v1073_v33 }
  0x73   :  { %966 = vmatpush1.bf16.msra.mxu0 %v2027_v40  ;;  %v1887_v40 = vcombine.high %v1084_v36, %v1088_v37  ;;  %v1077_v36 = vld [vmem:[%s2895_s4 + $0x108] sm:$0xff] }
  0x74   :  { %967 = vmatprep.subr.bf16.mxu0 %v2032_v41  ;;  %v1096_v41 = vld [vmem:[%s2895_s4 + $0x1a0] sm:$0xff]  ;;  %v1081_v37 = vld [vmem:[%s2895_s4 + $0x128] sm:$0xff] }
  0x75   :  { %1480 = vmatprep.subr.bf16.mxu1 %v1887_v40  ;;  %v1894_v51 = vcombine.low %v1092_v38, %v1096_v41  ;;  %v1085_v40 = vld [vmem:[%s2895_s4 + $0x148] sm:$0xff] }
  0x76   :  { %1481 = vmatpush1.bf16.msra.mxu1 %v1886_v39  ;;  %v1881_v39 = vcombine.high %v1077_v36, %v1081_v37 }
  0x77   :  { %968 = vmatpush1.bf16.msra.mxu0 %v2030_v42  ;;  %v2139_v42 = vmov 0  }
  0x78   :  { %969 = vmatprep.subr.bf16.mxu0 %v2035_v43  ;;  %1502 = vmatprep.mubr.bf16.mxu1 %v2139_v42  ;;  %v1895_v43 = vcombine.high %v1092_v38, %v1096_v41  ;;  %v1872_v38 = vcombine.low %v1069_v32, %v1073_v33  ;;  %v1089_v41 = vld [vmem:[%s2895_s4 + $0x168] sm:$0xff]  ;;  %v1063_v33 = vld [vmem:[%s2895_s4 + $0x98] sm:$0xff] }
  0x7a   :  { %1482 = vmatprep.subr.bf16.mxu1 %v1895_v43  ;;  %v1880_v43 = vcombine.low %v1077_v36, %v1081_v37  ;;  %v1071_v37 = vld [vmem:[%s2895_s4 + $0xd8] sm:$0xff] }
  0x7b   :  { %970 = vmatpush1.bf16.msra.mxu0 %v2033_v44  ;;  %v2663_v44 = vld [vmem:[%s2895_s4 + $0x8] sm:$0xff]  ;;  %1483 = vmatpush1.bf16.msra.mxu1 %v1894_v51 }
  0x7c   :  { %971 = vmatprep.subr.bf16.mxu0 %v2041_v45  ;;  %v2668_v45 = vld [vmem:[%s2895_s4 + $0x28] sm:$0xff] }
  0x7d   :  { %v1848_v50 = vcombine.low %v2663_v44, %v2668_v45  ;;  %v1101_v51 = vld [vmem:[%s2895_s4 + $0x1c8] sm:$0xff] }
  0x7f   :  { %972 = vmatpush1.bf16.msra.mxu0 %v2039_v46  ;;  %v1100_v46 = vld [vmem:[%s2895_s4 + $0x1c0] sm:$0xff] }
  0x80   :  { %984 = vmatprep.subr.bf16.mxu0 %v2047_v49  ;;  %v1104_v49 = vld [vmem:[%s2895_s4 + $0x1e0] sm:$0xff] }
  0x82   :  { %974 = vmatmul.mubr.bf16.vlgmr.msra.gmra.mrb[0].mxu0 %v1714_v52  ;;  %v1903_v52 = vcombine.high %v1100_v46, %v1104_v49 }
  0x83   :  { %985 = vmatpush1.bf16.msra.mxu0 %v2045_v53  ;;  %1016 = vmatprep.mubr.bf16.mxu0 %v1717_v54  ;;  %v1902_v53 = vcombine.low %v1100_v46, %v1104_v49  ;;  %v1849_v54 = vcombine.high %v2663_v44, %v2668_v45  ;;  %v1889_v44 = vcombine.high %v1085_v40, %v1089_v41  ;;  %v1093_v45 = vld [vmem:[%s2895_s4 + $0x188] sm:$0xff] }
  0x84   :  { %986 = vmatprep.subr.bf16.mxu0 %v2053_v55  ;;  %1484 = vmatprep.subr.bf16.mxu1 %v1903_v52  ;;  %v1097_v46 = vld [vmem:[%s2895_s4 + $0x1a8] sm:$0xff]  ;;  %v1888_v49 = vcombine.low %v1085_v40, %v1089_v41  ;;  %v1079_v41 = vld [vmem:[%s2895_s4 + $0x118] sm:$0xff] }
  0x85   :  { %1485 = vmatpush1.bf16.msra.mxu1 %v1902_v53  ;;  %v1105_v52 = vld [vmem:[%s2895_s4 + $0x1e8] sm:$0xff]  ;;  %v1896_v53 = vcombine.low %v1093_v45, %v1097_v46 }
  0x86   :  { %1513 = vmatprep.subr.bf16.mxu1 %v1849_v54  ;;  %v1905_v54 = vcombine.high %v1101_v51, %v1105_v52 }
  0x87   :  { %987 = vmatpush1.bf16.msra.mxu0 %v2051_v56 }
  0x88   :  { %988 = vmatprep.subr.bf16.mxu0 %v2059_v47 }
  0x8b   :  { %989 = vmatpush1.bf16.msra.mxu0 %v2057_v48 }
  0x8c   :  { %990 = vmatprep.subr.bf16.mxu0 %v2065_v57  ;;  %v165_v57 = vlaneseq }
  0x8f   :  { %991 = vmatpush1.bf16.msra.mxu0 %v2063_v58  ;;  %v2680_v58 = vshrl.u32 %v165_v57, 7  ;;  %v1054_v57 = vld [vmem:[%s2895_s4 + $0x50] sm:$0xff] }
  0x90   :  { %992 = vmatprep.subr.bf16.mxu0 %v2071_v59 }
  0x91   :  { %v167_v59 = vsub.s32 0, %v2680_v58 }
  0x93   :  { %993 = vmatpush1.bf16.msra.mxu0 %v2069_v60  ;;  %v163_v60 = vld [vmem:[%s2896_s2] sm:$0x3] }
  0x94   :  { %994 = vmatprep.subr.bf16.mxu0 %v2077_v61  ;;  %v171_v61 = vsub.s32 1, %v2680_v58 }
  0x97   :  { %995 = vmatpush1.bf16.msra.mxu0 %v2075_v62  ;;  %v168_v62 = vrot.slane %v163_v60, %v167_v59 }
  0x98   :  { %996 = vmatprep.subr.bf16.mxu0 %v2083_v63  ;;  %v172_v63 = vrot.slane %v163_v60, %v171_v61  ;;  %v1058_v60 = vld [vmem:[%s2895_s4 + $0x70] sm:$0xff] }
  0x9b   :  { %997 = vmatpush1.bf16.msra.mxu0 %v2081_v0 }
  0x9c   :  { %998 = vmatprep.subr.bf16.mxu0 %v2089_v1 }
  0x9f   :  { %999 = vmatpush1.bf16.msra.mxu0 %v2087_v2 }
  0xa0   :  { %1000 = vmatprep.subr.bf16.mxu0 %v2095_v3 }
  0xa3   :  { %1001 = vmatpush1.bf16.msra.mxu0 %v2093_v4 }
  0xa4   :  { %1002 = vmatprep.subr.bf16.mxu0 %v2101_v5 }
  0xa7   :  { %1003 = vmatpush1.bf16.msra.mxu0 %v2099_v6 }
  0xa8   :  { %1004 = vmatprep.subr.bf16.mxu0 %v2107_v7 }
  0xab   :  { %1005 = vmatpush1.bf16.msra.mxu0 %v2105_v8 }
  0xac   :  { %1006 = vmatprep.subr.bf16.mxu0 %v2113_v9 }
  0xaf   :  { %1007 = vmatpush1.bf16.msra.mxu0 %v2111_v10 }
  0xb0   :  { %1008 = vmatprep.subr.bf16.mxu0 %v2119_v11 }
  0xb3   :  { %1009 = vmatpush1.bf16.msra.mxu0 %v2117_v12 }
  0xb4   :  { %1010 = vmatprep.subr.bf16.mxu0 %v2125_v13 }
  0xb7   :  { %1011 = vmatpush1.bf16.msra.mxu0 %v2123_v14 }
  0xb8   :  { %1012 = vmatprep.subr.bf16.mxu0 %v2131_v15 }
  0xbb   :  { %1013 = vmatpush1.bf16.msra.mxu0 %v2129_v16  ;;  %v1027_v16 = vld [vmem:[%s2899_s3] sm:$0xff] }
  0xbc   :  { %1014 = vmatprep.subr.bf16.mxu0 %v2134_v17 }
  0xbf   :  { %1015 = vmatpush1.bf16.msra.mxu0 %v2132_v18  ;;  %v1028_v18 = vld [vmem:[%s2899_s3 + $0x8] sm:$0xff] }
  0xc2   :  { %1017 = vmatmul.mubr.bf16.vlgmr.msra.gmra.mrb[0].mxu0 %v1716_v19 }
 0x11e   :  { %v889_v55 = vpop.f32.mrb[0].mxu1 }
 0x11f   :  { %v891_v56 = vpop.f32.mrb[1].mxu1  ;;  %v890_v0 = vadd.f32 %v889_v55, %v168_v62  ;;  %v1046_v55 = vld [vmem:[%s2895_s4 + $0x10] sm:$0xff] }
 0x120   :  { %v893_v47 = vpop.f32.mrb[2].mxu1  ;;  %v892_v1 = vadd.f32 %v891_v56, %v172_v63  ;;  %v1050_v56 = vld [vmem:[%s2895_s4 + $0x30] sm:$0xff] }
 0x121   :  { %v895_v48 = vpop.f32.mrb[3].mxu1  ;;  %v894_v3 = vadd.f32 %v893_v47, %v168_v62  ;;  %v1904_v47 = vcombine.low %v1101_v51, %v1105_v52  ;;  %v1850_v62 = vcombine.low %v1046_v55, %v1050_v56  ;;  %v1095_v51 = vld [vmem:[%s2895_s4 + $0x198] sm:$0xff] }
 0x122   :  { %v896_v6 = vadd.f32 %v895_v48, %v172_v63  ;;  %v1851_v48 = vcombine.high %v1046_v55, %v1050_v56  ;;  %v1859_v63 = vcombine.high %v1054_v57, %v1058_v60  ;;  %v1099_v52 = vld [vmem:[%s2895_s4 + $0x1b8] sm:$0xff] }
 0x123   :  { %v1103_v55 = vld [vmem:[%s2895_s4 + $0x1d8] sm:$0xff] }
 0x124   :  { %v1107_v56 = vld [vmem:[%s2895_s4 + $0x1f8] sm:$0xff] }
 0x195   :  { %v1018_v2 = vpop.f32.mrb[0].mxu0 }
 0x196   :  { %v1927_v4 = vadd.f32 %v1018_v2, %v890_v0  ;;  %v1020_v5 = vpop.f32.mrb[1].mxu0  ;;  %v1062_v0 = vld [vmem:[%s2895_s4 + $0x90] sm:$0xff]  ;;  %v1858_v2 = vcombine.low %v1054_v57, %v1058_v60  ;;  %v1908_v57 = vcombine.low %v1103_v55, %v1107_v56  ;;  %v1108_v60 = vld [vmem:[%s2900_s5] sm:$0xff] }
 0x197   :  { %v1929_v7 = vadd.f32 %v1020_v5, %v892_v1  ;;  %v1022_v8 = vpop.f32.mrb[2].mxu0  ;;  %v1066_v1 = vld [vmem:[%s2895_s4 + $0xb0] sm:$0xff] }
 0x198   :  { %1039 = vst [vmem:[%s2897_s6] sm:$0xff] %v1927_v4  ;;  %v1931_v9 = vadd.f32 %v1022_v8, %v894_v3  ;;  %v1024_v10 = vpop.f32.mrb[3].mxu0  ;;  %v1867_v3 = vcombine.high %v1062_v0, %v1066_v1  ;;  %v1074_v5 = vld [vmem:[%s2895_s4 + $0xf0] sm:$0xff] }
 0x199   :  { %v1029_v11 = vmul.f32 0.5, %v1929_v7  ;;  %1041 = vst [vmem:[%s2898_s7] sm:$0xff] %v1929_v7  ;;  %v1933_v12 = vadd.f32 %v1024_v10, %v896_v6  ;;  %v1866_v6 = vcombine.low %v1062_v0, %v1066_v1  ;;  %v1078_v8 = vld [vmem:[%s2895_s4 + $0x110] sm:$0xff] }
 0x19a   :  { %1040 = vst [vmem:[%s2897_s6 + $0x8] sm:$0xff] %v1931_v9 }
 0x19b   :  { %v1031_v13 = vmul.f32 1.442695, %v1029_v11  ;;  %v1030_v14 = vmul.f32 0.5, %v1933_v12  ;;  %1042 = vst [vmem:[%s2898_s7 + $0x8] sm:$0xff] %v1933_v12  ;;  %v1086_v12 = vld [vmem:[%s2895_s4 + $0x150] sm:$0xff] }
 0x19d   :  { %2135 = vpow2.f32 %v1031_v13  ;;  %v1033_v15 = vmul.f32 1.442695, %v1030_v14  ;;  %v1090_v13 = vld [vmem:[%s2895_s4 + $0x170] sm:$0xff] }
 0x19f   :  { %2137 = vpow2.f32 %v1033_v15  ;;  %v1891_v15 = vcombine.high %v1086_v12, %v1090_v13 }
 0x1a7   :  { %v2136_v17 = vpop.eup %2135 }
 0x1a8   :  { %v1035_v19 = vmul.f32 %v2136_v17, %v1027_v16  ;;  %v1094_v16 = vld [vmem:[%s2895_s4 + $0x190] sm:$0xff] }
 0x1a9   :  { %v2138_v20 = vpop.eup %2137  ;;  %v1098_v17 = vld [vmem:[%s2895_s4 + $0x1b0] sm:$0xff] }
 0x1aa   :  { %v1036_v21 = vmul.f32 %v2138_v20, %v1028_v18  ;;  %v1037_v22 = vadd.f32 %v1927_v4, %v1035_v19  ;;  %v1070_v4 = vld [vmem:[%s2895_s4 + $0xd0] sm:$0xff]  ;;  %v1890_v18 = vcombine.low %v1086_v12, %v1090_v13  ;;  %v1899_v19 = vcombine.high %v1094_v16, %v1098_v17 }
 0x1ab   :  { %v1875_v7 = vcombine.high %v1070_v4, %v1074_v5  ;;  %v1874_v10 = vcombine.low %v1070_v4, %v1074_v5  ;;  %v1102_v20 = vld [vmem:[%s2895_s4 + $0x1d0] sm:$0xff] }
 0x1ac   :  { %v1038_v25 = vadd.f32 %v1931_v9, %v1036_v21  ;;  %v1082_v9 = vld [vmem:[%s2895_s4 + $0x130] sm:$0xff] }
 0x1ad   :  { %v1883_v11 = vcombine.high %v1078_v8, %v1082_v9  ;;  %v1882_v14 = vcombine.low %v1078_v8, %v1082_v9  ;;  %v1106_v21 = vld [vmem:[%s2895_s4 + $0x1f0] sm:$0xff] }
 0x1ae   :  { %v2715_v26 = vpack.c.bf16 %v1038_v25, %v1037_v22  ;;  %v1898_v22 = vcombine.low %v1094_v16, %v1098_v17  ;;  %v1907_v23 = vcombine.high %v1102_v20, %v1106_v21  ;;  %v1051_v25 = vld [vmem:[%s2895_s4 + $0x38] sm:$0xff] }
 0x1af   :  { %v1853_v28 = vcombine.high %v1047_v24, %v1051_v25 }
 0x1b0   :  { %1503 = vmatmul.mubr.bf16.vlgmr.msra.gmra.mrb[4].mxu1 %v2715_v26 }
 0x1b1   :  { %1514 = vmatpush1.bf16.msra.mxu1 %v1848_v50  ;;  %1545 = vmatprep.mubr.bf16.mxu1 %v2139_v42  ;;  %v1897_v50 = vcombine.high %v1093_v45, %v1097_v46  ;;  %v1087_v45 = vld [vmem:[%s2895_s4 + $0x158] sm:$0xff] }
 0x1b2   :  { %1515 = vmatprep.subr.bf16.mxu1 %v1857_v27  ;;  %v1906_v27 = vcombine.low %v1102_v20, %v1106_v21  ;;  %v1091_v46 = vld [vmem:[%s2895_s4 + $0x178] sm:$0xff]  ;;  %v1128_v21 = vsub.s32 4, %v2680_v58 }
 0x1b5   :  { %1516 = vmatpush1.bf16.msra.mxu1 %v1856_v30  ;;  %v1059_v30 = vld [vmem:[%s2895_s4 + $0x78] sm:$0xff] }
 0x1b6   :  { %1517 = vmatprep.subr.bf16.mxu1 %v1865_v31  ;;  %v1852_v31 = vcombine.low %v1047_v24, %v1051_v25  ;;  %v1861_v32 = vcombine.high %v1055_v29, %v1059_v30 }
 0x1b9   :  { %1518 = vmatpush1.bf16.msra.mxu1 %v1864_v34  ;;  %v1067_v34 = vld [vmem:[%s2895_s4 + $0xb8] sm:$0xff] }
 0x1ba   :  { %1519 = vmatprep.subr.bf16.mxu1 %v1873_v35  ;;  %v1860_v35 = vcombine.low %v1055_v29, %v1059_v30  ;;  %v1869_v36 = vcombine.high %v1063_v33, %v1067_v34 }
 0x1bd   :  { %1520 = vmatpush1.bf16.msra.mxu1 %v1872_v38  ;;  %v1075_v38 = vld [vmem:[%s2895_s4 + $0xf8] sm:$0xff] }
 0x1be   :  { %1521 = vmatprep.subr.bf16.mxu1 %v1881_v39  ;;  %v1868_v39 = vcombine.low %v1063_v33, %v1067_v34  ;;  %v1877_v40 = vcombine.high %v1071_v37, %v1075_v38 }
 0x1c1   :  { %1522 = vmatpush1.bf16.msra.mxu1 %v1880_v43  ;;  %v1876_v43 = vcombine.low %v1071_v37, %v1075_v38  ;;  %v1140_v37 = vsub.s32 7, %v2680_v58 }
 0x1c2   :  { %1523 = vmatprep.subr.bf16.mxu1 %v1889_v44 }
 0x1c5   :  { %1524 = vmatpush1.bf16.msra.mxu1 %v1888_v49 }
 0x1c6   :  { %1525 = vmatprep.subr.bf16.mxu1 %v1897_v50  ;;  %v1893_v50 = vcombine.high %v1087_v45, %v1091_v46 }
 0x1c9   :  { %1526 = vmatpush1.bf16.msra.mxu1 %v1896_v53  ;;  %v1892_v53 = vcombine.low %v1087_v45, %v1091_v46 }
 0x1ca   :  { %1527 = vmatprep.subr.bf16.mxu1 %v1905_v54  ;;  %v1901_v54 = vcombine.high %v1095_v51, %v1099_v52 }
 0x1cd   :  { %1528 = vmatpush1.bf16.msra.mxu1 %v1904_v47  ;;  %v1900_v47 = vcombine.low %v1095_v51, %v1099_v52 }
 0x1ce   :  { %1556 = vmatprep.subr.bf16.mxu1 %v1851_v48  ;;  %v1909_v48 = vcombine.high %v1103_v55, %v1107_v56 }
 0x1d0   :  { %1546 = vmatmul.mubr.bf16.vlgmr.msra.gmra.mrb[8].mxu1 %v2715_v26 }
 0x1d1   :  { %1557 = vmatpush1.bf16.msra.mxu1 %v1850_v62  ;;  %1588 = vmatprep.mubr.bf16.mxu1 %v2139_v42  ;;  %v1113_v62 = vrot.slane %v1108_v60, %v167_v59  ;;  %v1120_v59 = vsub.s32 2, %v2680_v58 }
 0x1d2   :  { %1558 = vmatprep.subr.bf16.mxu1 %v1859_v63  ;;  %v1117_v63 = vrot.slane %v1108_v60, %v171_v61  ;;  %v1124_v61 = vsub.s32 3, %v2680_v58 }
 0x1d3   :  { %v1121_v9 = vrot.slane %v1108_v60, %v1120_v59 }
 0x1d5   :  { %1559 = vmatpush1.bf16.msra.mxu1 %v1858_v2 }
 0x1d6   :  { %1560 = vmatprep.subr.bf16.mxu1 %v1867_v3 }
 0x1d9   :  { %1561 = vmatpush1.bf16.msra.mxu1 %v1866_v6 }
 0x1da   :  { %1562 = vmatprep.subr.bf16.mxu1 %v1875_v7 }
 0x1dd   :  { %1563 = vmatpush1.bf16.msra.mxu1 %v1874_v10  ;;  %v1125_v10 = vrot.slane %v1108_v60, %v1124_v61 }
 0x1de   :  { %1564 = vmatprep.subr.bf16.mxu1 %v1883_v11 }
 0x1e1   :  { %1565 = vmatpush1.bf16.msra.mxu1 %v1882_v14 }
 0x1e2   :  { %1566 = vmatprep.subr.bf16.mxu1 %v1891_v15 }
 0x1e5   :  { %1567 = vmatpush1.bf16.msra.mxu1 %v1890_v18 }
 0x1e6   :  { %1568 = vmatprep.subr.bf16.mxu1 %v1899_v19 }
 0x1e9   :  { %1569 = vmatpush1.bf16.msra.mxu1 %v1898_v22  ;;  %v1132_v22 = vsub.s32 5, %v2680_v58 }
 0x1ea   :  { %1570 = vmatprep.subr.bf16.mxu1 %v1907_v23  ;;  %v1129_v23 = vrot.slane %v1108_v60, %v1128_v21 }
 0x1eb   :  { %v1133_v24 = vrot.slane %v1108_v60, %v1132_v22 }
 0x1ed   :  { %1571 = vmatpush1.bf16.msra.mxu1 %v1906_v27 }
 0x1ee   :  { %1599 = vmatprep.subr.bf16.mxu1 %v1853_v28 }
 0x1f0   :  { %1589 = vmatmul.mubr.bf16.vlgmr.msra.gmra.mrb[12].mxu1 %v2715_v26 }
 0x1f1   :  { %1600 = vmatpush1.bf16.msra.mxu1 %v1852_v31  ;;  %1631 = vmatprep.mubr.bf16.mxu1 %v2139_v42  ;;  %v1083_v42 = vld [vmem:[%s2895_s4 + $0x138] sm:$0xff] }
 0x1f2   :  { %1601 = vmatprep.subr.bf16.mxu1 %v1861_v32  ;;  %v1885_v44 = vcombine.high %v1079_v41, %v1083_v42  ;;  %v1884_v49 = vcombine.low %v1079_v41, %v1083_v42 }
 0x1f5   :  { %1602 = vmatpush1.bf16.msra.mxu1 %v1860_v35 }
 0x1f6   :  { %1603 = vmatprep.subr.bf16.mxu1 %v1869_v36  ;;  %v1136_v36 = vsub.s32 6, %v2680_v58 }
 0x1f8   :  { %v1137_v38 = vrot.slane %v1108_v60, %v1136_v36 }
 0x1f9   :  { %1604 = vmatpush1.bf16.msra.mxu1 %v1868_v39  ;;  %v1141_v39 = vrot.slane %v1108_v60, %v1140_v37 }
 0x1fa   :  { %1605 = vmatprep.subr.bf16.mxu1 %v1877_v40 }
 0x1fd   :  { %1606 = vmatpush1.bf16.msra.mxu1 %v1876_v43 }
 0x1fe   :  { %1607 = vmatprep.subr.bf16.mxu1 %v1885_v44 }
 0x201   :  { %1608 = vmatpush1.bf16.msra.mxu1 %v1884_v49 }
 0x202   :  { %1609 = vmatprep.subr.bf16.mxu1 %v1893_v50 }
 0x205   :  { %1610 = vmatpush1.bf16.msra.mxu1 %v1892_v53 }
 0x206   :  { %1611 = vmatprep.subr.bf16.mxu1 %v1901_v54 }
 0x209   :  { %1612 = vmatpush1.bf16.msra.mxu1 %v1900_v47 }
 0x20a   :  { %1613 = vmatprep.subr.bf16.mxu1 %v1909_v48 }
 0x20d   :  { %1614 = vmatpush1.bf16.msra.mxu1 %v1908_v57 }
 0x210   :  { %1632 = vmatmul.mubr.bf16.vlgmr.msra.gmra.mrb[16].mxu1 %v2715_v26 }
 0x283   :  { %v1504_v0 = vpop.f32.mrb[4].mxu1 }
 0x284   :  { %v1505_v1 = vadd.f32 %v1504_v0, %v1113_v62  ;;  %v1506_v2 = vpop.f32.mrb[5].mxu1 }
 0x285   :  { %v1507_v3 = vadd.f32 %v1506_v2, %v1117_v63  ;;  %v1508_v4 = vpop.f32.mrb[6].mxu1 }
 0x286   :  { %v1509_v5 = vadd.f32 %v1508_v4, %v1113_v62  ;;  %v1510_v6 = vpop.f32.mrb[7].mxu1 }
 0x287   :  { %v1918_v7 = vpack.c.bf16 %v1507_v3, %v1505_v1  ;;  %v1511_v8 = vadd.f32 %v1510_v6, %v1117_v63 }
 0x289   :  { %1690 = vst [vmem:[%s2901_s8] sm:$0xff] %v1918_v7  ;;  %v1922_v26 = vpack.c.bf16 %v1511_v8, %v1509_v5 }
 0x28b   :  { %1694 = vst [vmem:[%s2901_s8 + $0x20] sm:$0xff] %v1922_v26 }
 0x2a3   :  { %v1547_v11 = vpop.f32.mrb[8].mxu1 }
 0x2a4   :  { %v1548_v12 = vadd.f32 %v1547_v11, %v1121_v9  ;;  %v1549_v13 = vpop.f32.mrb[9].mxu1 }
 0x2a5   :  { %v1550_v14 = vadd.f32 %v1549_v13, %v1125_v10  ;;  %v1551_v15 = vpop.f32.mrb[10].mxu1 }
 0x2a6   :  { %v1552_v16 = vadd.f32 %v1551_v15, %v1121_v9  ;;  %v1553_v17 = vpop.f32.mrb[11].mxu1 }
 0x2a7   :  { %v1919_v18 = vpack.c.bf16 %v1550_v14, %v1548_v12  ;;  %v1554_v19 = vadd.f32 %v1553_v17, %v1125_v10 }
 0x2a9   :  { %1691 = vst [vmem:[%s2901_s8 + $0x8] sm:$0xff] %v1919_v18  ;;  %v1923_v20 = vpack.c.bf16 %v1554_v19, %v1552_v16 }
 0x2ab   :  { %1695 = vst [vmem:[%s2901_s8 + $0x28] sm:$0xff] %v1923_v20 }
 0x2c3   :  { %v1590_v25 = vpop.f32.mrb[12].mxu1 }
 0x2c4   :  { %v1591_v27 = vadd.f32 %v1590_v25, %v1129_v23  ;;  %v1592_v28 = vpop.f32.mrb[13].mxu1 }
 0x2c5   :  { %v1593_v29 = vadd.f32 %v1592_v28, %v1133_v24  ;;  %v1594_v30 = vpop.f32.mrb[14].mxu1 }
 0x2c6   :  { %v1595_v31 = vadd.f32 %v1594_v30, %v1129_v23  ;;  %v1596_v32 = vpop.f32.mrb[15].mxu1 }
 0x2c7   :  { %v1920_v33 = vpack.c.bf16 %v1593_v29, %v1591_v27  ;;  %v1597_v34 = vadd.f32 %v1596_v32, %v1133_v24 }
 0x2c9   :  { %1692 = vst [vmem:[%s2901_s8 + $0x10] sm:$0xff] %v1920_v33  ;;  %v1924_v35 = vpack.c.bf16 %v1597_v34, %v1595_v31 }
 0x2cb   :  { %1696 = vst [vmem:[%s2901_s8 + $0x30] sm:$0xff] %v1924_v35 }
 0x2e3   :  { %v1633_v40 = vpop.f32.mrb[16].mxu1 }
 0x2e4   :  { %v1634_v41 = vadd.f32 %v1633_v40, %v1137_v38  ;;  %v1635_v42 = vpop.f32.mrb[17].mxu1 }
 0x2e5   :  { %v1636_v43 = vadd.f32 %v1635_v42, %v1141_v39  ;;  %v1637_v44 = vpop.f32.mrb[18].mxu1 }
 0x2e6   :  { %v1638_v45 = vadd.f32 %v1637_v44, %v1137_v38  ;;  %v1639_v46 = vpop.f32.mrb[19].mxu1 }
 0x2e7   :  { %v1921_v49 = vpack.c.bf16 %v1636_v43, %v1634_v41  ;;  %v1640_v50 = vadd.f32 %v1639_v46, %v1141_v39 }
 0x2e9   :  { %1693 = vst [vmem:[%s2901_s8 + $0x18] sm:$0xff] %v1921_v49  ;;  %v1925_v51 = vpack.c.bf16 %v1640_v50, %v1638_v45 }
 0x2eb   :  { %1697 = vst [vmem:[%s2901_s8 + $0x38] sm:$0xff] %v1925_v51 }

// kernel: conv_vae_forward.12
= control target key start
LH: loop header
LB: loop body
LE: loop exit
PB: predicated region body
PF: predicated region fallthrough
CT: control target
= control target key end

     0   :  { %s3609_s1 = inlined_call_operand.vmem [shape: bf16[2048,256], index: 1, kind: input, shape index: {}]   ;;  %s3610_s0 = inlined_call_operand.vmem [shape: bf16[16,2048], index: 0, kind: input, shape index: {}]   ;;  %s3611_s2 = inlined_call_operand.vmem [shape: f32[1,256], index: 2, kind: input, shape index: {}]   ;;  %s3612_s3 = inlined_call_operand.vmem [shape: bf16[16,256], index: 3, kind: output, shape index: {}]  }
   0x1   :  { %v2332_v0 = vld [vmem:[%s3609_s1 + $0x4] ss:$8 sps:$4 sm:$0xff]   ;;  %v2336_v2 = vld [vmem:[%s3609_s1] ss:$8 sps:$4 sm:$0xff]   ;;  %v2338_v4 = vld [vmem:[%s3609_s1 + $0x14] ss:$8 sps:$4 sm:$0xff]  }
   0x2   :  { %v2334_v1 = vld [vmem:[%s3609_s1 + $0x404] ss:$8 sps:$4 sm:$0xff]   ;;  %1658 = vmatprep.subr.bf16.mxu1 %v2332_v0  ;;  %v2337_v3 = vld [vmem:[%s3609_s1 + $0x400] ss:$8 sps:$4 sm:$0xff]   ;;  %v2340_v5 = vld [vmem:[%s3609_s1 + $0x414] ss:$8 sps:$4 sm:$0xff]  }
   0x3   :  { %1830 = vmatprep.subr.bf16.mxu0 %v2334_v1  ;;  %1659 = vmatpush1.bf16.msra.mxu1 %v2336_v2  ;;  %v2342_v6 = vld [vmem:[%s3609_s1 + $0x10] ss:$8 sps:$4 sm:$0xff]   ;;  %v2344_v8 = vld [vmem:[%s3609_s1 + $0x24] ss:$8 sps:$4 sm:$0xff]   ;;  %v2348_v10 = vld [vmem:[%s3609_s1 + $0x20] ss:$8 sps:$4 sm:$0xff]  }
   0x4   :  { %1831 = vmatpush1.bf16.msra.mxu0 %v2337_v3  ;;  %1660 = vmatprep.subr.bf16.mxu1 %v2338_v4  ;;  %v2343_v7 = vld [vmem:[%s3609_s1 + $0x410] ss:$8 sps:$4 sm:$0xff]   ;;  %v2346_v9 = vld [vmem:[%s3609_s1 + $0x424] ss:$8 sps:$4 sm:$0xff]   ;;  %v2349_v11 = vld [vmem:[%s3609_s1 + $0x420] ss:$8 sps:$4 sm:$0xff]  }
   0x5   :  { %1832 = vmatprep.subr.bf16.mxu0 %v2340_v5  ;;  %v2350_v12 = vld [vmem:[%s3609_s1 + $0x34] ss:$8 sps:$4 sm:$0xff]   ;;  %v2354_v14 = vld [vmem:[%s3609_s1 + $0x30] ss:$8 sps:$4 sm:$0xff]   ;;  %v2356_v16 = vld [vmem:[%s3609_s1 + $0x44] ss:$8 sps:$4 sm:$0xff]  }
   0x6   :  { %v2352_v13 = vld [vmem:[%s3609_s1 + $0x434] ss:$8 sps:$4 sm:$0xff]   ;;  %v2355_v15 = vld [vmem:[%s3609_s1 + $0x430] ss:$8 sps:$4 sm:$0xff]   ;;  %v2358_v17 = vld [vmem:[%s3609_s1 + $0x444] ss:$8 sps:$4 sm:$0xff]  }
   0x7   :  { %1661 = vmatpush1.bf16.msra.mxu1 %v2342_v6  ;;  %v2360_v18 = vld [vmem:[%s3609_s1 + $0x40] ss:$8 sps:$4 sm:$0xff]   ;;  %v2362_v20 = vld [vmem:[%s3609_s1 + $0x54] ss:$8 sps:$4 sm:$0xff]   ;;  %v2366_v22 = vld [vmem:[%s3609_s1 + $0x50] ss:$8 sps:$4 sm:$0xff]  }
   0x8   :  { %1833 = vmatpush1.bf16.msra.mxu0 %v2343_v7  ;;  %1662 = vmatprep.subr.bf16.mxu1 %v2344_v8  ;;  %v2361_v19 = vld [vmem:[%s3609_s1 + $0x440] ss:$8 sps:$4 sm:$0xff]   ;;  %v2364_v21 = vld [vmem:[%s3609_s1 + $0x454] ss:$8 sps:$4 sm:$0xff]   ;;  %v2367_v23 = vld [vmem:[%s3609_s1 + $0x450] ss:$8 sps:$4 sm:$0xff]  }
   0x9   :  { %1834 = vmatprep.subr.bf16.mxu0 %v2346_v9  ;;  %v2368_v24 = vld [vmem:[%s3609_s1 + $0x64] ss:$8 sps:$4 sm:$0xff]   ;;  %v2372_v26 = vld [vmem:[%s3609_s1 + $0x60] ss:$8 sps:$4 sm:$0xff]   ;;  %v2374_v28 = vld [vmem:[%s3609_s1 + $0x74] ss:$8 sps:$4 sm:$0xff]  }
   0xa   :  { %v2370_v25 = vld [vmem:[%s3609_s1 + $0x464] ss:$8 sps:$4 sm:$0xff]   ;;  %v2373_v27 = vld [vmem:[%s3609_s1 + $0x460] ss:$8 sps:$4 sm:$0xff]   ;;  %v2376_v29 = vld [vmem:[%s3609_s1 + $0x474] ss:$8 sps:$4 sm:$0xff]  }
   0xb   :  { %1663 = vmatpush1.bf16.msra.mxu1 %v2348_v10  ;;  %v2378_v30 = vld [vmem:[%s3609_s1 + $0x70] ss:$8 sps:$4 sm:$0xff]   ;;  %v2380_v32 = vld [vmem:[%s3609_s1 + $0x84] ss:$8 sps:$4 sm:$0xff]   ;;  %v2384_v34 = vld [vmem:[%s3609_s1 + $0x80] ss:$8 sps:$4 sm:$0xff]  }
   0xc   :  { %1835 = vmatpush1.bf16.msra.mxu0 %v2349_v11  ;;  %1664 = vmatprep.subr.bf16.mxu1 %v2350_v12  ;;  %v2379_v31 = vld [vmem:[%s3609_s1 + $0x470] ss:$8 sps:$4 sm:$0xff]   ;;  %v2382_v33 = vld [vmem:[%s3609_s1 + $0x484] ss:$8 sps:$4 sm:$0xff]   ;;  %v2385_v35 = vld [vmem:[%s3609_s1 + $0x480] ss:$8 sps:$4 sm:$0xff]  }
   0xd   :  { %1836 = vmatprep.subr.bf16.mxu0 %v2352_v13  ;;  %v2386_v36 = vld [vmem:[%s3609_s1 + $0x94] ss:$8 sps:$4 sm:$0xff]   ;;  %v2390_v38 = vld [vmem:[%s3609_s1 + $0x90] ss:$8 sps:$4 sm:$0xff]   ;;  %v2392_v40 = vld [vmem:[%s3609_s1 + $0xa4] ss:$8 sps:$4 sm:$0xff]  }
   0xe   :  { %v2388_v37 = vld [vmem:[%s3609_s1 + $0x494] ss:$8 sps:$4 sm:$0xff]   ;;  %v2391_v39 = vld [vmem:[%s3609_s1 + $0x490] ss:$8 sps:$4 sm:$0xff]   ;;  %v2394_v41 = vld [vmem:[%s3609_s1 + $0x4a4] ss:$8 sps:$4 sm:$0xff]  }
   0xf   :  { %1665 = vmatpush1.bf16.msra.mxu1 %v2354_v14  ;;  %v2396_v42 = vld [vmem:[%s3609_s1 + $0xa0] ss:$8 sps:$4 sm:$0xff]   ;;  %v2398_v44 = vld [vmem:[%s3609_s1 + $0xb4] ss:$8 sps:$4 sm:$0xff]   ;;  %v2402_v46 = vld [vmem:[%s3609_s1 + $0xb0] ss:$8 sps:$4 sm:$0xff]  }
  0x10   :  { %1837 = vmatpush1.bf16.msra.mxu0 %v2355_v15  ;;  %1666 = vmatprep.subr.bf16.mxu1 %v2356_v16  ;;  %v2397_v43 = vld [vmem:[%s3609_s1 + $0x4a0] ss:$8 sps:$4 sm:$0xff]   ;;  %v2400_v45 = vld [vmem:[%s3609_s1 + $0x4b4] ss:$8 sps:$4 sm:$0xff]   ;;  %v2403_v47 = vld [vmem:[%s3609_s1 + $0x4b0] ss:$8 sps:$4 sm:$0xff]  }
  0x11   :  { %1838 = vmatprep.subr.bf16.mxu0 %v2358_v17  ;;  %v14_v48 = vld [vmem:[%s3610_s0] sm:$0xff]  ;;  %v2410_v58 = vld [vmem:[%s3609_s1 + $0xd4] ss:$8 sps:$4 sm:$0xff]   ;;  %v2414_v60 = vld [vmem:[%s3609_s1 + $0xd0] ss:$8 sps:$4 sm:$0xff]  }
  0x12   :  { %v22_v49 = vld [vmem:[%s3610_s0 + $0x40] sm:$0xff]  ;;  %v2412_v59 = vld [vmem:[%s3609_s1 + $0x4d4] ss:$8 sps:$4 sm:$0xff]   ;;  %v2415_v61 = vld [vmem:[%s3609_s1 + $0x4d0] ss:$8 sps:$4 sm:$0xff]  }
  0x13   :  { %1667 = vmatpush1.bf16.msra.mxu1 %v2360_v18  ;;  %v2404_v50 = vld [vmem:[%s3609_s1 + $0xc4] ss:$8 sps:$4 sm:$0xff]   ;;  %v2025_v52 = vcombine.high %v14_v48, %v22_v49  ;;  %v2408_v56 = vld [vmem:[%s3609_s1 + $0xc0] ss:$8 sps:$4 sm:$0xff]   ;;  %v2422_v2 = vld [vmem:[%s3609_s1 + $0xf4] ss:$8 sps:$4 sm:$0xff]   ;;  %v2024_v8 = vcombine.low %v14_v48, %v22_v49 }
  0x14   :  { %1839 = vmatpush1.bf16.msra.mxu0 %v2361_v19  ;;  %1668 = vmatprep.subr.bf16.mxu1 %v2362_v20  ;;  %v2406_v51 = vld [vmem:[%s3609_s1 + $0x4c4] ss:$8 sps:$4 sm:$0xff]   ;;  %v2409_v57 = vld [vmem:[%s3609_s1 + $0x4c0] ss:$8 sps:$4 sm:$0xff]   ;;  %v2424_v3 = vld [vmem:[%s3609_s1 + $0x4f4] ss:$8 sps:$4 sm:$0xff]  }
  0x15   :  { %1840 = vmatprep.subr.bf16.mxu0 %v2364_v21  ;;  %v18_v53 = vld [vmem:[%s3610_s0 + $0x20] sm:$0xff]  ;;  %1690 = vmatprep.mubr.bf16.mxu1 %v2025_v52  ;;  %v2426_v4 = vld [vmem:[%s3609_s1 + $0xf0] ss:$8 sps:$4 sm:$0xff]   ;;  %v2436_v12 = vld [vmem:[%s3609_s1 + $0x114] ss:$8 sps:$4 sm:$0xff]  }
  0x16   :  { %v26_v54 = vld [vmem:[%s3610_s0 + $0x60] sm:$0xff]  ;;  %v2427_v5 = vld [vmem:[%s3609_s1 + $0x4f0] ss:$8 sps:$4 sm:$0xff]   ;;  %v2439_v13 = vld [vmem:[%s3609_s1 + $0x514] ss:$8 sps:$4 sm:$0xff]  }
  0x17   :  { %1669 = vmatpush1.bf16.msra.mxu1 %v2366_v22  ;;  %v2033_v55 = vcombine.high %v18_v53, %v26_v54  ;;  %v2416_v62 = vld [vmem:[%s3609_s1 + $0xe4] ss:$8 sps:$4 sm:$0xff]   ;;  %v2420_v0 = vld [vmem:[%s3609_s1 + $0xe0] ss:$8 sps:$4 sm:$0xff]   ;;  %v2032_v10 = vcombine.low %v18_v53, %v26_v54  ;;  %v2434_v14 = vld [vmem:[%s3609_s1 + $0x110] ss:$8 sps:$4 sm:$0xff]  }
  0x18   :  { %1841 = vmatpush1.bf16.msra.mxu0 %v2367_v23  ;;  %1670 = vmatprep.subr.bf16.mxu1 %v2368_v24  ;;  %v2418_v63 = vld [vmem:[%s3609_s1 + $0x4e4] ss:$8 sps:$4 sm:$0xff]   ;;  %v2421_v1 = vld [vmem:[%s3609_s1 + $0x4e0] ss:$8 sps:$4 sm:$0xff]   ;;  %v2437_v15 = vld [vmem:[%s3609_s1 + $0x510] ss:$8 sps:$4 sm:$0xff]  }
  0x19   :  { %1842 = vmatprep.subr.bf16.mxu0 %v2370_v25  ;;  %1862 = vmatprep.mubr.bf16.mxu0 %v2033_v55  ;;  %v2430_v6 = vld [vmem:[%s3609_s1 + $0x104] ss:$8 sps:$4 sm:$0xff]   ;;  %v2428_v9 = vld [vmem:[%s3609_s1 + $0x100] ss:$8 sps:$4 sm:$0xff]   ;;  %v2448_v20 = vld [vmem:[%s3609_s1 + $0x134] ss:$8 sps:$4 sm:$0xff]  }
  0x1a   :  { %v2433_v7 = vld [vmem:[%s3609_s1 + $0x504] ss:$8 sps:$4 sm:$0xff]   ;;  %v2431_v11 = vld [vmem:[%s3609_s1 + $0x500] ss:$8 sps:$4 sm:$0xff]   ;;  %v2451_v21 = vld [vmem:[%s3609_s1 + $0x534] ss:$8 sps:$4 sm:$0xff]  }
  0x1b   :  { %1671 = vmatpush1.bf16.msra.mxu1 %v2372_v26  ;;  %v2442_v16 = vld [vmem:[%s3609_s1 + $0x124] ss:$8 sps:$4 sm:$0xff]   ;;  %v2440_v18 = vld [vmem:[%s3609_s1 + $0x120] ss:$8 sps:$4 sm:$0xff]   ;;  %v2446_v22 = vld [vmem:[%s3609_s1 + $0x130] ss:$8 sps:$4 sm:$0xff]  }
  0x1c   :  { %1843 = vmatpush1.bf16.msra.mxu0 %v2373_v27  ;;  %1672 = vmatprep.subr.bf16.mxu1 %v2374_v28  ;;  %v2445_v17 = vld [vmem:[%s3609_s1 + $0x524] ss:$8 sps:$4 sm:$0xff]   ;;  %v2443_v19 = vld [vmem:[%s3609_s1 + $0x520] ss:$8 sps:$4 sm:$0xff]   ;;  %v2449_v23 = vld [vmem:[%s3609_s1 + $0x530] ss:$8 sps:$4 sm:$0xff]  }
  0x1d   :  { %1844 = vmatprep.subr.bf16.mxu0 %v2376_v29  ;;  %v2454_v24 = vld [vmem:[%s3609_s1 + $0x144] ss:$8 sps:$4 sm:$0xff]   ;;  %v2452_v26 = vld [vmem:[%s3609_s1 + $0x140] ss:$8 sps:$4 sm:$0xff]   ;;  %v2460_v28 = vld [vmem:[%s3609_s1 + $0x154] ss:$8 sps:$4 sm:$0xff]  }
  0x1e   :  { %v2457_v25 = vld [vmem:[%s3609_s1 + $0x544] ss:$8 sps:$4 sm:$0xff]   ;;  %v2455_v27 = vld [vmem:[%s3609_s1 + $0x540] ss:$8 sps:$4 sm:$0xff]   ;;  %v2463_v29 = vld [vmem:[%s3609_s1 + $0x554] ss:$8 sps:$4 sm:$0xff]  }
  0x1f   :  { %1673 = vmatpush1.bf16.msra.mxu1 %v2378_v30  ;;  %v2458_v30 = vld [vmem:[%s3609_s1 + $0x150] ss:$8 sps:$4 sm:$0xff]   ;;  %v2476_v48 = vld [vmem:[%s3609_s1 + $0x180] ss:$8 sps:$4 sm:$0xff]   ;;  %v2490_v54 = vld [vmem:[%s3609_s1 + $0x1a4] ss:$8 sps:$4 sm:$0xff]  }
  0x20   :  { %1845 = vmatpush1.bf16.msra.mxu0 %v2379_v31  ;;  %1674 = vmatprep.subr.bf16.mxu1 %v2380_v32  ;;  %v2461_v31 = vld [vmem:[%s3609_s1 + $0x550] ss:$8 sps:$4 sm:$0xff]   ;;  %v2466_v32 = vld [vmem:[%s3609_s1 + $0x164] ss:$8 sps:$4 sm:$0xff]   ;;  %v2479_v49 = vld [vmem:[%s3609_s1 + $0x580] ss:$8 sps:$4 sm:$0xff]  }
  0x21   :  { %1846 = vmatprep.subr.bf16.mxu0 %v2382_v33  ;;  %v2469_v33 = vld [vmem:[%s3609_s1 + $0x564] ss:$8 sps:$4 sm:$0xff]   ;;  %v2482_v52 = vld [vmem:[%s3609_s1 + $0x190] ss:$8 sps:$4 sm:$0xff]  }
  0x22   :  { %v2485_v53 = vld [vmem:[%s3609_s1 + $0x590] ss:$8 sps:$4 sm:$0xff]   ;;  %v2493_v55 = vld [vmem:[%s3609_s1 + $0x5a4] ss:$8 sps:$4 sm:$0xff]  }
  0x23   :  { %1675 = vmatpush1.bf16.msra.mxu1 %v2384_v34  ;;  %v2464_v34 = vld [vmem:[%s3609_s1 + $0x160] ss:$8 sps:$4 sm:$0xff]  }
  0x24   :  { %1847 = vmatpush1.bf16.msra.mxu0 %v2385_v35  ;;  %1676 = vmatprep.subr.bf16.mxu1 %v2386_v36  ;;  %v2467_v35 = vld [vmem:[%s3609_s1 + $0x560] ss:$8 sps:$4 sm:$0xff]  }
  0x25   :  { %1848 = vmatprep.subr.bf16.mxu0 %v2388_v37  ;;  %v3027_v36 = vld [vmem:[%s3610_s0 + $0x8] sm:$0xff] }
  0x26   :  { %v3032_v37 = vld [vmem:[%s3610_s0 + $0x48] sm:$0xff] }
  0x27   :  { %1677 = vmatpush1.bf16.msra.mxu1 %v2390_v38  ;;  %v2472_v38 = vld [vmem:[%s3609_s1 + $0x174] ss:$8 sps:$4 sm:$0xff]  }
  0x28   :  { %1849 = vmatpush1.bf16.msra.mxu0 %v2391_v39  ;;  %1678 = vmatprep.subr.bf16.mxu1 %v2392_v40  ;;  %v2475_v39 = vld [vmem:[%s3609_s1 + $0x574] ss:$8 sps:$4 sm:$0xff]   ;;  %v2027_v40 = vcombine.high %v3027_v36, %v3032_v37 }
  0x29   :  { %1850 = vmatprep.subr.bf16.mxu0 %v2394_v41  ;;  %v3045_v41 = vld [vmem:[%s3610_s0 + $0x28] sm:$0xff] }
  0x2b   :  { %1679 = vmatpush1.bf16.msra.mxu1 %v2396_v42  ;;  %v3050_v42 = vld [vmem:[%s3610_s0 + $0x68] sm:$0xff] }
  0x2c   :  { %1851 = vmatpush1.bf16.msra.mxu0 %v2397_v43  ;;  %1680 = vmatprep.subr.bf16.mxu1 %v2398_v44  ;;  %v2035_v43 = vcombine.high %v3045_v41, %v3050_v42  ;;  %v2470_v44 = vld [vmem:[%s3609_s1 + $0x170] ss:$8 sps:$4 sm:$0xff]  }
  0x2d   :  { %1852 = vmatprep.subr.bf16.mxu0 %v2400_v45  ;;  %v2473_v45 = vld [vmem:[%s3609_s1 + $0x570] ss:$8 sps:$4 sm:$0xff]  }
  0x2f   :  { %1681 = vmatpush1.bf16.msra.mxu1 %v2402_v46  ;;  %v2478_v46 = vld [vmem:[%s3609_s1 + $0x184] ss:$8 sps:$4 sm:$0xff]  }
  0x30   :  { %1853 = vmatpush1.bf16.msra.mxu0 %v2403_v47  ;;  %1682 = vmatprep.subr.bf16.mxu1 %v2404_v50  ;;  %v2481_v47 = vld [vmem:[%s3609_s1 + $0x584] ss:$8 sps:$4 sm:$0xff]   ;;  %v2484_v50 = vld [vmem:[%s3609_s1 + $0x194] ss:$8 sps:$4 sm:$0xff]  }
  0x31   :  { %1854 = vmatprep.subr.bf16.mxu0 %v2406_v51  ;;  %v2487_v51 = vld [vmem:[%s3609_s1 + $0x594] ss:$8 sps:$4 sm:$0xff]  }
  0x33   :  { %1683 = vmatpush1.bf16.msra.mxu1 %v2408_v56  ;;  %v2488_v56 = vld [vmem:[%s3609_s1 + $0x1a0] ss:$8 sps:$4 sm:$0xff]  }
  0x34   :  { %1855 = vmatpush1.bf16.msra.mxu0 %v2409_v57  ;;  %1684 = vmatprep.subr.bf16.mxu1 %v2410_v58  ;;  %v2491_v57 = vld [vmem:[%s3609_s1 + $0x5a0] ss:$8 sps:$4 sm:$0xff]   ;;  %v2496_v58 = vld [vmem:[%s3609_s1 + $0x1b4] ss:$8 sps:$4 sm:$0xff]  }
  0x35   :  { %1856 = vmatprep.subr.bf16.mxu0 %v2412_v59  ;;  %v2499_v59 = vld [vmem:[%s3609_s1 + $0x5b4] ss:$8 sps:$4 sm:$0xff]  }
  0x37   :  { %1685 = vmatpush1.bf16.msra.mxu1 %v2414_v60  ;;  %v2494_v60 = vld [vmem:[%s3609_s1 + $0x1b0] ss:$8 sps:$4 sm:$0xff]  }
  0x38   :  { %1857 = vmatpush1.bf16.msra.mxu0 %v2415_v61  ;;  %1686 = vmatprep.subr.bf16.mxu1 %v2416_v62  ;;  %v2497_v61 = vld [vmem:[%s3609_s1 + $0x5b0] ss:$8 sps:$4 sm:$0xff]   ;;  %v2502_v62 = vld [vmem:[%s3609_s1 + $0x1c4] ss:$8 sps:$4 sm:$0xff]  }
  0x39   :  { %1858 = vmatprep.subr.bf16.mxu0 %v2418_v63  ;;  %v2505_v63 = vld [vmem:[%s3609_s1 + $0x5c4] ss:$8 sps:$4 sm:$0xff]  }
  0x3b   :  { %1687 = vmatpush1.bf16.msra.mxu1 %v2420_v0  ;;  %v2500_v0 = vld [vmem:[%s3609_s1 + $0x1c0] ss:$8 sps:$4 sm:$0xff]  }
  0x3c   :  { %1859 = vmatpush1.bf16.msra.mxu0 %v2421_v1  ;;  %1688 = vmatprep.subr.bf16.mxu1 %v2422_v2  ;;  %v2503_v1 = vld [vmem:[%s3609_s1 + $0x5c0] ss:$8 sps:$4 sm:$0xff]   ;;  %v2508_v2 = vld [vmem:[%s3609_s1 + $0x1d4] ss:$8 sps:$4 sm:$0xff]  }
  0x3d   :  { %1860 = vmatprep.subr.bf16.mxu0 %v2424_v3  ;;  %v2511_v3 = vld [vmem:[%s3609_s1 + $0x5d4] ss:$8 sps:$4 sm:$0xff]  }
  0x3f   :  { %1689 = vmatpush1.bf16.msra.mxu1 %v2426_v4  ;;  %v2506_v4 = vld [vmem:[%s3609_s1 + $0x1d0] ss:$8 sps:$4 sm:$0xff]  }
  0x40   :  { %1861 = vmatpush1.bf16.msra.mxu0 %v2427_v5  ;;  %1701 = vmatprep.subr.bf16.mxu1 %v2430_v6  ;;  %v2509_v5 = vld [vmem:[%s3609_s1 + $0x5d0] ss:$8 sps:$4 sm:$0xff]   ;;  %v2514_v6 = vld [vmem:[%s3609_s1 + $0x1e4] ss:$8 sps:$4 sm:$0xff]  }
  0x41   :  { %1873 = vmatprep.subr.bf16.mxu0 %v2433_v7  ;;  %v2517_v7 = vld [vmem:[%s3609_s1 + $0x5e4] ss:$8 sps:$4 sm:$0xff]  }
  0x42   :  { %1691 = vmatmul.mubr.bf16.vlgmr.msra.gmra.mrb[0].mxu1 %v2024_v8  ;;  %v2512_v8 = vld [vmem:[%s3609_s1 + $0x1e0] ss:$8 sps:$4 sm:$0xff]  }
  0x43   :  { %1863 = vmatmul.mubr.bf16.vlgmr.msra.gmra.mrb[0].mxu0 %v2032_v10  ;;  %1702 = vmatpush1.bf16.msra.mxu1 %v2428_v9  ;;  %v2515_v9 = vld [vmem:[%s3609_s1 + $0x5e0] ss:$8 sps:$4 sm:$0xff]   ;;  %v2520_v10 = vld [vmem:[%s3609_s1 + $0x1f4] ss:$8 sps:$4 sm:$0xff]  }
  0x44   :  { %1874 = vmatpush1.bf16.msra.mxu0 %v2431_v11  ;;  %1703 = vmatprep.subr.bf16.mxu1 %v2436_v12  ;;  %v2523_v11 = vld [vmem:[%s3609_s1 + $0x5f4] ss:$8 sps:$4 sm:$0xff]   ;;  %v2518_v12 = vld [vmem:[%s3609_s1 + $0x1f0] ss:$8 sps:$4 sm:$0xff]  }
  0x45   :  { %1875 = vmatprep.subr.bf16.mxu0 %v2439_v13  ;;  %1733 = vmatprep.mubr.bf16.mxu1 %v2027_v40  ;;  %v2521_v13 = vld [vmem:[%s3609_s1 + $0x5f0] ss:$8 sps:$4 sm:$0xff]   ;;  %v2548_v40 = vld [vmem:[%s3609_s1 + $0x240] ss:$8 sps:$4 sm:$0xff]  }
  0x46   :  { %1905 = vmatprep.mubr.bf16.mxu0 %v2035_v43  ;;  %v2559_v43 = vld [vmem:[%s3609_s1 + $0x654] ss:$8 sps:$4 sm:$0xff]  }
  0x47   :  { %1704 = vmatpush1.bf16.msra.mxu1 %v2434_v14  ;;  %v2526_v14 = vld [vmem:[%s3609_s1 + $0x204] ss:$8 sps:$4 sm:$0xff]  }
  0x48   :  { %1876 = vmatpush1.bf16.msra.mxu0 %v2437_v15  ;;  %1705 = vmatprep.subr.bf16.mxu1 %v2442_v16  ;;  %v2529_v15 = vld [vmem:[%s3609_s1 + $0x604] ss:$8 sps:$4 sm:$0xff]   ;;  %v2026_v16 = vcombine.low %v3027_v36, %v3032_v37  ;;  %v2542_v36 = vld [vmem:[%s3609_s1 + $0x230] ss:$8 sps:$4 sm:$0xff]  }
  0x49   :  { %1877 = vmatprep.subr.bf16.mxu0 %v2445_v17  ;;  %v2524_v17 = vld [vmem:[%s3609_s1 + $0x200] ss:$8 sps:$4 sm:$0xff]   ;;  %v2545_v37 = vld [vmem:[%s3609_s1 + $0x630] ss:$8 sps:$4 sm:$0xff]  }
  0x4b   :  { %1706 = vmatpush1.bf16.msra.mxu1 %v2440_v18  ;;  %v2034_v18 = vcombine.low %v3045_v41, %v3050_v42  ;;  %v2551_v41 = vld [vmem:[%s3609_s1 + $0x640] ss:$8 sps:$4 sm:$0xff]   ;;  %v2556_v42 = vld [vmem:[%s3609_s1 + $0x254] ss:$8 sps:$4 sm:$0xff]  }
  0x4c   :  { %1878 = vmatpush1.bf16.msra.mxu0 %v2443_v19  ;;  %1707 = vmatprep.subr.bf16.mxu1 %v2448_v20  ;;  %v2527_v19 = vld [vmem:[%s3609_s1 + $0x600] ss:$8 sps:$4 sm:$0xff]   ;;  %v2532_v20 = vld [vmem:[%s3609_s1 + $0x214] ss:$8 sps:$4 sm:$0xff]  }
  0x4d   :  { %1879 = vmatprep.subr.bf16.mxu0 %v2451_v21  ;;  %v2535_v21 = vld [vmem:[%s3609_s1 + $0x614] ss:$8 sps:$4 sm:$0xff]  }
  0x4f   :  { %1708 = vmatpush1.bf16.msra.mxu1 %v2446_v22  ;;  %v2530_v22 = vld [vmem:[%s3609_s1 + $0x210] ss:$8 sps:$4 sm:$0xff]  }
  0x50   :  { %1880 = vmatpush1.bf16.msra.mxu0 %v2449_v23  ;;  %1709 = vmatprep.subr.bf16.mxu1 %v2454_v24  ;;  %v2533_v23 = vld [vmem:[%s3609_s1 + $0x610] ss:$8 sps:$4 sm:$0xff]  }
  0x51   :  { %1881 = vmatprep.subr.bf16.mxu0 %v2457_v25  ;;  %v3187_v24 = vld [vmem:[%s3610_s0 + $0x10] sm:$0xff] }
  0x52   :  { %v3192_v25 = vld [vmem:[%s3610_s0 + $0x50] sm:$0xff] }
  0x53   :  { %1710 = vmatpush1.bf16.msra.mxu1 %v2452_v26  ;;  %v2538_v26 = vld [vmem:[%s3609_s1 + $0x224] ss:$8 sps:$4 sm:$0xff]  }
  0x54   :  { %1882 = vmatpush1.bf16.msra.mxu0 %v2455_v27  ;;  %1711 = vmatprep.subr.bf16.mxu1 %v2460_v28  ;;  %v2541_v27 = vld [vmem:[%s3609_s1 + $0x624] ss:$8 sps:$4 sm:$0xff]   ;;  %v2029_v28 = vcombine.high %v3187_v24, %v3192_v25 }
  0x55   :  { %1883 = vmatprep.subr.bf16.mxu0 %v2463_v29  ;;  %v3205_v29 = vld [vmem:[%s3610_s0 + $0x30] sm:$0xff] }
  0x57   :  { %1712 = vmatpush1.bf16.msra.mxu1 %v2458_v30  ;;  %v3210_v30 = vld [vmem:[%s3610_s0 + $0x70] sm:$0xff] }
  0x58   :  { %1884 = vmatpush1.bf16.msra.mxu0 %v2461_v31  ;;  %1713 = vmatprep.subr.bf16.mxu1 %v2466_v32  ;;  %v2037_v31 = vcombine.high %v3205_v29, %v3210_v30  ;;  %v2536_v32 = vld [vmem:[%s3609_s1 + $0x220] ss:$8 sps:$4 sm:$0xff]  }
  0x59   :  { %1885 = vmatprep.subr.bf16.mxu0 %v2469_v33  ;;  %v2539_v33 = vld [vmem:[%s3609_s1 + $0x620] ss:$8 sps:$4 sm:$0xff]  }
  0x5b   :  { %1714 = vmatpush1.bf16.msra.mxu1 %v2464_v34  ;;  %v2544_v34 = vld [vmem:[%s3609_s1 + $0x234] ss:$8 sps:$4 sm:$0xff]  }
  0x5c   :  { %1886 = vmatpush1.bf16.msra.mxu0 %v2467_v35  ;;  %1715 = vmatprep.subr.bf16.mxu1 %v2472_v38  ;;  %v2547_v35 = vld [vmem:[%s3609_s1 + $0x634] ss:$8 sps:$4 sm:$0xff]   ;;  %v2550_v38 = vld [vmem:[%s3609_s1 + $0x244] ss:$8 sps:$4 sm:$0xff]  }
  0x5d   :  { %1887 = vmatprep.subr.bf16.mxu0 %v2475_v39  ;;  %v2553_v39 = vld [vmem:[%s3609_s1 + $0x644] ss:$8 sps:$4 sm:$0xff]  }
  0x5f   :  { %1716 = vmatpush1.bf16.msra.mxu1 %v2470_v44  ;;  %v2554_v44 = vld [vmem:[%s3609_s1 + $0x250] ss:$8 sps:$4 sm:$0xff]  }
  0x60   :  { %1888 = vmatpush1.bf16.msra.mxu0 %v2473_v45  ;;  %1717 = vmatprep.subr.bf16.mxu1 %v2478_v46  ;;  %v2557_v45 = vld [vmem:[%s3609_s1 + $0x650] ss:$8 sps:$4 sm:$0xff]   ;;  %v2562_v46 = vld [vmem:[%s3609_s1 + $0x264] ss:$8 sps:$4 sm:$0xff]  }
  0x61   :  { %1889 = vmatprep.subr.bf16.mxu0 %v2481_v47  ;;  %v2565_v47 = vld [vmem:[%s3609_s1 + $0x664] ss:$8 sps:$4 sm:$0xff]  }
  0x63   :  { %1718 = vmatpush1.bf16.msra.mxu1 %v2476_v48  ;;  %v2560_v48 = vld [vmem:[%s3609_s1 + $0x260] ss:$8 sps:$4 sm:$0xff]  }
  0x64   :  { %1890 = vmatpush1.bf16.msra.mxu0 %v2479_v49  ;;  %1719 = vmatprep.subr.bf16.mxu1 %v2484_v50  ;;  %v2563_v49 = vld [vmem:[%s3609_s1 + $0x660] ss:$8 sps:$4 sm:$0xff]   ;;  %v2568_v50 = vld [vmem:[%s3609_s1 + $0x274] ss:$8 sps:$4 sm:$0xff]  }
  0x65   :  { %1891 = vmatprep.subr.bf16.mxu0 %v2487_v51  ;;  %v2571_v51 = vld [vmem:[%s3609_s1 + $0x674] ss:$8 sps:$4 sm:$0xff]  }
  0x67   :  { %1720 = vmatpush1.bf16.msra.mxu1 %v2482_v52  ;;  %v2566_v52 = vld [vmem:[%s3609_s1 + $0x270] ss:$8 sps:$4 sm:$0xff]  }
  0x68   :  { %1892 = vmatpush1.bf16.msra.mxu0 %v2485_v53  ;;  %1721 = vmatprep.subr.bf16.mxu1 %v2490_v54  ;;  %v2569_v53 = vld [vmem:[%s3609_s1 + $0x670] ss:$8 sps:$4 sm:$0xff]   ;;  %v2574_v54 = vld [vmem:[%s3609_s1 + $0x284] ss:$8 sps:$4 sm:$0xff]  }
  0x69   :  { %1893 = vmatprep.subr.bf16.mxu0 %v2493_v55  ;;  %v2577_v55 = vld [vmem:[%s3609_s1 + $0x684] ss:$8 sps:$4 sm:$0xff]  }
  0x6b   :  { %1722 = vmatpush1.bf16.msra.mxu1 %v2488_v56  ;;  %v2572_v56 = vld [vmem:[%s3609_s1 + $0x280] ss:$8 sps:$4 sm:$0xff]  }
  0x6c   :  { %1894 = vmatpush1.bf16.msra.mxu0 %v2491_v57  ;;  %1723 = vmatprep.subr.bf16.mxu1 %v2496_v58  ;;  %v2575_v57 = vld [vmem:[%s3609_s1 + $0x680] ss:$8 sps:$4 sm:$0xff]   ;;  %v2580_v58 = vld [vmem:[%s3609_s1 + $0x294] ss:$8 sps:$4 sm:$0xff]  }
  0x6d   :  { %1895 = vmatprep.subr.bf16.mxu0 %v2499_v59  ;;  %v2583_v59 = vld [vmem:[%s3609_s1 + $0x694] ss:$8 sps:$4 sm:$0xff]  }
  0x6f   :  { %1724 = vmatpush1.bf16.msra.mxu1 %v2494_v60  ;;  %v2578_v60 = vld [vmem:[%s3609_s1 + $0x290] ss:$8 sps:$4 sm:$0xff]  }
  0x70   :  { %1896 = vmatpush1.bf16.msra.mxu0 %v2497_v61  ;;  %1725 = vmatprep.subr.bf16.mxu1 %v2502_v62  ;;  %v2581_v61 = vld [vmem:[%s3609_s1 + $0x690] ss:$8 sps:$4 sm:$0xff]   ;;  %v2586_v62 = vld [vmem:[%s3609_s1 + $0x2a4] ss:$8 sps:$4 sm:$0xff]  }
  0x71   :  { %1897 = vmatprep.subr.bf16.mxu0 %v2505_v63  ;;  %v2589_v63 = vld [vmem:[%s3609_s1 + $0x6a4] ss:$8 sps:$4 sm:$0xff]  }
  0x73   :  { %1726 = vmatpush1.bf16.msra.mxu1 %v2500_v0  ;;  %v2584_v0 = vld [vmem:[%s3609_s1 + $0x2a0] ss:$8 sps:$4 sm:$0xff]  }
  0x74   :  { %1898 = vmatpush1.bf16.msra.mxu0 %v2503_v1  ;;  %1727 = vmatprep.subr.bf16.mxu1 %v2508_v2  ;;  %v2587_v1 = vld [vmem:[%s3609_s1 + $0x6a0] ss:$8 sps:$4 sm:$0xff]   ;;  %v2592_v2 = vld [vmem:[%s3609_s1 + $0x2b4] ss:$8 sps:$4 sm:$0xff]  }
  0x75   :  { %1899 = vmatprep.subr.bf16.mxu0 %v2511_v3  ;;  %v2595_v3 = vld [vmem:[%s3609_s1 + $0x6b4] ss:$8 sps:$4 sm:$0xff]  }
  0x77   :  { %1728 = vmatpush1.bf16.msra.mxu1 %v2506_v4  ;;  %v2590_v4 = vld [vmem:[%s3609_s1 + $0x2b0] ss:$8 sps:$4 sm:$0xff]  }
  0x78   :  { %1900 = vmatpush1.bf16.msra.mxu0 %v2509_v5  ;;  %1729 = vmatprep.subr.bf16.mxu1 %v2514_v6  ;;  %v2593_v5 = vld [vmem:[%s3609_s1 + $0x6b0] ss:$8 sps:$4 sm:$0xff]   ;;  %v2598_v6 = vld [vmem:[%s3609_s1 + $0x2c4] ss:$8 sps:$4 sm:$0xff]  }
  0x79   :  { %1901 = vmatprep.subr.bf16.mxu0 %v2517_v7  ;;  %v2601_v7 = vld [vmem:[%s3609_s1 + $0x6c4] ss:$8 sps:$4 sm:$0xff]  }
  0x7b   :  { %1730 = vmatpush1.bf16.msra.mxu1 %v2512_v8  ;;  %v2596_v8 = vld [vmem:[%s3609_s1 + $0x2c0] ss:$8 sps:$4 sm:$0xff]  }
  0x7c   :  { %1902 = vmatpush1.bf16.msra.mxu0 %v2515_v9  ;;  %1731 = vmatprep.subr.bf16.mxu1 %v2520_v10  ;;  %v2599_v9 = vld [vmem:[%s3609_s1 + $0x6c0] ss:$8 sps:$4 sm:$0xff]   ;;  %v2604_v10 = vld [vmem:[%s3609_s1 + $0x2d4] ss:$8 sps:$4 sm:$0xff]  }
  0x7d   :  { %1903 = vmatprep.subr.bf16.mxu0 %v2523_v11  ;;  %v2607_v11 = vld [vmem:[%s3609_s1 + $0x6d4] ss:$8 sps:$4 sm:$0xff]  }
  0x7f   :  { %1732 = vmatpush1.bf16.msra.mxu1 %v2518_v12  ;;  %v2602_v12 = vld [vmem:[%s3609_s1 + $0x2d0] ss:$8 sps:$4 sm:$0xff]  }
  0x80   :  { %1904 = vmatpush1.bf16.msra.mxu0 %v2521_v13  ;;  %1744 = vmatprep.subr.bf16.mxu1 %v2526_v14  ;;  %v2605_v13 = vld [vmem:[%s3609_s1 + $0x6d0] ss:$8 sps:$4 sm:$0xff]   ;;  %v2610_v14 = vld [vmem:[%s3609_s1 + $0x2e4] ss:$8 sps:$4 sm:$0xff]  }
  0x81   :  { %1916 = vmatprep.subr.bf16.mxu0 %v2529_v15  ;;  %v2613_v15 = vld [vmem:[%s3609_s1 + $0x6e4] ss:$8 sps:$4 sm:$0xff]  }
  0x82   :  { %1734 = vmatmul.mubr.bf16.vlgmr.msra.gmra.mrb[0].mxu1 %v2026_v16  ;;  %v2608_v16 = vld [vmem:[%s3609_s1 + $0x2e0] ss:$8 sps:$4 sm:$0xff]  }
  0x83   :  { %1906 = vmatmul.mubr.bf16.vlgmr.msra.gmra.mrb[0].mxu0 %v2034_v18  ;;  %1745 = vmatpush1.bf16.msra.mxu1 %v2524_v17  ;;  %v2611_v17 = vld [vmem:[%s3609_s1 + $0x6e0] ss:$8 sps:$4 sm:$0xff]   ;;  %v2616_v18 = vld [vmem:[%s3609_s1 + $0x2f4] ss:$8 sps:$4 sm:$0xff]  }
  0x84   :  { %1917 = vmatpush1.bf16.msra.mxu0 %v2527_v19  ;;  %1746 = vmatprep.subr.bf16.mxu1 %v2532_v20  ;;  %v2619_v19 = vld [vmem:[%s3609_s1 + $0x6f4] ss:$8 sps:$4 sm:$0xff]   ;;  %v2614_v20 = vld [vmem:[%s3609_s1 + $0x2f0] ss:$8 sps:$4 sm:$0xff]  }
  0x85   :  { %1918 = vmatprep.subr.bf16.mxu0 %v2535_v21  ;;  %1776 = vmatprep.mubr.bf16.mxu1 %v2029_v28  ;;  %v2617_v21 = vld [vmem:[%s3609_s1 + $0x6f0] ss:$8 sps:$4 sm:$0xff]   ;;  %v2036_v28 = vcombine.low %v3205_v29, %v3210_v30  ;;  %v2628_v29 = vld [vmem:[%s3609_s1 + $0x314] ss:$8 sps:$4 sm:$0xff]  }
  0x86   :  { %1948 = vmatprep.mubr.bf16.mxu0 %v2037_v31  ;;  %v3394_v31 = vld [vmem:[%s3610_s0 + $0x58] sm:$0xff] }
  0x87   :  { %1747 = vmatpush1.bf16.msra.mxu1 %v2530_v22  ;;  %v2622_v22 = vld [vmem:[%s3609_s1 + $0x304] ss:$8 sps:$4 sm:$0xff]   ;;  %v2631_v30 = vld [vmem:[%s3609_s1 + $0x714] ss:$8 sps:$4 sm:$0xff]  }
  0x88   :  { %1919 = vmatpush1.bf16.msra.mxu0 %v2533_v23  ;;  %1748 = vmatprep.subr.bf16.mxu1 %v2538_v26  ;;  %v2625_v23 = vld [vmem:[%s3609_s1 + $0x704] ss:$8 sps:$4 sm:$0xff]   ;;  %v3385_v26 = vld [vmem:[%s3610_s0 + $0x18] sm:$0xff] }
  0x89   :  { %1920 = vmatprep.subr.bf16.mxu0 %v2541_v27  ;;  %v2028_v27 = vcombine.low %v3187_v24, %v3192_v25  ;;  %v2620_v24 = vld [vmem:[%s3609_s1 + $0x300] ss:$8 sps:$4 sm:$0xff]  }
  0x8a   :  { %v2623_v25 = vld [vmem:[%s3609_s1 + $0x700] ss:$8 sps:$4 sm:$0xff]  }
  0x8b   :  { %1749 = vmatpush1.bf16.msra.mxu1 %v2536_v32  ;;  %v3399_v32 = vld [vmem:[%s3610_s0 + $0x38] sm:$0xff] }
  0x8c   :  { %1921 = vmatpush1.bf16.msra.mxu0 %v2539_v33  ;;  %1750 = vmatprep.subr.bf16.mxu1 %v2544_v34  ;;  %v3404_v33 = vld [vmem:[%s3610_s0 + $0x78] sm:$0xff]  ;;  %v2031_v34 = vcombine.high %v3385_v26, %v3394_v31 }
  0x8d   :  { %1922 = vmatprep.subr.bf16.mxu0 %v2547_v35  ;;  %v2039_v35 = vcombine.high %v3399_v32, %v3404_v33 }
  0x8f   :  { %1751 = vmatpush1.bf16.msra.mxu1 %v2542_v36  ;;  %v2626_v36 = vld [vmem:[%s3609_s1 + $0x310] ss:$8 sps:$4 sm:$0xff]  }
  0x90   :  { %1923 = vmatpush1.bf16.msra.mxu0 %v2545_v37  ;;  %1752 = vmatprep.subr.bf16.mxu1 %v2550_v38  ;;  %v2629_v37 = vld [vmem:[%s3609_s1 + $0x710] ss:$8 sps:$4 sm:$0xff]   ;;  %v2634_v38 = vld [vmem:[%s3609_s1 + $0x324] ss:$8 sps:$4 sm:$0xff]  }
  0x91   :  { %1924 = vmatprep.subr.bf16.mxu0 %v2553_v39  ;;  %v2637_v39 = vld [vmem:[%s3609_s1 + $0x724] ss:$8 sps:$4 sm:$0xff]  }
  0x93   :  { %1753 = vmatpush1.bf16.msra.mxu1 %v2548_v40  ;;  %v2632_v40 = vld [vmem:[%s3609_s1 + $0x320] ss:$8 sps:$4 sm:$0xff]  }
  0x94   :  { %1925 = vmatpush1.bf16.msra.mxu0 %v2551_v41  ;;  %1754 = vmatprep.subr.bf16.mxu1 %v2556_v42  ;;  %v2635_v41 = vld [vmem:[%s3609_s1 + $0x720] ss:$8 sps:$4 sm:$0xff]   ;;  %v2640_v42 = vld [vmem:[%s3609_s1 + $0x334] ss:$8 sps:$4 sm:$0xff]  }
  0x95   :  { %1926 = vmatprep.subr.bf16.mxu0 %v2559_v43  ;;  %v2643_v43 = vld [vmem:[%s3609_s1 + $0x734] ss:$8 sps:$4 sm:$0xff]  }
  0x97   :  { %1755 = vmatpush1.bf16.msra.mxu1 %v2554_v44  ;;  %v2638_v44 = vld [vmem:[%s3609_s1 + $0x330] ss:$8 sps:$4 sm:$0xff]  }
  0x98   :  { %1927 = vmatpush1.bf16.msra.mxu0 %v2557_v45  ;;  %1756 = vmatprep.subr.bf16.mxu1 %v2562_v46  ;;  %v2641_v45 = vld [vmem:[%s3609_s1 + $0x730] ss:$8 sps:$4 sm:$0xff]   ;;  %v2646_v46 = vld [vmem:[%s3609_s1 + $0x344] ss:$8 sps:$4 sm:$0xff]  }
  0x99   :  { %1928 = vmatprep.subr.bf16.mxu0 %v2565_v47  ;;  %v2649_v47 = vld [vmem:[%s3609_s1 + $0x744] ss:$8 sps:$4 sm:$0xff]  }
  0x9b   :  { %1757 = vmatpush1.bf16.msra.mxu1 %v2560_v48  ;;  %v2644_v48 = vld [vmem:[%s3609_s1 + $0x340] ss:$8 sps:$4 sm:$0xff]  }
  0x9c   :  { %1929 = vmatpush1.bf16.msra.mxu0 %v2563_v49  ;;  %1758 = vmatprep.subr.bf16.mxu1 %v2568_v50  ;;  %v2647_v49 = vld [vmem:[%s3609_s1 + $0x740] ss:$8 sps:$4 sm:$0xff]   ;;  %v2652_v50 = vld [vmem:[%s3609_s1 + $0x354] ss:$8 sps:$4 sm:$0xff]  }
  0x9d   :  { %1930 = vmatprep.subr.bf16.mxu0 %v2571_v51  ;;  %v2655_v51 = vld [vmem:[%s3609_s1 + $0x754] ss:$8 sps:$4 sm:$0xff]  }
  0x9f   :  { %1759 = vmatpush1.bf16.msra.mxu1 %v2566_v52  ;;  %v2650_v52 = vld [vmem:[%s3609_s1 + $0x350] ss:$8 sps:$4 sm:$0xff]  }
  0xa0   :  { %1931 = vmatpush1.bf16.msra.mxu0 %v2569_v53  ;;  %1760 = vmatprep.subr.bf16.mxu1 %v2574_v54  ;;  %v2653_v53 = vld [vmem:[%s3609_s1 + $0x750] ss:$8 sps:$4 sm:$0xff]   ;;  %v2658_v54 = vld [vmem:[%s3609_s1 + $0x364] ss:$8 sps:$4 sm:$0xff]  }
  0xa1   :  { %1932 = vmatprep.subr.bf16.mxu0 %v2577_v55  ;;  %v2661_v55 = vld [vmem:[%s3609_s1 + $0x764] ss:$8 sps:$4 sm:$0xff]  }
  0xa3   :  { %1761 = vmatpush1.bf16.msra.mxu1 %v2572_v56  ;;  %v2656_v56 = vld [vmem:[%s3609_s1 + $0x360] ss:$8 sps:$4 sm:$0xff]  }
  0xa4   :  { %1933 = vmatpush1.bf16.msra.mxu0 %v2575_v57  ;;  %1762 = vmatprep.subr.bf16.mxu1 %v2580_v58  ;;  %v2659_v57 = vld [vmem:[%s3609_s1 + $0x760] ss:$8 sps:$4 sm:$0xff]   ;;  %v2664_v58 = vld [vmem:[%s3609_s1 + $0x374] ss:$8 sps:$4 sm:$0xff]  }
  0xa5   :  { %1934 = vmatprep.subr.bf16.mxu0 %v2583_v59  ;;  %v2667_v59 = vld [vmem:[%s3609_s1 + $0x774] ss:$8 sps:$4 sm:$0xff]  }
  0xa7   :  { %1763 = vmatpush1.bf16.msra.mxu1 %v2578_v60  ;;  %v2662_v60 = vld [vmem:[%s3609_s1 + $0x370] ss:$8 sps:$4 sm:$0xff]  }
  0xa8   :  { %1935 = vmatpush1.bf16.msra.mxu0 %v2581_v61  ;;  %1764 = vmatprep.subr.bf16.mxu1 %v2586_v62  ;;  %v2665_v61 = vld [vmem:[%s3609_s1 + $0x770] ss:$8 sps:$4 sm:$0xff]   ;;  %v2670_v62 = vld [vmem:[%s3609_s1 + $0x384] ss:$8 sps:$4 sm:$0xff]  }
  0xa9   :  { %1936 = vmatprep.subr.bf16.mxu0 %v2589_v63  ;;  %v2673_v63 = vld [vmem:[%s3609_s1 + $0x784] ss:$8 sps:$4 sm:$0xff]  }
  0xab   :  { %1765 = vmatpush1.bf16.msra.mxu1 %v2584_v0  ;;  %v2668_v0 = vld [vmem:[%s3609_s1 + $0x380] ss:$8 sps:$4 sm:$0xff]  }
  0xac   :  { %1937 = vmatpush1.bf16.msra.mxu0 %v2587_v1  ;;  %1766 = vmatprep.subr.bf16.mxu1 %v2592_v2  ;;  %v2671_v1 = vld [vmem:[%s3609_s1 + $0x780] ss:$8 sps:$4 sm:$0xff]   ;;  %v2676_v2 = vld [vmem:[%s3609_s1 + $0x394] ss:$8 sps:$4 sm:$0xff]  }
  0xad   :  { %1938 = vmatprep.subr.bf16.mxu0 %v2595_v3  ;;  %v2679_v3 = vld [vmem:[%s3609_s1 + $0x794] ss:$8 sps:$4 sm:$0xff]  }
  0xaf   :  { %1767 = vmatpush1.bf16.msra.mxu1 %v2590_v4  ;;  %v2674_v4 = vld [vmem:[%s3609_s1 + $0x390] ss:$8 sps:$4 sm:$0xff]  }
  0xb0   :  { %1939 = vmatpush1.bf16.msra.mxu0 %v2593_v5  ;;  %1768 = vmatprep.subr.bf16.mxu1 %v2598_v6  ;;  %v2677_v5 = vld [vmem:[%s3609_s1 + $0x790] ss:$8 sps:$4 sm:$0xff]   ;;  %v2682_v6 = vld [vmem:[%s3609_s1 + $0x3a4] ss:$8 sps:$4 sm:$0xff]  }
  0xb1   :  { %1940 = vmatprep.subr.bf16.mxu0 %v2601_v7  ;;  %v2685_v7 = vld [vmem:[%s3609_s1 + $0x7a4] ss:$8 sps:$4 sm:$0xff]  }
  0xb3   :  { %1769 = vmatpush1.bf16.msra.mxu1 %v2596_v8  ;;  %v2680_v8 = vld [vmem:[%s3609_s1 + $0x3a0] ss:$8 sps:$4 sm:$0xff]  }
  0xb4   :  { %1941 = vmatpush1.bf16.msra.mxu0 %v2599_v9  ;;  %1770 = vmatprep.subr.bf16.mxu1 %v2604_v10  ;;  %v2683_v9 = vld [vmem:[%s3609_s1 + $0x7a0] ss:$8 sps:$4 sm:$0xff]   ;;  %v2688_v10 = vld [vmem:[%s3609_s1 + $0x3b4] ss:$8 sps:$4 sm:$0xff]  }
  0xb5   :  { %1942 = vmatprep.subr.bf16.mxu0 %v2607_v11  ;;  %v2691_v11 = vld [vmem:[%s3609_s1 + $0x7b4] ss:$8 sps:$4 sm:$0xff]  }
  0xb7   :  { %1771 = vmatpush1.bf16.msra.mxu1 %v2602_v12  ;;  %v2686_v12 = vld [vmem:[%s3609_s1 + $0x3b0] ss:$8 sps:$4 sm:$0xff]  }
  0xb8   :  { %1943 = vmatpush1.bf16.msra.mxu0 %v2605_v13  ;;  %1772 = vmatprep.subr.bf16.mxu1 %v2610_v14  ;;  %v2689_v13 = vld [vmem:[%s3609_s1 + $0x7b0] ss:$8 sps:$4 sm:$0xff]   ;;  %v2694_v14 = vld [vmem:[%s3609_s1 + $0x3c4] ss:$8 sps:$4 sm:$0xff]  }
  0xb9   :  { %1944 = vmatprep.subr.bf16.mxu0 %v2613_v15  ;;  %v2697_v15 = vld [vmem:[%s3609_s1 + $0x7c4] ss:$8 sps:$4 sm:$0xff]  }
  0xbb   :  { %1773 = vmatpush1.bf16.msra.mxu1 %v2608_v16  ;;  %v2692_v16 = vld [vmem:[%s3609_s1 + $0x3c0] ss:$8 sps:$4 sm:$0xff]  }
  0xbc   :  { %1945 = vmatpush1.bf16.msra.mxu0 %v2611_v17  ;;  %1774 = vmatprep.subr.bf16.mxu1 %v2616_v18  ;;  %v2695_v17 = vld [vmem:[%s3609_s1 + $0x7c0] ss:$8 sps:$4 sm:$0xff]   ;;  %v2700_v18 = vld [vmem:[%s3609_s1 + $0x3d4] ss:$8 sps:$4 sm:$0xff]  }
  0xbd   :  { %1946 = vmatprep.subr.bf16.mxu0 %v2619_v19  ;;  %v2703_v19 = vld [vmem:[%s3609_s1 + $0x7d4] ss:$8 sps:$4 sm:$0xff]  }
  0xbf   :  { %1775 = vmatpush1.bf16.msra.mxu1 %v2614_v20  ;;  %v2698_v20 = vld [vmem:[%s3609_s1 + $0x3d0] ss:$8 sps:$4 sm:$0xff]  }
  0xc0   :  { %1947 = vmatpush1.bf16.msra.mxu0 %v2617_v21  ;;  %1787 = vmatprep.subr.bf16.mxu1 %v2622_v22  ;;  %v2701_v21 = vld [vmem:[%s3609_s1 + $0x7d0] ss:$8 sps:$4 sm:$0xff]   ;;  %v2706_v22 = vld [vmem:[%s3609_s1 + $0x3e4] ss:$8 sps:$4 sm:$0xff]  }
  0xc1   :  { %1959 = vmatprep.subr.bf16.mxu0 %v2625_v23  ;;  %v2709_v23 = vld [vmem:[%s3609_s1 + $0x7e4] ss:$8 sps:$4 sm:$0xff]  }
  0xc2   :  { %1777 = vmatmul.mubr.bf16.vlgmr.msra.gmra.mrb[0].mxu1 %v2028_v27  ;;  %v2704_v27 = vld [vmem:[%s3609_s1 + $0x3e0] ss:$8 sps:$4 sm:$0xff]  }
  0xc3   :  { %1949 = vmatmul.mubr.bf16.vlgmr.msra.gmra.mrb[0].mxu0 %v2036_v28  ;;  %1788 = vmatpush1.bf16.msra.mxu1 %v2620_v24  ;;  %v2707_v28 = vld [vmem:[%s3609_s1 + $0x7e0] ss:$8 sps:$4 sm:$0xff]   ;;  %v2712_v24 = vld [vmem:[%s3609_s1 + $0x3f4] ss:$8 sps:$4 sm:$0xff]  }
  0xc4   :  { %1960 = vmatpush1.bf16.msra.mxu0 %v2623_v25  ;;  %1789 = vmatprep.subr.bf16.mxu1 %v2628_v29  ;;  %v2715_v25 = vld [vmem:[%s3609_s1 + $0x7f4] ss:$8 sps:$4 sm:$0xff]   ;;  %v2710_v29 = vld [vmem:[%s3609_s1 + $0x3f0] ss:$8 sps:$4 sm:$0xff]  }
  0xc5   :  { %1961 = vmatprep.subr.bf16.mxu0 %v2631_v30  ;;  %1819 = vmatprep.mubr.bf16.mxu1 %v2031_v34  ;;  %v2713_v30 = vld [vmem:[%s3609_s1 + $0x7f0] ss:$8 sps:$4 sm:$0xff]   ;;  %v2030_v34 = vcombine.low %v3385_v26, %v3394_v31 }
  0xc6   :  { %1991 = vmatprep.mubr.bf16.mxu0 %v2039_v35  ;;  %v2038_v35 = vcombine.low %v3399_v32, %v3404_v33 }
  0xc7   :  { %1790 = vmatpush1.bf16.msra.mxu1 %v2626_v36  ;;  %v288_v36 = vlaneseq }
  0xc8   :  { %1962 = vmatpush1.bf16.msra.mxu0 %v2629_v37  ;;  %1791 = vmatprep.subr.bf16.mxu1 %v2634_v38 }
  0xc9   :  { %1963 = vmatprep.subr.bf16.mxu0 %v2637_v39  ;;  %v289_v37 = vshrl.u32 %v288_v36, 7  ;;  %v286_v39 = vld [vmem:[%s3611_s2] sm:$0x3] }
  0xcb   :  { %1792 = vmatpush1.bf16.msra.mxu1 %v2632_v40  ;;  %v290_v38 = vsub.s32 0, %v289_v37  ;;  %v294_v40 = vsub.s32 1, %v289_v37 }
  0xcc   :  { %1964 = vmatpush1.bf16.msra.mxu0 %v2635_v41  ;;  %1793 = vmatprep.subr.bf16.mxu1 %v2640_v42 }
  0xcd   :  { %1965 = vmatprep.subr.bf16.mxu0 %v2643_v43  ;;  %v291_v41 = vrot.slane %v286_v39, %v290_v38  ;;  %v295_v42 = vrot.slane %v286_v39, %v294_v40 }
  0xcf   :  { %1794 = vmatpush1.bf16.msra.mxu1 %v2638_v44 }
  0xd0   :  { %1966 = vmatpush1.bf16.msra.mxu0 %v2641_v45  ;;  %1795 = vmatprep.subr.bf16.mxu1 %v2646_v46 }
  0xd1   :  { %1967 = vmatprep.subr.bf16.mxu0 %v2649_v47 }
  0xd3   :  { %1796 = vmatpush1.bf16.msra.mxu1 %v2644_v48 }
  0xd4   :  { %1968 = vmatpush1.bf16.msra.mxu0 %v2647_v49  ;;  %1797 = vmatprep.subr.bf16.mxu1 %v2652_v50 }
  0xd5   :  { %1969 = vmatprep.subr.bf16.mxu0 %v2655_v51 }
  0xd7   :  { %1798 = vmatpush1.bf16.msra.mxu1 %v2650_v52 }
  0xd8   :  { %1970 = vmatpush1.bf16.msra.mxu0 %v2653_v53  ;;  %1799 = vmatprep.subr.bf16.mxu1 %v2658_v54 }
  0xd9   :  { %1971 = vmatprep.subr.bf16.mxu0 %v2661_v55 }
  0xdb   :  { %1800 = vmatpush1.bf16.msra.mxu1 %v2656_v56 }
  0xdc   :  { %1972 = vmatpush1.bf16.msra.mxu0 %v2659_v57  ;;  %1801 = vmatprep.subr.bf16.mxu1 %v2664_v58 }
  0xdd   :  { %1973 = vmatprep.subr.bf16.mxu0 %v2667_v59 }
  0xdf   :  { %1802 = vmatpush1.bf16.msra.mxu1 %v2662_v60 }
  0xe0   :  { %1974 = vmatpush1.bf16.msra.mxu0 %v2665_v61  ;;  %1803 = vmatprep.subr.bf16.mxu1 %v2670_v62 }
  0xe1   :  { %1975 = vmatprep.subr.bf16.mxu0 %v2673_v63 }
  0xe3   :  { %1804 = vmatpush1.bf16.msra.mxu1 %v2668_v0 }
  0xe4   :  { %1976 = vmatpush1.bf16.msra.mxu0 %v2671_v1  ;;  %1805 = vmatprep.subr.bf16.mxu1 %v2676_v2 }
  0xe5   :  { %1977 = vmatprep.subr.bf16.mxu0 %v2679_v3 }
  0xe7   :  { %1806 = vmatpush1.bf16.msra.mxu1 %v2674_v4 }
  0xe8   :  { %1978 = vmatpush1.bf16.msra.mxu0 %v2677_v5  ;;  %1807 = vmatprep.subr.bf16.mxu1 %v2682_v6 }
  0xe9   :  { %1979 = vmatprep.subr.bf16.mxu0 %v2685_v7 }
  0xeb   :  { %1808 = vmatpush1.bf16.msra.mxu1 %v2680_v8 }
  0xec   :  { %1980 = vmatpush1.bf16.msra.mxu0 %v2683_v9  ;;  %1809 = vmatprep.subr.bf16.mxu1 %v2688_v10 }
  0xed   :  { %1981 = vmatprep.subr.bf16.mxu0 %v2691_v11 }
  0xef   :  { %1810 = vmatpush1.bf16.msra.mxu1 %v2686_v12 }
  0xf0   :  { %1982 = vmatpush1.bf16.msra.mxu0 %v2689_v13  ;;  %1811 = vmatprep.subr.bf16.mxu1 %v2694_v14 }
  0xf1   :  { %1983 = vmatprep.subr.bf16.mxu0 %v2697_v15 }
  0xf3   :  { %1812 = vmatpush1.bf16.msra.mxu1 %v2692_v16 }
  0xf4   :  { %1984 = vmatpush1.bf16.msra.mxu0 %v2695_v17  ;;  %1813 = vmatprep.subr.bf16.mxu1 %v2700_v18 }
  0xf5   :  { %1985 = vmatprep.subr.bf16.mxu0 %v2703_v19 }
  0xf7   :  { %1814 = vmatpush1.bf16.msra.mxu1 %v2698_v20 }
  0xf8   :  { %1986 = vmatpush1.bf16.msra.mxu0 %v2701_v21  ;;  %1815 = vmatprep.subr.bf16.mxu1 %v2706_v22 }
  0xf9   :  { %1987 = vmatprep.subr.bf16.mxu0 %v2709_v23 }
  0xfb   :  { %1816 = vmatpush1.bf16.msra.mxu1 %v2704_v27 }
  0xfc   :  { %1988 = vmatpush1.bf16.msra.mxu0 %v2707_v28  ;;  %1817 = vmatprep.subr.bf16.mxu1 %v2712_v24 }
  0xfd   :  { %1989 = vmatprep.subr.bf16.mxu0 %v2715_v25 }
  0xff   :  { %1818 = vmatpush1.bf16.msra.mxu1 %v2710_v29 }
 0x100   :  { %1990 = vmatpush1.bf16.msra.mxu0 %v2713_v30 }
 0x102   :  { %1820 = vmatmul.mubr.bf16.vlgmr.msra.gmra.mrb[0].mxu1 %v2030_v34 }
 0x103   :  { %1992 = vmatmul.mubr.bf16.vlgmr.msra.gmra.mrb[0].mxu0 %v2038_v35 }
 0x1d5   :  { %v1821_v43 = vpop.f32.mrb[0].mxu1 }
 0x1d6   :  { %v1993_v44 = vpop.f32.mrb[0].mxu0  ;;  %v2300_v26 = vadd.f32 %v1821_v43, %v291_v41  ;;  %v1823_v31 = vpop.f32.mrb[1].mxu1 }
 0x1d7   :  { %v1995_v45 = vpop.f32.mrb[1].mxu0  ;;  %v2302_v32 = vadd.f32 %v1823_v31, %v295_v42  ;;  %v1825_v33 = vpop.f32.mrb[2].mxu1 }
 0x1d8   :  { %v1997_v46 = vpop.f32.mrb[2].mxu0  ;;  %v2301_v47 = vadd.f32 %v2300_v26, %v1993_v44  ;;  %v2304_v48 = vadd.f32 %v1825_v33, %v291_v41  ;;  %v1827_v49 = vpop.f32.mrb[3].mxu1 }
 0x1d9   :  { %v1999_v50 = vpop.f32.mrb[3].mxu0  ;;  %v2303_v51 = vadd.f32 %v2302_v32, %v1995_v45  ;;  %v2306_v52 = vadd.f32 %v1827_v49, %v295_v42 }
 0x1da   :  { %v2002_v53 = vmax.f32 %v2301_v47, 0.0  ;;  %v2305_v54 = vadd.f32 %v2304_v48, %v1997_v46 }
 0x1db   :  { %v2003_v55 = vmax.f32 %v2303_v51, 0.0  ;;  %v2307_v56 = vadd.f32 %v2306_v52, %v1999_v50 }
 0x1dc   :  { %v2004_v57 = vmax.f32 %v2305_v54, 0.0 }
 0x1dd   :  { %v2298_v58 = vpack.c.bf16 %v2003_v55, %v2002_v53  ;;  %v2005_v59 = vmax.f32 %v2307_v56, 0.0 }
 0x1df   :  { %2018 = vst [vmem:[%s3612_s3] sm:$0xff] %v2298_v58  ;;  %v2299_v60 = vpack.c.bf16 %v2005_v59, %v2004_v57 }
 0x1e1   :  { %2019 = vst [vmem:[%s3612_s3 + $0x8] sm:$0xff] %v2299_v60 }

// kernel: conv_vae_forward.15
= control target key start
LH: loop header
LB: loop body
LE: loop exit
PB: predicated region body
PF: predicated region fallthrough
CT: control target
= control target key end

     0   :  { %s2299_s1 = inlined_call_operand.vmem [shape: bf16[1152,256], index: 1, kind: input, shape index: {}]   ;;  %s2300_s0 = inlined_call_operand.vmem [shape: bf16[32,1152], index: 0, kind: input, shape index: {}]   ;;  %s2301_s2 = inlined_call_operand.vmem [shape: f32[1,256], index: 2, kind: input, shape index: {}]   ;;  %s2302_s3 = inlined_call_operand.vmem [shape: bf16[32,256], index: 3, kind: output, shape index: {}]  }
   0x1   :  { %v1535_v0 = vld [vmem:[%s2299_s1 + $0x4] ss:$8 sps:$4 sm:$0xff]   ;;  %v1539_v2 = vld [vmem:[%s2299_s1] ss:$8 sps:$4 sm:$0xff]   ;;  %v1541_v4 = vld [vmem:[%s2299_s1 + $0x14] ss:$8 sps:$4 sm:$0xff]  }
   0x2   :  { %v1537_v1 = vld [vmem:[%s2299_s1 + $0x204] ss:$8 sps:$4 sm:$0xff]   ;;  %1003 = vmatprep.subr.bf16.mxu1 %v1535_v0  ;;  %v1540_v3 = vld [vmem:[%s2299_s1 + $0x200] ss:$8 sps:$4 sm:$0xff]   ;;  %v1543_v5 = vld [vmem:[%s2299_s1 + $0x214] ss:$8 sps:$4 sm:$0xff]  }
   0x3   :  { %1109 = vmatprep.subr.bf16.mxu0 %v1537_v1  ;;  %1004 = vmatpush1.bf16.msra.mxu1 %v1539_v2  ;;  %v1545_v6 = vld [vmem:[%s2299_s1 + $0x10] ss:$8 sps:$4 sm:$0xff]   ;;  %v1547_v8 = vld [vmem:[%s2299_s1 + $0x24] ss:$8 sps:$4 sm:$0xff]   ;;  %v1551_v10 = vld [vmem:[%s2299_s1 + $0x20] ss:$8 sps:$4 sm:$0xff]  }
   0x4   :  { %1110 = vmatpush1.bf16.msra.mxu0 %v1540_v3  ;;  %1005 = vmatprep.subr.bf16.mxu1 %v1541_v4  ;;  %v1546_v7 = vld [vmem:[%s2299_s1 + $0x210] ss:$8 sps:$4 sm:$0xff]   ;;  %v1549_v9 = vld [vmem:[%s2299_s1 + $0x224] ss:$8 sps:$4 sm:$0xff]   ;;  %v1552_v11 = vld [vmem:[%s2299_s1 + $0x220] ss:$8 sps:$4 sm:$0xff]  }
   0x5   :  { %1111 = vmatprep.subr.bf16.mxu0 %v1543_v5  ;;  %v1553_v12 = vld [vmem:[%s2299_s1 + $0x34] ss:$8 sps:$4 sm:$0xff]   ;;  %v1557_v14 = vld [vmem:[%s2299_s1 + $0x30] ss:$8 sps:$4 sm:$0xff]   ;;  %v1559_v16 = vld [vmem:[%s2299_s1 + $0x44] ss:$8 sps:$4 sm:$0xff]  }
   0x6   :  { %v1555_v13 = vld [vmem:[%s2299_s1 + $0x234] ss:$8 sps:$4 sm:$0xff]   ;;  %v1558_v15 = vld [vmem:[%s2299_s1 + $0x230] ss:$8 sps:$4 sm:$0xff]   ;;  %v1561_v17 = vld [vmem:[%s2299_s1 + $0x244] ss:$8 sps:$4 sm:$0xff]  }
   0x7   :  { %1006 = vmatpush1.bf16.msra.mxu1 %v1545_v6  ;;  %v1563_v18 = vld [vmem:[%s2299_s1 + $0x40] ss:$8 sps:$4 sm:$0xff]   ;;  %v1565_v20 = vld [vmem:[%s2299_s1 + $0x54] ss:$8 sps:$4 sm:$0xff]   ;;  %v1569_v22 = vld [vmem:[%s2299_s1 + $0x50] ss:$8 sps:$4 sm:$0xff]  }
   0x8   :  { %1112 = vmatpush1.bf16.msra.mxu0 %v1546_v7  ;;  %1007 = vmatprep.subr.bf16.mxu1 %v1547_v8  ;;  %v1564_v19 = vld [vmem:[%s2299_s1 + $0x240] ss:$8 sps:$4 sm:$0xff]   ;;  %v1567_v21 = vld [vmem:[%s2299_s1 + $0x254] ss:$8 sps:$4 sm:$0xff]   ;;  %v1570_v23 = vld [vmem:[%s2299_s1 + $0x250] ss:$8 sps:$4 sm:$0xff]  }
   0x9   :  { %1113 = vmatprep.subr.bf16.mxu0 %v1549_v9  ;;  %v1571_v24 = vld [vmem:[%s2299_s1 + $0x64] ss:$8 sps:$4 sm:$0xff]   ;;  %v1575_v26 = vld [vmem:[%s2299_s1 + $0x60] ss:$8 sps:$4 sm:$0xff]   ;;  %v1577_v28 = vld [vmem:[%s2299_s1 + $0x74] ss:$8 sps:$4 sm:$0xff]  }
   0xa   :  { %v1573_v25 = vld [vmem:[%s2299_s1 + $0x264] ss:$8 sps:$4 sm:$0xff]   ;;  %v1576_v27 = vld [vmem:[%s2299_s1 + $0x260] ss:$8 sps:$4 sm:$0xff]   ;;  %v1579_v29 = vld [vmem:[%s2299_s1 + $0x274] ss:$8 sps:$4 sm:$0xff]  }
   0xb   :  { %1008 = vmatpush1.bf16.msra.mxu1 %v1551_v10  ;;  %v1581_v30 = vld [vmem:[%s2299_s1 + $0x70] ss:$8 sps:$4 sm:$0xff]   ;;  %v1583_v32 = vld [vmem:[%s2299_s1 + $0x84] ss:$8 sps:$4 sm:$0xff]   ;;  %v1587_v34 = vld [vmem:[%s2299_s1 + $0x80] ss:$8 sps:$4 sm:$0xff]  }
   0xc   :  { %1114 = vmatpush1.bf16.msra.mxu0 %v1552_v11  ;;  %1009 = vmatprep.subr.bf16.mxu1 %v1553_v12  ;;  %v1582_v31 = vld [vmem:[%s2299_s1 + $0x270] ss:$8 sps:$4 sm:$0xff]   ;;  %v1585_v33 = vld [vmem:[%s2299_s1 + $0x284] ss:$8 sps:$4 sm:$0xff]   ;;  %v1588_v35 = vld [vmem:[%s2299_s1 + $0x280] ss:$8 sps:$4 sm:$0xff]  }
   0xd   :  { %1115 = vmatprep.subr.bf16.mxu0 %v1555_v13  ;;  %v1589_v36 = vld [vmem:[%s2299_s1 + $0x94] ss:$8 sps:$4 sm:$0xff]   ;;  %v1593_v38 = vld [vmem:[%s2299_s1 + $0x90] ss:$8 sps:$4 sm:$0xff]   ;;  %v1595_v40 = vld [vmem:[%s2299_s1 + $0xa4] ss:$8 sps:$4 sm:$0xff]  }
   0xe   :  { %v1591_v37 = vld [vmem:[%s2299_s1 + $0x294] ss:$8 sps:$4 sm:$0xff]   ;;  %v1594_v39 = vld [vmem:[%s2299_s1 + $0x290] ss:$8 sps:$4 sm:$0xff]   ;;  %v1597_v41 = vld [vmem:[%s2299_s1 + $0x2a4] ss:$8 sps:$4 sm:$0xff]  }
   0xf   :  { %1010 = vmatpush1.bf16.msra.mxu1 %v1557_v14  ;;  %v1599_v42 = vld [vmem:[%s2299_s1 + $0xa0] ss:$8 sps:$4 sm:$0xff]   ;;  %v1601_v44 = vld [vmem:[%s2299_s1 + $0xb4] ss:$8 sps:$4 sm:$0xff]   ;;  %v1605_v46 = vld [vmem:[%s2299_s1 + $0xb0] ss:$8 sps:$4 sm:$0xff]  }
  0x10   :  { %1116 = vmatpush1.bf16.msra.mxu0 %v1558_v15  ;;  %1011 = vmatprep.subr.bf16.mxu1 %v1559_v16  ;;  %v1600_v43 = vld [vmem:[%s2299_s1 + $0x2a0] ss:$8 sps:$4 sm:$0xff]   ;;  %v1603_v45 = vld [vmem:[%s2299_s1 + $0x2b4] ss:$8 sps:$4 sm:$0xff]   ;;  %v1606_v47 = vld [vmem:[%s2299_s1 + $0x2b0] ss:$8 sps:$4 sm:$0xff]  }
  0x11   :  { %1117 = vmatprep.subr.bf16.mxu0 %v1561_v17  ;;  %v1633_v48 = vld [vmem:[%s2300_s0 + $0x4] ss:$36 sps:$4 sm:$0xff]   ;;  %v1639_v51 = vld [vmem:[%s2300_s0 + $0x14] ss:$36 sps:$4 sm:$0xff]  }
  0x12   :  { %v1607_v49 = vld [vmem:[%s2299_s1 + $0xc4] ss:$8 sps:$4 sm:$0xff]   ;;  %1035 = vmatprep.mubr.bf16.mxu1 %v1633_v48  ;;  %v1611_v52 = vld [vmem:[%s2299_s1 + $0xc0] ss:$8 sps:$4 sm:$0xff]   ;;  %v1613_v54 = vld [vmem:[%s2299_s1 + $0xd4] ss:$8 sps:$4 sm:$0xff]   ;;  %1141 = vmatprep.mubr.bf16.mxu0 %v1639_v51 }
  0x13   :  { %1012 = vmatpush1.bf16.msra.mxu1 %v1563_v18  ;;  %v1609_v50 = vld [vmem:[%s2299_s1 + $0x2c4] ss:$8 sps:$4 sm:$0xff]   ;;  %v1612_v53 = vld [vmem:[%s2299_s1 + $0x2c0] ss:$8 sps:$4 sm:$0xff]   ;;  %v1615_v55 = vld [vmem:[%s2299_s1 + $0x2d4] ss:$8 sps:$4 sm:$0xff]  }
  0x14   :  { %1118 = vmatpush1.bf16.msra.mxu0 %v1564_v19  ;;  %1013 = vmatprep.subr.bf16.mxu1 %v1565_v20  ;;  %v1617_v56 = vld [vmem:[%s2299_s1 + $0xd0] ss:$8 sps:$4 sm:$0xff]   ;;  %v1619_v58 = vld [vmem:[%s2299_s1 + $0xe4] ss:$8 sps:$4 sm:$0xff]   ;;  %v1623_v60 = vld [vmem:[%s2299_s1 + $0xe0] ss:$8 sps:$4 sm:$0xff]  }
  0x15   :  { %1119 = vmatprep.subr.bf16.mxu0 %v1567_v21  ;;  %v1618_v57 = vld [vmem:[%s2299_s1 + $0x2d0] ss:$8 sps:$4 sm:$0xff]   ;;  %v1621_v59 = vld [vmem:[%s2299_s1 + $0x2e4] ss:$8 sps:$4 sm:$0xff]   ;;  %v1624_v61 = vld [vmem:[%s2299_s1 + $0x2e0] ss:$8 sps:$4 sm:$0xff]  }
  0x16   :  { %v1625_v62 = vld [vmem:[%s2299_s1 + $0xf4] ss:$8 sps:$4 sm:$0xff]   ;;  %v1629_v0 = vld [vmem:[%s2299_s1 + $0xf0] ss:$8 sps:$4 sm:$0xff]   ;;  %v1636_v2 = vld [vmem:[%s2299_s1 + $0x104] ss:$8 sps:$4 sm:$0xff]  }
  0x17   :  { %1014 = vmatpush1.bf16.msra.mxu1 %v1569_v22  ;;  %v1627_v63 = vld [vmem:[%s2299_s1 + $0x2f4] ss:$8 sps:$4 sm:$0xff]   ;;  %v1630_v1 = vld [vmem:[%s2299_s1 + $0x2f0] ss:$8 sps:$4 sm:$0xff]   ;;  %v1642_v3 = vld [vmem:[%s2299_s1 + $0x304] ss:$8 sps:$4 sm:$0xff]  }
  0x18   :  { %1120 = vmatpush1.bf16.msra.mxu0 %v1570_v23  ;;  %1015 = vmatprep.subr.bf16.mxu1 %v1571_v24  ;;  %v1631_v4 = vld [vmem:[%s2300_s0] ss:$36 sps:$4 sm:$0xff]   ;;  %v1637_v6 = vld [vmem:[%s2300_s0 + $0x10] ss:$36 sps:$4 sm:$0xff]  }
  0x19   :  { %1121 = vmatprep.subr.bf16.mxu0 %v1573_v25  ;;  %v1634_v5 = vld [vmem:[%s2299_s1 + $0x100] ss:$8 sps:$4 sm:$0xff]   ;;  %v1645_v8 = vld [vmem:[%s2299_s1 + $0x114] ss:$8 sps:$4 sm:$0xff]   ;;  %v1643_v10 = vld [vmem:[%s2299_s1 + $0x110] ss:$8 sps:$4 sm:$0xff]  }
  0x1a   :  { %v1640_v7 = vld [vmem:[%s2299_s1 + $0x300] ss:$8 sps:$4 sm:$0xff]   ;;  %v1648_v9 = vld [vmem:[%s2299_s1 + $0x314] ss:$8 sps:$4 sm:$0xff]   ;;  %v1646_v11 = vld [vmem:[%s2299_s1 + $0x310] ss:$8 sps:$4 sm:$0xff]  }
  0x1b   :  { %1016 = vmatpush1.bf16.msra.mxu1 %v1575_v26  ;;  %v1651_v12 = vld [vmem:[%s2299_s1 + $0x124] ss:$8 sps:$4 sm:$0xff]   ;;  %v1649_v14 = vld [vmem:[%s2299_s1 + $0x120] ss:$8 sps:$4 sm:$0xff]   ;;  %v1657_v16 = vld [vmem:[%s2299_s1 + $0x134] ss:$8 sps:$4 sm:$0xff]  }
  0x1c   :  { %1122 = vmatpush1.bf16.msra.mxu0 %v1576_v27  ;;  %1017 = vmatprep.subr.bf16.mxu1 %v1577_v28  ;;  %v1654_v13 = vld [vmem:[%s2299_s1 + $0x324] ss:$8 sps:$4 sm:$0xff]   ;;  %v1652_v15 = vld [vmem:[%s2299_s1 + $0x320] ss:$8 sps:$4 sm:$0xff]   ;;  %v1660_v17 = vld [vmem:[%s2299_s1 + $0x334] ss:$8 sps:$4 sm:$0xff]  }
  0x1d   :  { %1123 = vmatprep.subr.bf16.mxu0 %v1579_v29  ;;  %v1655_v18 = vld [vmem:[%s2299_s1 + $0x130] ss:$8 sps:$4 sm:$0xff]   ;;  %v1663_v20 = vld [vmem:[%s2299_s1 + $0x144] ss:$8 sps:$4 sm:$0xff]   ;;  %v1661_v22 = vld [vmem:[%s2299_s1 + $0x140] ss:$8 sps:$4 sm:$0xff]  }
  0x1e   :  { %v1658_v19 = vld [vmem:[%s2299_s1 + $0x330] ss:$8 sps:$4 sm:$0xff]   ;;  %v1666_v21 = vld [vmem:[%s2299_s1 + $0x344] ss:$8 sps:$4 sm:$0xff]   ;;  %v1664_v23 = vld [vmem:[%s2299_s1 + $0x340] ss:$8 sps:$4 sm:$0xff]  }
  0x1f   :  { %1018 = vmatpush1.bf16.msra.mxu1 %v1581_v30  ;;  %v1669_v24 = vld [vmem:[%s2299_s1 + $0x154] ss:$8 sps:$4 sm:$0xff]   ;;  %v1667_v26 = vld [vmem:[%s2299_s1 + $0x150] ss:$8 sps:$4 sm:$0xff]   ;;  %v1675_v28 = vld [vmem:[%s2299_s1 + $0x164] ss:$8 sps:$4 sm:$0xff]  }
  0x20   :  { %1124 = vmatpush1.bf16.msra.mxu0 %v1582_v31  ;;  %1019 = vmatprep.subr.bf16.mxu1 %v1583_v32  ;;  %v1672_v25 = vld [vmem:[%s2299_s1 + $0x354] ss:$8 sps:$4 sm:$0xff]   ;;  %v1670_v27 = vld [vmem:[%s2299_s1 + $0x350] ss:$8 sps:$4 sm:$0xff]   ;;  %v1725_v31 = vld [vmem:[%s2300_s0 + $0x48] ss:$36 sps:$4 sm:$0xff]  }
  0x21   :  { %1125 = vmatprep.subr.bf16.mxu0 %v1585_v33  ;;  %v1721_v29 = vld [vmem:[%s2300_s0 + $0x4c] ss:$36 sps:$4 sm:$0xff]   ;;  %v1723_v30 = vld [vmem:[%s2300_s0 + $0x5c] ss:$36 sps:$4 sm:$0xff]  }
  0x22   :  { %v1678_v32 = vld [vmem:[%s2299_s1 + $0x364] ss:$8 sps:$4 sm:$0xff]   ;;  %v1729_v33 = vld [vmem:[%s2300_s0 + $0x58] ss:$36 sps:$4 sm:$0xff]  }
  0x23   :  { %1020 = vmatpush1.bf16.msra.mxu1 %v1587_v34  ;;  %v1673_v34 = vld [vmem:[%s2299_s1 + $0x160] ss:$8 sps:$4 sm:$0xff]   ;;  %v1691_v48 = vld [vmem:[%s2299_s1 + $0x190] ss:$8 sps:$4 sm:$0xff]   ;;  %v1702_v51 = vld [vmem:[%s2299_s1 + $0x3a4] ss:$8 sps:$4 sm:$0xff]  }
  0x24   :  { %1126 = vmatpush1.bf16.msra.mxu0 %v1588_v35  ;;  %1021 = vmatprep.subr.bf16.mxu1 %v1589_v36  ;;  %v1676_v35 = vld [vmem:[%s2299_s1 + $0x360] ss:$8 sps:$4 sm:$0xff]   ;;  %v1681_v36 = vld [vmem:[%s2299_s1 + $0x174] ss:$8 sps:$4 sm:$0xff]  }
  0x25   :  { %1127 = vmatprep.subr.bf16.mxu0 %v1591_v37  ;;  %v1684_v37 = vld [vmem:[%s2299_s1 + $0x374] ss:$8 sps:$4 sm:$0xff]  }
  0x27   :  { %1022 = vmatpush1.bf16.msra.mxu1 %v1593_v38  ;;  %v1679_v38 = vld [vmem:[%s2299_s1 + $0x170] ss:$8 sps:$4 sm:$0xff]  }
  0x28   :  { %1128 = vmatpush1.bf16.msra.mxu0 %v1594_v39  ;;  %1023 = vmatprep.subr.bf16.mxu1 %v1595_v40  ;;  %v1682_v39 = vld [vmem:[%s2299_s1 + $0x370] ss:$8 sps:$4 sm:$0xff]   ;;  %v1687_v40 = vld [vmem:[%s2299_s1 + $0x184] ss:$8 sps:$4 sm:$0xff]  }
  0x29   :  { %1129 = vmatprep.subr.bf16.mxu0 %v1597_v41  ;;  %v1741_v41 = vld [vmem:[%s2300_s0 + $0xc] ss:$36 sps:$4 sm:$0xff]  }
  0x2b   :  { %1024 = vmatpush1.bf16.msra.mxu1 %v1599_v42  ;;  %v1690_v42 = vld [vmem:[%s2299_s1 + $0x384] ss:$8 sps:$4 sm:$0xff]  }
  0x2c   :  { %1130 = vmatpush1.bf16.msra.mxu0 %v1600_v43  ;;  %1025 = vmatprep.subr.bf16.mxu1 %v1601_v44  ;;  %v1744_v43 = vld [vmem:[%s2300_s0 + $0x1c] ss:$36 sps:$4 sm:$0xff]  }
  0x2d   :  { %1131 = vmatprep.subr.bf16.mxu0 %v1603_v45  ;;  %v1685_v44 = vld [vmem:[%s2299_s1 + $0x180] ss:$8 sps:$4 sm:$0xff]  }
  0x2e   :  { %v1688_v45 = vld [vmem:[%s2299_s1 + $0x380] ss:$8 sps:$4 sm:$0xff]  }
  0x2f   :  { %1026 = vmatpush1.bf16.msra.mxu1 %v1605_v46  ;;  %v1693_v46 = vld [vmem:[%s2299_s1 + $0x194] ss:$8 sps:$4 sm:$0xff]  }
  0x30   :  { %1132 = vmatpush1.bf16.msra.mxu0 %v1606_v47  ;;  %1027 = vmatprep.subr.bf16.mxu1 %v1607_v49  ;;  %v1696_v47 = vld [vmem:[%s2299_s1 + $0x394] ss:$8 sps:$4 sm:$0xff]   ;;  %v1694_v49 = vld [vmem:[%s2299_s1 + $0x390] ss:$8 sps:$4 sm:$0xff]  }
  0x31   :  { %1133 = vmatprep.subr.bf16.mxu0 %v1609_v50  ;;  %v1699_v50 = vld [vmem:[%s2299_s1 + $0x1a4] ss:$8 sps:$4 sm:$0xff]  }
  0x33   :  { %1028 = vmatpush1.bf16.msra.mxu1 %v1611_v52  ;;  %v1697_v52 = vld [vmem:[%s2299_s1 + $0x1a0] ss:$8 sps:$4 sm:$0xff]  }
  0x34   :  { %1134 = vmatpush1.bf16.msra.mxu0 %v1612_v53  ;;  %1029 = vmatprep.subr.bf16.mxu1 %v1613_v54  ;;  %v1700_v53 = vld [vmem:[%s2299_s1 + $0x3a0] ss:$8 sps:$4 sm:$0xff]   ;;  %v1705_v54 = vld [vmem:[%s2299_s1 + $0x1b4] ss:$8 sps:$4 sm:$0xff]  }
  0x35   :  { %1135 = vmatprep.subr.bf16.mxu0 %v1615_v55  ;;  %v1708_v55 = vld [vmem:[%s2299_s1 + $0x3b4] ss:$8 sps:$4 sm:$0xff]  }
  0x37   :  { %1030 = vmatpush1.bf16.msra.mxu1 %v1617_v56  ;;  %v1703_v56 = vld [vmem:[%s2299_s1 + $0x1b0] ss:$8 sps:$4 sm:$0xff]  }
  0x38   :  { %1136 = vmatpush1.bf16.msra.mxu0 %v1618_v57  ;;  %1031 = vmatprep.subr.bf16.mxu1 %v1619_v58  ;;  %v1706_v57 = vld [vmem:[%s2299_s1 + $0x3b0] ss:$8 sps:$4 sm:$0xff]   ;;  %v1711_v58 = vld [vmem:[%s2299_s1 + $0x1c4] ss:$8 sps:$4 sm:$0xff]  }
  0x39   :  { %1137 = vmatprep.subr.bf16.mxu0 %v1621_v59  ;;  %v1714_v59 = vld [vmem:[%s2299_s1 + $0x3c4] ss:$8 sps:$4 sm:$0xff]  }
  0x3b   :  { %1032 = vmatpush1.bf16.msra.mxu1 %v1623_v60  ;;  %v1709_v60 = vld [vmem:[%s2299_s1 + $0x1c0] ss:$8 sps:$4 sm:$0xff]  }
  0x3c   :  { %1138 = vmatpush1.bf16.msra.mxu0 %v1624_v61  ;;  %1033 = vmatprep.subr.bf16.mxu1 %v1625_v62  ;;  %v1712_v61 = vld [vmem:[%s2299_s1 + $0x3c0] ss:$8 sps:$4 sm:$0xff]   ;;  %v1717_v62 = vld [vmem:[%s2299_s1 + $0x1d4] ss:$8 sps:$4 sm:$0xff]  }
  0x3d   :  { %1139 = vmatprep.subr.bf16.mxu0 %v1627_v63  ;;  %v1720_v63 = vld [vmem:[%s2299_s1 + $0x3d4] ss:$8 sps:$4 sm:$0xff]  }
  0x3f   :  { %1034 = vmatpush1.bf16.msra.mxu1 %v1629_v0  ;;  %v1715_v0 = vld [vmem:[%s2299_s1 + $0x1d0] ss:$8 sps:$4 sm:$0xff]  }
  0x40   :  { %1140 = vmatpush1.bf16.msra.mxu0 %v1630_v1  ;;  %1056 = vmatprep.subr.bf16.mxu1 %v1636_v2  ;;  %v1718_v1 = vld [vmem:[%s2299_s1 + $0x3d0] ss:$8 sps:$4 sm:$0xff]   ;;  %v1728_v2 = vld [vmem:[%s2299_s1 + $0x1e4] ss:$8 sps:$4 sm:$0xff]  }
  0x41   :  { %1162 = vmatprep.subr.bf16.mxu0 %v1642_v3  ;;  %v1732_v3 = vld [vmem:[%s2299_s1 + $0x3e4] ss:$8 sps:$4 sm:$0xff]  }
  0x42   :  { %1036 = vmatmul.mubr.bf16.vlgmr.msra.gmra.mrb[0].mxu1 %v1631_v4  ;;  %v1726_v4 = vld [vmem:[%s2299_s1 + $0x1e0] ss:$8 sps:$4 sm:$0xff]  }
  0x43   :  { %1142 = vmatmul.mubr.bf16.vlgmr.msra.gmra.mrb[0].mxu0 %v1637_v6  ;;  %1057 = vmatpush1.bf16.msra.mxu1 %v1634_v5  ;;  %v1730_v5 = vld [vmem:[%s2299_s1 + $0x3e0] ss:$8 sps:$4 sm:$0xff]   ;;  %v1735_v6 = vld [vmem:[%s2299_s1 + $0x1f4] ss:$8 sps:$4 sm:$0xff]  }
  0x44   :  { %1163 = vmatpush1.bf16.msra.mxu0 %v1640_v7  ;;  %1058 = vmatprep.subr.bf16.mxu1 %v1645_v8  ;;  %v1738_v7 = vld [vmem:[%s2299_s1 + $0x3f4] ss:$8 sps:$4 sm:$0xff]   ;;  %v1733_v8 = vld [vmem:[%s2299_s1 + $0x1f0] ss:$8 sps:$4 sm:$0xff]  }
  0x45   :  { %1164 = vmatprep.subr.bf16.mxu0 %v1648_v9  ;;  %1045 = vmatprep.mubr.bf16.mxu1 %v1721_v29  ;;  %v1736_v9 = vld [vmem:[%s2299_s1 + $0x3f0] ss:$8 sps:$4 sm:$0xff]   ;;  %v1771_v29 = vld [vmem:[%s2299_s1 + $0x464] ss:$8 sps:$4 sm:$0xff]  }
  0x46   :  { %1151 = vmatprep.mubr.bf16.mxu0 %v1723_v30  ;;  %v1769_v30 = vld [vmem:[%s2299_s1 + $0x460] ss:$8 sps:$4 sm:$0xff]  }
  0x47   :  { %1059 = vmatpush1.bf16.msra.mxu1 %v1643_v10  ;;  %v1747_v10 = vld [vmem:[%s2299_s1 + $0x404] ss:$8 sps:$4 sm:$0xff]  }
  0x48   :  { %1165 = vmatpush1.bf16.msra.mxu0 %v1646_v11  ;;  %1060 = vmatprep.subr.bf16.mxu1 %v1651_v12  ;;  %v1739_v11 = vld [vmem:[%s2300_s0 + $0x8] ss:$36 sps:$4 sm:$0xff]   ;;  %v1742_v12 = vld [vmem:[%s2300_s0 + $0x18] ss:$36 sps:$4 sm:$0xff]  }
  0x49   :  { %1166 = vmatprep.subr.bf16.mxu0 %v1654_v13  ;;  %v1745_v13 = vld [vmem:[%s2299_s1 + $0x400] ss:$8 sps:$4 sm:$0xff]  }
  0x4a   :  { %1046 = vmatmul.mubr.bf16.gmra.mrb[4].mxu1 %v1725_v31  ;;  %v1774_v31 = vld [vmem:[%s2299_s1 + $0x474] ss:$8 sps:$4 sm:$0xff]  }
  0x4b   :  { %1061 = vmatpush1.bf16.msra.mxu1 %v1649_v14  ;;  %1152 = vmatmul.mubr.bf16.gmra.mrb[4].mxu0 %v1729_v33  ;;  %v1750_v14 = vld [vmem:[%s2299_s1 + $0x414] ss:$8 sps:$4 sm:$0xff]   ;;  %v1775_v33 = vld [vmem:[%s2300_s0 + $0x20] ss:$36 sps:$4 sm:$0xff]  }
  0x4c   :  { %1167 = vmatpush1.bf16.msra.mxu0 %v1652_v15  ;;  %1062 = vmatprep.subr.bf16.mxu1 %v1657_v16  ;;  %v1751_v15 = vld [vmem:[%s2300_s0 + $0x54] ss:$36 sps:$4 sm:$0xff]   ;;  %v1753_v16 = vld [vmem:[%s2300_s0 + $0x64] ss:$36 sps:$4 sm:$0xff]  }
  0x4d   :  { %1168 = vmatprep.subr.bf16.mxu0 %v1660_v17  ;;  %1088 = vmatprep.mubr.bf16.mxu1 %v1741_v41  ;;  %v1748_v17 = vld [vmem:[%s2299_s1 + $0x410] ss:$8 sps:$4 sm:$0xff]  }
  0x4e   :  { %1194 = vmatprep.mubr.bf16.mxu0 %v1744_v43 }
  0x4f   :  { %1063 = vmatpush1.bf16.msra.mxu1 %v1655_v18  ;;  %v1759_v18 = vld [vmem:[%s2299_s1 + $0x424] ss:$8 sps:$4 sm:$0xff]  }
  0x50   :  { %1169 = vmatpush1.bf16.msra.mxu0 %v1658_v19  ;;  %1064 = vmatprep.subr.bf16.mxu1 %v1663_v20  ;;  %v1755_v19 = vld [vmem:[%s2300_s0 + $0x50] ss:$36 sps:$4 sm:$0xff]   ;;  %v1756_v20 = vld [vmem:[%s2300_s0 + $0x60] ss:$36 sps:$4 sm:$0xff]  }
  0x51   :  { %1170 = vmatprep.subr.bf16.mxu0 %v1666_v21  ;;  %v1757_v21 = vld [vmem:[%s2299_s1 + $0x420] ss:$8 sps:$4 sm:$0xff]  }
  0x53   :  { %1065 = vmatpush1.bf16.msra.mxu1 %v1661_v22  ;;  %v1762_v22 = vld [vmem:[%s2299_s1 + $0x434] ss:$8 sps:$4 sm:$0xff]  }
  0x54   :  { %1171 = vmatpush1.bf16.msra.mxu0 %v1664_v23  ;;  %1066 = vmatprep.subr.bf16.mxu1 %v1669_v24  ;;  %v1760_v23 = vld [vmem:[%s2299_s1 + $0x430] ss:$8 sps:$4 sm:$0xff]   ;;  %v1765_v24 = vld [vmem:[%s2299_s1 + $0x444] ss:$8 sps:$4 sm:$0xff]  }
  0x55   :  { %1172 = vmatprep.subr.bf16.mxu0 %v1672_v25  ;;  %v1777_v25 = vmov 0  }
  0x57   :  { %1067 = vmatpush1.bf16.msra.mxu1 %v1667_v26  ;;  %v1763_v26 = vld [vmem:[%s2299_s1 + $0x440] ss:$8 sps:$4 sm:$0xff]  }
  0x58   :  { %1173 = vmatpush1.bf16.msra.mxu0 %v1670_v27  ;;  %1068 = vmatprep.subr.bf16.mxu1 %v1675_v28  ;;  %v1768_v27 = vld [vmem:[%s2299_s1 + $0x454] ss:$8 sps:$4 sm:$0xff]   ;;  %v1766_v28 = vld [vmem:[%s2299_s1 + $0x450] ss:$8 sps:$4 sm:$0xff]  }
  0x59   :  { %1174 = vmatprep.subr.bf16.mxu0 %v1678_v32  ;;  %v1772_v32 = vld [vmem:[%s2299_s1 + $0x470] ss:$8 sps:$4 sm:$0xff]  }
  0x5b   :  { %1069 = vmatpush1.bf16.msra.mxu1 %v1673_v34  ;;  %v1776_v34 = vld [vmem:[%s2300_s0 + $0x68] ss:$36 sps:$4 sm:$0xff]  }
  0x5c   :  { %1175 = vmatpush1.bf16.msra.mxu0 %v1676_v35  ;;  %1070 = vmatprep.subr.bf16.mxu1 %v1681_v36  ;;  %v181_v35 = vlaneseq }
  0x5d   :  { %1176 = vmatprep.subr.bf16.mxu0 %v1684_v37 }
  0x5e   :  { %v182_v36 = vshrl.u32 %v181_v35, 7 }
  0x5f   :  { %1071 = vmatpush1.bf16.msra.mxu1 %v1679_v38 }
  0x60   :  { %1177 = vmatpush1.bf16.msra.mxu0 %v1682_v39  ;;  %1072 = vmatprep.subr.bf16.mxu1 %v1687_v40  ;;  %v183_v40 = vsub.s32 0, %v182_v36  ;;  %v187_v43 = vsub.s32 1, %v182_v36 }
  0x61   :  { %1178 = vmatprep.subr.bf16.mxu0 %v1690_v42  ;;  %v179_v42 = vld [vmem:[%s2301_s2] sm:$0x3] }
  0x63   :  { %1073 = vmatpush1.bf16.msra.mxu1 %v1685_v44  ;;  %v184_v44 = vrot.slane %v179_v42, %v183_v40 }
  0x64   :  { %1179 = vmatpush1.bf16.msra.mxu0 %v1688_v45  ;;  %1074 = vmatprep.subr.bf16.mxu1 %v1693_v46  ;;  %v188_v45 = vrot.slane %v179_v42, %v187_v43 }
  0x65   :  { %1180 = vmatprep.subr.bf16.mxu0 %v1696_v47 }
  0x67   :  { %1075 = vmatpush1.bf16.msra.mxu1 %v1691_v48 }
  0x68   :  { %1181 = vmatpush1.bf16.msra.mxu0 %v1694_v49  ;;  %1076 = vmatprep.subr.bf16.mxu1 %v1699_v50 }
  0x69   :  { %1182 = vmatprep.subr.bf16.mxu0 %v1702_v51 }
  0x6b   :  { %1077 = vmatpush1.bf16.msra.mxu1 %v1697_v52 }
  0x6c   :  { %1183 = vmatpush1.bf16.msra.mxu0 %v1700_v53  ;;  %1078 = vmatprep.subr.bf16.mxu1 %v1705_v54 }
  0x6d   :  { %1184 = vmatprep.subr.bf16.mxu0 %v1708_v55 }
  0x6f   :  { %1079 = vmatpush1.bf16.msra.mxu1 %v1703_v56 }
  0x70   :  { %1185 = vmatpush1.bf16.msra.mxu0 %v1706_v57  ;;  %1080 = vmatprep.subr.bf16.mxu1 %v1711_v58 }
  0x71   :  { %1186 = vmatprep.subr.bf16.mxu0 %v1714_v59 }
  0x73   :  { %1081 = vmatpush1.bf16.msra.mxu1 %v1709_v60 }
  0x74   :  { %1187 = vmatpush1.bf16.msra.mxu0 %v1712_v61  ;;  %1082 = vmatprep.subr.bf16.mxu1 %v1717_v62 }
  0x75   :  { %1188 = vmatprep.subr.bf16.mxu0 %v1720_v63 }
  0x77   :  { %1083 = vmatpush1.bf16.msra.mxu1 %v1715_v0 }
  0x78   :  { %1189 = vmatpush1.bf16.msra.mxu0 %v1718_v1  ;;  %1084 = vmatprep.subr.bf16.mxu1 %v1728_v2 }
  0x79   :  { %1190 = vmatprep.subr.bf16.mxu0 %v1732_v3 }
  0x7b   :  { %1085 = vmatpush1.bf16.msra.mxu1 %v1726_v4 }
  0x7c   :  { %1191 = vmatpush1.bf16.msra.mxu0 %v1730_v5  ;;  %1086 = vmatprep.subr.bf16.mxu1 %v1735_v6 }
  0x7d   :  { %1192 = vmatprep.subr.bf16.mxu0 %v1738_v7 }
  0x7f   :  { %1087 = vmatpush1.bf16.msra.mxu1 %v1733_v8 }
  0x80   :  { %1193 = vmatpush1.bf16.msra.mxu0 %v1736_v9  ;;  %1478 = vmatprep.subr.bf16.mxu1 %v1747_v10 }
  0x81   :  { %1215 = vmatprep.subr.bf16.mxu0 %v1747_v10 }
  0x82   :  { %1089 = vmatmul.mubr.bf16.vlgmr.msra.gmra.mrb[0].mxu1 %v1739_v11 }
  0x83   :  { %1195 = vmatmul.mubr.bf16.vlgmr.msra.gmra.mrb[0].mxu0 %v1742_v12  ;;  %1486 = vmatpush1.bf16.msra.mxu1 %v1745_v13 }
  0x84   :  { %1216 = vmatpush1.bf16.msra.mxu0 %v1745_v13  ;;  %1479 = vmatprep.subr.bf16.mxu1 %v1750_v14 }
  0x85   :  { %1217 = vmatprep.subr.bf16.mxu0 %v1750_v14  ;;  %1098 = vmatprep.mubr.bf16.mxu1 %v1751_v15 }
  0x86   :  { %1204 = vmatprep.mubr.bf16.mxu0 %v1753_v16 }
  0x87   :  { %1487 = vmatpush1.bf16.msra.mxu1 %v1748_v17 }
  0x88   :  { %1218 = vmatpush1.bf16.msra.mxu0 %v1748_v17  ;;  %1480 = vmatprep.subr.bf16.mxu1 %v1759_v18 }
  0x89   :  { %1219 = vmatprep.subr.bf16.mxu0 %v1759_v18 }
  0x8a   :  { %1099 = vmatmul.mubr.bf16.gmra.mrb[4].mxu1 %v1755_v19 }
  0x8b   :  { %1205 = vmatmul.mubr.bf16.gmra.mrb[4].mxu0 %v1756_v20  ;;  %1488 = vmatpush1.bf16.msra.mxu1 %v1757_v21 }
  0x8c   :  { %1220 = vmatpush1.bf16.msra.mxu0 %v1757_v21  ;;  %1481 = vmatprep.subr.bf16.mxu1 %v1762_v22 }
  0x8d   :  { %1221 = vmatprep.subr.bf16.mxu0 %v1762_v22  ;;  %1247 = vmatprep.mubr.bf16.mxu0 %v1777_v25 }
  0x8e   :  { %1257 = vmatprep.mubr.bf16.mxu1 %v1777_v25 }
  0x8f   :  { %1489 = vmatpush1.bf16.msra.mxu1 %v1760_v23 }
  0x90   :  { %1222 = vmatpush1.bf16.msra.mxu0 %v1760_v23  ;;  %1482 = vmatprep.subr.bf16.mxu1 %v1765_v24 }
  0x91   :  { %1223 = vmatprep.subr.bf16.mxu0 %v1765_v24 }
  0x93   :  { %1490 = vmatpush1.bf16.msra.mxu1 %v1763_v26 }
  0x94   :  { %1224 = vmatpush1.bf16.msra.mxu0 %v1763_v26  ;;  %1483 = vmatprep.subr.bf16.mxu1 %v1768_v27 }
  0x95   :  { %1225 = vmatprep.subr.bf16.mxu0 %v1768_v27 }
  0x97   :  { %1491 = vmatpush1.bf16.msra.mxu1 %v1766_v28 }
  0x98   :  { %1226 = vmatpush1.bf16.msra.mxu0 %v1766_v28  ;;  %1484 = vmatprep.subr.bf16.mxu1 %v1771_v29 }
  0x99   :  { %1227 = vmatprep.subr.bf16.mxu0 %v1771_v29 }
  0x9b   :  { %1492 = vmatpush1.bf16.msra.mxu1 %v1769_v30 }
  0x9c   :  { %1228 = vmatpush1.bf16.msra.mxu0 %v1769_v30  ;;  %1485 = vmatprep.subr.bf16.mxu1 %v1774_v31 }
  0x9d   :  { %1229 = vmatprep.subr.bf16.mxu0 %v1774_v31 }
  0x9f   :  { %1493 = vmatpush1.bf16.msra.mxu1 %v1772_v32 }
  0xa0   :  { %1230 = vmatpush1.bf16.msra.mxu0 %v1772_v32 }
  0xa2   :  { %1258 = vmatmul.mubr.bf16.vlgmr.msra.gmra.mrb[8].mxu1 %v1776_v34 }
  0xa3   :  { %1248 = vmatmul.mubr.bf16.vlgmr.msra.gmra.mrb[0].mxu0 %v1775_v33 }
 0x155   :  { %v1090_v37 = vpop.f32.mrb[0].mxu1 }
 0x156   :  { %v1092_v38 = vpop.f32.mrb[1].mxu1  ;;  %v1494_v62 = vadd.f32 %v1090_v37, %v184_v44 }
 0x157   :  { %v1094_v39 = vpop.f32.mrb[2].mxu1  ;;  %v1496_v63 = vadd.f32 %v1092_v38, %v188_v45 }
 0x158   :  { %v1096_v41 = vpop.f32.mrb[3].mxu1  ;;  %v1498_v2 = vadd.f32 %v1094_v39, %v184_v44 }
 0x159   :  { %v1500_v7 = vadd.f32 %v1096_v41, %v188_v45 }
 0x15d   :  { %v1100_v46 = vpop.f32.mrb[4].mxu1 }
 0x15e   :  { %v1206_v47 = vpop.f32.mrb[4].mxu0  ;;  %v1502_v48 = vadd.f32 %v1100_v46, %v184_v44  ;;  %v1102_v49 = vpop.f32.mrb[5].mxu1 }
 0x15f   :  { %v1208_v50 = vpop.f32.mrb[5].mxu0  ;;  %v1505_v51 = vadd.f32 %v1102_v49, %v188_v45  ;;  %v1104_v52 = vpop.f32.mrb[6].mxu1 }
 0x160   :  { %v1210_v53 = vpop.f32.mrb[6].mxu0  ;;  %v1503_v54 = vadd.f32 %v1502_v48, %v1206_v47  ;;  %v1508_v55 = vadd.f32 %v1104_v52, %v184_v44  ;;  %v1106_v56 = vpop.f32.mrb[7].mxu1 }
 0x161   :  { %v1212_v57 = vpop.f32.mrb[7].mxu0  ;;  %v1506_v58 = vadd.f32 %v1505_v51, %v1208_v50  ;;  %v1511_v59 = vadd.f32 %v1106_v56, %v188_v45 }
 0x162   :  { %v1509_v60 = vadd.f32 %v1508_v55, %v1210_v53 }
 0x163   :  { %v1512_v61 = vadd.f32 %v1511_v59, %v1212_v57 }
 0x175   :  { %v1259_v1 = vpop.f32.mrb[8].mxu1 }
 0x176   :  { %v1249_v0 = vpop.f32.mrb[0].mxu0  ;;  %v1504_v4 = vadd.f32 %v1503_v54, %v1259_v1  ;;  %v1261_v6 = vpop.f32.mrb[9].mxu1 }
 0x177   :  { %v1495_v3 = vadd.f32 %v1494_v62, %v1249_v0  ;;  %v1251_v5 = vpop.f32.mrb[1].mxu0  ;;  %v1507_v9 = vadd.f32 %v1506_v58, %v1261_v6  ;;  %v1263_v11 = vpop.f32.mrb[10].mxu1 }
 0x178   :  { %v1497_v8 = vadd.f32 %v1496_v63, %v1251_v5  ;;  %v1253_v10 = vpop.f32.mrb[2].mxu0  ;;  %v1272_v13 = vmax.f32 %v1504_v4, 0.0  ;;  %v1510_v15 = vadd.f32 %v1509_v60, %v1263_v11  ;;  %v1265_v17 = vpop.f32.mrb[11].mxu1 }
 0x179   :  { %v1268_v12 = vmax.f32 %v1495_v3, 0.0  ;;  %v1499_v14 = vadd.f32 %v1498_v2, %v1253_v10  ;;  %v1255_v16 = vpop.f32.mrb[3].mxu0  ;;  %v1273_v19 = vmax.f32 %v1507_v9, 0.0  ;;  %v1513_v21 = vadd.f32 %v1512_v61, %v1265_v17 }
 0x17a   :  { %v1269_v18 = vmax.f32 %v1497_v8, 0.0  ;;  %v1501_v20 = vadd.f32 %v1500_v7, %v1255_v16  ;;  %v1274_v23 = vmax.f32 %v1510_v15, 0.0 }
 0x17b   :  { %v1270_v22 = vmax.f32 %v1499_v14, 0.0  ;;  %v1476_v25 = vpack.c.bf16 %v1273_v19, %v1272_v13  ;;  %v1275_v27 = vmax.f32 %v1513_v21, 0.0 }
 0x17c   :  { %v1474_v24 = vpack.c.bf16 %v1269_v18, %v1268_v12  ;;  %v1271_v26 = vmax.f32 %v1501_v20, 0.0 }
 0x17d   :  { %1302 = vst [vmem:[%s2302_s3 + $0x10] sm:$0xff] %v1476_v25  ;;  %v1477_v29 = vpack.c.bf16 %v1275_v27, %v1274_v23 }
 0x17e   :  { %1300 = vst [vmem:[%s2302_s3] sm:$0xff] %v1474_v24  ;;  %v1475_v28 = vpack.c.bf16 %v1271_v26, %v1270_v22 }
 0x17f   :  { %1303 = vst [vmem:[%s2302_s3 + $0x18] sm:$0xff] %v1477_v29 }
 0x180   :  { %1301 = vst [vmem:[%s2302_s3 + $0x8] sm:$0xff] %v1475_v28 }

// kernel: conv_vae_forward.16
= control target key start
LH: loop header
LB: loop body
LE: loop exit
PB: predicated region body
PF: predicated region fallthrough
CT: control target
= control target key end

     0   :  { %vm558_vm0 = vcmask 523264   ;;  %s1733_s1 = inlined_call_operand.vmem [shape: bf16[576,128], index: 1, kind: input, shape index: {}]   ;;  %s1734_s0 = inlined_call_operand.vmem [shape: bf16[128,576], index: 0, kind: input, shape index: {}]   ;;  %s1735_s2 = inlined_call_operand.vmem [shape: f32[1,128], index: 2, kind: input, shape index: {}]   ;;  %s1736_s3 = inlined_call_operand.vmem [shape: bf16[128,128], index: 3, kind: output, shape index: {}]  }
   0x1   :  { %v1310_v0 = vld [vmem:[%s1733_s1 + $0x40] sm:$0xff]   ;;  %v1314_v4 = vld [vmem:[%s1733_s1 + $0x48] sm:$0xff]   ;;  %v1318_v8 = vld [vmem:[%s1733_s1 + $0x50] sm:$0xff]  }
   0x2   :  { %v1311_v1 = vld [vmem:[%s1733_s1 + $0xc0] sm:$0xff]   ;;  %1138 = vmatprep.subr.bf16.mxu0 %v1310_v0  ;;  %v1315_v5 = vld [vmem:[%s1733_s1 + $0xc8] sm:$0xff]   ;;  %v1319_v9 = vld [vmem:[%s1733_s1 + $0xd0] sm:$0xff]  }
   0x3   :  { %v1312_v2 = vld [vmem:[%s1733_s1] sm:$0xff]   ;;  %1202 = vmatprep.subr.bf16.mxu1 %v1311_v1  ;;  %v1316_v6 = vld [vmem:[%s1733_s1 + $0x8] sm:$0xff]   ;;  %v1320_v10 = vld [vmem:[%s1733_s1 + $0x10] sm:$0xff]  }
   0x4   :  { %v1313_v3 = vld [vmem:[%s1733_s1 + $0x80] sm:$0xff]   ;;  %1139 = vmatpush3.bf16.msra.mxu0 %v1312_v2  ;;  %v1317_v7 = vld [vmem:[%s1733_s1 + $0x88] sm:$0xff]   ;;  %v1321_v11 = vld [vmem:[%s1733_s1 + $0x90] sm:$0xff]  }
   0x5   :  { %1203 = vmatpush3.bf16.msra.mxu1 %v1313_v3  ;;  %1140 = vmatprep.subr.bf16.mxu0 %v1314_v4  ;;  %v1322_v12 = vld [vmem:[%s1733_s1 + $0x58] sm:$0xff]   ;;  %v1326_v16 = vld [vmem:[%s1733_s1 + $0x60] sm:$0xff]   ;;  %v1330_v20 = vld [vmem:[%s1733_s1 + $0x68] sm:$0xff]  }
   0x6   :  { %1204 = vmatprep.subr.bf16.mxu1 %v1315_v5  ;;  %v1323_v13 = vld [vmem:[%s1733_s1 + $0xd8] sm:$0xff]   ;;  %v1327_v17 = vld [vmem:[%s1733_s1 + $0xe0] sm:$0xff]   ;;  %v1331_v21 = vld [vmem:[%s1733_s1 + $0xe8] sm:$0xff]  }
   0x7   :  { %v1324_v14 = vld [vmem:[%s1733_s1 + $0x18] sm:$0xff]   ;;  %v1328_v18 = vld [vmem:[%s1733_s1 + $0x20] sm:$0xff]   ;;  %v1332_v22 = vld [vmem:[%s1733_s1 + $0x28] sm:$0xff]  }
   0x8   :  { %1141 = vmatpush3.bf16.msra.mxu0 %v1316_v6  ;;  %v1325_v15 = vld [vmem:[%s1733_s1 + $0x98] sm:$0xff]   ;;  %v1329_v19 = vld [vmem:[%s1733_s1 + $0xa0] sm:$0xff]   ;;  %v1333_v23 = vld [vmem:[%s1733_s1 + $0xa8] sm:$0xff]  }
   0x9   :  { %1205 = vmatpush3.bf16.msra.mxu1 %v1317_v7  ;;  %1142 = vmatprep.subr.bf16.mxu0 %v1318_v8  ;;  %v1334_v24 = vld [vmem:[%s1733_s1 + $0x70] sm:$0xff]   ;;  %v1338_v28 = vld [vmem:[%s1733_s1 + $0x78] sm:$0xff]   ;;  %v1347_v35 = vld [vmem:[%s1734_s0 + $0xc] ss:$20 sps:$4 sm:$0xff]  }
   0xa   :  { %1206 = vmatprep.subr.bf16.mxu1 %v1319_v9  ;;  %v1335_v25 = vld [vmem:[%s1733_s1 + $0xf0] sm:$0xff]   ;;  %v1339_v29 = vld [vmem:[%s1733_s1 + $0xf8] sm:$0xff]   ;;  %v1348_v36 = vld [vmem:[%s1733_s1 + $0x100] sm:$0xff]   ;;  %712 = vmatprep.mubr.bf16.mxu1 %v1347_v35 }
   0xb   :  { %v1336_v26 = vld [vmem:[%s1733_s1 + $0x30] sm:$0xff]   ;;  %v1340_v30 = vld [vmem:[%s1733_s1 + $0x38] sm:$0xff]   ;;  %v1349_v37 = vld [vmem:[%s1734_s0 + $0x2c] ss:$20 sps:$4 sm:$0xff]  }
   0xc   :  { %1143 = vmatpush3.bf16.msra.mxu0 %v1320_v10  ;;  %v1337_v27 = vld [vmem:[%s1733_s1 + $0xb0] sm:$0xff]   ;;  %v1341_v31 = vld [vmem:[%s1733_s1 + $0xb8] sm:$0xff]   ;;  %v1361_v42 = vld [vmem:[%s1733_s1 + $0x108] sm:$0xff]  }
   0xd   :  { %1207 = vmatpush3.bf16.msra.mxu1 %v1321_v11  ;;  %1144 = vmatprep.subr.bf16.mxu0 %v1322_v12  ;;  %v1342_v32 = vld [vmem:[%s1734_s0] ss:$20 sps:$4 sm:$0xff]   ;;  %v1344_v33 = vld [vmem:[%s1734_s0 + $0x4] ss:$20 sps:$4 sm:$0xff]   ;;  %v1345_v34 = vld [vmem:[%s1734_s0 + $0x8] ss:$20 sps:$4 sm:$0xff]  }
   0xe   :  { %1208 = vmatprep.subr.bf16.mxu1 %v1323_v13  ;;  %615 = vmatprep.mubr.bf16.mxu0 %v1344_v33  ;;  %v1351_v38 = vld [vmem:[%s1734_s0 + $0x34] ss:$20 sps:$4 sm:$0xff]   ;;  %v1354_v40 = vld [vmem:[%s1734_s0 + $0x30] ss:$20 sps:$4 sm:$0xff]   ;;  %v1360_v45 = vld [vmem:[%s1734_s0 + $0x58] ss:$20 sps:$4 sm:$0xff]  }
   0xf   :  { %v1353_v39 = vld [vmem:[%s1734_s0 + $0x28] ss:$20 sps:$4 sm:$0xff]   ;;  %v1359_v44 = vld [vmem:[%s1734_s0 + $0x50] ss:$20 sps:$4 sm:$0xff]   ;;  %v1366_v50 = vld [vmem:[%s1734_s0 + $0x78] ss:$20 sps:$4 sm:$0xff]  }
  0x10   :  { %1145 = vmatpush3.bf16.msra.mxu0 %v1324_v14  ;;  %v1355_v41 = vld [vmem:[%s1734_s0 + $0x54] ss:$20 sps:$4 sm:$0xff]   ;;  %v1357_v43 = vld [vmem:[%s1734_s0 + $0x5c] ss:$20 sps:$4 sm:$0xff]   ;;  %v1364_v48 = vld [vmem:[%s1734_s0 + $0x84] ss:$20 sps:$4 sm:$0xff]  }
  0x11   :  { %1209 = vmatpush3.bf16.msra.mxu1 %v1325_v15  ;;  %1146 = vmatprep.subr.bf16.mxu0 %v1326_v16  ;;  %v1374_v46 = vld [vmem:[%s1733_s1 + $0x110] sm:$0xff]   ;;  %v1387_v49 = vld [vmem:[%s1733_s1 + $0x118] sm:$0xff]   ;;  %v1370_v53 = vld [vmem:[%s1734_s0 + $0xac] ss:$20 sps:$4 sm:$0xff]  }
  0x12   :  { %1210 = vmatprep.subr.bf16.mxu1 %v1327_v17  ;;  %v1362_v47 = vld [vmem:[%s1734_s0 + $0x7c] ss:$20 sps:$4 sm:$0xff]   ;;  %v1367_v51 = vld [vmem:[%s1734_s0 + $0x80] ss:$20 sps:$4 sm:$0xff]   ;;  %v1368_v52 = vld [vmem:[%s1734_s0 + $0xa4] ss:$20 sps:$4 sm:$0xff]  }
  0x13   :  { %v1372_v54 = vld [vmem:[%s1734_s0 + $0xa0] ss:$20 sps:$4 sm:$0xff]   ;;  %v1373_v55 = vld [vmem:[%s1734_s0 + $0xa8] ss:$20 sps:$4 sm:$0xff]   ;;  %v1380_v59 = vld [vmem:[%s1734_s0 + $0xd0] ss:$20 sps:$4 sm:$0xff]  }
  0x14   :  { %1147 = vmatpush3.bf16.msra.mxu0 %v1328_v18  ;;  %v1375_v56 = vld [vmem:[%s1734_s0 + $0xcc] ss:$20 sps:$4 sm:$0xff]   ;;  %v1377_v57 = vld [vmem:[%s1734_s0 + $0xd4] ss:$20 sps:$4 sm:$0xff]   ;;  %v1383_v61 = vld [vmem:[%s1734_s0 + $0xfc] ss:$20 sps:$4 sm:$0xff]  }
  0x15   :  { %1211 = vmatpush3.bf16.msra.mxu1 %v1329_v19  ;;  %1148 = vmatprep.subr.bf16.mxu0 %v1330_v20  ;;  %v1379_v58 = vld [vmem:[%s1734_s0 + $0xc8] ss:$20 sps:$4 sm:$0xff]   ;;  %v1385_v62 = vld [vmem:[%s1734_s0 + $0xf0] ss:$20 sps:$4 sm:$0xff]   ;;  %v1386_v63 = vld [vmem:[%s1734_s0 + $0xf8] ss:$20 sps:$4 sm:$0xff]  }
  0x16   :  { %1212 = vmatprep.subr.bf16.mxu1 %v1331_v21  ;;  %v1381_v60 = vld [vmem:[%s1734_s0 + $0xf4] ss:$20 sps:$4 sm:$0xff]   ;;  %v1388_v0 = vld [vmem:[%s1734_s0 + $0x11c] ss:$20 sps:$4 sm:$0xff]   ;;  %v1390_v1 = vld [vmem:[%s1734_s0 + $0x124] ss:$20 sps:$4 sm:$0xff]  }
  0x17   :  { %v1392_v2 = vld [vmem:[%s1734_s0 + $0x118] ss:$20 sps:$4 sm:$0xff]   ;;  %v1393_v3 = vld [vmem:[%s1734_s0 + $0x120] ss:$20 sps:$4 sm:$0xff]   ;;  %v1394_v4 = vld [vmem:[%s1734_s0 + $0x10] ss:$20 sps:$4 sm:$0xff]  }
  0x18   :  { %1149 = vmatpush3.bf16.msra.mxu0 %v1332_v22  ;;  %v1395_v5 = vld [vmem:[%s1734_s0 + $0xb0] ss:$20 sps:$4 sm:$0xff]   ;;  %v1396_v6 = vld [vmem:[%s1734_s0 + $0x38] ss:$20 sps:$4 sm:$0xff]   ;;  %v1398_v8 = vld [vmem:[%s1734_s0 + $0x60] ss:$20 sps:$4 sm:$0xff]  }
  0x19   :  { %1213 = vmatpush3.bf16.msra.mxu1 %v1333_v23  ;;  %1150 = vmatprep.subr.bf16.mxu0 %v1334_v24  ;;  %v1397_v7 = vld [vmem:[%s1734_s0 + $0xd8] ss:$20 sps:$4 sm:$0xff]   ;;  %v1399_v9 = vld [vmem:[%s1734_s0 + $0x100] ss:$20 sps:$4 sm:$0xff]   ;;  %v1400_v10 = vld [vmem:[%s1734_s0 + $0x88] ss:$20 sps:$4 sm:$0xff]  }
  0x1a   :  { %1214 = vmatprep.subr.bf16.mxu1 %v1335_v25  ;;  %v1401_v11 = vld [vmem:[%s1734_s0 + $0x128] ss:$20 sps:$4 sm:$0xff]   ;;  %v1661_v14 = vld [vmem:[%s1735_s2] ss:$0 sm:$0xff] }
  0x1c   :  { %1151 = vmatpush3.bf16.msra.mxu0 %v1336_v26 }
  0x1d   :  { %1215 = vmatpush3.bf16.msra.mxu1 %v1337_v27  ;;  %1152 = vmatprep.subr.bf16.mxu0 %v1338_v28 }
  0x1e   :  { %1216 = vmatprep.subr.bf16.mxu1 %v1339_v29 }
  0x20   :  { %1153 = vmatpush3.bf16.msra.mxu0 %v1340_v30 }
  0x21   :  { %1217 = vmatpush3.bf16.msra.mxu1 %v1341_v31  ;;  %1278 = vmatprep.subr.bf16.mxu0 %v1348_v36 }
  0x22   :  { %1302 = vmatprep.subr.bf16.mxu1 %v1348_v36 }
  0x23   :  { %616 = vmatmul.mubr.bf16.vlgmr.msra.gmra.mrb[0].mxu0 %v1342_v32 }
  0x24   :  { %713 = vmatmul.mubr.bf16.vlgmr.msra.gmra.mrb[0].mxu1 %v1345_v34  ;;  %1279 = vmatpush3.bf16.msra.mxu0 %v1348_v36 }
  0x25   :  { %1306 = vmatpush3.bf16.msra.mxu1 %v1348_v36  ;;  %623 = vmatprep.mubr.bf16.mxu0 %v1349_v37 }
  0x26   :  { %720 = vmatprep.mubr.bf16.mxu1 %v1351_v38  ;;  %1280 = vmatprep.subr.bf16.mxu0 %v1361_v42 }
  0x27   :  { %1303 = vmatprep.subr.bf16.mxu1 %v1361_v42 }
  0x28   :  { %1281 = vmatpush3.bf16.msra.mxu0 %v1361_v42 }
  0x29   :  { %1307 = vmatpush3.bf16.msra.mxu1 %v1361_v42  ;;  %1282 = vmatprep.subr.bf16.mxu0 %v1374_v46 }
  0x2a   :  { %1304 = vmatprep.subr.bf16.mxu1 %v1374_v46 }
  0x2b   :  { %624 = vmatmul.mubr.bf16.gmra.mrb[4].mxu0 %v1353_v39 }
  0x2c   :  { %721 = vmatmul.mubr.bf16.gmra.mrb[4].mxu1 %v1354_v40  ;;  %631 = vmatprep.mubr.bf16.mxu0 %v1355_v41 }
  0x2d   :  { %728 = vmatprep.mubr.bf16.mxu1 %v1357_v43  ;;  %1283 = vmatpush3.bf16.msra.mxu0 %v1374_v46 }
  0x2e   :  { %1308 = vmatpush3.bf16.msra.mxu1 %v1374_v46  ;;  %1284 = vmatprep.subr.bf16.mxu0 %v1387_v49 }
  0x2f   :  { %1305 = vmatprep.subr.bf16.mxu1 %v1387_v49 }
  0x31   :  { %1285 = vmatpush3.bf16.msra.mxu0 %v1387_v49 }
  0x32   :  { %1309 = vmatpush3.bf16.msra.mxu1 %v1387_v49 }
  0x33   :  { %632 = vmatmul.mubr.bf16.gmra.mrb[8].mxu0 %v1359_v44 }
  0x34   :  { %729 = vmatmul.mubr.bf16.gmra.mrb[8].mxu1 %v1360_v45  ;;  %639 = vmatprep.mubr.bf16.mxu0 %v1362_v47 }
  0x35   :  { %736 = vmatprep.mubr.bf16.mxu1 %v1364_v48 }
  0x3b   :  { %640 = vmatmul.mubr.bf16.gmra.mrb[12].mxu0 %v1366_v50 }
  0x3c   :  { %737 = vmatmul.mubr.bf16.gmra.mrb[12].mxu1 %v1367_v51  ;;  %647 = vmatprep.mubr.bf16.mxu0 %v1368_v52 }
  0x3d   :  { %744 = vmatprep.mubr.bf16.mxu1 %v1370_v53 }
  0x43   :  { %648 = vmatmul.mubr.bf16.gmra.mrb[16].mxu0 %v1372_v54 }
  0x44   :  { %745 = vmatmul.mubr.bf16.gmra.mrb[16].mxu1 %v1373_v55  ;;  %655 = vmatprep.mubr.bf16.mxu0 %v1375_v56 }
  0x45   :  { %752 = vmatprep.mubr.bf16.mxu1 %v1377_v57 }
  0x4b   :  { %656 = vmatmul.mubr.bf16.gmra.mrb[20].mxu0 %v1379_v58 }
  0x4c   :  { %753 = vmatmul.mubr.bf16.gmra.mrb[20].mxu1 %v1380_v59  ;;  %663 = vmatprep.mubr.bf16.mxu0 %v1381_v60 }
  0x4d   :  { %760 = vmatprep.mubr.bf16.mxu1 %v1383_v61 }
  0x53   :  { %664 = vmatmul.mubr.bf16.gmra.mrb[24].mxu0 %v1385_v62 }
  0x54   :  { %761 = vmatmul.mubr.bf16.gmra.mrb[24].mxu1 %v1386_v63  ;;  %671 = vmatprep.mubr.bf16.mxu0 %v1388_v0 }
  0x55   :  { %768 = vmatprep.mubr.bf16.mxu1 %v1390_v1 }
  0x5b   :  { %672 = vmatmul.mubr.bf16.gmra.mrb[28].mxu0 %v1392_v2 }
  0x5c   :  { %769 = vmatmul.mubr.bf16.gmra.mrb[28].mxu1 %v1393_v3  ;;  %1286 = vmatprep.mubr.msk.bf16.mxu0 %vm558_vm0, %v1394_v4 }
  0x5d   :  { %1294 = vmatprep.mubr.msk.bf16.mxu1 %vm558_vm0, %v1395_v5 }
  0x63   :  { %1287 = vmatmul.mubr.msk.bf16.vlgmr.msra.gmra.mrb[32].mxu0 %vm558_vm0, %v1396_v6 }
  0x64   :  { %1295 = vmatmul.mubr.msk.bf16.vlgmr.msra.gmra.mrb[32].mxu1 %vm558_vm0, %v1397_v7  ;;  %1290 = vmatprep.mubr.msk.bf16.mxu0 %vm558_vm0, %v1398_v8 }
  0x65   :  { %1298 = vmatprep.mubr.msk.bf16.mxu1 %vm558_vm0, %v1399_v9 }
  0x6b   :  { %1291 = vmatmul.mubr.msk.bf16.gmra.mrb[36].mxu0 %vm558_vm0, %v1400_v10 }
  0x6c   :  { %1299 = vmatmul.mubr.msk.bf16.gmra.mrb[36].mxu1 %vm558_vm0, %v1401_v11 }
  0xf6   :  { %v1154_v12 = vpop.f32.mrb[0].mxu0 }
  0xf7   :  { %v1218_v13 = vpop.f32.mrb[0].mxu1  ;;  %v1155_v15 = vpop.f32.mrb[1].mxu0 }
  0xf8   :  { %v1156_v16 = vadd.f32 %v1155_v15, %v1154_v12  ;;  %v1219_v17 = vpop.f32.mrb[1].mxu1  ;;  %v1157_v18 = vpop.f32.mrb[2].mxu0 }
  0xf9   :  { %v1220_v19 = vadd.f32 %v1219_v17, %v1218_v13  ;;  %v1221_v20 = vpop.f32.mrb[2].mxu1  ;;  %v1158_v21 = vpop.f32.mrb[3].mxu0 }
  0xfa   :  { %v618_v22 = vadd.f32 %v1156_v16, %v1661_v14  ;;  %v1159_v23 = vadd.f32 %v1158_v21, %v1157_v18  ;;  %v1222_v24 = vpop.f32.mrb[3].mxu1 }
  0xfb   :  { %v1223_v25 = vadd.f32 %v1222_v24, %v1221_v20 }
  0xfc   :  { %v621_v26 = vadd.f32 %v1159_v23, %v1661_v14  ;;  %v1665_v27 = vadd.f32 %v1220_v19, %v618_v22 }
  0xfe   :  { %v1160_v28 = vpop.f32.mrb[4].mxu0  ;;  %v1667_v29 = vadd.f32 %v1223_v25, %v621_v26 }
  0xff   :  { %v1224_v30 = vpop.f32.mrb[4].mxu1  ;;  %v1161_v31 = vpop.f32.mrb[5].mxu0 }
 0x100   :  { %v1162_v32 = vadd.f32 %v1161_v31, %v1160_v28  ;;  %v1225_v33 = vpop.f32.mrb[5].mxu1  ;;  %v1163_v34 = vpop.f32.mrb[6].mxu0 }
 0x101   :  { %v1226_v35 = vadd.f32 %v1225_v33, %v1224_v30  ;;  %v1227_v36 = vpop.f32.mrb[6].mxu1  ;;  %v1164_v37 = vpop.f32.mrb[7].mxu0 }
 0x102   :  { %v626_v38 = vadd.f32 %v1162_v32, %v1661_v14  ;;  %v1165_v39 = vadd.f32 %v1164_v37, %v1163_v34  ;;  %v1228_v40 = vpop.f32.mrb[7].mxu1 }
 0x103   :  { %v1229_v41 = vadd.f32 %v1228_v40, %v1227_v36 }
 0x104   :  { %v629_v42 = vadd.f32 %v1165_v39, %v1661_v14  ;;  %v1671_v43 = vadd.f32 %v1226_v35, %v626_v38 }
 0x106   :  { %v1166_v44 = vpop.f32.mrb[8].mxu0  ;;  %v1673_v45 = vadd.f32 %v1229_v41, %v629_v42 }
 0x107   :  { %v1230_v46 = vpop.f32.mrb[8].mxu1  ;;  %v1167_v47 = vpop.f32.mrb[9].mxu0 }
 0x108   :  { %v1168_v48 = vadd.f32 %v1167_v47, %v1166_v44  ;;  %v1231_v49 = vpop.f32.mrb[9].mxu1  ;;  %v1169_v50 = vpop.f32.mrb[10].mxu0 }
 0x109   :  { %v1232_v51 = vadd.f32 %v1231_v49, %v1230_v46  ;;  %v1233_v52 = vpop.f32.mrb[10].mxu1  ;;  %v1170_v53 = vpop.f32.mrb[11].mxu0 }
 0x10a   :  { %v634_v54 = vadd.f32 %v1168_v48, %v1661_v14  ;;  %v1171_v55 = vadd.f32 %v1170_v53, %v1169_v50  ;;  %v1234_v56 = vpop.f32.mrb[11].mxu1 }
 0x10b   :  { %v1235_v57 = vadd.f32 %v1234_v56, %v1233_v52 }
 0x10c   :  { %v637_v58 = vadd.f32 %v1171_v55, %v1661_v14  ;;  %v1677_v59 = vadd.f32 %v1232_v51, %v634_v54 }
 0x10e   :  { %v1172_v60 = vpop.f32.mrb[12].mxu0  ;;  %v1679_v61 = vadd.f32 %v1235_v57, %v637_v58 }
 0x10f   :  { %v1236_v62 = vpop.f32.mrb[12].mxu1  ;;  %v1173_v63 = vpop.f32.mrb[13].mxu0 }
 0x110   :  { %v1174_v0 = vadd.f32 %v1173_v63, %v1172_v60  ;;  %v1237_v1 = vpop.f32.mrb[13].mxu1  ;;  %v1175_v2 = vpop.f32.mrb[14].mxu0 }
 0x111   :  { %v1238_v3 = vadd.f32 %v1237_v1, %v1236_v62  ;;  %v1239_v4 = vpop.f32.mrb[14].mxu1  ;;  %v1176_v5 = vpop.f32.mrb[15].mxu0 }
 0x112   :  { %v642_v6 = vadd.f32 %v1174_v0, %v1661_v14  ;;  %v1177_v7 = vadd.f32 %v1176_v5, %v1175_v2  ;;  %v1240_v8 = vpop.f32.mrb[15].mxu1 }
 0x113   :  { %v1241_v9 = vadd.f32 %v1240_v8, %v1239_v4 }
 0x114   :  { %v645_v10 = vadd.f32 %v1177_v7, %v1661_v14  ;;  %v1683_v11 = vadd.f32 %v1238_v3, %v642_v6 }
 0x116   :  { %v1178_v12 = vpop.f32.mrb[16].mxu0  ;;  %v1685_v13 = vadd.f32 %v1241_v9, %v645_v10 }
 0x117   :  { %v1242_v15 = vpop.f32.mrb[16].mxu1  ;;  %v1179_v16 = vpop.f32.mrb[17].mxu0 }
 0x118   :  { %v1180_v17 = vadd.f32 %v1179_v16, %v1178_v12  ;;  %v1243_v18 = vpop.f32.mrb[17].mxu1  ;;  %v1181_v19 = vpop.f32.mrb[18].mxu0 }
 0x119   :  { %v1244_v20 = vadd.f32 %v1243_v18, %v1242_v15  ;;  %v1245_v21 = vpop.f32.mrb[18].mxu1  ;;  %v1182_v22 = vpop.f32.mrb[19].mxu0 }
 0x11a   :  { %v650_v23 = vadd.f32 %v1180_v17, %v1661_v14  ;;  %v1183_v24 = vadd.f32 %v1182_v22, %v1181_v19  ;;  %v1246_v25 = vpop.f32.mrb[19].mxu1 }
 0x11b   :  { %v1247_v26 = vadd.f32 %v1246_v25, %v1245_v21 }
 0x11c   :  { %v653_v28 = vadd.f32 %v1183_v24, %v1661_v14  ;;  %v747_v30 = vadd.f32 %v1244_v20, %v650_v23 }
 0x11e   :  { %v1184_v31 = vpop.f32.mrb[20].mxu0  ;;  %v1689_v32 = vadd.f32 %v1247_v26, %v653_v28 }
 0x11f   :  { %v1248_v33 = vpop.f32.mrb[20].mxu1  ;;  %v1185_v34 = vpop.f32.mrb[21].mxu0 }
 0x120   :  { %v1186_v35 = vadd.f32 %v1185_v34, %v1184_v31  ;;  %v1249_v36 = vpop.f32.mrb[21].mxu1  ;;  %v1187_v37 = vpop.f32.mrb[22].mxu0 }
 0x121   :  { %v1250_v38 = vadd.f32 %v1249_v36, %v1248_v33  ;;  %v1251_v39 = vpop.f32.mrb[22].mxu1  ;;  %v1188_v40 = vpop.f32.mrb[23].mxu0 }
 0x122   :  { %v658_v41 = vadd.f32 %v1186_v35, %v1661_v14  ;;  %v1189_v42 = vadd.f32 %v1188_v40, %v1187_v37  ;;  %v1252_v44 = vpop.f32.mrb[23].mxu1 }
 0x123   :  { %v1253_v46 = vadd.f32 %v1252_v44, %v1251_v39 }
 0x124   :  { %v661_v47 = vadd.f32 %v1189_v42, %v1661_v14  ;;  %v755_v48 = vadd.f32 %v1250_v38, %v658_v41 }
 0x126   :  { %v1190_v49 = vpop.f32.mrb[24].mxu0  ;;  %v758_v50 = vadd.f32 %v1253_v46, %v661_v47 }
 0x127   :  { %v1254_v51 = vpop.f32.mrb[24].mxu1  ;;  %v1191_v52 = vpop.f32.mrb[25].mxu0 }
 0x128   :  { %v1192_v53 = vadd.f32 %v1191_v52, %v1190_v49  ;;  %v1255_v54 = vpop.f32.mrb[25].mxu1  ;;  %v1193_v55 = vpop.f32.mrb[26].mxu0 }
 0x129   :  { %v1256_v56 = vadd.f32 %v1255_v54, %v1254_v51  ;;  %v1257_v57 = vpop.f32.mrb[26].mxu1  ;;  %v1194_v58 = vpop.f32.mrb[27].mxu0 }
 0x12a   :  { %v666_v60 = vadd.f32 %v1192_v53, %v1661_v14  ;;  %v1195_v62 = vadd.f32 %v1194_v58, %v1193_v55  ;;  %v1258_v63 = vpop.f32.mrb[27].mxu1 }
 0x12b   :  { %v1259_v0 = vadd.f32 %v1258_v63, %v1257_v57 }
 0x12c   :  { %v669_v1 = vadd.f32 %v1195_v62, %v1661_v14  ;;  %v763_v2 = vadd.f32 %v1256_v56, %v666_v60 }
 0x12e   :  { %v1196_v3 = vpop.f32.mrb[28].mxu0  ;;  %v1695_v4 = vadd.f32 %v1259_v0, %v669_v1 }
 0x12f   :  { %v1260_v5 = vpop.f32.mrb[28].mxu1  ;;  %v1197_v6 = vpop.f32.mrb[29].mxu0 }
 0x130   :  { %v1198_v7 = vadd.f32 %v1197_v6, %v1196_v3  ;;  %v1261_v8 = vpop.f32.mrb[29].mxu1  ;;  %v1199_v9 = vpop.f32.mrb[30].mxu0 }
 0x131   :  { %v1262_v10 = vadd.f32 %v1261_v8, %v1260_v5  ;;  %v1263_v12 = vpop.f32.mrb[30].mxu1  ;;  %v1200_v15 = vpop.f32.mrb[31].mxu0 }
 0x132   :  { %v674_v16 = vadd.f32 %v1198_v7, %v1661_v14  ;;  %v1201_v17 = vadd.f32 %v1200_v15, %v1199_v9  ;;  %v1264_v18 = vpop.f32.mrb[31].mxu1 }
 0x133   :  { %v1265_v19 = vadd.f32 %v1264_v18, %v1263_v12 }
 0x134   :  { %v677_v20 = vadd.f32 %v1201_v17, %v1661_v14  ;;  %v771_v21 = vadd.f32 %v1262_v10, %v674_v16 }
 0x136   :  { %v1288_v22 = vpop.f32.mrb[32].mxu0  ;;  %v774_v23 = vadd.f32 %v1265_v19, %v677_v20 }
 0x137   :  { %v820_v24 = vadd.f32 %v1288_v22, %v1671_v43  ;;  %v1296_v25 = vpop.f32.mrb[32].mxu1  ;;  %v811_v26 = vpop.f32.mrb[33].mxu0 }
 0x138   :  { %v852_v28 = vadd.f32 %v1296_v25, %v755_v48  ;;  %v812_v31 = vadd.f32 %v811_v26, %v1665_v27  ;;  %v843_v33 = vpop.f32.mrb[33].mxu1  ;;  %v1289_v34 = vpop.f32.mrb[34].mxu0 }
 0x139   :  { %v844_v35 = vadd.f32 %v843_v33, %v747_v30  ;;  %v823_v36 = vadd.f32 %v1289_v34, %v1673_v45  ;;  %v1297_v37 = vpop.f32.mrb[34].mxu1  ;;  %v814_v38 = vpop.f32.mrb[35].mxu0  ;;  %v876_v41 = vmax.f32 %v820_v24, 0.0 }
 0x13a   :  { %v855_v39 = vadd.f32 %v1297_v37, %v758_v50  ;;  %v815_v14 = vadd.f32 %v814_v38, %v1667_v29  ;;  %v846_v40 = vpop.f32.mrb[35].mxu1  ;;  %v884_v44 = vmax.f32 %v852_v28, 0.0  ;;  %v874_v46 = vmax.f32 %v812_v31, 0.0 }
 0x13b   :  { %v877_v42 = vmax.f32 %v823_v36, 0.0  ;;  %v847_v43 = vadd.f32 %v846_v40, %v1689_v32  ;;  %v882_v27 = vmax.f32 %v844_v35, 0.0 }
 0x13c   :  { %v885_v47 = vmax.f32 %v855_v39, 0.0  ;;  %v875_v48 = vmax.f32 %v815_v14, 0.0 }
 0x13d   :  { %v1099_v49 = vpack.c.bf16 %v877_v42, %v876_v41  ;;  %v883_v51 = vmax.f32 %v847_v43, 0.0 }
 0x13e   :  { %v1119_v30 = vpack.c.bf16 %v885_v47, %v884_v44  ;;  %v1094_v52 = vpack.c.bf16 %v875_v48, %v874_v46  ;;  %v1292_v45 = vpop.f32.mrb[36].mxu0 }
 0x13f   :  { %1131 = vst [vmem:[%s1736_s3 + $0x8] sm:$0xff] %v1099_v49   ;;  %v1114_v29 = vpack.c.bf16 %v883_v51, %v882_v27  ;;  %v836_v50 = vadd.f32 %v1292_v45, %v1683_v11  ;;  %v1300_v53 = vpop.f32.mrb[36].mxu1  ;;  %v827_v54 = vpop.f32.mrb[37].mxu0 }
 0x140   :  { %1135 = vst [vmem:[%s1736_s3 + $0x28] sm:$0xff] %v1119_v30   ;;  %1095 = vst [vmem:[%s1736_s3] sm:$0xff] %v1094_v52   ;;  %v868_v32 = vadd.f32 %v1300_v53, %v771_v21  ;;  %v828_v55 = vadd.f32 %v827_v54, %v1677_v59  ;;  %v859_v56 = vpop.f32.mrb[37].mxu1  ;;  %v1293_v57 = vpop.f32.mrb[38].mxu0 }
 0x141   :  { %1134 = vst [vmem:[%s1736_s3 + $0x20] sm:$0xff] %v1114_v29   ;;  %v860_v11 = vadd.f32 %v859_v56, %v763_v2  ;;  %v839_v58 = vadd.f32 %v1293_v57, %v1685_v13  ;;  %v1301_v60 = vpop.f32.mrb[38].mxu1  ;;  %v830_v62 = vpop.f32.mrb[39].mxu0  ;;  %v880_v3 = vmax.f32 %v836_v50, 0.0 }
 0x142   :  { %v871_v63 = vadd.f32 %v1301_v60, %v774_v23  ;;  %v831_v0 = vadd.f32 %v830_v62, %v1679_v61  ;;  %v862_v1 = vpop.f32.mrb[39].mxu1  ;;  %v888_v59 = vmax.f32 %v868_v32, 0.0  ;;  %v878_v7 = vmax.f32 %v828_v55, 0.0 }
 0x143   :  { %v881_v5 = vmax.f32 %v839_v58, 0.0  ;;  %v863_v6 = vadd.f32 %v862_v1, %v1695_v4  ;;  %v886_v10 = vmax.f32 %v860_v11, 0.0 }
 0x144   :  { %v889_v8 = vmax.f32 %v871_v63, 0.0  ;;  %v879_v9 = vmax.f32 %v831_v0, 0.0 }
 0x145   :  { %v1109_v12 = vpack.c.bf16 %v881_v5, %v880_v3  ;;  %v887_v15 = vmax.f32 %v863_v6, 0.0 }
 0x146   :  { %v1129_v2 = vpack.c.bf16 %v889_v8, %v888_v59  ;;  %v1104_v16 = vpack.c.bf16 %v879_v9, %v878_v7 }
 0x147   :  { %1133 = vst [vmem:[%s1736_s3 + $0x18] sm:$0xff] %v1109_v12   ;;  %v1124_v13 = vpack.c.bf16 %v887_v15, %v886_v10 }
 0x148   :  { %1137 = vst [vmem:[%s1736_s3 + $0x38] sm:$0xff] %v1129_v2   ;;  %1132 = vst [vmem:[%s1736_s3 + $0x10] sm:$0xff] %v1104_v16  }
 0x149   :  { %1136 = vst [vmem:[%s1736_s3 + $0x30] sm:$0xff] %v1124_v13  }

// kernel: conv_vae_forward.14
= control target key start
LH: loop header
LB: loop body
LE: loop exit
PB: predicated region body
PF: predicated region fallthrough
CT: control target
= control target key end

     0   :  { %s7796_s1 = inlined_call_operand.vmem [shape: bf16[2304,512], index: 1, kind: input, shape index: {}]   ;;  %s7797_s0 = inlined_call_operand.vmem [shape: bf16[16,2304], index: 0, kind: input, shape index: {}]   ;;  %s7798_s2 = inlined_call_operand.vmem [shape: f32[1,512], index: 2, kind: input, shape index: {}]   ;;  %s7799_s3 = inlined_call_operand.vmem [shape: bf16[16,512], index: 3, kind: output, shape index: {}]  }
   0x1   :  { %v5088_v0 = vld [vmem:[%s7796_s1 + $0x4] ss:$16 sps:$4 sm:$0xff]   ;;  %v5090_v1 = vld [vmem:[%s7796_s1 + $0xc] ss:$16 sps:$4 sm:$0xff]   ;;  %v5092_v2 = vld [vmem:[%s7796_s1] ss:$16 sps:$4 sm:$0xff]  }
   0x2   :  { %3600 = vmatprep.subr.bf16.mxu0 %v5088_v0  ;;  %v5093_v3 = vld [vmem:[%s7796_s1 + $0x8] ss:$16 sps:$4 sm:$0xff]   ;;  %3987 = vmatprep.subr.bf16.mxu1 %v5090_v1  ;;  %v5094_v4 = vld [vmem:[%s7796_s1 + $0x24] ss:$16 sps:$4 sm:$0xff]   ;;  %v5096_v5 = vld [vmem:[%s7796_s1 + $0x2c] ss:$16 sps:$4 sm:$0xff]  }
   0x3   :  { %3601 = vmatpush1.bf16.msra.mxu0 %v5092_v2  ;;  %3988 = vmatpush1.bf16.msra.mxu1 %v5093_v3  ;;  %v5098_v6 = vld [vmem:[%s7796_s1 + $0x20] ss:$16 sps:$4 sm:$0xff]   ;;  %v5099_v7 = vld [vmem:[%s7796_s1 + $0x28] ss:$16 sps:$4 sm:$0xff]   ;;  %v5100_v8 = vld [vmem:[%s7796_s1 + $0x44] ss:$16 sps:$4 sm:$0xff]  }
   0x4   :  { %3602 = vmatprep.subr.bf16.mxu0 %v5094_v4  ;;  %3989 = vmatprep.subr.bf16.mxu1 %v5096_v5  ;;  %v5102_v9 = vld [vmem:[%s7796_s1 + $0x4c] ss:$16 sps:$4 sm:$0xff]   ;;  %v5104_v10 = vld [vmem:[%s7796_s1 + $0x40] ss:$16 sps:$4 sm:$0xff]   ;;  %v5105_v11 = vld [vmem:[%s7796_s1 + $0x48] ss:$16 sps:$4 sm:$0xff]  }
   0x5   :  { %v5106_v12 = vld [vmem:[%s7796_s1 + $0x64] ss:$16 sps:$4 sm:$0xff]   ;;  %v5108_v13 = vld [vmem:[%s7796_s1 + $0x6c] ss:$16 sps:$4 sm:$0xff]   ;;  %v5110_v14 = vld [vmem:[%s7796_s1 + $0x60] ss:$16 sps:$4 sm:$0xff]  }
   0x6   :  { %v5111_v15 = vld [vmem:[%s7796_s1 + $0x68] ss:$16 sps:$4 sm:$0xff]   ;;  %v5112_v16 = vld [vmem:[%s7796_s1 + $0x84] ss:$16 sps:$4 sm:$0xff]   ;;  %v5114_v17 = vld [vmem:[%s7796_s1 + $0x8c] ss:$16 sps:$4 sm:$0xff]  }
   0x7   :  { %3603 = vmatpush1.bf16.msra.mxu0 %v5098_v6  ;;  %3990 = vmatpush1.bf16.msra.mxu1 %v5099_v7  ;;  %v5116_v18 = vld [vmem:[%s7796_s1 + $0x80] ss:$16 sps:$4 sm:$0xff]   ;;  %v5117_v19 = vld [vmem:[%s7796_s1 + $0x88] ss:$16 sps:$4 sm:$0xff]   ;;  %v5118_v20 = vld [vmem:[%s7796_s1 + $0xa4] ss:$16 sps:$4 sm:$0xff]  }
   0x8   :  { %3604 = vmatprep.subr.bf16.mxu0 %v5100_v8  ;;  %3991 = vmatprep.subr.bf16.mxu1 %v5102_v9  ;;  %v5120_v21 = vld [vmem:[%s7796_s1 + $0xac] ss:$16 sps:$4 sm:$0xff]   ;;  %v5122_v22 = vld [vmem:[%s7796_s1 + $0xa0] ss:$16 sps:$4 sm:$0xff]   ;;  %v5123_v23 = vld [vmem:[%s7796_s1 + $0xa8] ss:$16 sps:$4 sm:$0xff]  }
   0x9   :  { %v5124_v24 = vld [vmem:[%s7796_s1 + $0xc4] ss:$16 sps:$4 sm:$0xff]   ;;  %v5126_v25 = vld [vmem:[%s7796_s1 + $0xcc] ss:$16 sps:$4 sm:$0xff]   ;;  %v5128_v26 = vld [vmem:[%s7796_s1 + $0xc0] ss:$16 sps:$4 sm:$0xff]  }
   0xa   :  { %v5129_v27 = vld [vmem:[%s7796_s1 + $0xc8] ss:$16 sps:$4 sm:$0xff]   ;;  %v5130_v28 = vld [vmem:[%s7796_s1 + $0xe4] ss:$16 sps:$4 sm:$0xff]   ;;  %v5132_v29 = vld [vmem:[%s7796_s1 + $0xec] ss:$16 sps:$4 sm:$0xff]  }
   0xb   :  { %3605 = vmatpush1.bf16.msra.mxu0 %v5104_v10  ;;  %3992 = vmatpush1.bf16.msra.mxu1 %v5105_v11  ;;  %v5134_v30 = vld [vmem:[%s7796_s1 + $0xe0] ss:$16 sps:$4 sm:$0xff]   ;;  %v5135_v31 = vld [vmem:[%s7796_s1 + $0xe8] ss:$16 sps:$4 sm:$0xff]   ;;  %v5136_v32 = vld [vmem:[%s7796_s1 + $0x104] ss:$16 sps:$4 sm:$0xff]  }
   0xc   :  { %3606 = vmatprep.subr.bf16.mxu0 %v5106_v12  ;;  %3993 = vmatprep.subr.bf16.mxu1 %v5108_v13  ;;  %v5138_v33 = vld [vmem:[%s7796_s1 + $0x10c] ss:$16 sps:$4 sm:$0xff]   ;;  %v5140_v34 = vld [vmem:[%s7796_s1 + $0x100] ss:$16 sps:$4 sm:$0xff]   ;;  %v5141_v35 = vld [vmem:[%s7796_s1 + $0x108] ss:$16 sps:$4 sm:$0xff]  }
   0xd   :  { %v5142_v36 = vld [vmem:[%s7796_s1 + $0x124] ss:$16 sps:$4 sm:$0xff]   ;;  %v5144_v37 = vld [vmem:[%s7796_s1 + $0x12c] ss:$16 sps:$4 sm:$0xff]   ;;  %v5146_v38 = vld [vmem:[%s7796_s1 + $0x120] ss:$16 sps:$4 sm:$0xff]  }
   0xe   :  { %v5147_v39 = vld [vmem:[%s7796_s1 + $0x128] ss:$16 sps:$4 sm:$0xff]   ;;  %v5148_v40 = vld [vmem:[%s7796_s1 + $0x144] ss:$16 sps:$4 sm:$0xff]   ;;  %v5150_v41 = vld [vmem:[%s7796_s1 + $0x14c] ss:$16 sps:$4 sm:$0xff]  }
   0xf   :  { %3607 = vmatpush1.bf16.msra.mxu0 %v5110_v14  ;;  %3994 = vmatpush1.bf16.msra.mxu1 %v5111_v15  ;;  %v5152_v42 = vld [vmem:[%s7796_s1 + $0x140] ss:$16 sps:$4 sm:$0xff]   ;;  %v5153_v43 = vld [vmem:[%s7796_s1 + $0x148] ss:$16 sps:$4 sm:$0xff]   ;;  %v5154_v44 = vld [vmem:[%s7796_s1 + $0x164] ss:$16 sps:$4 sm:$0xff]  }
  0x10   :  { %3608 = vmatprep.subr.bf16.mxu0 %v5112_v16  ;;  %3995 = vmatprep.subr.bf16.mxu1 %v5114_v17  ;;  %v5156_v45 = vld [vmem:[%s7796_s1 + $0x16c] ss:$16 sps:$4 sm:$0xff]   ;;  %v5158_v46 = vld [vmem:[%s7796_s1 + $0x160] ss:$16 sps:$4 sm:$0xff]   ;;  %v5159_v47 = vld [vmem:[%s7796_s1 + $0x168] ss:$16 sps:$4 sm:$0xff]  }
  0x11   :  { %v5186_v48 = vld [vmem:[%s7797_s0 + $0x4] ss:$72 sps:$4 sm:$0xff]   ;;  %v5164_v51 = vld [vmem:[%s7796_s1 + $0x180] ss:$16 sps:$4 sm:$0xff]   ;;  %v5165_v52 = vld [vmem:[%s7796_s1 + $0x188] ss:$16 sps:$4 sm:$0xff]  }
  0x12   :  { %v5160_v49 = vld [vmem:[%s7796_s1 + $0x184] ss:$16 sps:$4 sm:$0xff]   ;;  %v5162_v50 = vld [vmem:[%s7796_s1 + $0x18c] ss:$16 sps:$4 sm:$0xff]   ;;  %3632 = vmatprep.mubr.bf16.mxu0 %v5186_v48  ;;  %4019 = vmatprep.mubr.bf16.mxu1 %v5186_v48  ;;  %v5170_v55 = vld [vmem:[%s7796_s1 + $0x1a0] ss:$16 sps:$4 sm:$0xff]  }
  0x13   :  { %3609 = vmatpush1.bf16.msra.mxu0 %v5116_v18  ;;  %3996 = vmatpush1.bf16.msra.mxu1 %v5117_v19  ;;  %v5166_v53 = vld [vmem:[%s7796_s1 + $0x1a4] ss:$16 sps:$4 sm:$0xff]   ;;  %v5168_v54 = vld [vmem:[%s7796_s1 + $0x1ac] ss:$16 sps:$4 sm:$0xff]   ;;  %v5171_v56 = vld [vmem:[%s7796_s1 + $0x1a8] ss:$16 sps:$4 sm:$0xff]  }
  0x14   :  { %3610 = vmatprep.subr.bf16.mxu0 %v5118_v20  ;;  %3997 = vmatprep.subr.bf16.mxu1 %v5120_v21  ;;  %v5172_v57 = vld [vmem:[%s7796_s1 + $0x1c4] ss:$16 sps:$4 sm:$0xff]   ;;  %v5174_v58 = vld [vmem:[%s7796_s1 + $0x1cc] ss:$16 sps:$4 sm:$0xff]   ;;  %v5176_v59 = vld [vmem:[%s7796_s1 + $0x1c0] ss:$16 sps:$4 sm:$0xff]  }
  0x15   :  { %v5177_v60 = vld [vmem:[%s7796_s1 + $0x1c8] ss:$16 sps:$4 sm:$0xff]   ;;  %v5178_v61 = vld [vmem:[%s7796_s1 + $0x1e4] ss:$16 sps:$4 sm:$0xff]   ;;  %v5180_v62 = vld [vmem:[%s7796_s1 + $0x1ec] ss:$16 sps:$4 sm:$0xff]  }
  0x16   :  { %v5182_v63 = vld [vmem:[%s7796_s1 + $0x1e0] ss:$16 sps:$4 sm:$0xff]   ;;  %v5183_v0 = vld [vmem:[%s7796_s1 + $0x1e8] ss:$16 sps:$4 sm:$0xff]   ;;  %v5189_v1 = vld [vmem:[%s7796_s1 + $0x204] ss:$16 sps:$4 sm:$0xff]  }
  0x17   :  { %3611 = vmatpush1.bf16.msra.mxu0 %v5122_v22  ;;  %3998 = vmatpush1.bf16.msra.mxu1 %v5123_v23  ;;  %v5192_v2 = vld [vmem:[%s7796_s1 + $0x20c] ss:$16 sps:$4 sm:$0xff]   ;;  %v5184_v3 = vld [vmem:[%s7797_s0] ss:$72 sps:$4 sm:$0xff]   ;;  %v5195_v6 = vld [vmem:[%s7796_s1 + $0x224] ss:$16 sps:$4 sm:$0xff]  }
  0x18   :  { %3612 = vmatprep.subr.bf16.mxu0 %v5124_v24  ;;  %3999 = vmatprep.subr.bf16.mxu1 %v5126_v25  ;;  %v5187_v4 = vld [vmem:[%s7796_s1 + $0x200] ss:$16 sps:$4 sm:$0xff]   ;;  %v5190_v5 = vld [vmem:[%s7796_s1 + $0x208] ss:$16 sps:$4 sm:$0xff]   ;;  %v5198_v7 = vld [vmem:[%s7796_s1 + $0x22c] ss:$16 sps:$4 sm:$0xff]  }
  0x19   :  { %v5193_v8 = vld [vmem:[%s7796_s1 + $0x220] ss:$16 sps:$4 sm:$0xff]   ;;  %v5196_v9 = vld [vmem:[%s7796_s1 + $0x228] ss:$16 sps:$4 sm:$0xff]   ;;  %v5201_v10 = vld [vmem:[%s7796_s1 + $0x244] ss:$16 sps:$4 sm:$0xff]  }
  0x1a   :  { %v5204_v11 = vld [vmem:[%s7796_s1 + $0x24c] ss:$16 sps:$4 sm:$0xff]   ;;  %v5199_v12 = vld [vmem:[%s7796_s1 + $0x240] ss:$16 sps:$4 sm:$0xff]   ;;  %v5202_v13 = vld [vmem:[%s7796_s1 + $0x248] ss:$16 sps:$4 sm:$0xff]  }
  0x1b   :  { %3613 = vmatpush1.bf16.msra.mxu0 %v5128_v26  ;;  %4000 = vmatpush1.bf16.msra.mxu1 %v5129_v27  ;;  %v5207_v14 = vld [vmem:[%s7796_s1 + $0x264] ss:$16 sps:$4 sm:$0xff]   ;;  %v5210_v15 = vld [vmem:[%s7796_s1 + $0x26c] ss:$16 sps:$4 sm:$0xff]   ;;  %v5205_v16 = vld [vmem:[%s7796_s1 + $0x260] ss:$16 sps:$4 sm:$0xff]  }
  0x1c   :  { %3614 = vmatprep.subr.bf16.mxu0 %v5130_v28  ;;  %4001 = vmatprep.subr.bf16.mxu1 %v5132_v29  ;;  %v5208_v17 = vld [vmem:[%s7796_s1 + $0x268] ss:$16 sps:$4 sm:$0xff]   ;;  %v5213_v18 = vld [vmem:[%s7796_s1 + $0x284] ss:$16 sps:$4 sm:$0xff]   ;;  %v5216_v19 = vld [vmem:[%s7796_s1 + $0x28c] ss:$16 sps:$4 sm:$0xff]  }
  0x1d   :  { %v5211_v20 = vld [vmem:[%s7796_s1 + $0x280] ss:$16 sps:$4 sm:$0xff]   ;;  %v5214_v21 = vld [vmem:[%s7796_s1 + $0x288] ss:$16 sps:$4 sm:$0xff]   ;;  %v5219_v22 = vld [vmem:[%s7796_s1 + $0x2a4] ss:$16 sps:$4 sm:$0xff]  }
  0x1e   :  { %v5222_v23 = vld [vmem:[%s7796_s1 + $0x2ac] ss:$16 sps:$4 sm:$0xff]   ;;  %v5217_v24 = vld [vmem:[%s7796_s1 + $0x2a0] ss:$16 sps:$4 sm:$0xff]   ;;  %v5220_v25 = vld [vmem:[%s7796_s1 + $0x2a8] ss:$16 sps:$4 sm:$0xff]  }
  0x1f   :  { %3615 = vmatpush1.bf16.msra.mxu0 %v5134_v30  ;;  %4002 = vmatpush1.bf16.msra.mxu1 %v5135_v31  ;;  %v5225_v26 = vld [vmem:[%s7796_s1 + $0x2c4] ss:$16 sps:$4 sm:$0xff]   ;;  %v5228_v27 = vld [vmem:[%s7796_s1 + $0x2cc] ss:$16 sps:$4 sm:$0xff]   ;;  %v5223_v28 = vld [vmem:[%s7796_s1 + $0x2c0] ss:$16 sps:$4 sm:$0xff]  }
  0x20   :  { %3616 = vmatprep.subr.bf16.mxu0 %v5136_v32  ;;  %4003 = vmatprep.subr.bf16.mxu1 %v5138_v33  ;;  %v5226_v29 = vld [vmem:[%s7796_s1 + $0x2c8] ss:$16 sps:$4 sm:$0xff]   ;;  %v5285_v30 = vld [vmem:[%s7797_s0 + $0xc] ss:$72 sps:$4 sm:$0xff]   ;;  %v5229_v33 = vld [vmem:[%s7796_s1 + $0x2e0] ss:$16 sps:$4 sm:$0xff]  }
  0x21   :  { %v5231_v31 = vld [vmem:[%s7796_s1 + $0x2e4] ss:$16 sps:$4 sm:$0xff]   ;;  %v5234_v32 = vld [vmem:[%s7796_s1 + $0x2ec] ss:$16 sps:$4 sm:$0xff]  }
  0x22   :  { %v5258_v48 = vld [vmem:[%s7796_s1 + $0x36c] ss:$16 sps:$4 sm:$0xff]  }
  0x23   :  { %3617 = vmatpush1.bf16.msra.mxu0 %v5140_v34  ;;  %4004 = vmatpush1.bf16.msra.mxu1 %v5141_v35  ;;  %v5232_v34 = vld [vmem:[%s7796_s1 + $0x2e8] ss:$16 sps:$4 sm:$0xff]   ;;  %v5237_v35 = vld [vmem:[%s7796_s1 + $0x304] ss:$16 sps:$4 sm:$0xff]  }
  0x24   :  { %3618 = vmatprep.subr.bf16.mxu0 %v5142_v36  ;;  %4005 = vmatprep.subr.bf16.mxu1 %v5144_v37  ;;  %v5240_v36 = vld [vmem:[%s7796_s1 + $0x30c] ss:$16 sps:$4 sm:$0xff]   ;;  %v5235_v37 = vld [vmem:[%s7796_s1 + $0x300] ss:$16 sps:$4 sm:$0xff]  }
  0x27   :  { %3619 = vmatpush1.bf16.msra.mxu0 %v5146_v38  ;;  %4006 = vmatpush1.bf16.msra.mxu1 %v5147_v39  ;;  %v5238_v38 = vld [vmem:[%s7796_s1 + $0x308] ss:$16 sps:$4 sm:$0xff]   ;;  %v5243_v39 = vld [vmem:[%s7796_s1 + $0x324] ss:$16 sps:$4 sm:$0xff]  }
  0x28   :  { %3620 = vmatprep.subr.bf16.mxu0 %v5148_v40  ;;  %4007 = vmatprep.subr.bf16.mxu1 %v5150_v41  ;;  %v5246_v40 = vld [vmem:[%s7796_s1 + $0x32c] ss:$16 sps:$4 sm:$0xff]   ;;  %v5241_v41 = vld [vmem:[%s7796_s1 + $0x320] ss:$16 sps:$4 sm:$0xff]  }
  0x2b   :  { %3621 = vmatpush1.bf16.msra.mxu0 %v5152_v42  ;;  %4008 = vmatpush1.bf16.msra.mxu1 %v5153_v43  ;;  %v5244_v42 = vld [vmem:[%s7796_s1 + $0x328] ss:$16 sps:$4 sm:$0xff]   ;;  %v5249_v43 = vld [vmem:[%s7796_s1 + $0x344] ss:$16 sps:$4 sm:$0xff]  }
  0x2c   :  { %3622 = vmatprep.subr.bf16.mxu0 %v5154_v44  ;;  %4009 = vmatprep.subr.bf16.mxu1 %v5156_v45  ;;  %v5252_v44 = vld [vmem:[%s7796_s1 + $0x34c] ss:$16 sps:$4 sm:$0xff]   ;;  %v5247_v45 = vld [vmem:[%s7796_s1 + $0x340] ss:$16 sps:$4 sm:$0xff]  }
  0x2f   :  { %3623 = vmatpush1.bf16.msra.mxu0 %v5158_v46  ;;  %4010 = vmatpush1.bf16.msra.mxu1 %v5159_v47  ;;  %v5250_v46 = vld [vmem:[%s7796_s1 + $0x348] ss:$16 sps:$4 sm:$0xff]   ;;  %v5255_v47 = vld [vmem:[%s7796_s1 + $0x364] ss:$16 sps:$4 sm:$0xff]  }
  0x30   :  { %3624 = vmatprep.subr.bf16.mxu0 %v5160_v49  ;;  %4011 = vmatprep.subr.bf16.mxu1 %v5162_v50  ;;  %v5253_v49 = vld [vmem:[%s7796_s1 + $0x360] ss:$16 sps:$4 sm:$0xff]   ;;  %v5256_v50 = vld [vmem:[%s7796_s1 + $0x368] ss:$16 sps:$4 sm:$0xff]  }
  0x33   :  { %3625 = vmatpush1.bf16.msra.mxu0 %v5164_v51  ;;  %4012 = vmatpush1.bf16.msra.mxu1 %v5165_v52  ;;  %v5261_v51 = vld [vmem:[%s7796_s1 + $0x384] ss:$16 sps:$4 sm:$0xff]   ;;  %v5264_v52 = vld [vmem:[%s7796_s1 + $0x38c] ss:$16 sps:$4 sm:$0xff]  }
  0x34   :  { %3626 = vmatprep.subr.bf16.mxu0 %v5166_v53  ;;  %4013 = vmatprep.subr.bf16.mxu1 %v5168_v54  ;;  %v5259_v53 = vld [vmem:[%s7796_s1 + $0x380] ss:$16 sps:$4 sm:$0xff]   ;;  %v5262_v54 = vld [vmem:[%s7796_s1 + $0x388] ss:$16 sps:$4 sm:$0xff]  }
  0x37   :  { %3627 = vmatpush1.bf16.msra.mxu0 %v5170_v55  ;;  %4014 = vmatpush1.bf16.msra.mxu1 %v5171_v56  ;;  %v5267_v55 = vld [vmem:[%s7796_s1 + $0x3a4] ss:$16 sps:$4 sm:$0xff]   ;;  %v5270_v56 = vld [vmem:[%s7796_s1 + $0x3ac] ss:$16 sps:$4 sm:$0xff]  }
  0x38   :  { %3628 = vmatprep.subr.bf16.mxu0 %v5172_v57  ;;  %4015 = vmatprep.subr.bf16.mxu1 %v5174_v58  ;;  %v5265_v57 = vld [vmem:[%s7796_s1 + $0x3a0] ss:$16 sps:$4 sm:$0xff]   ;;  %v5268_v58 = vld [vmem:[%s7796_s1 + $0x3a8] ss:$16 sps:$4 sm:$0xff]  }
  0x3b   :  { %3629 = vmatpush1.bf16.msra.mxu0 %v5176_v59  ;;  %4016 = vmatpush1.bf16.msra.mxu1 %v5177_v60  ;;  %v5273_v59 = vld [vmem:[%s7796_s1 + $0x3c4] ss:$16 sps:$4 sm:$0xff]   ;;  %v5276_v60 = vld [vmem:[%s7796_s1 + $0x3cc] ss:$16 sps:$4 sm:$0xff]  }
  0x3c   :  { %3630 = vmatprep.subr.bf16.mxu0 %v5178_v61  ;;  %4017 = vmatprep.subr.bf16.mxu1 %v5180_v62  ;;  %v5271_v61 = vld [vmem:[%s7796_s1 + $0x3c0] ss:$16 sps:$4 sm:$0xff]   ;;  %v5274_v62 = vld [vmem:[%s7796_s1 + $0x3c8] ss:$16 sps:$4 sm:$0xff]  }
  0x3f   :  { %3631 = vmatpush1.bf16.msra.mxu0 %v5182_v63  ;;  %4018 = vmatpush1.bf16.msra.mxu1 %v5183_v0  ;;  %v5279_v63 = vld [vmem:[%s7796_s1 + $0x3e4] ss:$16 sps:$4 sm:$0xff]   ;;  %v5282_v0 = vld [vmem:[%s7796_s1 + $0x3ec] ss:$16 sps:$4 sm:$0xff]  }
  0x40   :  { %3643 = vmatprep.subr.bf16.mxu0 %v5189_v1  ;;  %4030 = vmatprep.subr.bf16.mxu1 %v5192_v2  ;;  %v5277_v1 = vld [vmem:[%s7796_s1 + $0x3e0] ss:$16 sps:$4 sm:$0xff]   ;;  %v5280_v2 = vld [vmem:[%s7796_s1 + $0x3e8] ss:$16 sps:$4 sm:$0xff]  }
  0x42   :  { %3633 = vmatmul.mubr.bf16.vlgmr.msra.gmra.mrb[0].mxu0 %v5184_v3  ;;  %4020 = vmatmul.mubr.bf16.vlgmr.msra.gmra.mrb[0].mxu1 %v5184_v3  ;;  %v5288_v3 = vld [vmem:[%s7796_s1 + $0x404] ss:$16 sps:$4 sm:$0xff]  }
  0x43   :  { %3644 = vmatpush1.bf16.msra.mxu0 %v5187_v4  ;;  %4031 = vmatpush1.bf16.msra.mxu1 %v5190_v5  ;;  %v5291_v4 = vld [vmem:[%s7796_s1 + $0x40c] ss:$16 sps:$4 sm:$0xff]   ;;  %v5283_v5 = vld [vmem:[%s7797_s0 + $0x8] ss:$72 sps:$4 sm:$0xff]  }
  0x44   :  { %3645 = vmatprep.subr.bf16.mxu0 %v5195_v6  ;;  %4032 = vmatprep.subr.bf16.mxu1 %v5198_v7  ;;  %v5286_v6 = vld [vmem:[%s7796_s1 + $0x400] ss:$16 sps:$4 sm:$0xff]   ;;  %v5289_v7 = vld [vmem:[%s7796_s1 + $0x408] ss:$16 sps:$4 sm:$0xff]  }
  0x45   :  { %3675 = vmatprep.mubr.bf16.mxu0 %v5285_v30  ;;  %4062 = vmatprep.mubr.bf16.mxu1 %v5285_v30  ;;  %v5327_v30 = vld [vmem:[%s7796_s1 + $0x4cc] ss:$16 sps:$4 sm:$0xff]  }
  0x47   :  { %3646 = vmatpush1.bf16.msra.mxu0 %v5193_v8  ;;  %4033 = vmatpush1.bf16.msra.mxu1 %v5196_v9  ;;  %v5294_v8 = vld [vmem:[%s7796_s1 + $0x424] ss:$16 sps:$4 sm:$0xff]   ;;  %v5297_v9 = vld [vmem:[%s7796_s1 + $0x42c] ss:$16 sps:$4 sm:$0xff]  }
  0x48   :  { %3647 = vmatprep.subr.bf16.mxu0 %v5201_v10  ;;  %4034 = vmatprep.subr.bf16.mxu1 %v5204_v11  ;;  %v5292_v10 = vld [vmem:[%s7796_s1 + $0x420] ss:$16 sps:$4 sm:$0xff]   ;;  %v5295_v11 = vld [vmem:[%s7796_s1 + $0x428] ss:$16 sps:$4 sm:$0xff]  }
  0x4b   :  { %3648 = vmatpush1.bf16.msra.mxu0 %v5199_v12  ;;  %4035 = vmatpush1.bf16.msra.mxu1 %v5202_v13  ;;  %v5384_v12 = vld [vmem:[%s7797_s0 + $0x14] ss:$72 sps:$4 sm:$0xff]  }
  0x4c   :  { %3649 = vmatprep.subr.bf16.mxu0 %v5207_v14  ;;  %4036 = vmatprep.subr.bf16.mxu1 %v5210_v15  ;;  %v5300_v13 = vld [vmem:[%s7796_s1 + $0x444] ss:$16 sps:$4 sm:$0xff]   ;;  %v5303_v14 = vld [vmem:[%s7796_s1 + $0x44c] ss:$16 sps:$4 sm:$0xff]   ;;  %v5298_v15 = vld [vmem:[%s7796_s1 + $0x440] ss:$16 sps:$4 sm:$0xff]  }
  0x4f   :  { %3650 = vmatpush1.bf16.msra.mxu0 %v5205_v16  ;;  %4037 = vmatpush1.bf16.msra.mxu1 %v5208_v17  ;;  %v5301_v16 = vld [vmem:[%s7796_s1 + $0x448] ss:$16 sps:$4 sm:$0xff]   ;;  %v5306_v17 = vld [vmem:[%s7796_s1 + $0x464] ss:$16 sps:$4 sm:$0xff]  }
  0x50   :  { %3651 = vmatprep.subr.bf16.mxu0 %v5213_v18  ;;  %4038 = vmatprep.subr.bf16.mxu1 %v5216_v19  ;;  %v5309_v18 = vld [vmem:[%s7796_s1 + $0x46c] ss:$16 sps:$4 sm:$0xff]   ;;  %v5304_v19 = vld [vmem:[%s7796_s1 + $0x460] ss:$16 sps:$4 sm:$0xff]  }
  0x53   :  { %3652 = vmatpush1.bf16.msra.mxu0 %v5211_v20  ;;  %4039 = vmatpush1.bf16.msra.mxu1 %v5214_v21  ;;  %v5307_v20 = vld [vmem:[%s7796_s1 + $0x468] ss:$16 sps:$4 sm:$0xff]   ;;  %v5312_v21 = vld [vmem:[%s7796_s1 + $0x484] ss:$16 sps:$4 sm:$0xff]  }
  0x54   :  { %3653 = vmatprep.subr.bf16.mxu0 %v5219_v22  ;;  %4040 = vmatprep.subr.bf16.mxu1 %v5222_v23  ;;  %v5315_v22 = vld [vmem:[%s7796_s1 + $0x48c] ss:$16 sps:$4 sm:$0xff]   ;;  %v5310_v23 = vld [vmem:[%s7796_s1 + $0x480] ss:$16 sps:$4 sm:$0xff]  }
  0x57   :  { %3654 = vmatpush1.bf16.msra.mxu0 %v5217_v24  ;;  %4041 = vmatpush1.bf16.msra.mxu1 %v5220_v25  ;;  %v5313_v24 = vld [vmem:[%s7796_s1 + $0x488] ss:$16 sps:$4 sm:$0xff]   ;;  %v5318_v25 = vld [vmem:[%s7796_s1 + $0x4a4] ss:$16 sps:$4 sm:$0xff]  }
  0x58   :  { %3655 = vmatprep.subr.bf16.mxu0 %v5225_v26  ;;  %4042 = vmatprep.subr.bf16.mxu1 %v5228_v27  ;;  %v5321_v26 = vld [vmem:[%s7796_s1 + $0x4ac] ss:$16 sps:$4 sm:$0xff]   ;;  %v5316_v27 = vld [vmem:[%s7796_s1 + $0x4a0] ss:$16 sps:$4 sm:$0xff]  }
  0x5b   :  { %3656 = vmatpush1.bf16.msra.mxu0 %v5223_v28  ;;  %4043 = vmatpush1.bf16.msra.mxu1 %v5226_v29  ;;  %v5319_v28 = vld [vmem:[%s7796_s1 + $0x4a8] ss:$16 sps:$4 sm:$0xff]   ;;  %v5324_v29 = vld [vmem:[%s7796_s1 + $0x4c4] ss:$16 sps:$4 sm:$0xff]  }
  0x5c   :  { %3657 = vmatprep.subr.bf16.mxu0 %v5231_v31  ;;  %4044 = vmatprep.subr.bf16.mxu1 %v5234_v32  ;;  %v5322_v31 = vld [vmem:[%s7796_s1 + $0x4c0] ss:$16 sps:$4 sm:$0xff]   ;;  %v5325_v32 = vld [vmem:[%s7796_s1 + $0x4c8] ss:$16 sps:$4 sm:$0xff]  }
  0x5f   :  { %3658 = vmatpush1.bf16.msra.mxu0 %v5229_v33  ;;  %4045 = vmatpush1.bf16.msra.mxu1 %v5232_v34  ;;  %v5330_v33 = vld [vmem:[%s7796_s1 + $0x4e4] ss:$16 sps:$4 sm:$0xff]   ;;  %v5333_v34 = vld [vmem:[%s7796_s1 + $0x4ec] ss:$16 sps:$4 sm:$0xff]  }
  0x60   :  { %3659 = vmatprep.subr.bf16.mxu0 %v5237_v35  ;;  %4046 = vmatprep.subr.bf16.mxu1 %v5240_v36  ;;  %v5328_v35 = vld [vmem:[%s7796_s1 + $0x4e0] ss:$16 sps:$4 sm:$0xff]   ;;  %v5331_v36 = vld [vmem:[%s7796_s1 + $0x4e8] ss:$16 sps:$4 sm:$0xff]  }
  0x63   :  { %3660 = vmatpush1.bf16.msra.mxu0 %v5235_v37  ;;  %4047 = vmatpush1.bf16.msra.mxu1 %v5238_v38  ;;  %v5336_v37 = vld [vmem:[%s7796_s1 + $0x504] ss:$16 sps:$4 sm:$0xff]   ;;  %v5339_v38 = vld [vmem:[%s7796_s1 + $0x50c] ss:$16 sps:$4 sm:$0xff]  }
  0x64   :  { %3661 = vmatprep.subr.bf16.mxu0 %v5243_v39  ;;  %4048 = vmatprep.subr.bf16.mxu1 %v5246_v40  ;;  %v5334_v39 = vld [vmem:[%s7796_s1 + $0x500] ss:$16 sps:$4 sm:$0xff]   ;;  %v5337_v40 = vld [vmem:[%s7796_s1 + $0x508] ss:$16 sps:$4 sm:$0xff]  }
  0x67   :  { %3662 = vmatpush1.bf16.msra.mxu0 %v5241_v41  ;;  %4049 = vmatpush1.bf16.msra.mxu1 %v5244_v42  ;;  %v5342_v41 = vld [vmem:[%s7796_s1 + $0x524] ss:$16 sps:$4 sm:$0xff]   ;;  %v5345_v42 = vld [vmem:[%s7796_s1 + $0x52c] ss:$16 sps:$4 sm:$0xff]  }
  0x68   :  { %3663 = vmatprep.subr.bf16.mxu0 %v5249_v43  ;;  %4050 = vmatprep.subr.bf16.mxu1 %v5252_v44  ;;  %v5340_v43 = vld [vmem:[%s7796_s1 + $0x520] ss:$16 sps:$4 sm:$0xff]   ;;  %v5343_v44 = vld [vmem:[%s7796_s1 + $0x528] ss:$16 sps:$4 sm:$0xff]  }
  0x6b   :  { %3664 = vmatpush1.bf16.msra.mxu0 %v5247_v45  ;;  %4051 = vmatpush1.bf16.msra.mxu1 %v5250_v46  ;;  %v5348_v45 = vld [vmem:[%s7796_s1 + $0x544] ss:$16 sps:$4 sm:$0xff]   ;;  %v5351_v46 = vld [vmem:[%s7796_s1 + $0x54c] ss:$16 sps:$4 sm:$0xff]  }
  0x6c   :  { %3665 = vmatprep.subr.bf16.mxu0 %v5255_v47  ;;  %4052 = vmatprep.subr.bf16.mxu1 %v5258_v48  ;;  %v5346_v47 = vld [vmem:[%s7796_s1 + $0x540] ss:$16 sps:$4 sm:$0xff]   ;;  %v5349_v48 = vld [vmem:[%s7796_s1 + $0x548] ss:$16 sps:$4 sm:$0xff]  }
  0x6f   :  { %3666 = vmatpush1.bf16.msra.mxu0 %v5253_v49  ;;  %4053 = vmatpush1.bf16.msra.mxu1 %v5256_v50  ;;  %v5354_v49 = vld [vmem:[%s7796_s1 + $0x564] ss:$16 sps:$4 sm:$0xff]   ;;  %v5357_v50 = vld [vmem:[%s7796_s1 + $0x56c] ss:$16 sps:$4 sm:$0xff]  }
  0x70   :  { %3667 = vmatprep.subr.bf16.mxu0 %v5261_v51  ;;  %4054 = vmatprep.subr.bf16.mxu1 %v5264_v52  ;;  %v5352_v51 = vld [vmem:[%s7796_s1 + $0x560] ss:$16 sps:$4 sm:$0xff]   ;;  %v5355_v52 = vld [vmem:[%s7796_s1 + $0x568] ss:$16 sps:$4 sm:$0xff]  }
  0x73   :  { %3668 = vmatpush1.bf16.msra.mxu0 %v5259_v53  ;;  %4055 = vmatpush1.bf16.msra.mxu1 %v5262_v54  ;;  %v5360_v53 = vld [vmem:[%s7796_s1 + $0x584] ss:$16 sps:$4 sm:$0xff]   ;;  %v5363_v54 = vld [vmem:[%s7796_s1 + $0x58c] ss:$16 sps:$4 sm:$0xff]  }
  0x74   :  { %3669 = vmatprep.subr.bf16.mxu0 %v5267_v55  ;;  %4056 = vmatprep.subr.bf16.mxu1 %v5270_v56  ;;  %v5358_v55 = vld [vmem:[%s7796_s1 + $0x580] ss:$16 sps:$4 sm:$0xff]   ;;  %v5361_v56 = vld [vmem:[%s7796_s1 + $0x588] ss:$16 sps:$4 sm:$0xff]  }
  0x77   :  { %3670 = vmatpush1.bf16.msra.mxu0 %v5265_v57  ;;  %4057 = vmatpush1.bf16.msra.mxu1 %v5268_v58  ;;  %v5366_v57 = vld [vmem:[%s7796_s1 + $0x5a4] ss:$16 sps:$4 sm:$0xff]   ;;  %v5369_v58 = vld [vmem:[%s7796_s1 + $0x5ac] ss:$16 sps:$4 sm:$0xff]  }
  0x78   :  { %3671 = vmatprep.subr.bf16.mxu0 %v5273_v59  ;;  %4058 = vmatprep.subr.bf16.mxu1 %v5276_v60  ;;  %v5364_v59 = vld [vmem:[%s7796_s1 + $0x5a0] ss:$16 sps:$4 sm:$0xff]   ;;  %v5367_v60 = vld [vmem:[%s7796_s1 + $0x5a8] ss:$16 sps:$4 sm:$0xff]  }
  0x7b   :  { %3672 = vmatpush1.bf16.msra.mxu0 %v5271_v61  ;;  %4059 = vmatpush1.bf16.msra.mxu1 %v5274_v62  ;;  %v5372_v61 = vld [vmem:[%s7796_s1 + $0x5c4] ss:$16 sps:$4 sm:$0xff]   ;;  %v5375_v62 = vld [vmem:[%s7796_s1 + $0x5cc] ss:$16 sps:$4 sm:$0xff]  }
  0x7c   :  { %3673 = vmatprep.subr.bf16.mxu0 %v5279_v63  ;;  %4060 = vmatprep.subr.bf16.mxu1 %v5282_v0  ;;  %v5370_v63 = vld [vmem:[%s7796_s1 + $0x5c0] ss:$16 sps:$4 sm:$0xff]   ;;  %v5373_v0 = vld [vmem:[%s7796_s1 + $0x5c8] ss:$16 sps:$4 sm:$0xff]  }
  0x7f   :  { %3674 = vmatpush1.bf16.msra.mxu0 %v5277_v1  ;;  %4061 = vmatpush1.bf16.msra.mxu1 %v5280_v2  ;;  %v5378_v1 = vld [vmem:[%s7796_s1 + $0x5e4] ss:$16 sps:$4 sm:$0xff]   ;;  %v5381_v2 = vld [vmem:[%s7796_s1 + $0x5ec] ss:$16 sps:$4 sm:$0xff]  }
  0x80   :  { %3686 = vmatprep.subr.bf16.mxu0 %v5288_v3  ;;  %4073 = vmatprep.subr.bf16.mxu1 %v5291_v4  ;;  %v5376_v3 = vld [vmem:[%s7796_s1 + $0x5e0] ss:$16 sps:$4 sm:$0xff]   ;;  %v5379_v4 = vld [vmem:[%s7796_s1 + $0x5e8] ss:$16 sps:$4 sm:$0xff]  }
  0x82   :  { %3676 = vmatmul.mubr.bf16.vlgmr.msra.gmra.mrb[0].mxu0 %v5283_v5  ;;  %4063 = vmatmul.mubr.bf16.vlgmr.msra.gmra.mrb[0].mxu1 %v5283_v5  ;;  %v5387_v5 = vld [vmem:[%s7796_s1 + $0x604] ss:$16 sps:$4 sm:$0xff]  }
  0x83   :  { %3687 = vmatpush1.bf16.msra.mxu0 %v5286_v6  ;;  %4074 = vmatpush1.bf16.msra.mxu1 %v5289_v7  ;;  %v5390_v6 = vld [vmem:[%s7796_s1 + $0x60c] ss:$16 sps:$4 sm:$0xff]   ;;  %v5382_v7 = vld [vmem:[%s7797_s0 + $0x10] ss:$72 sps:$4 sm:$0xff]  }
  0x84   :  { %3688 = vmatprep.subr.bf16.mxu0 %v5294_v8  ;;  %4075 = vmatprep.subr.bf16.mxu1 %v5297_v9  ;;  %v5385_v8 = vld [vmem:[%s7796_s1 + $0x600] ss:$16 sps:$4 sm:$0xff]   ;;  %v5388_v9 = vld [vmem:[%s7796_s1 + $0x608] ss:$16 sps:$4 sm:$0xff]  }
  0x85   :  { %3718 = vmatprep.mubr.bf16.mxu0 %v5384_v12  ;;  %4105 = vmatprep.mubr.bf16.mxu1 %v5384_v12  ;;  %v5483_v12 = vld [vmem:[%s7797_s0 + $0x1c] ss:$72 sps:$4 sm:$0xff]  }
  0x87   :  { %3689 = vmatpush1.bf16.msra.mxu0 %v5292_v10  ;;  %4076 = vmatpush1.bf16.msra.mxu1 %v5295_v11  ;;  %v5393_v10 = vld [vmem:[%s7796_s1 + $0x624] ss:$16 sps:$4 sm:$0xff]   ;;  %v5396_v11 = vld [vmem:[%s7796_s1 + $0x62c] ss:$16 sps:$4 sm:$0xff]  }
  0x88   :  { %3690 = vmatprep.subr.bf16.mxu0 %v5300_v13  ;;  %4077 = vmatprep.subr.bf16.mxu1 %v5303_v14  ;;  %v5391_v13 = vld [vmem:[%s7796_s1 + $0x620] ss:$16 sps:$4 sm:$0xff]   ;;  %v5394_v14 = vld [vmem:[%s7796_s1 + $0x628] ss:$16 sps:$4 sm:$0xff]  }
  0x8b   :  { %3691 = vmatpush1.bf16.msra.mxu0 %v5298_v15  ;;  %4078 = vmatpush1.bf16.msra.mxu1 %v5301_v16  ;;  %v5399_v15 = vld [vmem:[%s7796_s1 + $0x644] ss:$16 sps:$4 sm:$0xff]   ;;  %v5402_v16 = vld [vmem:[%s7796_s1 + $0x64c] ss:$16 sps:$4 sm:$0xff]  }
  0x8c   :  { %3692 = vmatprep.subr.bf16.mxu0 %v5306_v17  ;;  %4079 = vmatprep.subr.bf16.mxu1 %v5309_v18  ;;  %v5397_v17 = vld [vmem:[%s7796_s1 + $0x640] ss:$16 sps:$4 sm:$0xff]   ;;  %v5400_v18 = vld [vmem:[%s7796_s1 + $0x648] ss:$16 sps:$4 sm:$0xff]  }
  0x8f   :  { %3693 = vmatpush1.bf16.msra.mxu0 %v5304_v19  ;;  %4080 = vmatpush1.bf16.msra.mxu1 %v5307_v20  ;;  %v5405_v19 = vld [vmem:[%s7796_s1 + $0x664] ss:$16 sps:$4 sm:$0xff]   ;;  %v5408_v20 = vld [vmem:[%s7796_s1 + $0x66c] ss:$16 sps:$4 sm:$0xff]  }
  0x90   :  { %3694 = vmatprep.subr.bf16.mxu0 %v5312_v21  ;;  %4081 = vmatprep.subr.bf16.mxu1 %v5315_v22  ;;  %v5403_v21 = vld [vmem:[%s7796_s1 + $0x660] ss:$16 sps:$4 sm:$0xff]   ;;  %v5406_v22 = vld [vmem:[%s7796_s1 + $0x668] ss:$16 sps:$4 sm:$0xff]  }
  0x93   :  { %3695 = vmatpush1.bf16.msra.mxu0 %v5310_v23  ;;  %4082 = vmatpush1.bf16.msra.mxu1 %v5313_v24  ;;  %v5411_v23 = vld [vmem:[%s7796_s1 + $0x684] ss:$16 sps:$4 sm:$0xff]   ;;  %v5414_v24 = vld [vmem:[%s7796_s1 + $0x68c] ss:$16 sps:$4 sm:$0xff]  }
  0x94   :  { %3696 = vmatprep.subr.bf16.mxu0 %v5318_v25  ;;  %4083 = vmatprep.subr.bf16.mxu1 %v5321_v26  ;;  %v5409_v25 = vld [vmem:[%s7796_s1 + $0x680] ss:$16 sps:$4 sm:$0xff]   ;;  %v5412_v26 = vld [vmem:[%s7796_s1 + $0x688] ss:$16 sps:$4 sm:$0xff]  }
  0x97   :  { %3697 = vmatpush1.bf16.msra.mxu0 %v5316_v27  ;;  %4084 = vmatpush1.bf16.msra.mxu1 %v5319_v28  ;;  %v5417_v27 = vld [vmem:[%s7796_s1 + $0x6a4] ss:$16 sps:$4 sm:$0xff]   ;;  %v5420_v28 = vld [vmem:[%s7796_s1 + $0x6ac] ss:$16 sps:$4 sm:$0xff]  }
  0x98   :  { %3698 = vmatprep.subr.bf16.mxu0 %v5324_v29  ;;  %4085 = vmatprep.subr.bf16.mxu1 %v5327_v30  ;;  %v5415_v29 = vld [vmem:[%s7796_s1 + $0x6a0] ss:$16 sps:$4 sm:$0xff]   ;;  %v5418_v30 = vld [vmem:[%s7796_s1 + $0x6a8] ss:$16 sps:$4 sm:$0xff]  }
  0x9b   :  { %3699 = vmatpush1.bf16.msra.mxu0 %v5322_v31  ;;  %4086 = vmatpush1.bf16.msra.mxu1 %v5325_v32  ;;  %v5423_v31 = vld [vmem:[%s7796_s1 + $0x6c4] ss:$16 sps:$4 sm:$0xff]   ;;  %v5426_v32 = vld [vmem:[%s7796_s1 + $0x6cc] ss:$16 sps:$4 sm:$0xff]  }
  0x9c   :  { %3700 = vmatprep.subr.bf16.mxu0 %v5330_v33  ;;  %4087 = vmatprep.subr.bf16.mxu1 %v5333_v34  ;;  %v5421_v33 = vld [vmem:[%s7796_s1 + $0x6c0] ss:$16 sps:$4 sm:$0xff]   ;;  %v5424_v34 = vld [vmem:[%s7796_s1 + $0x6c8] ss:$16 sps:$4 sm:$0xff]  }
  0x9f   :  { %3701 = vmatpush1.bf16.msra.mxu0 %v5328_v35  ;;  %4088 = vmatpush1.bf16.msra.mxu1 %v5331_v36  ;;  %v5429_v35 = vld [vmem:[%s7796_s1 + $0x6e4] ss:$16 sps:$4 sm:$0xff]   ;;  %v5432_v36 = vld [vmem:[%s7796_s1 + $0x6ec] ss:$16 sps:$4 sm:$0xff]  }
  0xa0   :  { %3702 = vmatprep.subr.bf16.mxu0 %v5336_v37  ;;  %4089 = vmatprep.subr.bf16.mxu1 %v5339_v38  ;;  %v5427_v37 = vld [vmem:[%s7796_s1 + $0x6e0] ss:$16 sps:$4 sm:$0xff]   ;;  %v5430_v38 = vld [vmem:[%s7796_s1 + $0x6e8] ss:$16 sps:$4 sm:$0xff]  }
  0xa3   :  { %3703 = vmatpush1.bf16.msra.mxu0 %v5334_v39  ;;  %4090 = vmatpush1.bf16.msra.mxu1 %v5337_v40  ;;  %v5435_v39 = vld [vmem:[%s7796_s1 + $0x704] ss:$16 sps:$4 sm:$0xff]   ;;  %v5438_v40 = vld [vmem:[%s7796_s1 + $0x70c] ss:$16 sps:$4 sm:$0xff]  }
  0xa4   :  { %3704 = vmatprep.subr.bf16.mxu0 %v5342_v41  ;;  %4091 = vmatprep.subr.bf16.mxu1 %v5345_v42  ;;  %v5433_v41 = vld [vmem:[%s7796_s1 + $0x700] ss:$16 sps:$4 sm:$0xff]   ;;  %v5436_v42 = vld [vmem:[%s7796_s1 + $0x708] ss:$16 sps:$4 sm:$0xff]  }
  0xa7   :  { %3705 = vmatpush1.bf16.msra.mxu0 %v5340_v43  ;;  %4092 = vmatpush1.bf16.msra.mxu1 %v5343_v44  ;;  %v5441_v43 = vld [vmem:[%s7796_s1 + $0x724] ss:$16 sps:$4 sm:$0xff]   ;;  %v5444_v44 = vld [vmem:[%s7796_s1 + $0x72c] ss:$16 sps:$4 sm:$0xff]  }
  0xa8   :  { %3706 = vmatprep.subr.bf16.mxu0 %v5348_v45  ;;  %4093 = vmatprep.subr.bf16.mxu1 %v5351_v46  ;;  %v5439_v45 = vld [vmem:[%s7796_s1 + $0x720] ss:$16 sps:$4 sm:$0xff]   ;;  %v5442_v46 = vld [vmem:[%s7796_s1 + $0x728] ss:$16 sps:$4 sm:$0xff]  }
  0xab   :  { %3707 = vmatpush1.bf16.msra.mxu0 %v5346_v47  ;;  %4094 = vmatpush1.bf16.msra.mxu1 %v5349_v48  ;;  %v5447_v47 = vld [vmem:[%s7796_s1 + $0x744] ss:$16 sps:$4 sm:$0xff]   ;;  %v5450_v48 = vld [vmem:[%s7796_s1 + $0x74c] ss:$16 sps:$4 sm:$0xff]  }
  0xac   :  { %3708 = vmatprep.subr.bf16.mxu0 %v5354_v49  ;;  %4095 = vmatprep.subr.bf16.mxu1 %v5357_v50  ;;  %v5445_v49 = vld [vmem:[%s7796_s1 + $0x740] ss:$16 sps:$4 sm:$0xff]   ;;  %v5448_v50 = vld [vmem:[%s7796_s1 + $0x748] ss:$16 sps:$4 sm:$0xff]  }
  0xaf   :  { %3709 = vmatpush1.bf16.msra.mxu0 %v5352_v51  ;;  %4096 = vmatpush1.bf16.msra.mxu1 %v5355_v52  ;;  %v5453_v51 = vld [vmem:[%s7796_s1 + $0x764] ss:$16 sps:$4 sm:$0xff]   ;;  %v5456_v52 = vld [vmem:[%s7796_s1 + $0x76c] ss:$16 sps:$4 sm:$0xff]  }
  0xb0   :  { %3710 = vmatprep.subr.bf16.mxu0 %v5360_v53  ;;  %4097 = vmatprep.subr.bf16.mxu1 %v5363_v54  ;;  %v5451_v53 = vld [vmem:[%s7796_s1 + $0x760] ss:$16 sps:$4 sm:$0xff]   ;;  %v5454_v54 = vld [vmem:[%s7796_s1 + $0x768] ss:$16 sps:$4 sm:$0xff]  }
  0xb3   :  { %3711 = vmatpush1.bf16.msra.mxu0 %v5358_v55  ;;  %4098 = vmatpush1.bf16.msra.mxu1 %v5361_v56  ;;  %v5459_v55 = vld [vmem:[%s7796_s1 + $0x784] ss:$16 sps:$4 sm:$0xff]   ;;  %v5462_v56 = vld [vmem:[%s7796_s1 + $0x78c] ss:$16 sps:$4 sm:$0xff]  }
  0xb4   :  { %3712 = vmatprep.subr.bf16.mxu0 %v5366_v57  ;;  %4099 = vmatprep.subr.bf16.mxu1 %v5369_v58  ;;  %v5457_v57 = vld [vmem:[%s7796_s1 + $0x780] ss:$16 sps:$4 sm:$0xff]   ;;  %v5460_v58 = vld [vmem:[%s7796_s1 + $0x788] ss:$16 sps:$4 sm:$0xff]  }
  0xb7   :  { %3713 = vmatpush1.bf16.msra.mxu0 %v5364_v59  ;;  %4100 = vmatpush1.bf16.msra.mxu1 %v5367_v60  ;;  %v5465_v59 = vld [vmem:[%s7796_s1 + $0x7a4] ss:$16 sps:$4 sm:$0xff]   ;;  %v5468_v60 = vld [vmem:[%s7796_s1 + $0x7ac] ss:$16 sps:$4 sm:$0xff]  }
  0xb8   :  { %3714 = vmatprep.subr.bf16.mxu0 %v5372_v61  ;;  %4101 = vmatprep.subr.bf16.mxu1 %v5375_v62  ;;  %v5463_v61 = vld [vmem:[%s7796_s1 + $0x7a0] ss:$16 sps:$4 sm:$0xff]   ;;  %v5466_v62 = vld [vmem:[%s7796_s1 + $0x7a8] ss:$16 sps:$4 sm:$0xff]  }
  0xbb   :  { %3715 = vmatpush1.bf16.msra.mxu0 %v5370_v63  ;;  %4102 = vmatpush1.bf16.msra.mxu1 %v5373_v0  ;;  %v5471_v63 = vld [vmem:[%s7796_s1 + $0x7c4] ss:$16 sps:$4 sm:$0xff]   ;;  %v5474_v0 = vld [vmem:[%s7796_s1 + $0x7cc] ss:$16 sps:$4 sm:$0xff]  }
  0xbc   :  { %3716 = vmatprep.subr.bf16.mxu0 %v5378_v1  ;;  %4103 = vmatprep.subr.bf16.mxu1 %v5381_v2  ;;  %v5469_v1 = vld [vmem:[%s7796_s1 + $0x7c0] ss:$16 sps:$4 sm:$0xff]   ;;  %v5472_v2 = vld [vmem:[%s7796_s1 + $0x7c8] ss:$16 sps:$4 sm:$0xff]  }
  0xbf   :  { %3717 = vmatpush1.bf16.msra.mxu0 %v5376_v3  ;;  %4104 = vmatpush1.bf16.msra.mxu1 %v5379_v4  ;;  %v5477_v3 = vld [vmem:[%s7796_s1 + $0x7e4] ss:$16 sps:$4 sm:$0xff]   ;;  %v5480_v4 = vld [vmem:[%s7796_s1 + $0x7ec] ss:$16 sps:$4 sm:$0xff]  }
  0xc0   :  { %3729 = vmatprep.subr.bf16.mxu0 %v5387_v5  ;;  %4116 = vmatprep.subr.bf16.mxu1 %v5390_v6  ;;  %v5475_v5 = vld [vmem:[%s7796_s1 + $0x7e0] ss:$16 sps:$4 sm:$0xff]   ;;  %v5478_v6 = vld [vmem:[%s7796_s1 + $0x7e8] ss:$16 sps:$4 sm:$0xff]  }
  0xc2   :  { %3719 = vmatmul.mubr.bf16.vlgmr.msra.gmra.mrb[0].mxu0 %v5382_v7  ;;  %4106 = vmatmul.mubr.bf16.vlgmr.msra.gmra.mrb[0].mxu1 %v5382_v7  ;;  %v5486_v7 = vld [vmem:[%s7796_s1 + $0x804] ss:$16 sps:$4 sm:$0xff]  }
  0xc3   :  { %3730 = vmatpush1.bf16.msra.mxu0 %v5385_v8  ;;  %4117 = vmatpush1.bf16.msra.mxu1 %v5388_v9  ;;  %v5489_v8 = vld [vmem:[%s7796_s1 + $0x80c] ss:$16 sps:$4 sm:$0xff]   ;;  %v5481_v9 = vld [vmem:[%s7797_s0 + $0x18] ss:$72 sps:$4 sm:$0xff]  }
  0xc4   :  { %3731 = vmatprep.subr.bf16.mxu0 %v5393_v10  ;;  %4118 = vmatprep.subr.bf16.mxu1 %v5396_v11  ;;  %v5484_v10 = vld [vmem:[%s7796_s1 + $0x800] ss:$16 sps:$4 sm:$0xff]   ;;  %v5487_v11 = vld [vmem:[%s7796_s1 + $0x808] ss:$16 sps:$4 sm:$0xff]  }
  0xc5   :  { %3761 = vmatprep.mubr.bf16.mxu0 %v5483_v12  ;;  %4148 = vmatprep.mubr.bf16.mxu1 %v5483_v12  ;;  %v5492_v12 = vld [vmem:[%s7796_s1 + $0x824] ss:$16 sps:$4 sm:$0xff]  }
  0xc7   :  { %3732 = vmatpush1.bf16.msra.mxu0 %v5391_v13  ;;  %4119 = vmatpush1.bf16.msra.mxu1 %v5394_v14  ;;  %v5495_v13 = vld [vmem:[%s7796_s1 + $0x82c] ss:$16 sps:$4 sm:$0xff]  }
  0xc8   :  { %3733 = vmatprep.subr.bf16.mxu0 %v5399_v15  ;;  %4120 = vmatprep.subr.bf16.mxu1 %v5402_v16  ;;  %v5582_v14 = vld [vmem:[%s7797_s0 + $0x24] ss:$72 sps:$4 sm:$0xff]   ;;  %v5490_v15 = vld [vmem:[%s7796_s1 + $0x820] ss:$16 sps:$4 sm:$0xff]   ;;  %v5493_v16 = vld [vmem:[%s7796_s1 + $0x828] ss:$16 sps:$4 sm:$0xff]  }
  0xcb   :  { %3734 = vmatpush1.bf16.msra.mxu0 %v5397_v17  ;;  %4121 = vmatpush1.bf16.msra.mxu1 %v5400_v18  ;;  %v5498_v17 = vld [vmem:[%s7796_s1 + $0x844] ss:$16 sps:$4 sm:$0xff]   ;;  %v5501_v18 = vld [vmem:[%s7796_s1 + $0x84c] ss:$16 sps:$4 sm:$0xff]  }
  0xcc   :  { %3735 = vmatprep.subr.bf16.mxu0 %v5405_v19  ;;  %4122 = vmatprep.subr.bf16.mxu1 %v5408_v20  ;;  %v5496_v19 = vld [vmem:[%s7796_s1 + $0x840] ss:$16 sps:$4 sm:$0xff]   ;;  %v5499_v20 = vld [vmem:[%s7796_s1 + $0x848] ss:$16 sps:$4 sm:$0xff]  }
  0xcf   :  { %3736 = vmatpush1.bf16.msra.mxu0 %v5403_v21  ;;  %4123 = vmatpush1.bf16.msra.mxu1 %v5406_v22  ;;  %v5504_v21 = vld [vmem:[%s7796_s1 + $0x864] ss:$16 sps:$4 sm:$0xff]   ;;  %v5507_v22 = vld [vmem:[%s7796_s1 + $0x86c] ss:$16 sps:$4 sm:$0xff]  }
  0xd0   :  { %3737 = vmatprep.subr.bf16.mxu0 %v5411_v23  ;;  %4124 = vmatprep.subr.bf16.mxu1 %v5414_v24  ;;  %v5502_v23 = vld [vmem:[%s7796_s1 + $0x860] ss:$16 sps:$4 sm:$0xff]   ;;  %v5505_v24 = vld [vmem:[%s7796_s1 + $0x868] ss:$16 sps:$4 sm:$0xff]  }
  0xd3   :  { %3738 = vmatpush1.bf16.msra.mxu0 %v5409_v25  ;;  %4125 = vmatpush1.bf16.msra.mxu1 %v5412_v26  ;;  %v5510_v25 = vld [vmem:[%s7796_s1 + $0x884] ss:$16 sps:$4 sm:$0xff]   ;;  %v5513_v26 = vld [vmem:[%s7796_s1 + $0x88c] ss:$16 sps:$4 sm:$0xff]  }
  0xd4   :  { %3739 = vmatprep.subr.bf16.mxu0 %v5417_v27  ;;  %4126 = vmatprep.subr.bf16.mxu1 %v5420_v28  ;;  %v5508_v27 = vld [vmem:[%s7796_s1 + $0x880] ss:$16 sps:$4 sm:$0xff]   ;;  %v5511_v28 = vld [vmem:[%s7796_s1 + $0x888] ss:$16 sps:$4 sm:$0xff]  }
  0xd7   :  { %3740 = vmatpush1.bf16.msra.mxu0 %v5415_v29  ;;  %4127 = vmatpush1.bf16.msra.mxu1 %v5418_v30  ;;  %v5516_v29 = vld [vmem:[%s7796_s1 + $0x8a4] ss:$16 sps:$4 sm:$0xff]   ;;  %v5519_v30 = vld [vmem:[%s7796_s1 + $0x8ac] ss:$16 sps:$4 sm:$0xff]  }
  0xd8   :  { %3741 = vmatprep.subr.bf16.mxu0 %v5423_v31  ;;  %4128 = vmatprep.subr.bf16.mxu1 %v5426_v32  ;;  %v5514_v31 = vld [vmem:[%s7796_s1 + $0x8a0] ss:$16 sps:$4 sm:$0xff]   ;;  %v5517_v32 = vld [vmem:[%s7796_s1 + $0x8a8] ss:$16 sps:$4 sm:$0xff]  }
  0xdb   :  { %3742 = vmatpush1.bf16.msra.mxu0 %v5421_v33  ;;  %4129 = vmatpush1.bf16.msra.mxu1 %v5424_v34  ;;  %v5522_v33 = vld [vmem:[%s7796_s1 + $0x8c4] ss:$16 sps:$4 sm:$0xff]   ;;  %v5525_v34 = vld [vmem:[%s7796_s1 + $0x8cc] ss:$16 sps:$4 sm:$0xff]  }
  0xdc   :  { %3743 = vmatprep.subr.bf16.mxu0 %v5429_v35  ;;  %4130 = vmatprep.subr.bf16.mxu1 %v5432_v36  ;;  %v5520_v35 = vld [vmem:[%s7796_s1 + $0x8c0] ss:$16 sps:$4 sm:$0xff]   ;;  %v5523_v36 = vld [vmem:[%s7796_s1 + $0x8c8] ss:$16 sps:$4 sm:$0xff]  }
  0xdf   :  { %3744 = vmatpush1.bf16.msra.mxu0 %v5427_v37  ;;  %4131 = vmatpush1.bf16.msra.mxu1 %v5430_v38  ;;  %v5528_v37 = vld [vmem:[%s7796_s1 + $0x8e4] ss:$16 sps:$4 sm:$0xff]   ;;  %v5531_v38 = vld [vmem:[%s7796_s1 + $0x8ec] ss:$16 sps:$4 sm:$0xff]  }
  0xe0   :  { %3745 = vmatprep.subr.bf16.mxu0 %v5435_v39  ;;  %4132 = vmatprep.subr.bf16.mxu1 %v5438_v40  ;;  %v5526_v39 = vld [vmem:[%s7796_s1 + $0x8e0] ss:$16 sps:$4 sm:$0xff]   ;;  %v5529_v40 = vld [vmem:[%s7796_s1 + $0x8e8] ss:$16 sps:$4 sm:$0xff]  }
  0xe3   :  { %3746 = vmatpush1.bf16.msra.mxu0 %v5433_v41  ;;  %4133 = vmatpush1.bf16.msra.mxu1 %v5436_v42  ;;  %v5534_v41 = vld [vmem:[%s7796_s1 + $0x904] ss:$16 sps:$4 sm:$0xff]   ;;  %v5537_v42 = vld [vmem:[%s7796_s1 + $0x90c] ss:$16 sps:$4 sm:$0xff]  }
  0xe4   :  { %3747 = vmatprep.subr.bf16.mxu0 %v5441_v43  ;;  %4134 = vmatprep.subr.bf16.mxu1 %v5444_v44  ;;  %v5532_v43 = vld [vmem:[%s7796_s1 + $0x900] ss:$16 sps:$4 sm:$0xff]   ;;  %v5535_v44 = vld [vmem:[%s7796_s1 + $0x908] ss:$16 sps:$4 sm:$0xff]  }
  0xe7   :  { %3748 = vmatpush1.bf16.msra.mxu0 %v5439_v45  ;;  %4135 = vmatpush1.bf16.msra.mxu1 %v5442_v46  ;;  %v5540_v45 = vld [vmem:[%s7796_s1 + $0x924] ss:$16 sps:$4 sm:$0xff]   ;;  %v5543_v46 = vld [vmem:[%s7796_s1 + $0x92c] ss:$16 sps:$4 sm:$0xff]  }
  0xe8   :  { %3749 = vmatprep.subr.bf16.mxu0 %v5447_v47  ;;  %4136 = vmatprep.subr.bf16.mxu1 %v5450_v48  ;;  %v5538_v47 = vld [vmem:[%s7796_s1 + $0x920] ss:$16 sps:$4 sm:$0xff]   ;;  %v5541_v48 = vld [vmem:[%s7796_s1 + $0x928] ss:$16 sps:$4 sm:$0xff]  }
  0xeb   :  { %3750 = vmatpush1.bf16.msra.mxu0 %v5445_v49  ;;  %4137 = vmatpush1.bf16.msra.mxu1 %v5448_v50  ;;  %v5546_v49 = vld [vmem:[%s7796_s1 + $0x944] ss:$16 sps:$4 sm:$0xff]   ;;  %v5549_v50 = vld [vmem:[%s7796_s1 + $0x94c] ss:$16 sps:$4 sm:$0xff]  }
  0xec   :  { %3751 = vmatprep.subr.bf16.mxu0 %v5453_v51  ;;  %4138 = vmatprep.subr.bf16.mxu1 %v5456_v52  ;;  %v5544_v51 = vld [vmem:[%s7796_s1 + $0x940] ss:$16 sps:$4 sm:$0xff]   ;;  %v5547_v52 = vld [vmem:[%s7796_s1 + $0x948] ss:$16 sps:$4 sm:$0xff]  }
  0xef   :  { %3752 = vmatpush1.bf16.msra.mxu0 %v5451_v53  ;;  %4139 = vmatpush1.bf16.msra.mxu1 %v5454_v54  ;;  %v5552_v53 = vld [vmem:[%s7796_s1 + $0x964] ss:$16 sps:$4 sm:$0xff]   ;;  %v5555_v54 = vld [vmem:[%s7796_s1 + $0x96c] ss:$16 sps:$4 sm:$0xff]  }
  0xf0   :  { %3753 = vmatprep.subr.bf16.mxu0 %v5459_v55  ;;  %4140 = vmatprep.subr.bf16.mxu1 %v5462_v56  ;;  %v5550_v55 = vld [vmem:[%s7796_s1 + $0x960] ss:$16 sps:$4 sm:$0xff]   ;;  %v5553_v56 = vld [vmem:[%s7796_s1 + $0x968] ss:$16 sps:$4 sm:$0xff]  }
  0xf3   :  { %3754 = vmatpush1.bf16.msra.mxu0 %v5457_v57  ;;  %4141 = vmatpush1.bf16.msra.mxu1 %v5460_v58  ;;  %v5558_v57 = vld [vmem:[%s7796_s1 + $0x984] ss:$16 sps:$4 sm:$0xff]   ;;  %v5561_v58 = vld [vmem:[%s7796_s1 + $0x98c] ss:$16 sps:$4 sm:$0xff]  }
  0xf4   :  { %3755 = vmatprep.subr.bf16.mxu0 %v5465_v59  ;;  %4142 = vmatprep.subr.bf16.mxu1 %v5468_v60  ;;  %v5556_v59 = vld [vmem:[%s7796_s1 + $0x980] ss:$16 sps:$4 sm:$0xff]   ;;  %v5559_v60 = vld [vmem:[%s7796_s1 + $0x988] ss:$16 sps:$4 sm:$0xff]  }
  0xf7   :  { %3756 = vmatpush1.bf16.msra.mxu0 %v5463_v61  ;;  %4143 = vmatpush1.bf16.msra.mxu1 %v5466_v62  ;;  %v5564_v61 = vld [vmem:[%s7796_s1 + $0x9a4] ss:$16 sps:$4 sm:$0xff]   ;;  %v5567_v62 = vld [vmem:[%s7796_s1 + $0x9ac] ss:$16 sps:$4 sm:$0xff]  }
  0xf8   :  { %3757 = vmatprep.subr.bf16.mxu0 %v5471_v63  ;;  %4144 = vmatprep.subr.bf16.mxu1 %v5474_v0  ;;  %v5562_v63 = vld [vmem:[%s7796_s1 + $0x9a0] ss:$16 sps:$4 sm:$0xff]   ;;  %v5565_v0 = vld [vmem:[%s7796_s1 + $0x9a8] ss:$16 sps:$4 sm:$0xff]  }
  0xfb   :  { %3758 = vmatpush1.bf16.msra.mxu0 %v5469_v1  ;;  %4145 = vmatpush1.bf16.msra.mxu1 %v5472_v2  ;;  %v5570_v1 = vld [vmem:[%s7796_s1 + $0x9c4] ss:$16 sps:$4 sm:$0xff]   ;;  %v5573_v2 = vld [vmem:[%s7796_s1 + $0x9cc] ss:$16 sps:$4 sm:$0xff]  }
  0xfc   :  { %3759 = vmatprep.subr.bf16.mxu0 %v5477_v3  ;;  %4146 = vmatprep.subr.bf16.mxu1 %v5480_v4  ;;  %v5568_v3 = vld [vmem:[%s7796_s1 + $0x9c0] ss:$16 sps:$4 sm:$0xff]   ;;  %v5571_v4 = vld [vmem:[%s7796_s1 + $0x9c8] ss:$16 sps:$4 sm:$0xff]  }
  0xff   :  { %3760 = vmatpush1.bf16.msra.mxu0 %v5475_v5  ;;  %4147 = vmatpush1.bf16.msra.mxu1 %v5478_v6  ;;  %v5576_v5 = vld [vmem:[%s7796_s1 + $0x9e4] ss:$16 sps:$4 sm:$0xff]   ;;  %v5579_v6 = vld [vmem:[%s7796_s1 + $0x9ec] ss:$16 sps:$4 sm:$0xff]  }
 0x100   :  { %3772 = vmatprep.subr.bf16.mxu0 %v5486_v7  ;;  %4159 = vmatprep.subr.bf16.mxu1 %v5489_v8  ;;  %v5574_v7 = vld [vmem:[%s7796_s1 + $0x9e0] ss:$16 sps:$4 sm:$0xff]   ;;  %v5577_v8 = vld [vmem:[%s7796_s1 + $0x9e8] ss:$16 sps:$4 sm:$0xff]  }
 0x102   :  { %3762 = vmatmul.mubr.bf16.vlgmr.msra.gmra.mrb[0].mxu0 %v5481_v9  ;;  %4149 = vmatmul.mubr.bf16.vlgmr.msra.gmra.mrb[0].mxu1 %v5481_v9  ;;  %v5580_v9 = vld [vmem:[%s7797_s0 + $0x20] ss:$72 sps:$4 sm:$0xff]  }
 0x103   :  { %3773 = vmatpush1.bf16.msra.mxu0 %v5484_v10  ;;  %4160 = vmatpush1.bf16.msra.mxu1 %v5487_v11  ;;  %v5585_v10 = vld [vmem:[%s7796_s1 + $0xa04] ss:$16 sps:$4 sm:$0xff]   ;;  %v5588_v11 = vld [vmem:[%s7796_s1 + $0xa0c] ss:$16 sps:$4 sm:$0xff]  }
 0x104   :  { %3774 = vmatprep.subr.bf16.mxu0 %v5492_v12  ;;  %4161 = vmatprep.subr.bf16.mxu1 %v5495_v13  ;;  %v5583_v12 = vld [vmem:[%s7796_s1 + $0xa00] ss:$16 sps:$4 sm:$0xff]   ;;  %v5586_v13 = vld [vmem:[%s7796_s1 + $0xa08] ss:$16 sps:$4 sm:$0xff]  }
 0x105   :  { %3804 = vmatprep.mubr.bf16.mxu0 %v5582_v14  ;;  %4191 = vmatprep.mubr.bf16.mxu1 %v5582_v14  ;;  %v5591_v14 = vld [vmem:[%s7796_s1 + $0xa24] ss:$16 sps:$4 sm:$0xff]  }
 0x107   :  { %3775 = vmatpush1.bf16.msra.mxu0 %v5490_v15  ;;  %4162 = vmatpush1.bf16.msra.mxu1 %v5493_v16  ;;  %v5594_v15 = vld [vmem:[%s7796_s1 + $0xa2c] ss:$16 sps:$4 sm:$0xff]  }
 0x108   :  { %3776 = vmatprep.subr.bf16.mxu0 %v5498_v17  ;;  %4163 = vmatprep.subr.bf16.mxu1 %v5501_v18  ;;  %v5681_v16 = vld [vmem:[%s7797_s0 + $0x2c] ss:$72 sps:$4 sm:$0xff]   ;;  %v5589_v17 = vld [vmem:[%s7796_s1 + $0xa20] ss:$16 sps:$4 sm:$0xff]   ;;  %v5592_v18 = vld [vmem:[%s7796_s1 + $0xa28] ss:$16 sps:$4 sm:$0xff]  }
 0x10b   :  { %3777 = vmatpush1.bf16.msra.mxu0 %v5496_v19  ;;  %4164 = vmatpush1.bf16.msra.mxu1 %v5499_v20  ;;  %v5597_v19 = vld [vmem:[%s7796_s1 + $0xa44] ss:$16 sps:$4 sm:$0xff]   ;;  %v5600_v20 = vld [vmem:[%s7796_s1 + $0xa4c] ss:$16 sps:$4 sm:$0xff]  }
 0x10c   :  { %3778 = vmatprep.subr.bf16.mxu0 %v5504_v21  ;;  %4165 = vmatprep.subr.bf16.mxu1 %v5507_v22  ;;  %v5595_v21 = vld [vmem:[%s7796_s1 + $0xa40] ss:$16 sps:$4 sm:$0xff]   ;;  %v5598_v22 = vld [vmem:[%s7796_s1 + $0xa48] ss:$16 sps:$4 sm:$0xff]  }
 0x10f   :  { %3779 = vmatpush1.bf16.msra.mxu0 %v5502_v23  ;;  %4166 = vmatpush1.bf16.msra.mxu1 %v5505_v24  ;;  %v5603_v23 = vld [vmem:[%s7796_s1 + $0xa64] ss:$16 sps:$4 sm:$0xff]   ;;  %v5606_v24 = vld [vmem:[%s7796_s1 + $0xa6c] ss:$16 sps:$4 sm:$0xff]  }
 0x110   :  { %3780 = vmatprep.subr.bf16.mxu0 %v5510_v25  ;;  %4167 = vmatprep.subr.bf16.mxu1 %v5513_v26  ;;  %v5601_v25 = vld [vmem:[%s7796_s1 + $0xa60] ss:$16 sps:$4 sm:$0xff]   ;;  %v5604_v26 = vld [vmem:[%s7796_s1 + $0xa68] ss:$16 sps:$4 sm:$0xff]  }
 0x113   :  { %3781 = vmatpush1.bf16.msra.mxu0 %v5508_v27  ;;  %4168 = vmatpush1.bf16.msra.mxu1 %v5511_v28  ;;  %v5609_v27 = vld [vmem:[%s7796_s1 + $0xa84] ss:$16 sps:$4 sm:$0xff]   ;;  %v5612_v28 = vld [vmem:[%s7796_s1 + $0xa8c] ss:$16 sps:$4 sm:$0xff]  }
 0x114   :  { %3782 = vmatprep.subr.bf16.mxu0 %v5516_v29  ;;  %4169 = vmatprep.subr.bf16.mxu1 %v5519_v30  ;;  %v5607_v29 = vld [vmem:[%s7796_s1 + $0xa80] ss:$16 sps:$4 sm:$0xff]   ;;  %v5610_v30 = vld [vmem:[%s7796_s1 + $0xa88] ss:$16 sps:$4 sm:$0xff]  }
 0x117   :  { %3783 = vmatpush1.bf16.msra.mxu0 %v5514_v31  ;;  %4170 = vmatpush1.bf16.msra.mxu1 %v5517_v32  ;;  %v5615_v31 = vld [vmem:[%s7796_s1 + $0xaa4] ss:$16 sps:$4 sm:$0xff]   ;;  %v5618_v32 = vld [vmem:[%s7796_s1 + $0xaac] ss:$16 sps:$4 sm:$0xff]  }
 0x118   :  { %3784 = vmatprep.subr.bf16.mxu0 %v5522_v33  ;;  %4171 = vmatprep.subr.bf16.mxu1 %v5525_v34  ;;  %v5613_v33 = vld [vmem:[%s7796_s1 + $0xaa0] ss:$16 sps:$4 sm:$0xff]   ;;  %v5616_v34 = vld [vmem:[%s7796_s1 + $0xaa8] ss:$16 sps:$4 sm:$0xff]  }
 0x11b   :  { %3785 = vmatpush1.bf16.msra.mxu0 %v5520_v35  ;;  %4172 = vmatpush1.bf16.msra.mxu1 %v5523_v36  ;;  %v5621_v35 = vld [vmem:[%s7796_s1 + $0xac4] ss:$16 sps:$4 sm:$0xff]   ;;  %v5624_v36 = vld [vmem:[%s7796_s1 + $0xacc] ss:$16 sps:$4 sm:$0xff]  }
 0x11c   :  { %3786 = vmatprep.subr.bf16.mxu0 %v5528_v37  ;;  %4173 = vmatprep.subr.bf16.mxu1 %v5531_v38  ;;  %v5619_v37 = vld [vmem:[%s7796_s1 + $0xac0] ss:$16 sps:$4 sm:$0xff]   ;;  %v5622_v38 = vld [vmem:[%s7796_s1 + $0xac8] ss:$16 sps:$4 sm:$0xff]  }
 0x11f   :  { %3787 = vmatpush1.bf16.msra.mxu0 %v5526_v39  ;;  %4174 = vmatpush1.bf16.msra.mxu1 %v5529_v40  ;;  %v5627_v39 = vld [vmem:[%s7796_s1 + $0xae4] ss:$16 sps:$4 sm:$0xff]   ;;  %v5630_v40 = vld [vmem:[%s7796_s1 + $0xaec] ss:$16 sps:$4 sm:$0xff]  }
 0x120   :  { %3788 = vmatprep.subr.bf16.mxu0 %v5534_v41  ;;  %4175 = vmatprep.subr.bf16.mxu1 %v5537_v42  ;;  %v5625_v41 = vld [vmem:[%s7796_s1 + $0xae0] ss:$16 sps:$4 sm:$0xff]   ;;  %v5628_v42 = vld [vmem:[%s7796_s1 + $0xae8] ss:$16 sps:$4 sm:$0xff]  }
 0x123   :  { %3789 = vmatpush1.bf16.msra.mxu0 %v5532_v43  ;;  %4176 = vmatpush1.bf16.msra.mxu1 %v5535_v44  ;;  %v5633_v43 = vld [vmem:[%s7796_s1 + $0xb04] ss:$16 sps:$4 sm:$0xff]   ;;  %v5636_v44 = vld [vmem:[%s7796_s1 + $0xb0c] ss:$16 sps:$4 sm:$0xff]  }
 0x124   :  { %3790 = vmatprep.subr.bf16.mxu0 %v5540_v45  ;;  %4177 = vmatprep.subr.bf16.mxu1 %v5543_v46  ;;  %v5631_v45 = vld [vmem:[%s7796_s1 + $0xb00] ss:$16 sps:$4 sm:$0xff]   ;;  %v5634_v46 = vld [vmem:[%s7796_s1 + $0xb08] ss:$16 sps:$4 sm:$0xff]  }
 0x127   :  { %3791 = vmatpush1.bf16.msra.mxu0 %v5538_v47  ;;  %4178 = vmatpush1.bf16.msra.mxu1 %v5541_v48  ;;  %v5639_v47 = vld [vmem:[%s7796_s1 + $0xb24] ss:$16 sps:$4 sm:$0xff]   ;;  %v5642_v48 = vld [vmem:[%s7796_s1 + $0xb2c] ss:$16 sps:$4 sm:$0xff]  }
 0x128   :  { %3792 = vmatprep.subr.bf16.mxu0 %v5546_v49  ;;  %4179 = vmatprep.subr.bf16.mxu1 %v5549_v50  ;;  %v5637_v49 = vld [vmem:[%s7796_s1 + $0xb20] ss:$16 sps:$4 sm:$0xff]   ;;  %v5640_v50 = vld [vmem:[%s7796_s1 + $0xb28] ss:$16 sps:$4 sm:$0xff]  }
 0x12b   :  { %3793 = vmatpush1.bf16.msra.mxu0 %v5544_v51  ;;  %4180 = vmatpush1.bf16.msra.mxu1 %v5547_v52  ;;  %v5645_v51 = vld [vmem:[%s7796_s1 + $0xb44] ss:$16 sps:$4 sm:$0xff]   ;;  %v5648_v52 = vld [vmem:[%s7796_s1 + $0xb4c] ss:$16 sps:$4 sm:$0xff]  }
 0x12c   :  { %3794 = vmatprep.subr.bf16.mxu0 %v5552_v53  ;;  %4181 = vmatprep.subr.bf16.mxu1 %v5555_v54  ;;  %v5643_v53 = vld [vmem:[%s7796_s1 + $0xb40] ss:$16 sps:$4 sm:$0xff]   ;;  %v5646_v54 = vld [vmem:[%s7796_s1 + $0xb48] ss:$16 sps:$4 sm:$0xff]  }
 0x12f   :  { %3795 = vmatpush1.bf16.msra.mxu0 %v5550_v55  ;;  %4182 = vmatpush1.bf16.msra.mxu1 %v5553_v56  ;;  %v5651_v55 = vld [vmem:[%s7796_s1 + $0xb64] ss:$16 sps:$4 sm:$0xff]   ;;  %v5654_v56 = vld [vmem:[%s7796_s1 + $0xb6c] ss:$16 sps:$4 sm:$0xff]  }
 0x130   :  { %3796 = vmatprep.subr.bf16.mxu0 %v5558_v57  ;;  %4183 = vmatprep.subr.bf16.mxu1 %v5561_v58  ;;  %v5649_v57 = vld [vmem:[%s7796_s1 + $0xb60] ss:$16 sps:$4 sm:$0xff]   ;;  %v5652_v58 = vld [vmem:[%s7796_s1 + $0xb68] ss:$16 sps:$4 sm:$0xff]  }
 0x133   :  { %3797 = vmatpush1.bf16.msra.mxu0 %v5556_v59  ;;  %4184 = vmatpush1.bf16.msra.mxu1 %v5559_v60  ;;  %v5657_v59 = vld [vmem:[%s7796_s1 + $0xb84] ss:$16 sps:$4 sm:$0xff]   ;;  %v5660_v60 = vld [vmem:[%s7796_s1 + $0xb8c] ss:$16 sps:$4 sm:$0xff]  }
 0x134   :  { %3798 = vmatprep.subr.bf16.mxu0 %v5564_v61  ;;  %4185 = vmatprep.subr.bf16.mxu1 %v5567_v62  ;;  %v5655_v61 = vld [vmem:[%s7796_s1 + $0xb80] ss:$16 sps:$4 sm:$0xff]   ;;  %v5658_v62 = vld [vmem:[%s7796_s1 + $0xb88] ss:$16 sps:$4 sm:$0xff]  }
 0x137   :  { %3799 = vmatpush1.bf16.msra.mxu0 %v5562_v63  ;;  %4186 = vmatpush1.bf16.msra.mxu1 %v5565_v0  ;;  %v5663_v63 = vld [vmem:[%s7796_s1 + $0xba4] ss:$16 sps:$4 sm:$0xff]   ;;  %v5666_v0 = vld [vmem:[%s7796_s1 + $0xbac] ss:$16 sps:$4 sm:$0xff]  }
 0x138   :  { %3800 = vmatprep.subr.bf16.mxu0 %v5570_v1  ;;  %4187 = vmatprep.subr.bf16.mxu1 %v5573_v2  ;;  %v5661_v1 = vld [vmem:[%s7796_s1 + $0xba0] ss:$16 sps:$4 sm:$0xff]   ;;  %v5664_v2 = vld [vmem:[%s7796_s1 + $0xba8] ss:$16 sps:$4 sm:$0xff]  }
 0x13b   :  { %3801 = vmatpush1.bf16.msra.mxu0 %v5568_v3  ;;  %4188 = vmatpush1.bf16.msra.mxu1 %v5571_v4  ;;  %v5669_v3 = vld [vmem:[%s7796_s1 + $0xbc4] ss:$16 sps:$4 sm:$0xff]   ;;  %v5672_v4 = vld [vmem:[%s7796_s1 + $0xbcc] ss:$16 sps:$4 sm:$0xff]  }
 0x13c   :  { %3802 = vmatprep.subr.bf16.mxu0 %v5576_v5  ;;  %4189 = vmatprep.subr.bf16.mxu1 %v5579_v6  ;;  %v5667_v5 = vld [vmem:[%s7796_s1 + $0xbc0] ss:$16 sps:$4 sm:$0xff]   ;;  %v5670_v6 = vld [vmem:[%s7796_s1 + $0xbc8] ss:$16 sps:$4 sm:$0xff]  }
 0x13f   :  { %3803 = vmatpush1.bf16.msra.mxu0 %v5574_v7  ;;  %4190 = vmatpush1.bf16.msra.mxu1 %v5577_v8  ;;  %v5675_v7 = vld [vmem:[%s7796_s1 + $0xbe4] ss:$16 sps:$4 sm:$0xff]   ;;  %v5678_v8 = vld [vmem:[%s7796_s1 + $0xbec] ss:$16 sps:$4 sm:$0xff]  }
 0x140   :  { %3815 = vmatprep.subr.bf16.mxu0 %v5585_v10  ;;  %4202 = vmatprep.subr.bf16.mxu1 %v5588_v11  ;;  %v5676_v10 = vld [vmem:[%s7796_s1 + $0xbe8] ss:$16 sps:$4 sm:$0xff]   ;;  %v5684_v11 = vld [vmem:[%s7796_s1 + $0xc04] ss:$16 sps:$4 sm:$0xff]  }
 0x142   :  { %3805 = vmatmul.mubr.bf16.vlgmr.msra.gmra.mrb[0].mxu0 %v5580_v9  ;;  %4192 = vmatmul.mubr.bf16.vlgmr.msra.gmra.mrb[0].mxu1 %v5580_v9  ;;  %v5673_v9 = vld [vmem:[%s7796_s1 + $0xbe0] ss:$16 sps:$4 sm:$0xff]  }
 0x143   :  { %3816 = vmatpush1.bf16.msra.mxu0 %v5583_v12  ;;  %4203 = vmatpush1.bf16.msra.mxu1 %v5586_v13  ;;  %v5687_v12 = vld [vmem:[%s7796_s1 + $0xc0c] ss:$16 sps:$4 sm:$0xff]   ;;  %v5679_v13 = vld [vmem:[%s7797_s0 + $0x28] ss:$72 sps:$4 sm:$0xff]  }
 0x144   :  { %3817 = vmatprep.subr.bf16.mxu0 %v5591_v14  ;;  %4204 = vmatprep.subr.bf16.mxu1 %v5594_v15  ;;  %v5682_v14 = vld [vmem:[%s7796_s1 + $0xc00] ss:$16 sps:$4 sm:$0xff]   ;;  %v5685_v15 = vld [vmem:[%s7796_s1 + $0xc08] ss:$16 sps:$4 sm:$0xff]  }
 0x145   :  { %3847 = vmatprep.mubr.bf16.mxu0 %v5681_v16  ;;  %4234 = vmatprep.mubr.bf16.mxu1 %v5681_v16  ;;  %v5690_v16 = vld [vmem:[%s7796_s1 + $0xc24] ss:$16 sps:$4 sm:$0xff]  }
 0x147   :  { %3818 = vmatpush1.bf16.msra.mxu0 %v5589_v17  ;;  %4205 = vmatpush1.bf16.msra.mxu1 %v5592_v18  ;;  %v5693_v17 = vld [vmem:[%s7796_s1 + $0xc2c] ss:$16 sps:$4 sm:$0xff]  }
 0x148   :  { %3819 = vmatprep.subr.bf16.mxu0 %v5597_v19  ;;  %4206 = vmatprep.subr.bf16.mxu1 %v5600_v20  ;;  %v5780_v18 = vld [vmem:[%s7797_s0 + $0x34] ss:$72 sps:$4 sm:$0xff]   ;;  %v5688_v19 = vld [vmem:[%s7796_s1 + $0xc20] ss:$16 sps:$4 sm:$0xff]   ;;  %v5691_v20 = vld [vmem:[%s7796_s1 + $0xc28] ss:$16 sps:$4 sm:$0xff]  }
 0x14b   :  { %3820 = vmatpush1.bf16.msra.mxu0 %v5595_v21  ;;  %4207 = vmatpush1.bf16.msra.mxu1 %v5598_v22  ;;  %v5696_v21 = vld [vmem:[%s7796_s1 + $0xc44] ss:$16 sps:$4 sm:$0xff]   ;;  %v5699_v22 = vld [vmem:[%s7796_s1 + $0xc4c] ss:$16 sps:$4 sm:$0xff]  }
 0x14c   :  { %3821 = vmatprep.subr.bf16.mxu0 %v5603_v23  ;;  %4208 = vmatprep.subr.bf16.mxu1 %v5606_v24  ;;  %v5694_v23 = vld [vmem:[%s7796_s1 + $0xc40] ss:$16 sps:$4 sm:$0xff]   ;;  %v5697_v24 = vld [vmem:[%s7796_s1 + $0xc48] ss:$16 sps:$4 sm:$0xff]  }
 0x14f   :  { %3822 = vmatpush1.bf16.msra.mxu0 %v5601_v25  ;;  %4209 = vmatpush1.bf16.msra.mxu1 %v5604_v26  ;;  %v5702_v25 = vld [vmem:[%s7796_s1 + $0xc64] ss:$16 sps:$4 sm:$0xff]   ;;  %v5705_v26 = vld [vmem:[%s7796_s1 + $0xc6c] ss:$16 sps:$4 sm:$0xff]  }
 0x150   :  { %3823 = vmatprep.subr.bf16.mxu0 %v5609_v27  ;;  %4210 = vmatprep.subr.bf16.mxu1 %v5612_v28  ;;  %v5700_v27 = vld [vmem:[%s7796_s1 + $0xc60] ss:$16 sps:$4 sm:$0xff]   ;;  %v5703_v28 = vld [vmem:[%s7796_s1 + $0xc68] ss:$16 sps:$4 sm:$0xff]  }
 0x153   :  { %3824 = vmatpush1.bf16.msra.mxu0 %v5607_v29  ;;  %4211 = vmatpush1.bf16.msra.mxu1 %v5610_v30  ;;  %v5708_v29 = vld [vmem:[%s7796_s1 + $0xc84] ss:$16 sps:$4 sm:$0xff]   ;;  %v5711_v30 = vld [vmem:[%s7796_s1 + $0xc8c] ss:$16 sps:$4 sm:$0xff]  }
 0x154   :  { %3825 = vmatprep.subr.bf16.mxu0 %v5615_v31  ;;  %4212 = vmatprep.subr.bf16.mxu1 %v5618_v32  ;;  %v5706_v31 = vld [vmem:[%s7796_s1 + $0xc80] ss:$16 sps:$4 sm:$0xff]   ;;  %v5709_v32 = vld [vmem:[%s7796_s1 + $0xc88] ss:$16 sps:$4 sm:$0xff]  }
 0x157   :  { %3826 = vmatpush1.bf16.msra.mxu0 %v5613_v33  ;;  %4213 = vmatpush1.bf16.msra.mxu1 %v5616_v34  ;;  %v5714_v33 = vld [vmem:[%s7796_s1 + $0xca4] ss:$16 sps:$4 sm:$0xff]   ;;  %v5717_v34 = vld [vmem:[%s7796_s1 + $0xcac] ss:$16 sps:$4 sm:$0xff]  }
 0x158   :  { %3827 = vmatprep.subr.bf16.mxu0 %v5621_v35  ;;  %4214 = vmatprep.subr.bf16.mxu1 %v5624_v36  ;;  %v5712_v35 = vld [vmem:[%s7796_s1 + $0xca0] ss:$16 sps:$4 sm:$0xff]   ;;  %v5715_v36 = vld [vmem:[%s7796_s1 + $0xca8] ss:$16 sps:$4 sm:$0xff]  }
 0x15b   :  { %3828 = vmatpush1.bf16.msra.mxu0 %v5619_v37  ;;  %4215 = vmatpush1.bf16.msra.mxu1 %v5622_v38  ;;  %v5720_v37 = vld [vmem:[%s7796_s1 + $0xcc4] ss:$16 sps:$4 sm:$0xff]   ;;  %v5723_v38 = vld [vmem:[%s7796_s1 + $0xccc] ss:$16 sps:$4 sm:$0xff]  }
 0x15c   :  { %3829 = vmatprep.subr.bf16.mxu0 %v5627_v39  ;;  %4216 = vmatprep.subr.bf16.mxu1 %v5630_v40  ;;  %v5718_v39 = vld [vmem:[%s7796_s1 + $0xcc0] ss:$16 sps:$4 sm:$0xff]   ;;  %v5721_v40 = vld [vmem:[%s7796_s1 + $0xcc8] ss:$16 sps:$4 sm:$0xff]  }
 0x15f   :  { %3830 = vmatpush1.bf16.msra.mxu0 %v5625_v41  ;;  %4217 = vmatpush1.bf16.msra.mxu1 %v5628_v42  ;;  %v5726_v41 = vld [vmem:[%s7796_s1 + $0xce4] ss:$16 sps:$4 sm:$0xff]   ;;  %v5729_v42 = vld [vmem:[%s7796_s1 + $0xcec] ss:$16 sps:$4 sm:$0xff]  }
 0x160   :  { %3831 = vmatprep.subr.bf16.mxu0 %v5633_v43  ;;  %4218 = vmatprep.subr.bf16.mxu1 %v5636_v44  ;;  %v5724_v43 = vld [vmem:[%s7796_s1 + $0xce0] ss:$16 sps:$4 sm:$0xff]   ;;  %v5727_v44 = vld [vmem:[%s7796_s1 + $0xce8] ss:$16 sps:$4 sm:$0xff]  }
 0x163   :  { %3832 = vmatpush1.bf16.msra.mxu0 %v5631_v45  ;;  %4219 = vmatpush1.bf16.msra.mxu1 %v5634_v46  ;;  %v5732_v45 = vld [vmem:[%s7796_s1 + $0xd04] ss:$16 sps:$4 sm:$0xff]   ;;  %v5735_v46 = vld [vmem:[%s7796_s1 + $0xd0c] ss:$16 sps:$4 sm:$0xff]  }
 0x164   :  { %3833 = vmatprep.subr.bf16.mxu0 %v5639_v47  ;;  %4220 = vmatprep.subr.bf16.mxu1 %v5642_v48  ;;  %v5730_v47 = vld [vmem:[%s7796_s1 + $0xd00] ss:$16 sps:$4 sm:$0xff]   ;;  %v5733_v48 = vld [vmem:[%s7796_s1 + $0xd08] ss:$16 sps:$4 sm:$0xff]  }
 0x167   :  { %3834 = vmatpush1.bf16.msra.mxu0 %v5637_v49  ;;  %4221 = vmatpush1.bf16.msra.mxu1 %v5640_v50  ;;  %v5738_v49 = vld [vmem:[%s7796_s1 + $0xd24] ss:$16 sps:$4 sm:$0xff]   ;;  %v5741_v50 = vld [vmem:[%s7796_s1 + $0xd2c] ss:$16 sps:$4 sm:$0xff]  }
 0x168   :  { %3835 = vmatprep.subr.bf16.mxu0 %v5645_v51  ;;  %4222 = vmatprep.subr.bf16.mxu1 %v5648_v52  ;;  %v5736_v51 = vld [vmem:[%s7796_s1 + $0xd20] ss:$16 sps:$4 sm:$0xff]   ;;  %v5739_v52 = vld [vmem:[%s7796_s1 + $0xd28] ss:$16 sps:$4 sm:$0xff]  }
 0x16b   :  { %3836 = vmatpush1.bf16.msra.mxu0 %v5643_v53  ;;  %4223 = vmatpush1.bf16.msra.mxu1 %v5646_v54  ;;  %v5744_v53 = vld [vmem:[%s7796_s1 + $0xd44] ss:$16 sps:$4 sm:$0xff]   ;;  %v5747_v54 = vld [vmem:[%s7796_s1 + $0xd4c] ss:$16 sps:$4 sm:$0xff]  }
 0x16c   :  { %3837 = vmatprep.subr.bf16.mxu0 %v5651_v55  ;;  %4224 = vmatprep.subr.bf16.mxu1 %v5654_v56  ;;  %v5742_v55 = vld [vmem:[%s7796_s1 + $0xd40] ss:$16 sps:$4 sm:$0xff]   ;;  %v5745_v56 = vld [vmem:[%s7796_s1 + $0xd48] ss:$16 sps:$4 sm:$0xff]  }
 0x16f   :  { %3838 = vmatpush1.bf16.msra.mxu0 %v5649_v57  ;;  %4225 = vmatpush1.bf16.msra.mxu1 %v5652_v58  ;;  %v5750_v57 = vld [vmem:[%s7796_s1 + $0xd64] ss:$16 sps:$4 sm:$0xff]   ;;  %v5753_v58 = vld [vmem:[%s7796_s1 + $0xd6c] ss:$16 sps:$4 sm:$0xff]  }
 0x170   :  { %3839 = vmatprep.subr.bf16.mxu0 %v5657_v59  ;;  %4226 = vmatprep.subr.bf16.mxu1 %v5660_v60  ;;  %v5748_v59 = vld [vmem:[%s7796_s1 + $0xd60] ss:$16 sps:$4 sm:$0xff]   ;;  %v5751_v60 = vld [vmem:[%s7796_s1 + $0xd68] ss:$16 sps:$4 sm:$0xff]  }
 0x173   :  { %3840 = vmatpush1.bf16.msra.mxu0 %v5655_v61  ;;  %4227 = vmatpush1.bf16.msra.mxu1 %v5658_v62  ;;  %v5756_v61 = vld [vmem:[%s7796_s1 + $0xd84] ss:$16 sps:$4 sm:$0xff]   ;;  %v5759_v62 = vld [vmem:[%s7796_s1 + $0xd8c] ss:$16 sps:$4 sm:$0xff]  }
 0x174   :  { %3841 = vmatprep.subr.bf16.mxu0 %v5663_v63  ;;  %4228 = vmatprep.subr.bf16.mxu1 %v5666_v0  ;;  %v5754_v63 = vld [vmem:[%s7796_s1 + $0xd80] ss:$16 sps:$4 sm:$0xff]   ;;  %v5757_v0 = vld [vmem:[%s7796_s1 + $0xd88] ss:$16 sps:$4 sm:$0xff]  }
 0x177   :  { %3842 = vmatpush1.bf16.msra.mxu0 %v5661_v1  ;;  %4229 = vmatpush1.bf16.msra.mxu1 %v5664_v2  ;;  %v5762_v1 = vld [vmem:[%s7796_s1 + $0xda4] ss:$16 sps:$4 sm:$0xff]   ;;  %v5765_v2 = vld [vmem:[%s7796_s1 + $0xdac] ss:$16 sps:$4 sm:$0xff]  }
 0x178   :  { %3843 = vmatprep.subr.bf16.mxu0 %v5669_v3  ;;  %4230 = vmatprep.subr.bf16.mxu1 %v5672_v4  ;;  %v5760_v3 = vld [vmem:[%s7796_s1 + $0xda0] ss:$16 sps:$4 sm:$0xff]   ;;  %v5763_v4 = vld [vmem:[%s7796_s1 + $0xda8] ss:$16 sps:$4 sm:$0xff]  }
 0x17b   :  { %3844 = vmatpush1.bf16.msra.mxu0 %v5667_v5  ;;  %4231 = vmatpush1.bf16.msra.mxu1 %v5670_v6  ;;  %v5768_v5 = vld [vmem:[%s7796_s1 + $0xdc4] ss:$16 sps:$4 sm:$0xff]   ;;  %v5771_v6 = vld [vmem:[%s7796_s1 + $0xdcc] ss:$16 sps:$4 sm:$0xff]  }
 0x17c   :  { %3845 = vmatprep.subr.bf16.mxu0 %v5675_v7  ;;  %4232 = vmatprep.subr.bf16.mxu1 %v5678_v8  ;;  %v5766_v7 = vld [vmem:[%s7796_s1 + $0xdc0] ss:$16 sps:$4 sm:$0xff]   ;;  %v5769_v8 = vld [vmem:[%s7796_s1 + $0xdc8] ss:$16 sps:$4 sm:$0xff]  }
 0x17f   :  { %3846 = vmatpush1.bf16.msra.mxu0 %v5673_v9  ;;  %4233 = vmatpush1.bf16.msra.mxu1 %v5676_v10  ;;  %v5774_v9 = vld [vmem:[%s7796_s1 + $0xde4] ss:$16 sps:$4 sm:$0xff]   ;;  %v5777_v10 = vld [vmem:[%s7796_s1 + $0xdec] ss:$16 sps:$4 sm:$0xff]  }
 0x180   :  { %3858 = vmatprep.subr.bf16.mxu0 %v5684_v11  ;;  %4245 = vmatprep.subr.bf16.mxu1 %v5687_v12  ;;  %v5772_v11 = vld [vmem:[%s7796_s1 + $0xde0] ss:$16 sps:$4 sm:$0xff]   ;;  %v5775_v12 = vld [vmem:[%s7796_s1 + $0xde8] ss:$16 sps:$4 sm:$0xff]  }
 0x182   :  { %3848 = vmatmul.mubr.bf16.vlgmr.msra.gmra.mrb[0].mxu0 %v5679_v13  ;;  %4235 = vmatmul.mubr.bf16.vlgmr.msra.gmra.mrb[0].mxu1 %v5679_v13  ;;  %v5783_v13 = vld [vmem:[%s7796_s1 + $0xe04] ss:$16 sps:$4 sm:$0xff]  }
 0x183   :  { %3859 = vmatpush1.bf16.msra.mxu0 %v5682_v14  ;;  %4246 = vmatpush1.bf16.msra.mxu1 %v5685_v15  ;;  %v5786_v14 = vld [vmem:[%s7796_s1 + $0xe0c] ss:$16 sps:$4 sm:$0xff]   ;;  %v5778_v15 = vld [vmem:[%s7797_s0 + $0x30] ss:$72 sps:$4 sm:$0xff]  }
 0x184   :  { %3860 = vmatprep.subr.bf16.mxu0 %v5690_v16  ;;  %4247 = vmatprep.subr.bf16.mxu1 %v5693_v17  ;;  %v5781_v16 = vld [vmem:[%s7796_s1 + $0xe00] ss:$16 sps:$4 sm:$0xff]   ;;  %v5784_v17 = vld [vmem:[%s7796_s1 + $0xe08] ss:$16 sps:$4 sm:$0xff]  }
 0x185   :  { %3890 = vmatprep.mubr.bf16.mxu0 %v5780_v18  ;;  %4277 = vmatprep.mubr.bf16.mxu1 %v5780_v18  ;;  %v5789_v18 = vld [vmem:[%s7796_s1 + $0xe24] ss:$16 sps:$4 sm:$0xff]  }
 0x187   :  { %3861 = vmatpush1.bf16.msra.mxu0 %v5688_v19  ;;  %4248 = vmatpush1.bf16.msra.mxu1 %v5691_v20  ;;  %v5792_v19 = vld [vmem:[%s7796_s1 + $0xe2c] ss:$16 sps:$4 sm:$0xff]  }
 0x188   :  { %3862 = vmatprep.subr.bf16.mxu0 %v5696_v21  ;;  %4249 = vmatprep.subr.bf16.mxu1 %v5699_v22  ;;  %v5879_v20 = vld [vmem:[%s7797_s0 + $0x3c] ss:$72 sps:$4 sm:$0xff]   ;;  %v5787_v21 = vld [vmem:[%s7796_s1 + $0xe20] ss:$16 sps:$4 sm:$0xff]   ;;  %v5790_v22 = vld [vmem:[%s7796_s1 + $0xe28] ss:$16 sps:$4 sm:$0xff]  }
 0x18b   :  { %3863 = vmatpush1.bf16.msra.mxu0 %v5694_v23  ;;  %4250 = vmatpush1.bf16.msra.mxu1 %v5697_v24  ;;  %v5795_v23 = vld [vmem:[%s7796_s1 + $0xe44] ss:$16 sps:$4 sm:$0xff]   ;;  %v5798_v24 = vld [vmem:[%s7796_s1 + $0xe4c] ss:$16 sps:$4 sm:$0xff]  }
 0x18c   :  { %3864 = vmatprep.subr.bf16.mxu0 %v5702_v25  ;;  %4251 = vmatprep.subr.bf16.mxu1 %v5705_v26  ;;  %v5793_v25 = vld [vmem:[%s7796_s1 + $0xe40] ss:$16 sps:$4 sm:$0xff]   ;;  %v5796_v26 = vld [vmem:[%s7796_s1 + $0xe48] ss:$16 sps:$4 sm:$0xff]  }
 0x18f   :  { %3865 = vmatpush1.bf16.msra.mxu0 %v5700_v27  ;;  %4252 = vmatpush1.bf16.msra.mxu1 %v5703_v28  ;;  %v5801_v27 = vld [vmem:[%s7796_s1 + $0xe64] ss:$16 sps:$4 sm:$0xff]   ;;  %v5804_v28 = vld [vmem:[%s7796_s1 + $0xe6c] ss:$16 sps:$4 sm:$0xff]  }
 0x190   :  { %3866 = vmatprep.subr.bf16.mxu0 %v5708_v29  ;;  %4253 = vmatprep.subr.bf16.mxu1 %v5711_v30  ;;  %v5799_v29 = vld [vmem:[%s7796_s1 + $0xe60] ss:$16 sps:$4 sm:$0xff]   ;;  %v5802_v30 = vld [vmem:[%s7796_s1 + $0xe68] ss:$16 sps:$4 sm:$0xff]  }
 0x193   :  { %3867 = vmatpush1.bf16.msra.mxu0 %v5706_v31  ;;  %4254 = vmatpush1.bf16.msra.mxu1 %v5709_v32  ;;  %v5807_v31 = vld [vmem:[%s7796_s1 + $0xe84] ss:$16 sps:$4 sm:$0xff]   ;;  %v5810_v32 = vld [vmem:[%s7796_s1 + $0xe8c] ss:$16 sps:$4 sm:$0xff]  }
 0x194   :  { %3868 = vmatprep.subr.bf16.mxu0 %v5714_v33  ;;  %4255 = vmatprep.subr.bf16.mxu1 %v5717_v34  ;;  %v5805_v33 = vld [vmem:[%s7796_s1 + $0xe80] ss:$16 sps:$4 sm:$0xff]   ;;  %v5808_v34 = vld [vmem:[%s7796_s1 + $0xe88] ss:$16 sps:$4 sm:$0xff]  }
 0x197   :  { %3869 = vmatpush1.bf16.msra.mxu0 %v5712_v35  ;;  %4256 = vmatpush1.bf16.msra.mxu1 %v5715_v36  ;;  %v5813_v35 = vld [vmem:[%s7796_s1 + $0xea4] ss:$16 sps:$4 sm:$0xff]   ;;  %v5816_v36 = vld [vmem:[%s7796_s1 + $0xeac] ss:$16 sps:$4 sm:$0xff]  }
 0x198   :  { %3870 = vmatprep.subr.bf16.mxu0 %v5720_v37  ;;  %4257 = vmatprep.subr.bf16.mxu1 %v5723_v38  ;;  %v5811_v37 = vld [vmem:[%s7796_s1 + $0xea0] ss:$16 sps:$4 sm:$0xff]   ;;  %v5814_v38 = vld [vmem:[%s7796_s1 + $0xea8] ss:$16 sps:$4 sm:$0xff]  }
 0x19b   :  { %3871 = vmatpush1.bf16.msra.mxu0 %v5718_v39  ;;  %4258 = vmatpush1.bf16.msra.mxu1 %v5721_v40  ;;  %v5819_v39 = vld [vmem:[%s7796_s1 + $0xec4] ss:$16 sps:$4 sm:$0xff]   ;;  %v5822_v40 = vld [vmem:[%s7796_s1 + $0xecc] ss:$16 sps:$4 sm:$0xff]  }
 0x19c   :  { %3872 = vmatprep.subr.bf16.mxu0 %v5726_v41  ;;  %4259 = vmatprep.subr.bf16.mxu1 %v5729_v42  ;;  %v5817_v41 = vld [vmem:[%s7796_s1 + $0xec0] ss:$16 sps:$4 sm:$0xff]   ;;  %v5820_v42 = vld [vmem:[%s7796_s1 + $0xec8] ss:$16 sps:$4 sm:$0xff]  }
 0x19f   :  { %3873 = vmatpush1.bf16.msra.mxu0 %v5724_v43  ;;  %4260 = vmatpush1.bf16.msra.mxu1 %v5727_v44  ;;  %v5825_v43 = vld [vmem:[%s7796_s1 + $0xee4] ss:$16 sps:$4 sm:$0xff]   ;;  %v5828_v44 = vld [vmem:[%s7796_s1 + $0xeec] ss:$16 sps:$4 sm:$0xff]  }
 0x1a0   :  { %3874 = vmatprep.subr.bf16.mxu0 %v5732_v45  ;;  %4261 = vmatprep.subr.bf16.mxu1 %v5735_v46  ;;  %v5823_v45 = vld [vmem:[%s7796_s1 + $0xee0] ss:$16 sps:$4 sm:$0xff]   ;;  %v5826_v46 = vld [vmem:[%s7796_s1 + $0xee8] ss:$16 sps:$4 sm:$0xff]  }
 0x1a3   :  { %3875 = vmatpush1.bf16.msra.mxu0 %v5730_v47  ;;  %4262 = vmatpush1.bf16.msra.mxu1 %v5733_v48  ;;  %v5831_v47 = vld [vmem:[%s7796_s1 + $0xf04] ss:$16 sps:$4 sm:$0xff]   ;;  %v5834_v48 = vld [vmem:[%s7796_s1 + $0xf0c] ss:$16 sps:$4 sm:$0xff]  }
 0x1a4   :  { %3876 = vmatprep.subr.bf16.mxu0 %v5738_v49  ;;  %4263 = vmatprep.subr.bf16.mxu1 %v5741_v50  ;;  %v5829_v49 = vld [vmem:[%s7796_s1 + $0xf00] ss:$16 sps:$4 sm:$0xff]   ;;  %v5832_v50 = vld [vmem:[%s7796_s1 + $0xf08] ss:$16 sps:$4 sm:$0xff]  }
 0x1a7   :  { %3877 = vmatpush1.bf16.msra.mxu0 %v5736_v51  ;;  %4264 = vmatpush1.bf16.msra.mxu1 %v5739_v52  ;;  %v5837_v51 = vld [vmem:[%s7796_s1 + $0xf24] ss:$16 sps:$4 sm:$0xff]   ;;  %v5840_v52 = vld [vmem:[%s7796_s1 + $0xf2c] ss:$16 sps:$4 sm:$0xff]  }
 0x1a8   :  { %3878 = vmatprep.subr.bf16.mxu0 %v5744_v53  ;;  %4265 = vmatprep.subr.bf16.mxu1 %v5747_v54  ;;  %v5835_v53 = vld [vmem:[%s7796_s1 + $0xf20] ss:$16 sps:$4 sm:$0xff]   ;;  %v5838_v54 = vld [vmem:[%s7796_s1 + $0xf28] ss:$16 sps:$4 sm:$0xff]  }
 0x1ab   :  { %3879 = vmatpush1.bf16.msra.mxu0 %v5742_v55  ;;  %4266 = vmatpush1.bf16.msra.mxu1 %v5745_v56  ;;  %v5843_v55 = vld [vmem:[%s7796_s1 + $0xf44] ss:$16 sps:$4 sm:$0xff]   ;;  %v5846_v56 = vld [vmem:[%s7796_s1 + $0xf4c] ss:$16 sps:$4 sm:$0xff]  }
 0x1ac   :  { %3880 = vmatprep.subr.bf16.mxu0 %v5750_v57  ;;  %4267 = vmatprep.subr.bf16.mxu1 %v5753_v58  ;;  %v5841_v57 = vld [vmem:[%s7796_s1 + $0xf40] ss:$16 sps:$4 sm:$0xff]   ;;  %v5844_v58 = vld [vmem:[%s7796_s1 + $0xf48] ss:$16 sps:$4 sm:$0xff]  }
 0x1af   :  { %3881 = vmatpush1.bf16.msra.mxu0 %v5748_v59  ;;  %4268 = vmatpush1.bf16.msra.mxu1 %v5751_v60  ;;  %v5849_v59 = vld [vmem:[%s7796_s1 + $0xf64] ss:$16 sps:$4 sm:$0xff]   ;;  %v5852_v60 = vld [vmem:[%s7796_s1 + $0xf6c] ss:$16 sps:$4 sm:$0xff]  }
 0x1b0   :  { %3882 = vmatprep.subr.bf16.mxu0 %v5756_v61  ;;  %4269 = vmatprep.subr.bf16.mxu1 %v5759_v62  ;;  %v5847_v61 = vld [vmem:[%s7796_s1 + $0xf60] ss:$16 sps:$4 sm:$0xff]   ;;  %v5850_v62 = vld [vmem:[%s7796_s1 + $0xf68] ss:$16 sps:$4 sm:$0xff]  }
 0x1b3   :  { %3883 = vmatpush1.bf16.msra.mxu0 %v5754_v63  ;;  %4270 = vmatpush1.bf16.msra.mxu1 %v5757_v0  ;;  %v5855_v63 = vld [vmem:[%s7796_s1 + $0xf84] ss:$16 sps:$4 sm:$0xff]   ;;  %v5858_v0 = vld [vmem:[%s7796_s1 + $0xf8c] ss:$16 sps:$4 sm:$0xff]  }
 0x1b4   :  { %3884 = vmatprep.subr.bf16.mxu0 %v5762_v1  ;;  %4271 = vmatprep.subr.bf16.mxu1 %v5765_v2  ;;  %v5853_v1 = vld [vmem:[%s7796_s1 + $0xf80] ss:$16 sps:$4 sm:$0xff]   ;;  %v5856_v2 = vld [vmem:[%s7796_s1 + $0xf88] ss:$16 sps:$4 sm:$0xff]  }
 0x1b7   :  { %3885 = vmatpush1.bf16.msra.mxu0 %v5760_v3  ;;  %4272 = vmatpush1.bf16.msra.mxu1 %v5763_v4  ;;  %v5861_v3 = vld [vmem:[%s7796_s1 + $0xfa4] ss:$16 sps:$4 sm:$0xff]   ;;  %v5864_v4 = vld [vmem:[%s7796_s1 + $0xfac] ss:$16 sps:$4 sm:$0xff]  }
 0x1b8   :  { %3886 = vmatprep.subr.bf16.mxu0 %v5768_v5  ;;  %4273 = vmatprep.subr.bf16.mxu1 %v5771_v6  ;;  %v5859_v5 = vld [vmem:[%s7796_s1 + $0xfa0] ss:$16 sps:$4 sm:$0xff]   ;;  %v5862_v6 = vld [vmem:[%s7796_s1 + $0xfa8] ss:$16 sps:$4 sm:$0xff]  }
 0x1bb   :  { %3887 = vmatpush1.bf16.msra.mxu0 %v5766_v7  ;;  %4274 = vmatpush1.bf16.msra.mxu1 %v5769_v8  ;;  %v5867_v7 = vld [vmem:[%s7796_s1 + $0xfc4] ss:$16 sps:$4 sm:$0xff]   ;;  %v5870_v8 = vld [vmem:[%s7796_s1 + $0xfcc] ss:$16 sps:$4 sm:$0xff]  }
 0x1bc   :  { %3888 = vmatprep.subr.bf16.mxu0 %v5774_v9  ;;  %4275 = vmatprep.subr.bf16.mxu1 %v5777_v10  ;;  %v5865_v9 = vld [vmem:[%s7796_s1 + $0xfc0] ss:$16 sps:$4 sm:$0xff]   ;;  %v5868_v10 = vld [vmem:[%s7796_s1 + $0xfc8] ss:$16 sps:$4 sm:$0xff]  }
 0x1bf   :  { %3889 = vmatpush1.bf16.msra.mxu0 %v5772_v11  ;;  %4276 = vmatpush1.bf16.msra.mxu1 %v5775_v12  ;;  %v5873_v11 = vld [vmem:[%s7796_s1 + $0xfe4] ss:$16 sps:$4 sm:$0xff]   ;;  %v5876_v12 = vld [vmem:[%s7796_s1 + $0xfec] ss:$16 sps:$4 sm:$0xff]  }
 0x1c0   :  { %3901 = vmatprep.subr.bf16.mxu0 %v5783_v13  ;;  %4288 = vmatprep.subr.bf16.mxu1 %v5786_v14  ;;  %v5871_v13 = vld [vmem:[%s7796_s1 + $0xfe0] ss:$16 sps:$4 sm:$0xff]   ;;  %v5874_v14 = vld [vmem:[%s7796_s1 + $0xfe8] ss:$16 sps:$4 sm:$0xff]  }
 0x1c2   :  { %3891 = vmatmul.mubr.bf16.vlgmr.msra.gmra.mrb[0].mxu0 %v5778_v15  ;;  %4278 = vmatmul.mubr.bf16.vlgmr.msra.gmra.mrb[0].mxu1 %v5778_v15  ;;  %v5882_v15 = vld [vmem:[%s7796_s1 + $0x1004] ss:$16 sps:$4 sm:$0xff]  }
 0x1c3   :  { %3902 = vmatpush1.bf16.msra.mxu0 %v5781_v16  ;;  %4289 = vmatpush1.bf16.msra.mxu1 %v5784_v17  ;;  %v5885_v16 = vld [vmem:[%s7796_s1 + $0x100c] ss:$16 sps:$4 sm:$0xff]   ;;  %v5877_v17 = vld [vmem:[%s7797_s0 + $0x38] ss:$72 sps:$4 sm:$0xff]  }
 0x1c4   :  { %3903 = vmatprep.subr.bf16.mxu0 %v5789_v18  ;;  %4290 = vmatprep.subr.bf16.mxu1 %v5792_v19  ;;  %v5880_v18 = vld [vmem:[%s7796_s1 + $0x1000] ss:$16 sps:$4 sm:$0xff]   ;;  %v5883_v19 = vld [vmem:[%s7796_s1 + $0x1008] ss:$16 sps:$4 sm:$0xff]  }
 0x1c5   :  { %3933 = vmatprep.mubr.bf16.mxu0 %v5879_v20  ;;  %4320 = vmatprep.mubr.bf16.mxu1 %v5879_v20  ;;  %v5888_v20 = vld [vmem:[%s7796_s1 + $0x1024] ss:$16 sps:$4 sm:$0xff]  }
 0x1c7   :  { %3904 = vmatpush1.bf16.msra.mxu0 %v5787_v21  ;;  %4291 = vmatpush1.bf16.msra.mxu1 %v5790_v22  ;;  %v5891_v21 = vld [vmem:[%s7796_s1 + $0x102c] ss:$16 sps:$4 sm:$0xff]  }
 0x1c8   :  { %3905 = vmatprep.subr.bf16.mxu0 %v5795_v23  ;;  %4292 = vmatprep.subr.bf16.mxu1 %v5798_v24  ;;  %v5978_v22 = vld [vmem:[%s7797_s0 + $0x44] ss:$72 sps:$4 sm:$0xff]   ;;  %v5886_v23 = vld [vmem:[%s7796_s1 + $0x1020] ss:$16 sps:$4 sm:$0xff]   ;;  %v5889_v24 = vld [vmem:[%s7796_s1 + $0x1028] ss:$16 sps:$4 sm:$0xff]  }
 0x1cb   :  { %3906 = vmatpush1.bf16.msra.mxu0 %v5793_v25  ;;  %4293 = vmatpush1.bf16.msra.mxu1 %v5796_v26  ;;  %v5894_v25 = vld [vmem:[%s7796_s1 + $0x1044] ss:$16 sps:$4 sm:$0xff]   ;;  %v5897_v26 = vld [vmem:[%s7796_s1 + $0x104c] ss:$16 sps:$4 sm:$0xff]  }
 0x1cc   :  { %3907 = vmatprep.subr.bf16.mxu0 %v5801_v27  ;;  %4294 = vmatprep.subr.bf16.mxu1 %v5804_v28  ;;  %v5892_v27 = vld [vmem:[%s7796_s1 + $0x1040] ss:$16 sps:$4 sm:$0xff]   ;;  %v5895_v28 = vld [vmem:[%s7796_s1 + $0x1048] ss:$16 sps:$4 sm:$0xff]  }
 0x1cf   :  { %3908 = vmatpush1.bf16.msra.mxu0 %v5799_v29  ;;  %4295 = vmatpush1.bf16.msra.mxu1 %v5802_v30  ;;  %v5900_v29 = vld [vmem:[%s7796_s1 + $0x1064] ss:$16 sps:$4 sm:$0xff]   ;;  %v5903_v30 = vld [vmem:[%s7796_s1 + $0x106c] ss:$16 sps:$4 sm:$0xff]  }
 0x1d0   :  { %3909 = vmatprep.subr.bf16.mxu0 %v5807_v31  ;;  %4296 = vmatprep.subr.bf16.mxu1 %v5810_v32  ;;  %v5898_v31 = vld [vmem:[%s7796_s1 + $0x1060] ss:$16 sps:$4 sm:$0xff]   ;;  %v5901_v32 = vld [vmem:[%s7796_s1 + $0x1068] ss:$16 sps:$4 sm:$0xff]  }
 0x1d3   :  { %3910 = vmatpush1.bf16.msra.mxu0 %v5805_v33  ;;  %4297 = vmatpush1.bf16.msra.mxu1 %v5808_v34  ;;  %v5906_v33 = vld [vmem:[%s7796_s1 + $0x1084] ss:$16 sps:$4 sm:$0xff]   ;;  %v5909_v34 = vld [vmem:[%s7796_s1 + $0x108c] ss:$16 sps:$4 sm:$0xff]  }
 0x1d4   :  { %3911 = vmatprep.subr.bf16.mxu0 %v5813_v35  ;;  %4298 = vmatprep.subr.bf16.mxu1 %v5816_v36  ;;  %v5904_v35 = vld [vmem:[%s7796_s1 + $0x1080] ss:$16 sps:$4 sm:$0xff]   ;;  %v5907_v36 = vld [vmem:[%s7796_s1 + $0x1088] ss:$16 sps:$4 sm:$0xff]  }
 0x1d7   :  { %3912 = vmatpush1.bf16.msra.mxu0 %v5811_v37  ;;  %4299 = vmatpush1.bf16.msra.mxu1 %v5814_v38  ;;  %v5912_v37 = vld [vmem:[%s7796_s1 + $0x10a4] ss:$16 sps:$4 sm:$0xff]   ;;  %v5915_v38 = vld [vmem:[%s7796_s1 + $0x10ac] ss:$16 sps:$4 sm:$0xff]  }
 0x1d8   :  { %3913 = vmatprep.subr.bf16.mxu0 %v5819_v39  ;;  %4300 = vmatprep.subr.bf16.mxu1 %v5822_v40  ;;  %v5910_v39 = vld [vmem:[%s7796_s1 + $0x10a0] ss:$16 sps:$4 sm:$0xff]   ;;  %v5913_v40 = vld [vmem:[%s7796_s1 + $0x10a8] ss:$16 sps:$4 sm:$0xff]  }
 0x1db   :  { %3914 = vmatpush1.bf16.msra.mxu0 %v5817_v41  ;;  %4301 = vmatpush1.bf16.msra.mxu1 %v5820_v42  ;;  %v5918_v41 = vld [vmem:[%s7796_s1 + $0x10c4] ss:$16 sps:$4 sm:$0xff]   ;;  %v5921_v42 = vld [vmem:[%s7796_s1 + $0x10cc] ss:$16 sps:$4 sm:$0xff]  }
 0x1dc   :  { %3915 = vmatprep.subr.bf16.mxu0 %v5825_v43  ;;  %4302 = vmatprep.subr.bf16.mxu1 %v5828_v44  ;;  %v5916_v43 = vld [vmem:[%s7796_s1 + $0x10c0] ss:$16 sps:$4 sm:$0xff]   ;;  %v5919_v44 = vld [vmem:[%s7796_s1 + $0x10c8] ss:$16 sps:$4 sm:$0xff]  }
 0x1df   :  { %3916 = vmatpush1.bf16.msra.mxu0 %v5823_v45  ;;  %4303 = vmatpush1.bf16.msra.mxu1 %v5826_v46  ;;  %v5924_v45 = vld [vmem:[%s7796_s1 + $0x10e4] ss:$16 sps:$4 sm:$0xff]   ;;  %v5927_v46 = vld [vmem:[%s7796_s1 + $0x10ec] ss:$16 sps:$4 sm:$0xff]  }
 0x1e0   :  { %3917 = vmatprep.subr.bf16.mxu0 %v5831_v47  ;;  %4304 = vmatprep.subr.bf16.mxu1 %v5834_v48  ;;  %v5922_v47 = vld [vmem:[%s7796_s1 + $0x10e0] ss:$16 sps:$4 sm:$0xff]   ;;  %v5925_v48 = vld [vmem:[%s7796_s1 + $0x10e8] ss:$16 sps:$4 sm:$0xff]  }
 0x1e3   :  { %3918 = vmatpush1.bf16.msra.mxu0 %v5829_v49  ;;  %4305 = vmatpush1.bf16.msra.mxu1 %v5832_v50  ;;  %v5930_v49 = vld [vmem:[%s7796_s1 + $0x1104] ss:$16 sps:$4 sm:$0xff]   ;;  %v5933_v50 = vld [vmem:[%s7796_s1 + $0x110c] ss:$16 sps:$4 sm:$0xff]  }
 0x1e4   :  { %3919 = vmatprep.subr.bf16.mxu0 %v5837_v51  ;;  %4306 = vmatprep.subr.bf16.mxu1 %v5840_v52  ;;  %v5928_v51 = vld [vmem:[%s7796_s1 + $0x1100] ss:$16 sps:$4 sm:$0xff]   ;;  %v5931_v52 = vld [vmem:[%s7796_s1 + $0x1108] ss:$16 sps:$4 sm:$0xff]  }
 0x1e7   :  { %3920 = vmatpush1.bf16.msra.mxu0 %v5835_v53  ;;  %4307 = vmatpush1.bf16.msra.mxu1 %v5838_v54  ;;  %v5936_v53 = vld [vmem:[%s7796_s1 + $0x1124] ss:$16 sps:$4 sm:$0xff]   ;;  %v5939_v54 = vld [vmem:[%s7796_s1 + $0x112c] ss:$16 sps:$4 sm:$0xff]  }
 0x1e8   :  { %3921 = vmatprep.subr.bf16.mxu0 %v5843_v55  ;;  %4308 = vmatprep.subr.bf16.mxu1 %v5846_v56  ;;  %v5934_v55 = vld [vmem:[%s7796_s1 + $0x1120] ss:$16 sps:$4 sm:$0xff]   ;;  %v5937_v56 = vld [vmem:[%s7796_s1 + $0x1128] ss:$16 sps:$4 sm:$0xff]  }
 0x1eb   :  { %3922 = vmatpush1.bf16.msra.mxu0 %v5841_v57  ;;  %4309 = vmatpush1.bf16.msra.mxu1 %v5844_v58  ;;  %v5942_v57 = vld [vmem:[%s7796_s1 + $0x1144] ss:$16 sps:$4 sm:$0xff]   ;;  %v5945_v58 = vld [vmem:[%s7796_s1 + $0x114c] ss:$16 sps:$4 sm:$0xff]  }
 0x1ec   :  { %3923 = vmatprep.subr.bf16.mxu0 %v5849_v59  ;;  %4310 = vmatprep.subr.bf16.mxu1 %v5852_v60  ;;  %v5940_v59 = vld [vmem:[%s7796_s1 + $0x1140] ss:$16 sps:$4 sm:$0xff]   ;;  %v5943_v60 = vld [vmem:[%s7796_s1 + $0x1148] ss:$16 sps:$4 sm:$0xff]  }
 0x1ef   :  { %3924 = vmatpush1.bf16.msra.mxu0 %v5847_v61  ;;  %4311 = vmatpush1.bf16.msra.mxu1 %v5850_v62  ;;  %v5948_v61 = vld [vmem:[%s7796_s1 + $0x1164] ss:$16 sps:$4 sm:$0xff]   ;;  %v5951_v62 = vld [vmem:[%s7796_s1 + $0x116c] ss:$16 sps:$4 sm:$0xff]  }
 0x1f0   :  { %3925 = vmatprep.subr.bf16.mxu0 %v5855_v63  ;;  %4312 = vmatprep.subr.bf16.mxu1 %v5858_v0  ;;  %v5946_v63 = vld [vmem:[%s7796_s1 + $0x1160] ss:$16 sps:$4 sm:$0xff]   ;;  %v5949_v0 = vld [vmem:[%s7796_s1 + $0x1168] ss:$16 sps:$4 sm:$0xff]  }
 0x1f3   :  { %3926 = vmatpush1.bf16.msra.mxu0 %v5853_v1  ;;  %4313 = vmatpush1.bf16.msra.mxu1 %v5856_v2  ;;  %v5954_v1 = vld [vmem:[%s7796_s1 + $0x1184] ss:$16 sps:$4 sm:$0xff]   ;;  %v5957_v2 = vld [vmem:[%s7796_s1 + $0x118c] ss:$16 sps:$4 sm:$0xff]  }
 0x1f4   :  { %3927 = vmatprep.subr.bf16.mxu0 %v5861_v3  ;;  %4314 = vmatprep.subr.bf16.mxu1 %v5864_v4  ;;  %v5952_v3 = vld [vmem:[%s7796_s1 + $0x1180] ss:$16 sps:$4 sm:$0xff]   ;;  %v5955_v4 = vld [vmem:[%s7796_s1 + $0x1188] ss:$16 sps:$4 sm:$0xff]  }
 0x1f7   :  { %3928 = vmatpush1.bf16.msra.mxu0 %v5859_v5  ;;  %4315 = vmatpush1.bf16.msra.mxu1 %v5862_v6  ;;  %v5960_v5 = vld [vmem:[%s7796_s1 + $0x11a4] ss:$16 sps:$4 sm:$0xff]   ;;  %v5963_v6 = vld [vmem:[%s7796_s1 + $0x11ac] ss:$16 sps:$4 sm:$0xff]  }
 0x1f8   :  { %3929 = vmatprep.subr.bf16.mxu0 %v5867_v7  ;;  %4316 = vmatprep.subr.bf16.mxu1 %v5870_v8  ;;  %v5958_v7 = vld [vmem:[%s7796_s1 + $0x11a0] ss:$16 sps:$4 sm:$0xff]   ;;  %v5961_v8 = vld [vmem:[%s7796_s1 + $0x11a8] ss:$16 sps:$4 sm:$0xff]  }
 0x1fb   :  { %3930 = vmatpush1.bf16.msra.mxu0 %v5865_v9  ;;  %4317 = vmatpush1.bf16.msra.mxu1 %v5868_v10  ;;  %v5966_v9 = vld [vmem:[%s7796_s1 + $0x11c4] ss:$16 sps:$4 sm:$0xff]   ;;  %v5969_v10 = vld [vmem:[%s7796_s1 + $0x11cc] ss:$16 sps:$4 sm:$0xff]  }
 0x1fc   :  { %3931 = vmatprep.subr.bf16.mxu0 %v5873_v11  ;;  %4318 = vmatprep.subr.bf16.mxu1 %v5876_v12  ;;  %v5964_v11 = vld [vmem:[%s7796_s1 + $0x11c0] ss:$16 sps:$4 sm:$0xff]   ;;  %v5967_v12 = vld [vmem:[%s7796_s1 + $0x11c8] ss:$16 sps:$4 sm:$0xff]  }
 0x1ff   :  { %3932 = vmatpush1.bf16.msra.mxu0 %v5871_v13  ;;  %4319 = vmatpush1.bf16.msra.mxu1 %v5874_v14  ;;  %v5972_v13 = vld [vmem:[%s7796_s1 + $0x11e4] ss:$16 sps:$4 sm:$0xff]   ;;  %v5975_v14 = vld [vmem:[%s7796_s1 + $0x11ec] ss:$16 sps:$4 sm:$0xff]  }
 0x200   :  { %3944 = vmatprep.subr.bf16.mxu0 %v5882_v15  ;;  %4331 = vmatprep.subr.bf16.mxu1 %v5885_v16  ;;  %v5970_v15 = vld [vmem:[%s7796_s1 + $0x11e0] ss:$16 sps:$4 sm:$0xff]   ;;  %v5973_v16 = vld [vmem:[%s7796_s1 + $0x11e8] ss:$16 sps:$4 sm:$0xff]  }
 0x202   :  { %3934 = vmatmul.mubr.bf16.vlgmr.msra.gmra.mrb[0].mxu0 %v5877_v17  ;;  %4321 = vmatmul.mubr.bf16.vlgmr.msra.gmra.mrb[0].mxu1 %v5877_v17  ;;  %v5976_v17 = vld [vmem:[%s7797_s0 + $0x40] ss:$72 sps:$4 sm:$0xff]  }
 0x203   :  { %3945 = vmatpush1.bf16.msra.mxu0 %v5880_v18  ;;  %4332 = vmatpush1.bf16.msra.mxu1 %v5883_v19  ;;  %v610_v18 = vlaneseq }
 0x204   :  { %3946 = vmatprep.subr.bf16.mxu0 %v5888_v20  ;;  %4333 = vmatprep.subr.bf16.mxu1 %v5891_v21 }
 0x205   :  { %3976 = vmatprep.mubr.bf16.mxu0 %v5978_v22  ;;  %4363 = vmatprep.mubr.bf16.mxu1 %v5978_v22  ;;  %v611_v19 = vshrl.u32 %v610_v18, 7  ;;  %v608_v22 = vld [vmem:[%s7798_s2] sm:$0xf] }
 0x207   :  { %3947 = vmatpush1.bf16.msra.mxu0 %v5886_v23  ;;  %4334 = vmatpush1.bf16.msra.mxu1 %v5889_v24  ;;  %v612_v20 = vsub.s32 0, %v611_v19  ;;  %v620_v21 = vsub.s32 2, %v611_v19  ;;  %v616_v23 = vsub.s32 1, %v611_v19  ;;  %v624_v24 = vsub.s32 3, %v611_v19 }
 0x208   :  { %3948 = vmatprep.subr.bf16.mxu0 %v5894_v25  ;;  %4335 = vmatprep.subr.bf16.mxu1 %v5897_v26 }
 0x209   :  { %v613_v25 = vrot.slane %v608_v22, %v612_v20  ;;  %v621_v26 = vrot.slane %v608_v22, %v620_v21 }
 0x20b   :  { %3949 = vmatpush1.bf16.msra.mxu0 %v5892_v27  ;;  %4336 = vmatpush1.bf16.msra.mxu1 %v5895_v28  ;;  %v617_v27 = vrot.slane %v608_v22, %v616_v23  ;;  %v625_v28 = vrot.slane %v608_v22, %v624_v24 }
 0x20c   :  { %3950 = vmatprep.subr.bf16.mxu0 %v5900_v29  ;;  %4337 = vmatprep.subr.bf16.mxu1 %v5903_v30 }
 0x20f   :  { %3951 = vmatpush1.bf16.msra.mxu0 %v5898_v31  ;;  %4338 = vmatpush1.bf16.msra.mxu1 %v5901_v32 }
 0x210   :  { %3952 = vmatprep.subr.bf16.mxu0 %v5906_v33  ;;  %4339 = vmatprep.subr.bf16.mxu1 %v5909_v34 }
 0x213   :  { %3953 = vmatpush1.bf16.msra.mxu0 %v5904_v35  ;;  %4340 = vmatpush1.bf16.msra.mxu1 %v5907_v36 }
 0x214   :  { %3954 = vmatprep.subr.bf16.mxu0 %v5912_v37  ;;  %4341 = vmatprep.subr.bf16.mxu1 %v5915_v38 }
 0x217   :  { %3955 = vmatpush1.bf16.msra.mxu0 %v5910_v39  ;;  %4342 = vmatpush1.bf16.msra.mxu1 %v5913_v40 }
 0x218   :  { %3956 = vmatprep.subr.bf16.mxu0 %v5918_v41  ;;  %4343 = vmatprep.subr.bf16.mxu1 %v5921_v42 }
 0x21b   :  { %3957 = vmatpush1.bf16.msra.mxu0 %v5916_v43  ;;  %4344 = vmatpush1.bf16.msra.mxu1 %v5919_v44 }
 0x21c   :  { %3958 = vmatprep.subr.bf16.mxu0 %v5924_v45  ;;  %4345 = vmatprep.subr.bf16.mxu1 %v5927_v46 }
 0x21f   :  { %3959 = vmatpush1.bf16.msra.mxu0 %v5922_v47  ;;  %4346 = vmatpush1.bf16.msra.mxu1 %v5925_v48 }
 0x220   :  { %3960 = vmatprep.subr.bf16.mxu0 %v5930_v49  ;;  %4347 = vmatprep.subr.bf16.mxu1 %v5933_v50 }
 0x223   :  { %3961 = vmatpush1.bf16.msra.mxu0 %v5928_v51  ;;  %4348 = vmatpush1.bf16.msra.mxu1 %v5931_v52 }
 0x224   :  { %3962 = vmatprep.subr.bf16.mxu0 %v5936_v53  ;;  %4349 = vmatprep.subr.bf16.mxu1 %v5939_v54 }
 0x227   :  { %3963 = vmatpush1.bf16.msra.mxu0 %v5934_v55  ;;  %4350 = vmatpush1.bf16.msra.mxu1 %v5937_v56 }
 0x228   :  { %3964 = vmatprep.subr.bf16.mxu0 %v5942_v57  ;;  %4351 = vmatprep.subr.bf16.mxu1 %v5945_v58 }
 0x22b   :  { %3965 = vmatpush1.bf16.msra.mxu0 %v5940_v59  ;;  %4352 = vmatpush1.bf16.msra.mxu1 %v5943_v60 }
 0x22c   :  { %3966 = vmatprep.subr.bf16.mxu0 %v5948_v61  ;;  %4353 = vmatprep.subr.bf16.mxu1 %v5951_v62 }
 0x22f   :  { %3967 = vmatpush1.bf16.msra.mxu0 %v5946_v63  ;;  %4354 = vmatpush1.bf16.msra.mxu1 %v5949_v0 }
 0x230   :  { %3968 = vmatprep.subr.bf16.mxu0 %v5954_v1  ;;  %4355 = vmatprep.subr.bf16.mxu1 %v5957_v2 }
 0x233   :  { %3969 = vmatpush1.bf16.msra.mxu0 %v5952_v3  ;;  %4356 = vmatpush1.bf16.msra.mxu1 %v5955_v4 }
 0x234   :  { %3970 = vmatprep.subr.bf16.mxu0 %v5960_v5  ;;  %4357 = vmatprep.subr.bf16.mxu1 %v5963_v6 }
 0x237   :  { %3971 = vmatpush1.bf16.msra.mxu0 %v5958_v7  ;;  %4358 = vmatpush1.bf16.msra.mxu1 %v5961_v8 }
 0x238   :  { %3972 = vmatprep.subr.bf16.mxu0 %v5966_v9  ;;  %4359 = vmatprep.subr.bf16.mxu1 %v5969_v10 }
 0x23b   :  { %3973 = vmatpush1.bf16.msra.mxu0 %v5964_v11  ;;  %4360 = vmatpush1.bf16.msra.mxu1 %v5967_v12 }
 0x23c   :  { %3974 = vmatprep.subr.bf16.mxu0 %v5972_v13  ;;  %4361 = vmatprep.subr.bf16.mxu1 %v5975_v14 }
 0x23f   :  { %3975 = vmatpush1.bf16.msra.mxu0 %v5970_v15  ;;  %4362 = vmatpush1.bf16.msra.mxu1 %v5973_v16 }
 0x242   :  { %3977 = vmatmul.mubr.bf16.vlgmr.msra.gmra.mrb[0].mxu0 %v5976_v17  ;;  %4364 = vmatmul.mubr.bf16.vlgmr.msra.gmra.mrb[0].mxu1 %v5976_v17 }
 0x315   :  { %v3978_v29 = vpop.f32.mrb[0].mxu0  ;;  %v4365_v30 = vpop.f32.mrb[0].mxu1 }
 0x316   :  { %v5016_v31 = vadd.f32 %v3978_v29, %v613_v25  ;;  %v5020_v32 = vadd.f32 %v4365_v30, %v621_v26  ;;  %v3980_v33 = vpop.f32.mrb[1].mxu0  ;;  %v4367_v34 = vpop.f32.mrb[1].mxu1 }
 0x317   :  { %v5017_v35 = vadd.f32 %v3980_v33, %v617_v27  ;;  %v5021_v36 = vadd.f32 %v4367_v34, %v625_v28  ;;  %v3982_v37 = vpop.f32.mrb[2].mxu0  ;;  %v4369_v38 = vpop.f32.mrb[2].mxu1 }
 0x318   :  { %v4374_v39 = vmax.f32 %v5016_v31, 0.0  ;;  %v4376_v40 = vmax.f32 %v5020_v32, 0.0  ;;  %v5018_v41 = vadd.f32 %v3982_v37, %v613_v25  ;;  %v5022_v42 = vadd.f32 %v4369_v38, %v621_v26  ;;  %v3984_v43 = vpop.f32.mrb[3].mxu0  ;;  %v4371_v44 = vpop.f32.mrb[3].mxu1 }
 0x319   :  { %v4375_v45 = vmax.f32 %v5017_v35, 0.0  ;;  %v4377_v46 = vmax.f32 %v5021_v36, 0.0  ;;  %v5019_v47 = vadd.f32 %v3984_v43, %v617_v27  ;;  %v5023_v48 = vadd.f32 %v4371_v44, %v625_v28 }
 0x31a   :  { %v4378_v49 = vmax.f32 %v5018_v41, 0.0  ;;  %v4380_v50 = vmax.f32 %v5022_v42, 0.0 }
 0x31b   :  { %v5012_v51 = vpack.c.bf16 %v4375_v45, %v4374_v39  ;;  %v5013_v52 = vpack.c.bf16 %v4377_v46, %v4376_v40  ;;  %v4379_v53 = vmax.f32 %v5019_v47, 0.0  ;;  %v4381_v54 = vmax.f32 %v5023_v48, 0.0 }
 0x31d   :  { %4406 = vst [vmem:[%s7799_s3] sm:$0xff] %v5012_v51  ;;  %4407 = vst [vmem:[%s7799_s3 + $0x8] sm:$0xff] %v5013_v52  ;;  %v5014_v55 = vpack.c.bf16 %v4379_v53, %v4378_v49  ;;  %v5015_v56 = vpack.c.bf16 %v4381_v54, %v4380_v50 }
 0x31f   :  { %4408 = vst [vmem:[%s7799_s3 + $0x10] sm:$0xff] %v5014_v55  ;;  %4409 = vst [vmem:[%s7799_s3 + $0x18] sm:$0xff] %v5015_v56 }

// kernel: conv_vae_forward.17
= control target key start
LH: loop header
LB: loop body
LE: loop exit
PB: predicated region body
PF: predicated region fallthrough
CT: control target
= control target key end

     0   :  { %s1840_s12 = smov 0   ;;  %s2120_s0 = inlined_call_operand.vmem [shape: bf16[512,288], index: 0, kind: input, shape index: {}]   ;;  %s2121_s1 = inlined_call_operand.vmem [shape: bf16[288,12], index: 1, kind: input, shape index: {}]   ;;  %s2122_s2 = inlined_call_operand.vmem [shape: f32[1,12], index: 2, kind: input, shape index: {}]   ;;  %s2123_s3 = inlined_call_operand.vmem [shape: f32[512,12], index: 3, kind: output, shape index: {}]  }
   0x1 LB: > { %s1285_s13 = sadd.s32 4294967295, %s1818_s12   ;;  %p1289_p0 = scmp.ge.s32.totalorder %s1818_s12, 1  ;;  %s1818_s12 = sphi %s1840_s12, %s13_s12  }
   0x2   : > { %p139_p1 = scmp.lt.s32.totalorder %s1818_s12, 3 }
   0x4   : > { %p140_p2 = pnand %p1289_p0, %p139_p1 }
   0x5   : > { %v1602_v0 = vld [vmem:[%s2121_s1 + $0x40] sm:$0xff] (!%p140_p2)   ;;  %s1290_s16 = sshll.u32 (!%p140_p2), %s1285_s13, 5  ;;  %v1604_v2 = vld [vmem:[%s2121_s1 + $0x48] sm:$0xff] (!%p140_p2)   ;;  %v1606_v4 = vld [vmem:[%s2121_s1 + $0x50] sm:$0xff] (!%p140_p2)   ;;  %vm633_vm0 = vcmask (!%p140_p2), 261120   ;;  %vm1196_vm1 = vcmask (!%p140_p2), 97280  }
   0x6   : > { %143 = sbr.rel (%p140_p2) target bundleno = 384 (0x180), region = 32  ;;  %v1603_v1 = vld [vmem:[%s2121_s1] sm:$0xff] (!%p140_p2)   ;;  %1411 = vmatprep.subr.bf16.mxu0 (!%p140_p2), %v1602_v0  ;;  %1577 = vmatprep.subr.bf16.mxu1 (!%p140_p2), %v1602_v0  ;;  %p165_p3 = scmp.lt.s32.totalorder (!%p140_p2), %s1290_s16, 63  ;;  %v1605_v3 = vld [vmem:[%s2121_s1 + $0x8] sm:$0xff] (!%p140_p2)   ;;  %v1607_v5 = vld [vmem:[%s2121_s1 + $0x10] sm:$0xff] (!%p140_p2)  }
   0x7   : > { %1412 = vmatpush3.bf16.msra.mxu0 (!%p140_p2), %v1603_v1  ;;  %1585 = vmatpush3.bf16.msra.mxu1 (!%p140_p2), %v1603_v1  ;;  %v1608_v6 = vld [vmem:[%s2121_s1 + $0x58] sm:$0xff] (!%p140_p2)   ;;  %v1610_v8 = vld [vmem:[%s2121_s1 + $0x60] sm:$0xff] (!%p140_p2)   ;;  %v1612_v10 = vld [vmem:[%s2121_s1 + $0x68] sm:$0xff] (!%p140_p2)  }
   0x8   : > { %1413 = vmatprep.subr.bf16.mxu0 (!%p140_p2), %v1604_v2  ;;  %1578 = vmatprep.subr.bf16.mxu1 (!%p140_p2), %v1604_v2  ;;  %v1609_v7 = vld [vmem:[%s2121_s1 + $0x18] sm:$0xff] (!%p140_p2)   ;;  %v1611_v9 = vld [vmem:[%s2121_s1 + $0x20] sm:$0xff] (!%p140_p2)   ;;  %v1613_v13 = vld [vmem:[%s2121_s1 + $0x28] sm:$0xff] (!%p140_p2)  }
   0x9   : > { %v1614_v14 = vld [vmem:[%s2121_s1 + $0x70] sm:$0xff] (!%p140_p2)   ;;  %v1616_v16 = vld [vmem:[%s2121_s1 + $0x78] sm:$0xff] (!%p140_p2)   ;;  %v1624_v18 = vld [vmem:[%s2121_s1 + $0x80] sm:$0xff] (!%p140_p2)  }
   0xa   : > { %v1615_v15 = vld [vmem:[%s2121_s1 + $0x30] sm:$0xff] (!%p140_p2)   ;;  %v1617_v17 = vld [vmem:[%s2121_s1 + $0x38] sm:$0xff] (!%p140_p2)   ;;  %v1637_v23 = vld [vmem:[%s2121_s1 + $0x88] sm:$0xff] (!%p140_p2)  }
   0xb   : > { %1414 = vmatpush3.bf16.msra.mxu0 (!%p140_p2), %v1605_v3  ;;  %1586 = vmatpush3.bf16.msra.mxu1 (!%p140_p2), %v1605_v3 }
   0xc   : > { %1415 = vmatprep.subr.bf16.mxu0 (!%p140_p2), %v1606_v4  ;;  %1579 = vmatprep.subr.bf16.mxu1 (!%p140_p2), %v1606_v4 }
   0xd   : > { %s2125_s16 = smov (!%p165_p3, %s1290_s16), 63 }
   0xe   : > { %s1593_s29 = smul.u32 12, %s2125_s16  ;;  %s1293_s5 = sshll.u32 %s2125_s16, 3 }
   0xf   : > { %1416 = vmatpush3.bf16.msra.mxu0 %v1607_v5  ;;  %1587 = vmatpush3.bf16.msra.mxu1 %v1607_v5  ;;  %s2012_s8 = scalar_lea.vmem %s2123_s3, %s1293_s5 }
  0x10   : > { %1417 = vmatprep.subr.bf16.mxu0 %v1608_v6  ;;  %1580 = vmatprep.subr.bf16.mxu1 %v1608_v6  ;;  %s1881_s9 = scalar_lea.vmem %s2120_s0, %s1593_s29 }
  0x11   : > { %v1620_v11 = vld [vmem:[%s1881_s9 + $0x4] ss:$12 sps:$4 sm:$0xff]   ;;  %v1618_v19 = vld [vmem:[%s1881_s9] ss:$12 sps:$4 sm:$0xff]   ;;  %v1625_v21 = vld [vmem:[%s1881_s9 + $0x1c] ss:$12 sps:$4 sm:$0xff]  }
  0x12   : > { %v1623_v12 = vld [vmem:[%s1881_s9 + $0x124] ss:$12 sps:$4 sm:$0xff]   ;;  %714 = vmatprep.mubr.bf16.mxu0 %v1620_v11  ;;  %v1621_v20 = vld [vmem:[%s1881_s9 + $0x120] ss:$12 sps:$4 sm:$0xff]   ;;  %v1627_v22 = vld [vmem:[%s1881_s9 + $0x13c] ss:$12 sps:$4 sm:$0xff]  }
  0x13   : > { %1418 = vmatpush3.bf16.msra.mxu0 %v1609_v7  ;;  %1588 = vmatpush3.bf16.msra.mxu1 %v1609_v7  ;;  %v1629_v24 = vld [vmem:[%s1881_s9 + $0x18] ss:$12 sps:$4 sm:$0xff]   ;;  %v1631_v26 = vld [vmem:[%s1881_s9 + $0x34] ss:$12 sps:$4 sm:$0xff]   ;;  %v1635_v28 = vld [vmem:[%s1881_s9 + $0x30] ss:$12 sps:$4 sm:$0xff]  }
  0x14   : > { %1419 = vmatprep.subr.bf16.mxu0 %v1610_v8  ;;  %1581 = vmatprep.subr.bf16.mxu1 %v1610_v8  ;;  %v1630_v25 = vld [vmem:[%s1881_s9 + $0x138] ss:$12 sps:$4 sm:$0xff]   ;;  %v1633_v27 = vld [vmem:[%s1881_s9 + $0x154] ss:$12 sps:$4 sm:$0xff]   ;;  %v1636_v29 = vld [vmem:[%s1881_s9 + $0x150] ss:$12 sps:$4 sm:$0xff]  }
  0x15   : > { %810 = vmatprep.mubr.bf16.mxu1 %v1623_v12  ;;  %v1638_v30 = vld [vmem:[%s1881_s9 + $0x4c] ss:$12 sps:$4 sm:$0xff]   ;;  %v1642_v32 = vld [vmem:[%s1881_s9 + $0x48] ss:$12 sps:$4 sm:$0xff]   ;;  %v1644_v34 = vld [vmem:[%s1881_s9 + $0x64] ss:$12 sps:$4 sm:$0xff]  }
  0x16   : > { %v1640_v31 = vld [vmem:[%s1881_s9 + $0x16c] ss:$12 sps:$4 sm:$0xff]   ;;  %v1643_v33 = vld [vmem:[%s1881_s9 + $0x168] ss:$12 sps:$4 sm:$0xff]   ;;  %v1653_v41 = vld [vmem:[%s1881_s9 + $0x50] ss:$12 sps:$4 sm:$0xff]  }
  0x17   : > { %1420 = vmatpush3.bf16.msra.mxu0 %v1611_v9  ;;  %1589 = vmatpush3.bf16.msra.mxu1 %v1611_v9  ;;  %v1646_v35 = vld [vmem:[%s1881_s9 + $0x8] ss:$12 sps:$4 sm:$0xff]   ;;  %v1647_v36 = vld [vmem:[%s1881_s9 + $0x60] ss:$12 sps:$4 sm:$0xff]   ;;  %v1651_v39 = vld [vmem:[%s1881_s9 + $0x38] ss:$12 sps:$4 sm:$0xff]  }
  0x18   : > { %1421 = vmatprep.subr.bf16.mxu0 %v1612_v10  ;;  %1582 = vmatprep.subr.bf16.mxu1 %v1612_v10  ;;  %v1648_v37 = vld [vmem:[%s1881_s9 + $0x20] ss:$12 sps:$4 sm:$0xff]   ;;  %v1649_v38 = vld [vmem:[%s1881_s9 + $0x7c] ss:$12 sps:$4 sm:$0xff]   ;;  %v1652_v40 = vld [vmem:[%s1881_s9 + $0x78] ss:$12 sps:$4 sm:$0xff]  }
  0x19   : > { %v1654_v42 = vld [vmem:[%s1881_s9 + $0x94] ss:$12 sps:$4 sm:$0xff]   ;;  %v1657_v44 = vld [vmem:[%s1881_s9 + $0x90] ss:$12 sps:$4 sm:$0xff]   ;;  %v1659_v46 = vld [vmem:[%s1881_s9 + $0xac] ss:$12 sps:$4 sm:$0xff]  }
  0x1a   : > { %v1656_v43 = vld [vmem:[%s1881_s9 + $0x68] ss:$12 sps:$4 sm:$0xff]   ;;  %v1658_v45 = vld [vmem:[%s1881_s9 + $0x80] ss:$12 sps:$4 sm:$0xff]   ;;  %v1661_v47 = vld [vmem:[%s1881_s9 + $0x98] ss:$12 sps:$4 sm:$0xff]  }
  0x1b   : > { %1422 = vmatpush3.bf16.msra.mxu0 %v1613_v13  ;;  %1590 = vmatpush3.bf16.msra.mxu1 %v1613_v13  ;;  %v1662_v48 = vld [vmem:[%s1881_s9 + $0xa8] ss:$12 sps:$4 sm:$0xff]   ;;  %v1663_v49 = vld [vmem:[%s1881_s9 + $0xb0] ss:$12 sps:$4 sm:$0xff]   ;;  %v1667_v52 = vld [vmem:[%s1881_s9 + $0xc0] ss:$12 sps:$4 sm:$0xff]  }
  0x1c   : > { %1423 = vmatprep.subr.bf16.mxu0 %v1614_v14  ;;  %1583 = vmatprep.subr.bf16.mxu1 %v1614_v14  ;;  %v1664_v50 = vld [vmem:[%s1881_s9 + $0xc4] ss:$12 sps:$4 sm:$0xff]   ;;  %v1666_v51 = vld [vmem:[%s1881_s9 + $0xc8] ss:$12 sps:$4 sm:$0xff]   ;;  %v1668_v53 = vld [vmem:[%s1881_s9 + $0xe0] ss:$12 sps:$4 sm:$0xff]  }
  0x1d   : > { %v1669_v54 = vld [vmem:[%s1881_s9 + $0xdc] ss:$12 sps:$4 sm:$0xff]   ;;  %v1671_v55 = vld [vmem:[%s1881_s9 + $0xf8] ss:$12 sps:$4 sm:$0xff]   ;;  %v1674_v58 = vld [vmem:[%s1881_s9 + $0xf4] ss:$12 sps:$4 sm:$0xff]  }
  0x1e   : > { %v1672_v56 = vld [vmem:[%s1881_s9 + $0xd8] ss:$12 sps:$4 sm:$0xff]   ;;  %v1673_v57 = vld [vmem:[%s1881_s9 + $0x110] ss:$12 sps:$4 sm:$0xff]   ;;  %v1676_v59 = vld [vmem:[%s1881_s9 + $0x128] ss:$12 sps:$4 sm:$0xff]  }
  0x1f   : > { %1424 = vmatpush3.bf16.msra.mxu0 %v1615_v15  ;;  %1591 = vmatpush3.bf16.msra.mxu1 %v1615_v15  ;;  %v1677_v60 = vld [vmem:[%s1881_s9 + $0xf0] ss:$12 sps:$4 sm:$0xff]   ;;  %v1678_v61 = vld [vmem:[%s1881_s9 + $0x140] ss:$12 sps:$4 sm:$0xff]   ;;  %v1681_v63 = vld [vmem:[%s1881_s9 + $0x158] ss:$12 sps:$4 sm:$0xff]  }
  0x20   : > { %1425 = vmatprep.subr.bf16.mxu0 %v1616_v16  ;;  %1584 = vmatprep.subr.bf16.mxu1 %v1616_v16  ;;  %v1679_v62 = vld [vmem:[%s1881_s9 + $0x10c] ss:$12 sps:$4 sm:$0xff]   ;;  %v1682_v0 = vld [vmem:[%s1881_s9 + $0x108] ss:$12 sps:$4 sm:$0xff]   ;;  %v1683_v1 = vld [vmem:[%s1881_s9 + $0x170] ss:$12 sps:$4 sm:$0xff]  }
  0x23   : > { %1426 = vmatpush3.bf16.msra.mxu0 %v1617_v17  ;;  %1592 = vmatpush3.bf16.msra.mxu1 %v1617_v17 }
  0x24   : > { %1541 = vmatprep.subr.bf16.mxu1 %v1624_v18 }
  0x26   : > { %715 = vmatmul.mubr.bf16.vlgmr.msra.gmra.mrb[0].mxu0 %v1618_v19  ;;  %811 = vmatmul.mubr.bf16.vlgmr.msra.gmra.mrb[0].mxu1 %v1621_v20 }
  0x27   : > { %1542 = vmatpush3.bf16.msra.mxu1 %v1624_v18  ;;  %722 = vmatprep.mubr.bf16.mxu0 %v1625_v21 }
  0x28   : > { %818 = vmatprep.mubr.bf16.mxu1 %v1627_v22  ;;  %1543 = vmatprep.subr.bf16.mxu1 %v1637_v23 }
  0x2b   : > { %1544 = vmatpush3.bf16.msra.mxu1 %v1637_v23 }
  0x2e   : > { %723 = vmatmul.mubr.bf16.gmra.mrb[4].mxu0 %v1629_v24  ;;  %819 = vmatmul.mubr.bf16.gmra.mrb[4].mxu1 %v1630_v25 }
  0x2f   : > { %730 = vmatprep.mubr.bf16.mxu0 %v1631_v26  ;;  %826 = vmatprep.mubr.bf16.mxu1 %v1633_v27 }
  0x36   : > { %731 = vmatmul.mubr.bf16.gmra.mrb[8].mxu0 %v1635_v28  ;;  %827 = vmatmul.mubr.bf16.gmra.mrb[8].mxu1 %v1636_v29 }
  0x37   : > { %738 = vmatprep.mubr.bf16.mxu0 %v1638_v30  ;;  %834 = vmatprep.mubr.bf16.mxu1 %v1640_v31 }
  0x3e   : > { %739 = vmatmul.mubr.bf16.gmra.mrb[12].mxu0 %v1642_v32  ;;  %835 = vmatmul.mubr.bf16.gmra.mrb[12].mxu1 %v1643_v33 }
  0x3f   : > { %746 = vmatprep.mubr.bf16.mxu0 %v1644_v34  ;;  %1545 = vmatprep.mubr.msk.bf16.mxu1 %vm633_vm0, %v1646_v35 }
  0x46   : > { %747 = vmatmul.mubr.bf16.gmra.mrb[16].mxu0 %v1647_v36  ;;  %1546 = vmatmul.mubr.msk.bf16.vlgmr.msra.gmra.mrb[16].mxu1 %vm633_vm0, %v1648_v37 }
  0x47   : > { %754 = vmatprep.mubr.bf16.mxu0 %v1649_v38  ;;  %1549 = vmatprep.mubr.msk.bf16.mxu1 %vm633_vm0, %v1651_v39 }
  0x4e   : > { %755 = vmatmul.mubr.bf16.gmra.mrb[20].mxu0 %v1652_v40  ;;  %1550 = vmatmul.mubr.msk.bf16.gmra.mrb[20].mxu1 %vm633_vm0, %v1653_v41 }
  0x4f   : > { %762 = vmatprep.mubr.bf16.mxu0 %v1654_v42  ;;  %1553 = vmatprep.mubr.msk.bf16.mxu1 %vm633_vm0, %v1656_v43 }
  0x56   : > { %763 = vmatmul.mubr.bf16.gmra.mrb[24].mxu0 %v1657_v44  ;;  %1554 = vmatmul.mubr.msk.bf16.gmra.mrb[24].mxu1 %vm633_vm0, %v1658_v45 }
  0x57   : > { %770 = vmatprep.mubr.bf16.mxu0 %v1659_v46  ;;  %1557 = vmatprep.mubr.msk.bf16.mxu1 %vm633_vm0, %v1661_v47 }
  0x5e   : > { %771 = vmatmul.mubr.bf16.gmra.mrb[28].mxu0 %v1662_v48  ;;  %1558 = vmatmul.mubr.msk.bf16.gmra.mrb[28].mxu1 %vm633_vm0, %v1663_v49 }
  0x5f   : > { %778 = vmatprep.mubr.bf16.mxu0 %v1664_v50  ;;  %1561 = vmatprep.mubr.msk.bf16.mxu1 %vm633_vm0, %v1666_v51  ;;  %v1993_v50 = vld [vmem:[%s2122_s2] ss:$0 sm:$0xff] }
  0x66   : > { %779 = vmatmul.mubr.bf16.gmra.mrb[32].mxu0 %v1667_v52  ;;  %1562 = vmatmul.mubr.msk.bf16.gmra.mrb[32].mxu1 %vm633_vm0, %v1668_v53 }
  0x67   : > { %786 = vmatprep.mubr.bf16.mxu0 %v1669_v54  ;;  %1565 = vmatprep.mubr.msk.bf16.mxu1 %vm633_vm0, %v1671_v55 }
  0x6e   : > { %787 = vmatmul.mubr.bf16.gmra.mrb[36].mxu0 %v1672_v56  ;;  %1566 = vmatmul.mubr.msk.bf16.gmra.mrb[36].mxu1 %vm633_vm0, %v1673_v57 }
  0x6f   : > { %794 = vmatprep.mubr.bf16.mxu0 %v1674_v58  ;;  %1569 = vmatprep.mubr.msk.bf16.mxu1 %vm633_vm0, %v1676_v59 }
  0x76   : > { %795 = vmatmul.mubr.bf16.gmra.mrb[40].mxu0 %v1677_v60  ;;  %1570 = vmatmul.mubr.msk.bf16.gmra.mrb[40].mxu1 %vm633_vm0, %v1678_v61 }
  0x77   : > { %802 = vmatprep.mubr.bf16.mxu0 %v1679_v62  ;;  %1573 = vmatprep.mubr.msk.bf16.mxu1 %vm633_vm0, %v1681_v63 }
  0x7e   : > { %803 = vmatmul.mubr.bf16.gmra.mrb[44].mxu0 %v1682_v0  ;;  %1574 = vmatmul.mubr.msk.bf16.gmra.mrb[44].mxu1 %vm633_vm0, %v1683_v1 }
  0xf9   : > { %v1427_v2 = vpop.f32.mrb[0].mxu0  ;;  %v1499_v3 = vpop.f32.mrb[0].mxu1 }
  0xfa   : > { %v1428_v4 = vpop.f32.mrb[1].mxu0  ;;  %v1500_v5 = vpop.f32.mrb[1].mxu1 }
  0xfb   : > { %v1429_v6 = vadd.f32 %v1428_v4, %v1427_v2  ;;  %v1430_v7 = vpop.f32.mrb[2].mxu0  ;;  %v1974_v8 = vadd.f32 %v1500_v5, %v1499_v3  ;;  %v1502_v9 = vpop.f32.mrb[2].mxu1 }
  0xfc   : > { %v1431_v10 = vpop.f32.mrb[3].mxu0  ;;  %v1503_v11 = vpop.f32.mrb[3].mxu1 }
  0xfd   : > { %v1432_v12 = vadd.f32 %v1431_v10, %v1430_v7  ;;  %v1976_v13 = vadd.f32 %v1503_v11, %v1502_v9  ;;  %v717_v54 = vadd.f32 %v1429_v6, %v1993_v50 }
  0xff   : > { %v720_v63 = vadd.f32 %v1432_v12, %v1993_v50 }
 0x101   : > { %v1433_v14 = vpop.f32.mrb[4].mxu0  ;;  %v1505_v15 = vpop.f32.mrb[4].mxu1 }
 0x102   : > { %v1434_v16 = vpop.f32.mrb[5].mxu0  ;;  %v1506_v17 = vpop.f32.mrb[5].mxu1 }
 0x103   : > { %v1435_v18 = vadd.f32 %v1434_v16, %v1433_v14  ;;  %v1436_v19 = vpop.f32.mrb[6].mxu0  ;;  %v1978_v20 = vadd.f32 %v1506_v17, %v1505_v15  ;;  %v1508_v21 = vpop.f32.mrb[6].mxu1 }
 0x104   : > { %v1437_v22 = vpop.f32.mrb[7].mxu0  ;;  %v1509_v23 = vpop.f32.mrb[7].mxu1 }
 0x105   : > { %v1438_v24 = vadd.f32 %v1437_v22, %v1436_v19  ;;  %v1980_v25 = vadd.f32 %v1509_v23, %v1508_v21  ;;  %v725_v51 = vadd.f32 %v1435_v18, %v1993_v50 }
 0x107   : > { %v728_v58 = vadd.f32 %v1438_v24, %v1993_v50 }
 0x109   : > { %v1439_v26 = vpop.f32.mrb[8].mxu0  ;;  %v1511_v27 = vpop.f32.mrb[8].mxu1 }
 0x10a   : > { %v1440_v28 = vpop.f32.mrb[9].mxu0  ;;  %v1512_v29 = vpop.f32.mrb[9].mxu1 }
 0x10b   : > { %v1441_v30 = vadd.f32 %v1440_v28, %v1439_v26  ;;  %v1442_v31 = vpop.f32.mrb[10].mxu0  ;;  %v1982_v32 = vadd.f32 %v1512_v29, %v1511_v27  ;;  %v1514_v33 = vpop.f32.mrb[10].mxu1 }
 0x10c   : > { %v1443_v34 = vpop.f32.mrb[11].mxu0  ;;  %v1515_v35 = vpop.f32.mrb[11].mxu1 }
 0x10d   : > { %v1444_v36 = vadd.f32 %v1443_v34, %v1442_v31  ;;  %v1984_v37 = vadd.f32 %v1515_v35, %v1514_v33  ;;  %v733_v15 = vadd.f32 %v1441_v30, %v1993_v50 }
 0x10f   : > { %v736_v24 = vadd.f32 %v1444_v36, %v1993_v50 }
 0x111   : > { %v1445_v38 = vpop.f32.mrb[12].mxu0  ;;  %v1517_v39 = vpop.f32.mrb[12].mxu1 }
 0x112   : > { %v1446_v40 = vpop.f32.mrb[13].mxu0  ;;  %v1518_v41 = vpop.f32.mrb[13].mxu1 }
 0x113   : > { %v1447_v42 = vadd.f32 %v1446_v40, %v1445_v38  ;;  %v1448_v43 = vpop.f32.mrb[14].mxu0  ;;  %v1986_v44 = vadd.f32 %v1518_v41, %v1517_v39  ;;  %v1520_v45 = vpop.f32.mrb[14].mxu1 }
 0x114   : > { %v1449_v46 = vpop.f32.mrb[15].mxu0  ;;  %v1521_v47 = vpop.f32.mrb[15].mxu1 }
 0x115   : > { %v1450_v48 = vadd.f32 %v1449_v46, %v1448_v43  ;;  %v1988_v49 = vadd.f32 %v1521_v47, %v1520_v45  ;;  %v741_v10 = vadd.f32 %v1447_v42, %v1993_v50 }
 0x117   : > { %v744_v18 = vadd.f32 %v1450_v48, %v1993_v50 }
 0x119   : > { %v1451_v52 = vpop.f32.mrb[16].mxu0  ;;  %v1547_v53 = vpop.f32.mrb[16].mxu1 }
 0x11a   : > { %v886_v55 = vadd.f32 %v1547_v53, %v725_v51  ;;  %v1452_v56 = vpop.f32.mrb[17].mxu0  ;;  %v877_v57 = vpop.f32.mrb[17].mxu1 }
 0x11b   : > { %v1453_v59 = vadd.f32 %v1452_v56, %v1451_v52  ;;  %v878_v60 = vadd.f32 %v877_v57, %v717_v54  ;;  %v1454_v61 = vpop.f32.mrb[18].mxu0  ;;  %v1548_v62 = vpop.f32.mrb[18].mxu1 }
 0x11c   : > { %v1379_v0 = vmul.f32 -1.442695, %v886_v55  ;;  %v889_v1 = vadd.f32 %v1548_v62, %v728_v58  ;;  %v1455_v2 = vpop.f32.mrb[19].mxu0  ;;  %v880_v3 = vpop.f32.mrb[19].mxu1 }
 0x11d   : > { %v1377_v4 = vmul.f32 -1.442695, %v878_v60  ;;  %v1456_v5 = vadd.f32 %v1455_v2, %v1454_v61  ;;  %v881_v7 = vadd.f32 %v880_v3, %v720_v63  ;;  %v749_v43 = vadd.f32 %v1453_v59, %v1993_v50 }
 0x11e   : > { %1684 = vpow2.f32 %v1379_v0  ;;  %v1380_v6 = vmul.f32 -1.442695, %v889_v1 }
 0x11f   : > { %1686 = vpow2.f32 %v1377_v4  ;;  %v1378_v9 = vmul.f32 -1.442695, %v881_v7  ;;  %v752_v53 = vadd.f32 %v1456_v5, %v1993_v50 }
 0x120   : > { %1688 = vpow2.f32 %v1380_v6 }
 0x121   : > { %1690 = vpow2.f32 %v1378_v9  ;;  %v1457_v11 = vpop.f32.mrb[20].mxu0  ;;  %v1551_v14 = vpop.f32.mrb[20].mxu1 }
 0x122   : > { %v902_v12 = vadd.f32 %v1551_v14, %v741_v10  ;;  %v1458_v16 = vpop.f32.mrb[21].mxu0  ;;  %v893_v17 = vpop.f32.mrb[21].mxu1 }
 0x123   : > { %v1459_v19 = vadd.f32 %v1458_v16, %v1457_v11  ;;  %v894_v21 = vadd.f32 %v893_v17, %v733_v15  ;;  %v1460_v22 = vpop.f32.mrb[22].mxu0  ;;  %v1552_v23 = vpop.f32.mrb[22].mxu1 }
 0x124   : > { %v1383_v26 = vmul.f32 -1.442695, %v902_v12  ;;  %v905_v27 = vadd.f32 %v1552_v23, %v744_v18  ;;  %v1461_v28 = vpop.f32.mrb[23].mxu0  ;;  %v896_v29 = vpop.f32.mrb[23].mxu1 }
 0x125   : > { %v1381_v31 = vmul.f32 -1.442695, %v894_v21  ;;  %v1462_v33 = vadd.f32 %v1461_v28, %v1460_v22  ;;  %v897_v34 = vadd.f32 %v896_v29, %v736_v24  ;;  %v757_v39 = vadd.f32 %v1459_v19, %v1993_v50 }
 0x126   : > { %1692 = vpow2.f32 %v1383_v26  ;;  %v1384_v30 = vmul.f32 -1.442695, %v905_v27 }
 0x127   : > { %1694 = vpow2.f32 %v1381_v31  ;;  %v1382_v35 = vmul.f32 -1.442695, %v897_v34  ;;  %v760_v52 = vadd.f32 %v1462_v33, %v1993_v50 }
 0x128   : > { %v1685_v38 = vpop.eup %1684  ;;  %1696 = vpow2.f32 %v1384_v30 }
 0x129   : > { %v1687_v40 = vpop.eup %1686  ;;  %v1102_v41 = vadd.f32 1.0, %v1685_v38  ;;  %1698 = vpow2.f32 %v1382_v35  ;;  %v1463_v42 = vpop.f32.mrb[24].mxu0 }
 0x12a   : > { %v1555_v36 = vpop.f32.mrb[24].mxu1  ;;  %v1689_v45 = vpop.eup %1688  ;;  %v1100_v46 = vadd.f32 1.0, %v1687_v40 }
 0x12b   : > { %v918_v47 = vadd.f32 %v1555_v36, %v757_v39  ;;  %v1464_v48 = vpop.f32.mrb[25].mxu0  ;;  %v909_v51 = vpop.f32.mrb[25].mxu1  ;;  %1700 = vrcp.f32 %v1102_v41  ;;  %v1103_v55 = vadd.f32 1.0, %v1689_v45 }
 0x12c   : > { %v1691_v54 = vpop.eup %1690  ;;  %v1465_v56 = vadd.f32 %v1464_v48, %v1463_v42  ;;  %v910_v57 = vadd.f32 %v909_v51, %v749_v43  ;;  %v1466_v58 = vpop.f32.mrb[26].mxu0  ;;  %1702 = vrcp.f32 %v1100_v46 }
 0x12d   : > { %v1556_v60 = vpop.f32.mrb[26].mxu1  ;;  %v1101_v61 = vadd.f32 1.0, %v1691_v54  ;;  %v1387_v59 = vmul.f32 -1.442695, %v918_v47  ;;  %v1467_v63 = vpop.f32.mrb[27].mxu0  ;;  %1704 = vrcp.f32 %v1103_v55 }
 0x12e   : > { %v921_v62 = vadd.f32 %v1556_v60, %v760_v52  ;;  %v912_v0 = vpop.f32.mrb[27].mxu1  ;;  %v1385_v1 = vmul.f32 -1.442695, %v910_v57  ;;  %v1468_v2 = vadd.f32 %v1467_v63, %v1466_v58  ;;  %v765_v14 = vadd.f32 %v1465_v56, %v1993_v50 }
 0x12f   : > { %v913_v3 = vadd.f32 %v912_v0, %v752_v53  ;;  %1706 = vrcp.f32 %v1101_v61 }
 0x130   : > { %v1388_v4 = vmul.f32 -1.442695, %v921_v62  ;;  %1708 = vpow2.f32 %v1387_v59  ;;  %v1693_v7 = vpop.eup %1692  ;;  %v768_v28 = vadd.f32 %v1468_v2, %v1993_v50 }
 0x131   : > { %v1386_v5 = vmul.f32 -1.442695, %v913_v3  ;;  %1710 = vpow2.f32 %v1385_v1  ;;  %v1695_v6 = vpop.eup %1694  ;;  %v1106_v9 = vadd.f32 1.0, %v1693_v7  ;;  %v1469_v10 = vpop.f32.mrb[28].mxu0 }
 0x132   : > { %1712 = vpow2.f32 %v1388_v4  ;;  %v1559_v11 = vpop.f32.mrb[28].mxu1  ;;  %v1697_v15 = vpop.eup %1696  ;;  %v1104_v12 = vadd.f32 1.0, %v1695_v6 }
 0x133   : > { %1714 = vpow2.f32 %v1386_v5  ;;  %v1470_v16 = vpop.f32.mrb[29].mxu0  ;;  %v925_v17 = vpop.f32.mrb[29].mxu1  ;;  %v1107_v19 = vadd.f32 1.0, %v1697_v15 }
 0x134   : > { %v1699_v18 = vpop.eup %1698  ;;  %1716 = vrcp.f32 %v1106_v9  ;;  %v1471_v21 = vadd.f32 %v1470_v16, %v1469_v10  ;;  %v926_v22 = vadd.f32 %v925_v17, %v765_v14  ;;  %v1472_v23 = vpop.f32.mrb[30].mxu0 }
 0x135   : > { %v1560_v24 = vpop.f32.mrb[30].mxu1  ;;  %1718 = vrcp.f32 %v1104_v12  ;;  %v1105_v26 = vadd.f32 1.0, %v1699_v18  ;;  %v1473_v27 = vpop.f32.mrb[31].mxu0 }
 0x136   : > { %v928_v29 = vpop.f32.mrb[31].mxu1  ;;  %v1701_v31 = vpop.eup %1700  ;;  %1720 = vrcp.f32 %v1107_v19  ;;  %v773_v33 = vadd.f32 %v1471_v21, %v1993_v50  ;;  %v1389_v34 = vmul.f32 -1.442695, %v926_v22  ;;  %v1474_v30 = vadd.f32 %v1473_v27, %v1472_v23 }
 0x137   : > { %v1703_v35 = vpop.eup %1702  ;;  %1199 = vst.msk [vmem:[%s2012_s8 + $0x10] sm:$0xff] %vm1196_vm1, %v1701_v31  ;;  %1722 = vrcp.f32 %v1105_v26  ;;  %v929_v38 = vadd.f32 %v928_v29, %v768_v28 }
 0x138   : > { %v1705_v39 = vpop.eup %1704  ;;  %1197 = vst.msk [vmem:[%s2012_s8] sm:$0xff] %vm1196_vm1, %v1703_v35  ;;  %v934_v40 = vadd.f32 %v1559_v11, %v773_v33  ;;  %1724 = vpow2.f32 %v1389_v34  ;;  %v776_v41 = vadd.f32 %v1474_v30, %v1993_v50 }
 0x139   : > { %v1707_v42 = vpop.eup %1706  ;;  %1200 = vst.msk [vmem:[%s2012_s8 + $0x18] sm:$0xff] %vm1196_vm1, %v1705_v39  ;;  %v1390_v36 = vmul.f32 -1.442695, %v929_v38  ;;  %v1475_v47 = vpop.f32.mrb[32].mxu0 }
 0x13a   : > { %v1709_v43 = vpop.eup %1708  ;;  %1198 = vst.msk [vmem:[%s2012_s8 + $0x8] sm:$0xff] %vm1196_vm1, %v1707_v42  ;;  %v1391_v45 = vmul.f32 -1.442695, %v934_v40  ;;  %v937_v46 = vadd.f32 %v1560_v24, %v776_v41  ;;  %v1563_v48 = vpop.f32.mrb[32].mxu1  ;;  %v821_v42 = vadd.f32 %v1978_v20, %v1993_v50  ;;  %v816_v20 = vadd.f32 %v1976_v13, %v1993_v50 }
 0x13b   : > { %v1711_v51 = vpop.eup %1710  ;;  %v1110_v52 = vadd.f32 1.0, %v1709_v43  ;;  %1726 = vpow2.f32 %v1390_v36  ;;  %v1476_v53 = vpop.f32.mrb[33].mxu0 }
 0x13c   : > { %v941_v54 = vpop.f32.mrb[33].mxu1  ;;  %v1713_v55 = vpop.eup %1712  ;;  %v1108_v56 = vadd.f32 1.0, %v1711_v51  ;;  %1728 = vpow2.f32 %v1391_v45  ;;  %v1477_v57 = vadd.f32 %v1476_v53, %v1475_v47  ;;  %v1392_v62 = vmul.f32 -1.442695, %v937_v46 }
 0x13d   : > { %v1478_v58 = vpop.f32.mrb[34].mxu0  ;;  %v1564_v60 = vpop.f32.mrb[34].mxu1  ;;  %1730 = vrcp.f32 %v1110_v52  ;;  %v1111_v59 = vadd.f32 1.0, %v1713_v55  ;;  %v813_v53 = vadd.f32 %v1974_v8, %v1993_v50  ;;  %v824_v55 = vadd.f32 %v1980_v25, %v1993_v50 }
 0x13e   : > { %v1715_v61 = vpop.eup %1714  ;;  %v1479_v63 = vpop.f32.mrb[35].mxu0  ;;  %1732 = vrcp.f32 %v1108_v56  ;;  %v781_v3 = vadd.f32 %v1477_v57, %v1993_v50 }
 0x13f   : > { %v944_v0 = vpop.f32.mrb[35].mxu1  ;;  %v1717_v1 = vpop.eup %1716  ;;  %v1109_v2 = vadd.f32 1.0, %v1715_v61  ;;  %v1480_v4 = vadd.f32 %v1479_v63, %v1478_v58  ;;  %1734 = vrcp.f32 %v1111_v59 }
 0x140   : > { %v1719_v5 = vpop.eup %1718  ;;  %1203 = vst.msk [vmem:[%s2012_s8 + $0x30] sm:$0xff] %vm1196_vm1, %v1717_v1  ;;  %v942_v6 = vadd.f32 %v941_v54, %v781_v3 }
 0x141   : > { %v1721_v7 = vpop.eup %1720  ;;  %1201 = vst.msk [vmem:[%s2012_s8 + $0x20] sm:$0xff] %vm1196_vm1, %v1719_v5  ;;  %1736 = vrcp.f32 %v1109_v2  ;;  %v784_v9 = vadd.f32 %v1480_v4, %v1993_v50  ;;  %v1481_v12 = vpop.f32.mrb[36].mxu0 }
 0x142   : > { %v1723_v10 = vpop.eup %1722  ;;  %1204 = vst.msk [vmem:[%s2012_s8 + $0x38] sm:$0xff] %vm1196_vm1, %v1721_v7  ;;  %1738 = vpow2.f32 %v1392_v62  ;;  %v1393_v14 = vmul.f32 -1.442695, %v942_v6  ;;  %v2035_v16 = vpop.f32.mrb[36].mxu1 }
 0x143   : > { %v1725_v11 = vpop.eup %1724  ;;  %1202 = vst.msk [vmem:[%s2012_s8 + $0x28] sm:$0xff] %vm1196_vm1, %v1723_v10  ;;  %v945_v15 = vadd.f32 %v944_v0, %v784_v9  ;;  %v1482_v18 = vpop.f32.mrb[37].mxu0 }
 0x144   : > { %v1112_v17 = vadd.f32 1.0, %v1725_v11  ;;  %v2037_v19 = vpop.f32.mrb[37].mxu1  ;;  %1740 = vpow2.f32 %v1393_v14  ;;  %v1483_v22 = vadd.f32 %v1482_v18, %v1481_v12  ;;  %v1484_v23 = vpop.f32.mrb[38].mxu0  ;;  %v837_v14 = vadd.f32 %v1986_v44, %v1993_v50 }
 0x145   : > { %v1394_v21 = vmul.f32 -1.442695, %v945_v15  ;;  %v2039_v24 = vpop.f32.mrb[38].mxu1  ;;  %v1727_v26 = vpop.eup %1726  ;;  %v840_v44 = vadd.f32 %v1988_v49, %v1993_v50 }
 0x146   : > { %1742 = vrcp.f32 %v1112_v17  ;;  %v1485_v27 = vpop.f32.mrb[39].mxu0  ;;  %v2041_v28 = vpop.f32.mrb[39].mxu1  ;;  %v1113_v31 = vadd.f32 1.0, %v1727_v26  ;;  %v789_v33 = vadd.f32 %v1483_v22, %v1993_v50  ;;  %v829_v22 = vadd.f32 %v1982_v32, %v1993_v50 }
 0x147   : > { %v1729_v29 = vpop.eup %1728  ;;  %1744 = vpow2.f32 %v1394_v21  ;;  %v1486_v34 = vadd.f32 %v1485_v27, %v1484_v23 }
 0x148   : > { %v1731_v30 = vpop.eup %1730  ;;  %v1114_v35 = vadd.f32 1.0, %v1729_v29  ;;  %1746 = vrcp.f32 %v1113_v31  ;;  %v950_v39 = vadd.f32 %v1563_v48, %v789_v33 }
 0x149   : > { %v1733_v38 = vpop.eup %1732  ;;  %1207 = vst.msk [vmem:[%s2012_s8 + $0x50] sm:$0xff] %vm1196_vm1, %v1731_v30  ;;  %v792_v40 = vadd.f32 %v1486_v34, %v1993_v50  ;;  %v1487_v46 = vpop.f32.mrb[40].mxu0 }
 0x14a   : > { %v1735_v41 = vpop.eup %1734  ;;  %1205 = vst.msk [vmem:[%s2012_s8 + $0x40] sm:$0xff] %vm1196_vm1, %v1733_v38  ;;  %1748 = vrcp.f32 %v1114_v35  ;;  %v1395_v43 = vmul.f32 -1.442695, %v950_v39  ;;  %v1571_v47 = vpop.f32.mrb[40].mxu1  ;;  %v832_v39 = vadd.f32 %v1984_v37, %v1993_v50 }
 0x14b   : > { %v1737_v36 = vpop.eup %1736  ;;  %1208 = vst.msk [vmem:[%s2012_s8 + $0x58] sm:$0xff] %vm1196_vm1, %v1735_v41  ;;  %v953_v45 = vadd.f32 %v1564_v60, %v792_v40  ;;  %v982_v48 = vadd.f32 %v1571_v47, %v821_v42  ;;  %v1488_v52 = vpop.f32.mrb[41].mxu0 }
 0x14c   : > { %v1739_v51 = vpop.eup %1738  ;;  %1206 = vst.msk [vmem:[%s2012_s8 + $0x48] sm:$0xff] %vm1196_vm1, %v1737_v36  ;;  %v973_v54 = vpop.f32.mrb[41].mxu1  ;;  %1750 = vpow2.f32 %v1395_v43  ;;  %v1489_v58 = vadd.f32 %v1488_v52, %v1487_v46 }
 0x14d   : > { %v1115_v56 = vadd.f32 1.0, %v1739_v51  ;;  %v1396_v57 = vmul.f32 -1.442695, %v953_v45  ;;  %v1490_v60 = vpop.f32.mrb[42].mxu0  ;;  %v1572_v61 = vpop.f32.mrb[42].mxu1  ;;  %v974_v62 = vadd.f32 %v973_v54, %v813_v53 }
 0x14e   : > { %v1403_v59 = vmul.f32 -1.442695, %v982_v48  ;;  %v985_v63 = vadd.f32 %v1572_v61, %v824_v55  ;;  %v1491_v0 = vpop.f32.mrb[43].mxu0  ;;  %v976_v1 = vpop.f32.mrb[43].mxu1  ;;  %v797_v2 = vadd.f32 %v1489_v58, %v1993_v50 }
 0x14f   : > { %v1741_v8 = vpop.eup %1740  ;;  %1752 = vrcp.f32 %v1115_v56  ;;  %v1492_v25 = vadd.f32 %v1491_v0, %v1490_v60  ;;  %v977_v3 = vadd.f32 %v976_v1, %v816_v20  ;;  %v1401_v5 = vmul.f32 -1.442695, %v974_v62 }
 0x150   : > { %v1743_v4 = vpop.eup %1742  ;;  %v1116_v13 = vadd.f32 1.0, %v1741_v8  ;;  %1754 = vpow2.f32 %v1396_v57  ;;  %v958_v6 = vadd.f32 %v2037_v19, %v797_v2  ;;  %v1404_v11 = vmul.f32 -1.442695, %v985_v63 }
 0x151   : > { %v1745_v7 = vpop.eup %1744  ;;  %1209 = vst.msk [vmem:[%s2012_s8 + $0x60] sm:$0xff] %vm1196_vm1, %v1743_v4  ;;  %1756 = vpow2.f32 %v1403_v59  ;;  %v800_v9 = vadd.f32 %v1492_v25, %v1993_v50  ;;  %v1493_v18 = vpop.f32.mrb[44].mxu0  ;;  %v1402_v23 = vmul.f32 -1.442695, %v977_v3 }
 0x152   : > { %1758 = vrcp.f32 %v1116_v13  ;;  %v1117_v10 = vadd.f32 1.0, %v1745_v7  ;;  %v1747_v15 = vpop.eup %1746  ;;  %v1397_v12 = vmul.f32 -1.442695, %v958_v6  ;;  %v1575_v21 = vpop.f32.mrb[44].mxu1 }
 0x153   : > { %1760 = vpow2.f32 %v1401_v5  ;;  %v961_v17 = vadd.f32 %v2041_v28, %v800_v9  ;;  %1210 = vst.msk [vmem:[%s2012_s8 + $0x68] sm:$0xff] %vm1196_vm1, %v1747_v15  ;;  %v998_v26 = vadd.f32 %v1575_v21, %v837_v14  ;;  %v1494_v27 = vpop.f32.mrb[45].mxu0  ;;  %v989_v29 = vpop.f32.mrb[45].mxu1 }
 0x154   : > { %v1749_v19 = vpop.eup %1748  ;;  %1762 = vrcp.f32 %v1117_v10  ;;  %v1495_v31 = vadd.f32 %v1494_v27, %v1493_v18  ;;  %v990_v33 = vadd.f32 %v989_v29, %v829_v22  ;;  %v1496_v34 = vpop.f32.mrb[46].mxu0 }
 0x155   : > { %1211 = vst.msk [vmem:[%s2012_s8 + $0x70] sm:$0xff] %vm1196_vm1, %v1749_v19  ;;  %1764 = vpow2.f32 %v1397_v12  ;;  %v1398_v28 = vmul.f32 -1.442695, %v961_v17  ;;  %v1576_v30 = vpop.f32.mrb[46].mxu1  ;;  %v1407_v32 = vmul.f32 -1.442695, %v998_v26 }
 0x156   : > { %1766 = vpow2.f32 %v1404_v11  ;;  %v1001_v35 = vadd.f32 %v1576_v30, %v840_v44  ;;  %v1497_v38 = vpop.f32.mrb[47].mxu0  ;;  %v992_v40 = vpop.f32.mrb[47].mxu1  ;;  %v805_v49 = vadd.f32 %v1495_v31, %v1993_v50  ;;  %v1405_v42 = vmul.f32 -1.442695, %v990_v33 }
 0x157   : > { %v1751_v41 = vpop.eup %1750  ;;  %1768 = vpow2.f32 %v1398_v28  ;;  %v1498_v36 = vadd.f32 %v1497_v38, %v1496_v34  ;;  %v993_v46 = vadd.f32 %v992_v40, %v832_v39 }
 0x158   : > { %v1118_v43 = vadd.f32 1.0, %v1751_v41  ;;  %1770 = vpow2.f32 %v1402_v23  ;;  %v1408_v45 = vmul.f32 -1.442695, %v1001_v35  ;;  %v966_v51 = vadd.f32 %v2035_v16, %v805_v49 }
 0x159   : > { %v1753_v47 = vpop.eup %1752  ;;  %1772 = vpow2.f32 %v1407_v32  ;;  %v808_v48 = vadd.f32 %v1498_v36, %v1993_v50  ;;  %v1406_v2 = vmul.f32 -1.442695, %v993_v46 }
 0x15a   : > { %v1755_v37 = vpop.eup %1754  ;;  %1212 = vst.msk [vmem:[%s2012_s8 + $0x78] sm:$0xff] %vm1196_vm1, %v1753_v47  ;;  %1774 = vrcp.f32 %v1118_v43  ;;  %v1399_v54 = vmul.f32 -1.442695, %v966_v51 }
 0x15b   : > { %v1757_v52 = vpop.eup %1756  ;;  %v1119_v53 = vadd.f32 1.0, %v1755_v37  ;;  %1776 = vpow2.f32 %v1405_v42  ;;  %v969_v55 = vadd.f32 %v2039_v24, %v808_v48 }
 0x15c   : > { %v1759_v20 = vpop.eup %1758  ;;  %v1126_v56 = vadd.f32 1.0, %v1757_v52  ;;  %1778 = vpow2.f32 %v1408_v45 }
 0x15d   : > { %v1761_v57 = vpop.eup %1760  ;;  %1213 = vst.msk [vmem:[%s2012_s8 + $0x80] sm:$0xff] %vm1196_vm1, %v1759_v20  ;;  %1780 = vrcp.f32 %v1119_v53  ;;  %v1400_v16 = vmul.f32 -1.442695, %v969_v55 }
 0x15e   : > { %v1763_v50 = vpop.eup %1762  ;;  %1782 = vrcp.f32 %v1126_v56  ;;  %v1124_v58 = vadd.f32 1.0, %v1761_v57 }
 0x15f   : > { %v1765_v60 = vpop.eup %1764  ;;  %1214 = vst.msk [vmem:[%s2012_s8 + $0x88] sm:$0xff] %vm1196_vm1, %v1763_v50  ;;  %1784 = vpow2.f32 %v1399_v54 }
 0x160   : > { %v1767_v61 = vpop.eup %1766  ;;  %v1120_v59 = vadd.f32 1.0, %v1765_v60  ;;  %1786 = vrcp.f32 %v1124_v58 }
 0x161   : > { %v1769_v24 = vpop.eup %1768  ;;  %v1127_v62 = vadd.f32 1.0, %v1767_v61  ;;  %1788 = vpow2.f32 %v1400_v16 }
 0x162   : > { %v1771_v63 = vpop.eup %1770  ;;  %1790 = vrcp.f32 %v1120_v59  ;;  %v1121_v0 = vadd.f32 1.0, %v1769_v24 }
 0x163   : > { %v1773_v1 = vpop.eup %1772  ;;  %1792 = vrcp.f32 %v1127_v62  ;;  %v1125_v8 = vadd.f32 1.0, %v1771_v63 }
 0x164   : > { %v1775_v25 = vpop.eup %1774  ;;  %1794 = vrcp.f32 %v1121_v0  ;;  %v1130_v3 = vadd.f32 1.0, %v1773_v1 }
 0x165   : > { %v1777_v4 = vpop.eup %1776  ;;  %1215 = vst.msk [vmem:[%s2012_s8 + $0x90] sm:$0xff] %vm1196_vm1, %v1775_v25  ;;  %1796 = vrcp.f32 %v1125_v8 }
 0x166   : > { %v1779_v13 = vpop.eup %1778  ;;  %1798 = vrcp.f32 %v1130_v3  ;;  %v1128_v5 = vadd.f32 1.0, %v1777_v4 }
 0x167   : > { %v1781_v7 = vpop.eup %1780  ;;  %v1131_v6 = vadd.f32 1.0, %v1779_v13  ;;  %1800 = vpow2.f32 %v1406_v2 }
 0x168   : > { %v1783_v9 = vpop.eup %1782  ;;  %1216 = vst.msk [vmem:[%s2012_s8 + $0x98] sm:$0xff] %vm1196_vm1, %v1781_v7  ;;  %1802 = vrcp.f32 %v1128_v5 }
 0x169   : > { %v1785_v10 = vpop.eup %1784  ;;  %1223 = vst.msk [vmem:[%s2012_s8 + $0xd0] sm:$0xff] %vm1196_vm1, %v1783_v9  ;;  %1804 = vrcp.f32 %v1131_v6 }
 0x16a   : > { %v1787_v11 = vpop.eup %1786  ;;  %v1122_v14 = vadd.f32 1.0, %v1785_v10 }
 0x16b   : > { %v1789_v15 = vpop.eup %1788  ;;  %1221 = vst.msk [vmem:[%s2012_s8 + $0xc0] sm:$0xff] %vm1196_vm1, %v1787_v11 }
 0x16c   : > { %v1791_v12 = vpop.eup %1790  ;;  %1806 = vrcp.f32 %v1122_v14  ;;  %v1123_v17 = vadd.f32 1.0, %v1789_v15 }
 0x16d   : > { %v1793_v18 = vpop.eup %1792  ;;  %1217 = vst.msk [vmem:[%s2012_s8 + $0xa0] sm:$0xff] %vm1196_vm1, %v1791_v12 }
 0x16e   : > { %v1795_v21 = vpop.eup %1794  ;;  %1224 = vst.msk [vmem:[%s2012_s8 + $0xd8] sm:$0xff] %vm1196_vm1, %v1793_v18  ;;  %1808 = vrcp.f32 %v1123_v17 }
 0x16f   : > { %v1797_v22 = vpop.eup %1796  ;;  %1218 = vst.msk [vmem:[%s2012_s8 + $0xa8] sm:$0xff] %vm1196_vm1, %v1795_v21 }
 0x170   : > { %v1799_v19 = vpop.eup %1798  ;;  %1222 = vst.msk [vmem:[%s2012_s8 + $0xc8] sm:$0xff] %vm1196_vm1, %v1797_v22 }
 0x171   : > { %v1801_v23 = vpop.eup %1800  ;;  %1227 = vst.msk [vmem:[%s2012_s8 + $0xf0] sm:$0xff] %vm1196_vm1, %v1799_v19 }
 0x172   : > { %v1803_v26 = vpop.eup %1802  ;;  %v1129_v27 = vadd.f32 1.0, %v1801_v23 }
 0x173   : > { %v1805_v29 = vpop.eup %1804  ;;  %1225 = vst.msk [vmem:[%s2012_s8 + $0xe0] sm:$0xff] %vm1196_vm1, %v1803_v26 }
 0x174   : > { %1228 = vst.msk [vmem:[%s2012_s8 + $0xf8] sm:$0xff] %vm1196_vm1, %v1805_v29  ;;  %1810 = vrcp.f32 %v1129_v27 }
 0x176   : > { %v1807_v44 = vpop.eup %1806 }
 0x177   : > { %1219 = vst.msk [vmem:[%s2012_s8 + $0xb0] sm:$0xff] %vm1196_vm1, %v1807_v44 }
 0x178   : > { %v1809_v28 = vpop.eup %1808 }
 0x179   : > { %1220 = vst.msk [vmem:[%s2012_s8 + $0xb8] sm:$0xff] %vm1196_vm1, %v1809_v28 }
 0x17e   : > { %v1811_v31 = vpop.eup %1810 }
 0x17f   : > { %1226 = vst.msk [vmem:[%s2012_s8 + $0xe8] sm:$0xff] %vm1196_vm1, %v1811_v31 }
 0x180 PF: > { %s13_s12 = sadd.s32 1, %s1818_s12  }
 0x181   : > { %p10_p4 = scmp.ge.s32.totalorder %s13_s12, 4  }
 0x183   :  { %12 = sbr.rel (!%p10_p4) target bundleno = 1 (0x1), region = 62 }

</bundles_post_ra>
